<compile_context>
chip_gen: v5e
topology: v5e:2x2
jax: 0.10.0
libtpu: 0.0.40
codegen_flags: <defaults>
</compile_context>

<pallas_src>
import functools
import math

import jax
import jax.numpy as jnp
from jax import lax
from jax.experimental import pallas as pl
from jax.experimental.pallas import tpu as pltpu

BN_EPS = 1e-5
TB_MAX = 32        # batch tile cap (review: ~32 keeps v7x 64MiB-VMEM happy; mult. of 8)
C1 = 64            # conv1 out channels
C2P = 64           # conv2 out channels, padded 50 -> 64
NH = 128           # classifier hidden width, padded 100 -> 128
NCLS = 10
NCLS_PAD = 128     # lane-dense output block width


# ------------------------------ Pallas kernel ------------------------------ #

def _cnn_kernel(cols1_ref,     # (1, 576, tb, 25) bf16  conv1 patches, rows (i, j, b)
                w1_ref,        # (25, 64)         bf16  bn1 scale folded in
                w2_ref,        # (1600, 64)       bf16  rows (di*5+dj)*64+cin, bn2 folded
                fc1_w_ref,     # (1024, 128)      bf16  rows (i*4+j)*64+c, bn folded
                fc2_w_ref,     # (128, 128)       bf16  bn folded
                fc3_w_ref,     # (128, 128)       bf16  cols >= 10 are zero
                shifts_ref,    # (8, 128)         f32   coalesced shifts / biases
                out_ref,       # (tb, 128)        f32   lane-dense log-softmax block
                *, tb):
    f32 = jnp.float32
    bf16 = jnp.bfloat16

    sh1 = shifts_ref[0:1, 0:C1]      # conv1 shift
    sh2 = shifts_ref[1:2, 0:C2P]     # conv2 shift
    fc1_sh = shifts_ref[2:3, :]
    fc2_sh = shifts_ref[3:4, :]
    fc3_b = shifts_ref[4:5, :]       # lanes >= 10 hold -1e30 (mask padded classes)

    # ---- conv1 (K=25 MXU matmul, bn scale pre-folded) + shift + relu --------
    lhs1 = cols1_ref[0].reshape(576 * tb, 25)
    y = jnp.dot(lhs1, w1_ref[...], preferred_element_type=f32)        # (576*tb, 64)
    y = jnp.maximum(y + sh1, 0.0)

    # ---- maxpool 2x2 (24x24 -> 12x12); relu/pool commute ---------------------
    y = y.reshape(12, 2, 24 * tb, C1)
    y = jnp.maximum(y[:, 0], y[:, 1])                 # (12, 24*tb, 64)
    y = y.reshape(12, 12, 2, tb, C1)
    p1 = jnp.maximum(y[:, :, 0], y[:, :, 1])          # (12, 12, tb, 64)  f32

    # ---- conv2: fused im2col -> single K=1600 MXU matmul ---------------------
    # 25 shifted leading-dim slices of the VMEM-resident p1, concatenated along lanes.
    pieces = [p1[di:di + 8, dj:dj + 8].reshape(64 * tb, C1).astype(bf16)
              for di in range(5) for dj in range(5)]
    lhs2 = jnp.concatenate(pieces, axis=-1)                           # (64*tb, 1600) bf16
    y = jnp.dot(lhs2, w2_ref[...], preferred_element_type=f32)        # (64*tb, 64)
    y = jnp.maximum(y + sh2, 0.0)                     # dropout2d: identity (eval)

    # ---- maxpool 2x2 (8x8 -> 4x4) --------------------------------------------
    y = y.reshape(4, 2, 8 * tb, C2P)
    y = jnp.maximum(y[:, 0], y[:, 1])                 # (4, 8*tb, 64)
    y = y.reshape(4, 4, 2, tb, C2P)
    feat = jnp.maximum(y[:, :, 0], y[:, :, 1])        # (4, 4, tb, 64)  f32

    # ---- classifier: fc1 (single K=1024 matmul) + fc2 + fc3 + log_softmax ----
    flat = jnp.concatenate([feat[i, j].astype(bf16)
                            for i in range(4) for j in range(4)], axis=-1)   # (tb, 1024)
    h = jnp.dot(flat, fc1_w_ref[...], preferred_element_type=f32)
    h = jnp.maximum(h + fc1_sh, 0.0).astype(bf16)

    h = jnp.dot(h, fc2_w_ref[...], preferred_element_type=f32)
    h = jnp.maximum(h + fc2_sh, 0.0).astype(bf16)

    logits = jnp.dot(h, fc3_w_ref[...], preferred_element_type=f32) + fc3_b  # (tb, 128)
    m = jnp.max(logits, axis=-1, keepdims=True)
    z = logits - m
    lse = jnp.log(jnp.sum(jnp.exp(z), axis=-1, keepdims=True))
    out_ref[...] = z - lse


# ------------------------------- JAX wrapper -------------------------------- #

def _pick_tb(batch):
    return min(TB_MAX, -(-batch // 8) * 8)


def _im2col_conv1(xg, tb):
    """xg: (Bp, 28, 28) f32 -> (Bp//tb, 576, tb, 25) bf16, row order (i, j, b),
    patch index p = di*5 + dj.  Tile-major so each grid step's DMA is contiguous."""
    bp = xg.shape[0]
    pats = [xg[:, di:di + 24, dj:dj + 24] for di in range(5) for dj in range(5)]
    p = jnp.stack(pats, axis=-1)                        # (Bp, 24, 24, 25)
    p = p.reshape(bp // tb, tb, 24, 24, 25)
    p = jnp.transpose(p, (0, 2, 3, 1, 4))               # (G, 24, 24, tb, 25)
    return p.reshape(bp // tb, 576, tb, 25).astype(jnp.bfloat16)


def cnn_forward(params, x):
    """x: (B, 1, 28, 28) float32 (the 3-channel expand is folded into w1)."""
    B = x.shape[0]
    tb = _pick_tb(B)
    Bp = -(-B // tb) * tb
    xg = x.reshape(B, 28, 28).astype(jnp.float32)
    if Bp != B:
        xg = jnp.pad(xg, ((0, Bp - B), (0, 0), (0, 0)))
    cols1 = _im2col_conv1(xg, tb)                       # (Bp//tb, 576, tb, 25) bf16

    const2 = lambda ib: (0, 0)
    kernel = functools.partial(_cnn_kernel, tb=tb)

    out = pl.pallas_call(
        kernel,
        out_shape=jax.ShapeDtypeStruct((Bp, NCLS_PAD), jnp.float32),
        grid=(Bp // tb,),
        in_specs=[
            pl.BlockSpec((1, 576, tb, 25), lambda ib: (ib, 0, 0, 0)),  # patches (pipelined)
            pl.BlockSpec((25, C1), const2),                            # w1
            pl.BlockSpec((25 * C1, C2P), const2),                      # w2 (1600, 64)
            pl.BlockSpec((16 * C2P, NH), const2),                      # fc1_w (1024, 128)
            pl.BlockSpec((NH, NH), const2),                            # fc2_w
            pl.BlockSpec((NH, NCLS_PAD), const2),                      # fc3_w
            pl.BlockSpec((8, 128), const2),                            # coalesced shifts
        ],
        out_specs=pl.BlockSpec((tb, NCLS_PAD), lambda ib: (ib, 0)),
        compiler_params=pltpu.CompilerParams(
            dimension_semantics=("parallel",),          # megacore over batch tiles
            vmem_limit_bytes=48 * 1024 * 1024),
    )(cols1, params['w1'], params['w2'], params['fc1_w'], params['fc2_w'],
      params['fc3_w'], params['shifts'])
    return out[:B, :NCLS]


# ------------------------------- parameters --------------------------------- #

def init_params(key):
    """Kernel-layout params: eval-mode BN *scale* folded into the bf16 weights, the
    remaining per-channel shifts coalesced into a single (8,128) f32 array.  Padded
    weight columns and padded shift lanes are exact zeros so padded lanes stay zero."""
    ks = jax.random.split(key, 10)
    u = lambda k, shape, bound: jax.random.uniform(k, shape, jnp.float32, -bound, bound)
    bn_s = 1.0 / math.sqrt(1.0 + BN_EPS)   # gamma=1, running var=1, mean=0 (eval mode)
    p = {}
    shifts = jnp.zeros((8, 128), jnp.float32)

    # conv1 (3->64, k5): identical input channels summed into the weights; bn1 folded.
    b1 = 1.0 / math.sqrt(3 * 25)
    w1 = u(ks[0], (5, 5, 3, C1), b1).sum(axis=2) * bn_s              # (5,5,64)
    p['w1'] = w1.reshape(25, C1).astype(jnp.bfloat16)
    shifts = shifts.at[0, :C1].set(u(ks[1], (C1,), b1) * bn_s)

    # conv2 (64->50, k5) padded to 64 out channels; bn2 scale folded (zero in pad lanes).
    b2 = 1.0 / math.sqrt(C1 * 25)
    w2 = jnp.pad(u(ks[2], (5, 5, C1, 50), b2), ((0, 0), (0, 0), (0, 0), (0, C2P - 50)))
    s2 = jnp.concatenate([jnp.full((50,), bn_s, jnp.float32),
                          jnp.zeros((C2P - 50,), jnp.float32)])
    w2 = w2 * s2
    p['w2'] = w2.reshape(25 * C1, C2P).astype(jnp.bfloat16)          # rows (di,dj,cin)
    shifts = shifts.at[1, :C2P].set(jnp.pad(u(ks[3], (50,), b2), (0, C2P - 50)) * s2)

    mask_c = (jnp.arange(C2P) < 50).astype(jnp.float32)
    mask_n = (jnp.arange(NH) < 100).astype(jnp.float32)
    sfc = mask_n * bn_s

    # fc1 (800->100) as (1024, 128), rows ordered ((i*4+j), c); bn scale folded.
    bf1 = 1.0 / math.sqrt(800)
    fw1 = u(ks[4], (16, C2P, NH), bf1) * mask_c[None, :, None] * sfc[None, None, :]
    p['fc1_w'] = fw1.reshape(16 * C2P, NH).astype(jnp.bfloat16)
    shifts = shifts.at[2, :].set(jnp.pad(u(ks[5], (100,), bf1), (0, NH - 100)) * sfc)

    # fc2 (100->100) padded to (128,128); bn scale folded.
    bf2 = 1.0 / math.sqrt(100)
    fw2 = u(ks[6], (NH, NH), bf2) * mask_n[:, None] * sfc[None, :]
    p['fc2_w'] = fw2.astype(jnp.bfloat16)
    shifts = shifts.at[3, :].set(jnp.pad(u(ks[7], (100,), bf2), (0, NH - 100)) * sfc)

    # fc3 (100->10), output lanes padded to 128; padded-class bias = -1e30.
    bf3 = 1.0 / math.sqrt(100)
    fw3 = u(ks[8], (NH, NCLS), bf3) * mask_n[:, None]
    p['fc3_w'] = jnp.pad(fw3, ((0, 0), (0, NCLS_PAD - NCLS))).astype(jnp.bfloat16)
    row4 = jnp.full((NCLS_PAD,), -1e30, jnp.float32).at[:NCLS].set(u(ks[9], (NCLS,), bf3))
    shifts = shifts.at[4, :].set(row4)

    p['shifts'] = shifts
    return p


# --------------------------- plain-JAX reference ---------------------------- #

def reference_forward(params, x):
    """f32 XLA reference with identical parameterization (for cross-checking)."""
    B = x.shape[0]
    sh = params['shifts']
    xg = x.reshape(B, 28, 28, 1).astype(jnp.float32)
    w1 = params['w1'].astype(jnp.float32).reshape(5, 5, 1, C1)
    y = lax.conv_general_dilated(xg, w1, (1, 1), 'VALID',
                                 dimension_numbers=('NHWC', 'HWIO', 'NHWC'))
    y = jnp.maximum(y + sh[0, :C1], 0.0)
    y = jnp.max(y.reshape(B, 12, 2, 12, 2, C1), axis=(2, 4))          # (B,12,12,64)
    w2 = params['w2'].astype(jnp.float32).reshape(5, 5, C1, C2P)
    y = lax.conv_general_dilated(y, w2, (1, 1), 'VALID',
                                 dimension_numbers=('NHWC', 'HWIO', 'NHWC'))
    y = jnp.maximum(y + sh[1, :C2P], 0.0)
    feat = jnp.max(y.reshape(B, 4, 2, 4, 2, C2P), axis=(2, 4))        # (B,4,4,64)
    h = feat.reshape(B, 16 * C2P) @ params['fc1_w'].astype(jnp.float32)
    h = jnp.maximum(h + sh[2], 0.0)
    h = h @ params['fc2_w'].astype(jnp.float32)
    h = jnp.maximum(h + sh[3], 0.0)
    logits = h @ params['fc3_w'].astype(jnp.float32)[:, :NCLS] + sh[4, :NCLS]
    return jax.nn.log_softmax(logits, axis=-1)


if __name__ == "__main__":
    key = jax.random.PRNGKey(0)
    pkey, xkey, xkey2 = jax.random.split(key, 3)
    params = init_params(pkey)

    # Small-shape check (B=2 -> tb=8, single grid step).
    x = jax.random.normal(xkey, (2, 1, 28, 28), jnp.float32)
    out = jax.block_until_ready(jax.jit(cnn_forward)(params, x))
    assert out.shape == (2, NCLS), out.shape
    assert out.dtype == jnp.float32
    assert bool(jnp.all(jnp.abs(jnp.sum(jnp.exp(out), axis=-1) - 1.0) < 1e-3))
    ref = jax.jit(reference_forward)(params, x)
    err = float(jnp.max(jnp.abs(out - ref)))
    assert err < 0.1, err

    # Larger batch exercises the TB=32 tile, multi-step (megacore-shardable) grid
    # and in-tile batch padding.
    xb = jax.random.normal(xkey2, (70, 1, 28, 28), jnp.float32)
    outb = jax.block_until_ready(jax.jit(cnn_forward)(params, xb))
    refb = jax.jit(reference_forward)(params, xb)
    assert outb.shape == (70, NCLS), outb.shape
    errb = float(jnp.max(jnp.abs(outb - refb)))
    assert errb < 0.1, errb

    print("KERNEL_OK")
</pallas_src>

<mosaic_0001>
module attributes {stable_mosaic.version = 11 : i64} {
  func.func @_cnn_kernel(%arg0: i32, %arg1: memref<1x576x8x25xbf16, #tpu.memory_space<vmem>>, %arg2: memref<25x64xbf16, #tpu.memory_space<vmem>>, %arg3: memref<1600x64xbf16, #tpu.memory_space<vmem>>, %arg4: memref<1024x128xbf16, #tpu.memory_space<vmem>>, %arg5: memref<128x128xbf16, #tpu.memory_space<vmem>>, %arg6: memref<128x128xbf16, #tpu.memory_space<vmem>>, %arg7: memref<8x128xf32, #tpu.memory_space<vmem>>, %arg8: memref<8x128xf32, #tpu.memory_space<vmem>>) attributes {dimension_semantics = [#tpu.dimension_semantics<parallel>], iteration_bounds = array<i64: 1>, scalar_prefetch = 0 : i64, scratch_operands = 0 : i64, tpu.core_type = #tpu.core_type<tc>, window_params = [{transform_indices = @transform_0, window_bounds = array<i64: 1, 576, 8, 25>}, {pipeline_mode = #tpu.pipeline_mode<synchronous>, transform_indices = @transform_1, window_bounds = array<i64: 25, 64>}, {pipeline_mode = #tpu.pipeline_mode<synchronous>, transform_indices = @transform_2, window_bounds = array<i64: 1600, 64>}, {pipeline_mode = #tpu.pipeline_mode<synchronous>, transform_indices = @transform_3, window_bounds = array<i64: 1024, 128>}, {pipeline_mode = #tpu.pipeline_mode<synchronous>, transform_indices = @transform_4, window_bounds = array<i64: 128, 128>}, {pipeline_mode = #tpu.pipeline_mode<synchronous>, transform_indices = @transform_5, window_bounds = array<i64: 128, 128>}, {pipeline_mode = #tpu.pipeline_mode<synchronous>, transform_indices = @transform_6, window_bounds = array<i64: 8, 128>}, {transform_indices = @transform_7, window_bounds = array<i64: 8, 128>}]} {
    %c0 = arith.constant 0 : index
    %c0_0 = arith.constant 0 : index
    %0 = vector.load %arg7[%c0, %c0_0] : memref<8x128xf32, #tpu.memory_space<vmem>>, vector<1x64xf32>
    %c1 = arith.constant 1 : index
    %c0_1 = arith.constant 0 : index
    %1 = vector.load %arg7[%c1, %c0_1] : memref<8x128xf32, #tpu.memory_space<vmem>>, vector<1x64xf32>
    %c2 = arith.constant 2 : index
    %c0_2 = arith.constant 0 : index
    %2 = vector.load %arg7[%c2, %c0_2] : memref<8x128xf32, #tpu.memory_space<vmem>>, vector<1x128xf32>
    %c3 = arith.constant 3 : index
    %c0_3 = arith.constant 0 : index
    %3 = vector.load %arg7[%c3, %c0_3] : memref<8x128xf32, #tpu.memory_space<vmem>>, vector<1x128xf32>
    %c4 = arith.constant 4 : index
    %c0_4 = arith.constant 0 : index
    %4 = vector.load %arg7[%c4, %c0_4] : memref<8x128xf32, #tpu.memory_space<vmem>>, vector<1x128xf32>
    %c0_5 = arith.constant 0 : index
    %c0_6 = arith.constant 0 : index
    %c0_7 = arith.constant 0 : index
    %c0_8 = arith.constant 0 : index
    %5 = vector.load %arg1[%c0_5, %c0_6, %c0_7, %c0_8] : memref<1x576x8x25xbf16, #tpu.memory_space<vmem>>, vector<1x576x8x25xbf16>
    %6 = vector.shape_cast %5 : vector<1x576x8x25xbf16> to vector<576x8x25xbf16>
    %7 = vector.shape_cast %6 : vector<576x8x25xbf16> to vector<4608x25xbf16>
    %c0_9 = arith.constant 0 : index
    %c0_10 = arith.constant 0 : index
    %8 = vector.load %arg2[%c0_9, %c0_10] : memref<25x64xbf16, #tpu.memory_space<vmem>>, vector<25x64xbf16>
    %cst = arith.constant dense<0.000000e+00> : vector<4608x64xf32>
    %9 = tpu.matmul %7, %8, %cst {dimension_numbers = #tpu.dot_dimension_numbers<[1], [0], [0], [1], [0, 0, 1, 1], [], []>} : vector<4608x25xbf16>, vector<25x64xbf16>, vector<4608x64xf32> -> vector<4608x64xf32>
    %10 = vector.broadcast %0 : vector<1x64xf32> to vector<4608x64xf32>
    %11 = arith.addf %9, %10 : vector<4608x64xf32>
    %cst_11 = arith.constant 0.000000e+00 : f32
    %12 = vector.broadcast %cst_11 : f32 to vector<4608x64xf32>
    %13 = arith.maximumf %11, %12 : vector<4608x64xf32>
    %14 = vector.shape_cast %13 : vector<4608x64xf32> to vector<12x2x192x64xf32>
    %15 = vector.extract_strided_slice %14 {offsets = [0, 0, 0, 0], sizes = [12, 1, 192, 64], strides = [1, 1, 1, 1]} : vector<12x2x192x64xf32> to vector<12x1x192x64xf32>
    %16 = vector.shape_cast %15 : vector<12x1x192x64xf32> to vector<12x192x64xf32>
    %17 = vector.extract_strided_slice %14 {offsets = [0, 1, 0, 0], sizes = [12, 1, 192, 64], strides = [1, 1, 1, 1]} : vector<12x2x192x64xf32> to vector<12x1x192x64xf32>
    %18 = vector.shape_cast %17 : vector<12x1x192x64xf32> to vector<12x192x64xf32>
    %19 = arith.maximumf %16, %18 : vector<12x192x64xf32>
    %20 = vector.shape_cast %19 : vector<12x192x64xf32> to vector<12x12x2x8x64xf32>
    %21 = vector.extract_strided_slice %20 {offsets = [0, 0, 0, 0, 0], sizes = [12, 12, 1, 8, 64], strides = [1, 1, 1, 1, 1]} : vector<12x12x2x8x64xf32> to vector<12x12x1x8x64xf32>
    %22 = vector.shape_cast %21 : vector<12x12x1x8x64xf32> to vector<12x12x8x64xf32>
    %23 = vector.extract_strided_slice %20 {offsets = [0, 0, 1, 0, 0], sizes = [12, 12, 1, 8, 64], strides = [1, 1, 1, 1, 1]} : vector<12x12x2x8x64xf32> to vector<12x12x1x8x64xf32>
    %24 = vector.shape_cast %23 : vector<12x12x1x8x64xf32> to vector<12x12x8x64xf32>
    %25 = arith.maximumf %22, %24 : vector<12x12x8x64xf32>
    %26 = vector.extract_strided_slice %25 {offsets = [0, 0, 0, 0], sizes = [8, 8, 8, 64], strides = [1, 1, 1, 1]} : vector<12x12x8x64xf32> to vector<8x8x8x64xf32>
    %27 = vector.shape_cast %26 : vector<8x8x8x64xf32> to vector<512x64xf32>
    %28 = arith.truncf %27 : vector<512x64xf32> to vector<512x64xbf16>
    %29 = vector.extract_strided_slice %25 {offsets = [0, 1, 0, 0], sizes = [8, 8, 8, 64], strides = [1, 1, 1, 1]} : vector<12x12x8x64xf32> to vector<8x8x8x64xf32>
    %30 = vector.shape_cast %29 : vector<8x8x8x64xf32> to vector<512x64xf32>
    %31 = arith.truncf %30 : vector<512x64xf32> to vector<512x64xbf16>
    %32 = vector.extract_strided_slice %25 {offsets = [0, 2, 0, 0], sizes = [8, 8, 8, 64], strides = [1, 1, 1, 1]} : vector<12x12x8x64xf32> to vector<8x8x8x64xf32>
    %33 = vector.shape_cast %32 : vector<8x8x8x64xf32> to vector<512x64xf32>
    %34 = arith.truncf %33 : vector<512x64xf32> to vector<512x64xbf16>
    %35 = vector.extract_strided_slice %25 {offsets = [0, 3, 0, 0], sizes = [8, 8, 8, 64], strides = [1, 1, 1, 1]} : vector<12x12x8x64xf32> to vector<8x8x8x64xf32>
    %36 = vector.shape_cast %35 : vector<8x8x8x64xf32> to vector<512x64xf32>
    %37 = arith.truncf %36 : vector<512x64xf32> to vector<512x64xbf16>
    %38 = vector.extract_strided_slice %25 {offsets = [0, 4, 0, 0], sizes = [8, 8, 8, 64], strides = [1, 1, 1, 1]} : vector<12x12x8x64xf32> to vector<8x8x8x64xf32>
    %39 = vector.shape_cast %38 : vector<8x8x8x64xf32> to vector<512x64xf32>
    %40 = arith.truncf %39 : vector<512x64xf32> to vector<512x64xbf16>
    %41 = vector.extract_strided_slice %25 {offsets = [1, 0, 0, 0], sizes = [8, 8, 8, 64], strides = [1, 1, 1, 1]} : vector<12x12x8x64xf32> to vector<8x8x8x64xf32>
    %42 = vector.shape_cast %41 : vector<8x8x8x64xf32> to vector<512x64xf32>
    %43 = arith.truncf %42 : vector<512x64xf32> to vector<512x64xbf16>
    %44 = vector.extract_strided_slice %25 {offsets = [1, 1, 0, 0], sizes = [8, 8, 8, 64], strides = [1, 1, 1, 1]} : vector<12x12x8x64xf32> to vector<8x8x8x64xf32>
    %45 = vector.shape_cast %44 : vector<8x8x8x64xf32> to vector<512x64xf32>
    %46 = arith.truncf %45 : vector<512x64xf32> to vector<512x64xbf16>
    %47 = vector.extract_strided_slice %25 {offsets = [1, 2, 0, 0], sizes = [8, 8, 8, 64], strides = [1, 1, 1, 1]} : vector<12x12x8x64xf32> to vector<8x8x8x64xf32>
    %48 = vector.shape_cast %47 : vector<8x8x8x64xf32> to vector<512x64xf32>
    %49 = arith.truncf %48 : vector<512x64xf32> to vector<512x64xbf16>
    %50 = vector.extract_strided_slice %25 {offsets = [1, 3, 0, 0], sizes = [8, 8, 8, 64], strides = [1, 1, 1, 1]} : vector<12x12x8x64xf32> to vector<8x8x8x64xf32>
    %51 = vector.shape_cast %50 : vector<8x8x8x64xf32> to vector<512x64xf32>
    %52 = arith.truncf %51 : vector<512x64xf32> to vector<512x64xbf16>
    %53 = vector.extract_strided_slice %25 {offsets = [1, 4, 0, 0], sizes = [8, 8, 8, 64], strides = [1, 1, 1, 1]} : vector<12x12x8x64xf32> to vector<8x8x8x64xf32>
    %54 = vector.shape_cast %53 : vector<8x8x8x64xf32> to vector<512x64xf32>
    %55 = arith.truncf %54 : vector<512x64xf32> to vector<512x64xbf16>
    %56 = vector.extract_strided_slice %25 {offsets = [2, 0, 0, 0], sizes = [8, 8, 8, 64], strides = [1, 1, 1, 1]} : vector<12x12x8x64xf32> to vector<8x8x8x64xf32>
    %57 = vector.shape_cast %56 : vector<8x8x8x64xf32> to vector<512x64xf32>
    %58 = arith.truncf %57 : vector<512x64xf32> to vector<512x64xbf16>
    %59 = vector.extract_strided_slice %25 {offsets = [2, 1, 0, 0], sizes = [8, 8, 8, 64], strides = [1, 1, 1, 1]} : vector<12x12x8x64xf32> to vector<8x8x8x64xf32>
    %60 = vector.shape_cast %59 : vector<8x8x8x64xf32> to vector<512x64xf32>
    %61 = arith.truncf %60 : vector<512x64xf32> to vector<512x64xbf16>
    %62 = vector.extract_strided_slice %25 {offsets = [2, 2, 0, 0], sizes = [8, 8, 8, 64], strides = [1, 1, 1, 1]} : vector<12x12x8x64xf32> to vector<8x8x8x64xf32>
    %63 = vector.shape_cast %62 : vector<8x8x8x64xf32> to vector<512x64xf32>
    %64 = arith.truncf %63 : vector<512x64xf32> to vector<512x64xbf16>
    %65 = vector.extract_strided_slice %25 {offsets = [2, 3, 0, 0], sizes = [8, 8, 8, 64], strides = [1, 1, 1, 1]} : vector<12x12x8x64xf32> to vector<8x8x8x64xf32>
    %66 = vector.shape_cast %65 : vector<8x8x8x64xf32> to vector<512x64xf32>
    %67 = arith.truncf %66 : vector<512x64xf32> to vector<512x64xbf16>
    %68 = vector.extract_strided_slice %25 {offsets = [2, 4, 0, 0], sizes = [8, 8, 8, 64], strides = [1, 1, 1, 1]} : vector<12x12x8x64xf32> to vector<8x8x8x64xf32>
    %69 = vector.shape_cast %68 : vector<8x8x8x64xf32> to vector<512x64xf32>
    %70 = arith.truncf %69 : vector<512x64xf32> to vector<512x64xbf16>
    %71 = vector.extract_strided_slice %25 {offsets = [3, 0, 0, 0], sizes = [8, 8, 8, 64], strides = [1, 1, 1, 1]} : vector<12x12x8x64xf32> to vector<8x8x8x64xf32>
    %72 = vector.shape_cast %71 : vector<8x8x8x64xf32> to vector<512x64xf32>
    %73 = arith.truncf %72 : vector<512x64xf32> to vector<512x64xbf16>
    %74 = vector.extract_strided_slice %25 {offsets = [3, 1, 0, 0], sizes = [8, 8, 8, 64], strides = [1, 1, 1, 1]} : vector<12x12x8x64xf32> to vector<8x8x8x64xf32>
    %75 = vector.shape_cast %74 : vector<8x8x8x64xf32> to vector<512x64xf32>
    %76 = arith.truncf %75 : vector<512x64xf32> to vector<512x64xbf16>
    %77 = vector.extract_strided_slice %25 {offsets = [3, 2, 0, 0], sizes = [8, 8, 8, 64], strides = [1, 1, 1, 1]} : vector<12x12x8x64xf32> to vector<8x8x8x64xf32>
    %78 = vector.shape_cast %77 : vector<8x8x8x64xf32> to vector<512x64xf32>
    %79 = arith.truncf %78 : vector<512x64xf32> to vector<512x64xbf16>
    %80 = vector.extract_strided_slice %25 {offsets = [3, 3, 0, 0], sizes = [8, 8, 8, 64], strides = [1, 1, 1, 1]} : vector<12x12x8x64xf32> to vector<8x8x8x64xf32>
    %81 = vector.shape_cast %80 : vector<8x8x8x64xf32> to vector<512x64xf32>
    %82 = arith.truncf %81 : vector<512x64xf32> to vector<512x64xbf16>
    %83 = vector.extract_strided_slice %25 {offsets = [3, 4, 0, 0], sizes = [8, 8, 8, 64], strides = [1, 1, 1, 1]} : vector<12x12x8x64xf32> to vector<8x8x8x64xf32>
    %84 = vector.shape_cast %83 : vector<8x8x8x64xf32> to vector<512x64xf32>
    %85 = arith.truncf %84 : vector<512x64xf32> to vector<512x64xbf16>
    %86 = vector.extract_strided_slice %25 {offsets = [4, 0, 0, 0], sizes = [8, 8, 8, 64], strides = [1, 1, 1, 1]} : vector<12x12x8x64xf32> to vector<8x8x8x64xf32>
    %87 = vector.shape_cast %86 : vector<8x8x8x64xf32> to vector<512x64xf32>
    %88 = arith.truncf %87 : vector<512x64xf32> to vector<512x64xbf16>
    %89 = vector.extract_strided_slice %25 {offsets = [4, 1, 0, 0], sizes = [8, 8, 8, 64], strides = [1, 1, 1, 1]} : vector<12x12x8x64xf32> to vector<8x8x8x64xf32>
    %90 = vector.shape_cast %89 : vector<8x8x8x64xf32> to vector<512x64xf32>
    %91 = arith.truncf %90 : vector<512x64xf32> to vector<512x64xbf16>
    %92 = vector.extract_strided_slice %25 {offsets = [4, 2, 0, 0], sizes = [8, 8, 8, 64], strides = [1, 1, 1, 1]} : vector<12x12x8x64xf32> to vector<8x8x8x64xf32>
    %93 = vector.shape_cast %92 : vector<8x8x8x64xf32> to vector<512x64xf32>
    %94 = arith.truncf %93 : vector<512x64xf32> to vector<512x64xbf16>
    %95 = vector.extract_strided_slice %25 {offsets = [4, 3, 0, 0], sizes = [8, 8, 8, 64], strides = [1, 1, 1, 1]} : vector<12x12x8x64xf32> to vector<8x8x8x64xf32>
    %96 = vector.shape_cast %95 : vector<8x8x8x64xf32> to vector<512x64xf32>
    %97 = arith.truncf %96 : vector<512x64xf32> to vector<512x64xbf16>
    %98 = vector.extract_strided_slice %25 {offsets = [4, 4, 0, 0], sizes = [8, 8, 8, 64], strides = [1, 1, 1, 1]} : vector<12x12x8x64xf32> to vector<8x8x8x64xf32>
    %99 = vector.shape_cast %98 : vector<8x8x8x64xf32> to vector<512x64xf32>
    %100 = arith.truncf %99 : vector<512x64xf32> to vector<512x64xbf16>
    %101 = tpu.concatenate %28, %31, %34, %37, %40, %43, %46, %49, %52, %55, %58, %61, %64, %67, %70, %73 in 1 : vector<512x64xbf16>, vector<512x64xbf16>, vector<512x64xbf16>, vector<512x64xbf16>, vector<512x64xbf16>, vector<512x64xbf16>, vector<512x64xbf16>, vector<512x64xbf16>, vector<512x64xbf16>, vector<512x64xbf16>, vector<512x64xbf16>, vector<512x64xbf16>, vector<512x64xbf16>, vector<512x64xbf16>, vector<512x64xbf16>, vector<512x64xbf16> -> vector<512x1024xbf16>
    %102 = tpu.concatenate %76, %79, %82, %85, %88, %91, %94, %97, %100 in 1 : vector<512x64xbf16>, vector<512x64xbf16>, vector<512x64xbf16>, vector<512x64xbf16>, vector<512x64xbf16>, vector<512x64xbf16>, vector<512x64xbf16>, vector<512x64xbf16>, vector<512x64xbf16> -> vector<512x576xbf16>
    %103 = tpu.concatenate %101, %102 in 1 : vector<512x1024xbf16>, vector<512x576xbf16> -> vector<512x1600xbf16>
    %c0_12 = arith.constant 0 : index
    %c0_13 = arith.constant 0 : index
    %104 = vector.load %arg3[%c0_12, %c0_13] : memref<1600x64xbf16, #tpu.memory_space<vmem>>, vector<1600x64xbf16>
    %cst_14 = arith.constant dense<0.000000e+00> : vector<512x64xf32>
    %105 = tpu.matmul %103, %104, %cst_14 {dimension_numbers = #tpu.dot_dimension_numbers<[1], [0], [0], [1], [0, 0, 1, 1], [], []>} : vector<512x1600xbf16>, vector<1600x64xbf16>, vector<512x64xf32> -> vector<512x64xf32>
    %106 = vector.broadcast %1 : vector<1x64xf32> to vector<512x64xf32>
    %107 = arith.addf %105, %106 : vector<512x64xf32>
    %cst_15 = arith.constant 0.000000e+00 : f32
    %108 = vector.broadcast %cst_15 : f32 to vector<512x64xf32>
    %109 = arith.maximumf %107, %108 : vector<512x64xf32>
    %110 = vector.shape_cast %109 : vector<512x64xf32> to vector<4x2x64x64xf32>
    %111 = vector.extract_strided_slice %110 {offsets = [0, 0, 0, 0], sizes = [4, 1, 64, 64], strides = [1, 1, 1, 1]} : vector<4x2x64x64xf32> to vector<4x1x64x64xf32>
    %112 = vector.shape_cast %111 : vector<4x1x64x64xf32> to vector<4x64x64xf32>
    %113 = vector.extract_strided_slice %110 {offsets = [0, 1, 0, 0], sizes = [4, 1, 64, 64], strides = [1, 1, 1, 1]} : vector<4x2x64x64xf32> to vector<4x1x64x64xf32>
    %114 = vector.shape_cast %113 : vector<4x1x64x64xf32> to vector<4x64x64xf32>
    %115 = arith.maximumf %112, %114 : vector<4x64x64xf32>
    %116 = vector.shape_cast %115 : vector<4x64x64xf32> to vector<4x4x2x8x64xf32>
    %117 = vector.extract_strided_slice %116 {offsets = [0, 0, 0, 0, 0], sizes = [4, 4, 1, 8, 64], strides = [1, 1, 1, 1, 1]} : vector<4x4x2x8x64xf32> to vector<4x4x1x8x64xf32>
    %118 = vector.shape_cast %117 : vector<4x4x1x8x64xf32> to vector<4x4x8x64xf32>
    %119 = vector.extract_strided_slice %116 {offsets = [0, 0, 1, 0, 0], sizes = [4, 4, 1, 8, 64], strides = [1, 1, 1, 1, 1]} : vector<4x4x2x8x64xf32> to vector<4x4x1x8x64xf32>
    %120 = vector.shape_cast %119 : vector<4x4x1x8x64xf32> to vector<4x4x8x64xf32>
    %121 = arith.maximumf %118, %120 : vector<4x4x8x64xf32>
    %122 = vector.extract_strided_slice %121 {offsets = [0, 0, 0, 0], sizes = [1, 1, 8, 64], strides = [1, 1, 1, 1]} : vector<4x4x8x64xf32> to vector<1x1x8x64xf32>
    %123 = vector.shape_cast %122 : vector<1x1x8x64xf32> to vector<8x64xf32>
    %124 = arith.truncf %123 : vector<8x64xf32> to vector<8x64xbf16>
    %125 = vector.extract_strided_slice %121 {offsets = [0, 1, 0, 0], sizes = [1, 1, 8, 64], strides = [1, 1, 1, 1]} : vector<4x4x8x64xf32> to vector<1x1x8x64xf32>
    %126 = vector.shape_cast %125 : vector<1x1x8x64xf32> to vector<8x64xf32>
    %127 = arith.truncf %126 : vector<8x64xf32> to vector<8x64xbf16>
    %128 = vector.extract_strided_slice %121 {offsets = [0, 2, 0, 0], sizes = [1, 1, 8, 64], strides = [1, 1, 1, 1]} : vector<4x4x8x64xf32> to vector<1x1x8x64xf32>
    %129 = vector.shape_cast %128 : vector<1x1x8x64xf32> to vector<8x64xf32>
    %130 = arith.truncf %129 : vector<8x64xf32> to vector<8x64xbf16>
    %131 = vector.extract_strided_slice %121 {offsets = [0, 3, 0, 0], sizes = [1, 1, 8, 64], strides = [1, 1, 1, 1]} : vector<4x4x8x64xf32> to vector<1x1x8x64xf32>
    %132 = vector.shape_cast %131 : vector<1x1x8x64xf32> to vector<8x64xf32>
    %133 = arith.truncf %132 : vector<8x64xf32> to vector<8x64xbf16>
    %134 = vector.extract_strided_slice %121 {offsets = [1, 0, 0, 0], sizes = [1, 1, 8, 64], strides = [1, 1, 1, 1]} : vector<4x4x8x64xf32> to vector<1x1x8x64xf32>
    %135 = vector.shape_cast %134 : vector<1x1x8x64xf32> to vector<8x64xf32>
    %136 = arith.truncf %135 : vector<8x64xf32> to vector<8x64xbf16>
    %137 = vector.extract_strided_slice %121 {offsets = [1, 1, 0, 0], sizes = [1, 1, 8, 64], strides = [1, 1, 1, 1]} : vector<4x4x8x64xf32> to vector<1x1x8x64xf32>
    %138 = vector.shape_cast %137 : vector<1x1x8x64xf32> to vector<8x64xf32>
    %139 = arith.truncf %138 : vector<8x64xf32> to vector<8x64xbf16>
    %140 = vector.extract_strided_slice %121 {offsets = [1, 2, 0, 0], sizes = [1, 1, 8, 64], strides = [1, 1, 1, 1]} : vector<4x4x8x64xf32> to vector<1x1x8x64xf32>
    %141 = vector.shape_cast %140 : vector<1x1x8x64xf32> to vector<8x64xf32>
    %142 = arith.truncf %141 : vector<8x64xf32> to vector<8x64xbf16>
    %143 = vector.extract_strided_slice %121 {offsets = [1, 3, 0, 0], sizes = [1, 1, 8, 64], strides = [1, 1, 1, 1]} : vector<4x4x8x64xf32> to vector<1x1x8x64xf32>
    %144 = vector.shape_cast %143 : vector<1x1x8x64xf32> to vector<8x64xf32>
    %145 = arith.truncf %144 : vector<8x64xf32> to vector<8x64xbf16>
    %146 = vector.extract_strided_slice %121 {offsets = [2, 0, 0, 0], sizes = [1, 1, 8, 64], strides = [1, 1, 1, 1]} : vector<4x4x8x64xf32> to vector<1x1x8x64xf32>
    %147 = vector.shape_cast %146 : vector<1x1x8x64xf32> to vector<8x64xf32>
    %148 = arith.truncf %147 : vector<8x64xf32> to vector<8x64xbf16>
    %149 = vector.extract_strided_slice %121 {offsets = [2, 1, 0, 0], sizes = [1, 1, 8, 64], strides = [1, 1, 1, 1]} : vector<4x4x8x64xf32> to vector<1x1x8x64xf32>
    %150 = vector.shape_cast %149 : vector<1x1x8x64xf32> to vector<8x64xf32>
    %151 = arith.truncf %150 : vector<8x64xf32> to vector<8x64xbf16>
    %152 = vector.extract_strided_slice %121 {offsets = [2, 2, 0, 0], sizes = [1, 1, 8, 64], strides = [1, 1, 1, 1]} : vector<4x4x8x64xf32> to vector<1x1x8x64xf32>
    %153 = vector.shape_cast %152 : vector<1x1x8x64xf32> to vector<8x64xf32>
    %154 = arith.truncf %153 : vector<8x64xf32> to vector<8x64xbf16>
    %155 = vector.extract_strided_slice %121 {offsets = [2, 3, 0, 0], sizes = [1, 1, 8, 64], strides = [1, 1, 1, 1]} : vector<4x4x8x64xf32> to vector<1x1x8x64xf32>
    %156 = vector.shape_cast %155 : vector<1x1x8x64xf32> to vector<8x64xf32>
    %157 = arith.truncf %156 : vector<8x64xf32> to vector<8x64xbf16>
    %158 = vector.extract_strided_slice %121 {offsets = [3, 0, 0, 0], sizes = [1, 1, 8, 64], strides = [1, 1, 1, 1]} : vector<4x4x8x64xf32> to vector<1x1x8x64xf32>
    %159 = vector.shape_cast %158 : vector<1x1x8x64xf32> to vector<8x64xf32>
    %160 = arith.truncf %159 : vector<8x64xf32> to vector<8x64xbf16>
    %161 = vector.extract_strided_slice %121 {offsets = [3, 1, 0, 0], sizes = [1, 1, 8, 64], strides = [1, 1, 1, 1]} : vector<4x4x8x64xf32> to vector<1x1x8x64xf32>
    %162 = vector.shape_cast %161 : vector<1x1x8x64xf32> to vector<8x64xf32>
    %163 = arith.truncf %162 : vector<8x64xf32> to vector<8x64xbf16>
    %164 = vector.extract_strided_slice %121 {offsets = [3, 2, 0, 0], sizes = [1, 1, 8, 64], strides = [1, 1, 1, 1]} : vector<4x4x8x64xf32> to vector<1x1x8x64xf32>
    %165 = vector.shape_cast %164 : vector<1x1x8x64xf32> to vector<8x64xf32>
    %166 = arith.truncf %165 : vector<8x64xf32> to vector<8x64xbf16>
    %167 = vector.extract_strided_slice %121 {offsets = [3, 3, 0, 0], sizes = [1, 1, 8, 64], strides = [1, 1, 1, 1]} : vector<4x4x8x64xf32> to vector<1x1x8x64xf32>
    %168 = vector.shape_cast %167 : vector<1x1x8x64xf32> to vector<8x64xf32>
    %169 = arith.truncf %168 : vector<8x64xf32> to vector<8x64xbf16>
    %170 = tpu.concatenate %124, %127, %130, %133, %136, %139, %142, %145, %148, %151, %154, %157, %160, %163, %166, %169 in 1 : vector<8x64xbf16>, vector<8x64xbf16>, vector<8x64xbf16>, vector<8x64xbf16>, vector<8x64xbf16>, vector<8x64xbf16>, vector<8x64xbf16>, vector<8x64xbf16>, vector<8x64xbf16>, vector<8x64xbf16>, vector<8x64xbf16>, vector<8x64xbf16>, vector<8x64xbf16>, vector<8x64xbf16>, vector<8x64xbf16>, vector<8x64xbf16> -> vector<8x1024xbf16>
    %c0_16 = arith.constant 0 : index
    %c0_17 = arith.constant 0 : index
    %171 = vector.load %arg4[%c0_16, %c0_17] : memref<1024x128xbf16, #tpu.memory_space<vmem>>, vector<1024x128xbf16>
    %cst_18 = arith.constant dense<0.000000e+00> : vector<8x128xf32>
    %172 = tpu.matmul %170, %171, %cst_18 {dimension_numbers = #tpu.dot_dimension_numbers<[1], [0], [0], [1], [0, 0, 1, 1], [], []>} : vector<8x1024xbf16>, vector<1024x128xbf16>, vector<8x128xf32> -> vector<8x128xf32>
    %173 = vector.broadcast %2 : vector<1x128xf32> to vector<8x128xf32>
    %174 = arith.addf %172, %173 : vector<8x128xf32>
    %cst_19 = arith.constant 0.000000e+00 : f32
    %175 = vector.broadcast %cst_19 : f32 to vector<8x128xf32>
    %176 = arith.maximumf %174, %175 : vector<8x128xf32>
    %177 = arith.truncf %176 : vector<8x128xf32> to vector<8x128xbf16>
    %c0_20 = arith.constant 0 : index
    %c0_21 = arith.constant 0 : index
    %178 = vector.load %arg5[%c0_20, %c0_21] : memref<128x128xbf16, #tpu.memory_space<vmem>>, vector<128x128xbf16>
    %cst_22 = arith.constant dense<0.000000e+00> : vector<8x128xf32>
    %179 = tpu.matmul %177, %178, %cst_22 {dimension_numbers = #tpu.dot_dimension_numbers<[1], [0], [0], [1], [0, 0, 1, 1], [], []>} : vector<8x128xbf16>, vector<128x128xbf16>, vector<8x128xf32> -> vector<8x128xf32>
    %180 = vector.broadcast %3 : vector<1x128xf32> to vector<8x128xf32>
    %181 = arith.addf %179, %180 : vector<8x128xf32>
    %cst_23 = arith.constant 0.000000e+00 : f32
    %182 = vector.broadcast %cst_23 : f32 to vector<8x128xf32>
    %183 = arith.maximumf %181, %182 : vector<8x128xf32>
    %184 = arith.truncf %183 : vector<8x128xf32> to vector<8x128xbf16>
    %c0_24 = arith.constant 0 : index
    %c0_25 = arith.constant 0 : index
    %185 = vector.load %arg6[%c0_24, %c0_25] : memref<128x128xbf16, #tpu.memory_space<vmem>>, vector<128x128xbf16>
    %cst_26 = arith.constant dense<0.000000e+00> : vector<8x128xf32>
    %186 = tpu.matmul %184, %185, %cst_26 {dimension_numbers = #tpu.dot_dimension_numbers<[1], [0], [0], [1], [0, 0, 1, 1], [], []>} : vector<8x128xbf16>, vector<128x128xbf16>, vector<8x128xf32> -> vector<8x128xf32>
    %187 = vector.broadcast %4 : vector<1x128xf32> to vector<8x128xf32>
    %188 = arith.addf %186, %187 : vector<8x128xf32>
    %cst_27 = arith.constant dense<0xFF800000> : vector<8xf32>
    %189 = vector.multi_reduction <maximumf>, %188, %cst_27 [1] : vector<8x128xf32> to vector<8xf32>
    %190 = vector.shape_cast %189 : vector<8xf32> to vector<8x1xf32>
    %191 = vector.broadcast %190 : vector<8x1xf32> to vector<8x128xf32>
    %192 = arith.subf %188, %191 : vector<8x128xf32>
    %193 = math.exp %192 : vector<8x128xf32>
    %cst_28 = arith.constant dense<0.000000e+00> : vector<8xf32>
    %194 = vector.multi_reduction <add>, %193, %cst_28 [1] : vector<8x128xf32> to vector<8xf32>
    %195 = vector.shape_cast %194 : vector<8xf32> to vector<8x1xf32>
    %196 = math.log %195 : vector<8x1xf32>
    %197 = vector.broadcast %196 : vector<8x1xf32> to vector<8x128xf32>
    %198 = arith.subf %192, %197 : vector<8x128xf32>
    %c0_29 = arith.constant 0 : index
    %c0_30 = arith.constant 0 : index
    %199 = vector.load %arg8[%c0_29, %c0_30] : memref<8x128xf32, #tpu.memory_space<vmem>>, vector<8x128xf32>
    tpu.vector_store %arg8[%c0_29, %c0_30], %198 {strides = array<i32>} : memref<8x128xf32, #tpu.memory_space<vmem>>, vector<8x128xf32>,
    return
  }
  func.func @transform_0(%arg0: i32) -> (i32, i32, i32, i32) {
    %c0_i32 = arith.constant 0 : i32
    %c0_i32_0 = arith.constant 0 : i32
    %c0_i32_1 = arith.constant 0 : i32
    %c0_i32_2 = arith.constant 0 : i32
    return %arg0, %c0_i32, %c0_i32_0, %c0_i32_1 : i32, i32, i32, i32
  }
  func.func @transform_1(%arg0: i32) -> (i32, i32) {
    %c0_i32 = arith.constant 0 : i32
    %c0_i32_0 = arith.constant 0 : i32
    %c0_i32_1 = arith.constant 0 : i32
    return %c0_i32, %c0_i32_0 : i32, i32
  }
  func.func @transform_2(%arg0: i32) -> (i32, i32) {
    %c0_i32 = arith.constant 0 : i32
    %c0_i32_0 = arith.constant 0 : i32
    %c0_i32_1 = arith.constant 0 : i32
    return %c0_i32, %c0_i32_0 : i32, i32
  }
  func.func @transform_3(%arg0: i32) -> (i32, i32) {
    %c0_i32 = arith.constant 0 : i32
    %c0_i32_0 = arith.constant 0 : i32
    %c0_i32_1 = arith.constant 0 : i32
    return %c0_i32, %c0_i32_0 : i32, i32
  }
  func.func @transform_4(%arg0: i32) -> (i32, i32) {
    %c0_i32 = arith.constant 0 : i32
    %c0_i32_0 = arith.constant 0 : i32
    %c0_i32_1 = arith.constant 0 : i32
    return %c0_i32, %c0_i32_0 : i32, i32
  }
  func.func @transform_5(%arg0: i32) -> (i32, i32) {
    %c0_i32 = arith.constant 0 : i32
    %c0_i32_0 = arith.constant 0 : i32
    %c0_i32_1 = arith.constant 0 : i32
    return %c0_i32, %c0_i32_0 : i32, i32
  }
  func.func @transform_6(%arg0: i32) -> (i32, i32) {
    %c0_i32 = arith.constant 0 : i32
    %c0_i32_0 = arith.constant 0 : i32
    %c0_i32_1 = arith.constant 0 : i32
    return %c0_i32, %c0_i32_0 : i32, i32
  }
  func.func @transform_7(%arg0: i32) -> (i32, i32) {
    %c0_i32 = arith.constant 0 : i32
    %c0_i32_0 = arith.constant 0 : i32
    return %arg0, %c0_i32 : i32, i32
  }
}

</mosaic_0001>

<bundles_post_ra>
// kernel: cnn_forward.1
= control target key start
LH: loop header
LB: loop body
LE: loop exit
PB: predicated region body
PF: predicated region fallthrough
CT: control target
= control target key end

     0   :  { %vm2929_vm0 = vcmask 1043456   ;;  %vm2930_vm1 = vcmask 1044480   ;;  %v13489_v2 = vmov 65535   ;;  %vm2064_vm2 = vcmask 203776   ;;  %s21046_s1 = inlined_call_operand.vmem [shape: bf16[25,64], index: 1, kind: input, shape index: {}]   ;;  %s21047_s6 = inlined_call_operand.vmem [shape: f32[8,128], index: 6, kind: input, shape index: {}]   ;;  %s21048_s0 = inlined_call_operand.vmem [shape: bf16[1,576,8,25], index: 0, kind: input, shape index: {}]   ;;  %s21049_s2 = inlined_call_operand.vmem [shape: bf16[1600,64], index: 2, kind: input, shape index: {}]   ;;  %s21050_s3 = inlined_call_operand.vmem [shape: bf16[1024,128], index: 3, kind: input, shape index: {}]   ;;  %s21051_s4 = inlined_call_operand.vmem [shape: bf16[128,128], index: 4, kind: input, shape index: {}]   ;;  %s21052_s5 = inlined_call_operand.vmem [shape: bf16[128,128], index: 5, kind: input, shape index: {}]   ;;  %s21053_s7 = inlined_call_operand.vmem [shape: f32[8,128], index: 7, kind: output, shape index: {}]  }
   0x1   :  { %v11952_v0 = vld [vmem:[%s21046_s1 + $0x8] sm:$0xf]  ;;  %v13283_v1 = vld [vmem:[%s21046_s1 + $0x8] sm:$0x10]  ;;  %v2931_v3 = vsel %vm2929_vm0, 4294967295, %v13489_v2  ;;  %v13282_v7 = vld [vmem:[%s21046_s1] sm:$0xff] }
   0x2   :  { %v11953_v4 = vor.u32 %v13283_v1, %v11952_v0  ;;  %v2932_v5 = vsel %vm2930_vm1, %v2931_v3, 0  ;;  %v12994_v8 = vld [vmem:[%s21048_s0] sm:$0xff]  ;;  %v12995_v10 = vld [vmem:[%s21048_s0 + $0x8] sm:$0xff]  ;;  %v12996_v12 = vld [vmem:[%s21048_s0 + $0x10] sm:$0xff]  ;;  %s13490_s1 = smov 64   ;;  %vm6119_vm3 = vcmask 523264  }
   0x3   :  { %v13194_v9 = vld [vmem:[%s21048_s0 + $0x640] sm:$0xff]  ;;  %v13195_v11 = vld [vmem:[%s21048_s0 + $0x648] sm:$0xff]  ;;  %v13196_v13 = vld [vmem:[%s21048_s0 + $0x650] sm:$0xff] }
   0x4   :  { %v2934_v6 = vand.u32 %v11953_v4, %v2932_v5  ;;  %v12997_v14 = vld [vmem:[%s21048_s0 + $0x18] sm:$0xff]  ;;  %v12998_v16 = vld [vmem:[%s21048_s0 + $0x20] sm:$0xff]  ;;  %v12999_v18 = vld [vmem:[%s21048_s0 + $0x28] sm:$0xff] }
   0x5   :  { %v13197_v15 = vld [vmem:[%s21048_s0 + $0x658] sm:$0xff]  ;;  %v13198_v17 = vld [vmem:[%s21048_s0 + $0x660] sm:$0xff]  ;;  %v13199_v19 = vld [vmem:[%s21048_s0 + $0x668] sm:$0xff] }
   0x6   :  { %2942 = vmatpush.bf16.msra.mxu0 %v2934_v6  ;;  %13465 = vmatpush.bf16.msra.mxu2 %v2934_v6  ;;  %v13000_v20 = vld [vmem:[%s21048_s0 + $0x30] sm:$0xff]  ;;  %v13001_v22 = vld [vmem:[%s21048_s0 + $0x38] sm:$0xff]  ;;  %v13002_v24 = vld [vmem:[%s21048_s0 + $0x40] sm:$0xff] }
   0x7   :  { %13464 = vmatpush.bf16.msra.mxu1 %v2934_v6  ;;  %13466 = vmatpush.bf16.msra.mxu3 %v2934_v6  ;;  %v13200_v21 = vld [vmem:[%s21048_s0 + $0x670] sm:$0xff]  ;;  %v13201_v23 = vld [vmem:[%s21048_s0 + $0x678] sm:$0xff]  ;;  %v13202_v25 = vld [vmem:[%s21048_s0 + $0x680] sm:$0xff] }
   0x8   :  { %v13003_v30 = vld [vmem:[%s21048_s0 + $0x48] sm:$0xff]  ;;  %v13004_v36 = vld [vmem:[%s21048_s0 + $0x50] sm:$0xff]  ;;  %v13005_v43 = vld [vmem:[%s21048_s0 + $0x58] sm:$0xff] }
   0x9   :  { %v13203_v31 = vld [vmem:[%s21048_s0 + $0x688] sm:$0xff]  ;;  %v13204_v37 = vld [vmem:[%s21048_s0 + $0x690] sm:$0xff]  ;;  %v13205_v44 = vld [vmem:[%s21048_s0 + $0x698] sm:$0xff] }
   0xa   :  { %2943 = vmatpush.bf16.msra.mxu0 %v13282_v7  ;;  %13468 = vmatpush.bf16.msra.mxu2 %v13282_v7  ;;  %v13176_v41 = vld [vmem:[%s21048_s0 + $0x5b0] sm:$0xff]  ;;  %v13177_v48 = vld [vmem:[%s21048_s0 + $0x5b8] sm:$0xff]  ;;  %v13006_v50 = vld [vmem:[%s21048_s0 + $0x60] sm:$0xff] }
   0xb   :  { %13467 = vmatpush.bf16.msra.mxu1 %v13282_v7  ;;  %13469 = vmatpush.bf16.msra.mxu3 %v13282_v7  ;;  %v13206_v51 = vld [vmem:[%s21048_s0 + $0x6a0] sm:$0xff]  ;;  %v13007_v57 = vld [vmem:[%s21048_s0 + $0x68] sm:$0xff]  ;;  %v13008_v0 = vld [vmem:[%s21048_s0 + $0x70] sm:$0xff] }
   0xc   :  { %v13178_v55 = vld [vmem:[%s21048_s0 + $0x5c0] sm:$0xff]  ;;  %v13207_v58 = vld [vmem:[%s21048_s0 + $0x6a8] sm:$0xff]  ;;  %v13208_v1 = vld [vmem:[%s21048_s0 + $0x6b0] sm:$0xff] }
   0xd   :  { %11954 = vmatmul.msk.bf16.vlgmr.msra.gmra.mxu0 %vm2064_vm2, %v12994_v8  ;;  %12154 = vmatmul.msk.bf16.vlgmr.msra.gmra.mxu2 %vm2064_vm2, %v13194_v9  ;;  %v13179_v62 = vld [vmem:[%s21048_s0 + $0x5c8] sm:$0xff]  ;;  %v13180_v5 = vld [vmem:[%s21048_s0 + $0x5d0] sm:$0xff]  ;;  %v13009_v7 = vld [vmem:[%s21048_s0 + $0x78] sm:$0xff] }
   0xe   :  { %12136 = vmatmul.msk.bf16.vlgmr.msra.gmra.mxu1 %vm2064_vm2, %v13176_v41  ;;  %v13209_v8 = vld [vmem:[%s21048_s0 + $0x6b8] sm:$0xff] }
  0x1d   :  { %11955 = vmatmul.msk.bf16.gmra.mxu0 %vm2064_vm2, %v12995_v10  ;;  %12155 = vmatmul.msk.bf16.gmra.mxu2 %vm2064_vm2, %v13195_v11 }
  0x1e   :  { %12137 = vmatmul.msk.bf16.gmra.mxu1 %vm2064_vm2, %v13177_v48 }
  0x2d   :  { %11956 = vmatmul.msk.bf16.gmra.mxu0 %vm2064_vm2, %v12996_v12  ;;  %12156 = vmatmul.msk.bf16.gmra.mxu2 %vm2064_vm2, %v13196_v13  ;;  %v13181_v12 = vld [vmem:[%s21048_s0 + $0x5d8] sm:$0xff] }
  0x2e   :  { %12138 = vmatmul.msk.bf16.gmra.mxu1 %vm2064_vm2, %v13178_v55  ;;  %v13013_v55 = vld [vmem:[%s21048_s0 + $0x98] sm:$0xff] }
  0x3d   :  { %11957 = vmatmul.msk.bf16.gmra.mxu0 %vm2064_vm2, %v12997_v14  ;;  %12157 = vmatmul.msk.bf16.gmra.mxu2 %vm2064_vm2, %v13197_v15  ;;  %v13010_v14 = vld [vmem:[%s21048_s0 + $0x80] sm:$0xff] }
  0x3e   :  { %12139 = vmatmul.msk.bf16.gmra.mxu1 %vm2064_vm2, %v13179_v62  ;;  %v13210_v15 = vld [vmem:[%s21048_s0 + $0x6c0] sm:$0xff] }
  0x4d   :  { %11958 = vmatmul.msk.bf16.gmra.mxu0 %vm2064_vm2, %v12998_v16  ;;  %12158 = vmatmul.msk.bf16.gmra.mxu2 %vm2064_vm2, %v13198_v17 }
  0x4e   :  { %12140 = vmatmul.msk.bf16.gmra.mxu1 %vm2064_vm2, %v13180_v5 }
  0x5d   :  { %11959 = vmatmul.msk.bf16.gmra.mxu0 %vm2064_vm2, %v12999_v18  ;;  %12159 = vmatmul.msk.bf16.gmra.mxu2 %vm2064_vm2, %v13199_v19  ;;  %v13182_v19 = vld [vmem:[%s21048_s0 + $0x5e0] sm:$0xff] }
  0x5e   :  { %12141 = vmatmul.msk.bf16.gmra.mxu1 %vm2064_vm2, %v13181_v12 }
  0x6d   :  { %11960 = vmatmul.msk.bf16.gmra.mxu0 %vm2064_vm2, %v13000_v20  ;;  %12160 = vmatmul.msk.bf16.gmra.mxu2 %vm2064_vm2, %v13200_v21  ;;  %v13011_v21 = vld [vmem:[%s21048_s0 + $0x88] sm:$0xff] }
  0x6e   :  { %12142 = vmatmul.msk.bf16.gmra.mxu1 %vm2064_vm2, %v13182_v19  ;;  %v13214_v19 = vld [vmem:[%s21048_s0 + $0x6e0] sm:$0xff] }
  0x7d   :  { %11961 = vmatmul.msk.bf16.gmra.mxu0 %vm2064_vm2, %v13001_v22  ;;  %12161 = vmatmul.msk.bf16.gmra.mxu2 %vm2064_vm2, %v13201_v23  ;;  %v13211_v22 = vld [vmem:[%s21048_s0 + $0x6c8] sm:$0xff] }
  0x8a   :  { %v13610_v26 = vpop.f32.mrf.mxu0 }
  0x8b   :  { %v13810_v48 = vpop.f32.mrf.mxu1 }
  0x8c   :  { %21378 = vst [vmem:[#allocation2_spill] sm:$0xff] %v13810_v48 }
  0x8d   :  { %11962 = vmatmul.msk.bf16.gmra.mxu0 %vm2064_vm2, %v13002_v24  ;;  %12162 = vmatmul.msk.bf16.gmra.mxu2 %vm2064_vm2, %v13202_v25 }
  0x90   :  { %v13614_v27 = vpop.f32.mrf.mxu2 }
  0x92   :  { %v13616_v28 = vpop.f32.mrf.mxu0 }
  0x93   :  { %v13826_v62 = vpop.f32.mrf.mxu1 }
  0x94   :  { %21379 = vst [vmem:[#allocation3_spill] sm:$0xff] %v13826_v62 }
  0x98   :  { %v13618_v29 = vpop.f32.mrf.mxu2 }
  0x9a   :  { %v13626_v32 = vpop.f32.mrf.mxu0 }
  0x9b   :  { %v13834_v5 = vpop.f32.mrf.mxu1 }
  0x9c   :  { %21380 = vst [vmem:[#allocation4_spill] sm:$0xff] %v13834_v5 }
  0x9d   :  { %11963 = vmatmul.msk.bf16.gmra.mxu0 %vm2064_vm2, %v13003_v30  ;;  %12163 = vmatmul.msk.bf16.gmra.mxu2 %vm2064_vm2, %v13203_v31  ;;  %v13183_v30 = vld [vmem:[%s21048_s0 + $0x5e8] sm:$0xff] }
  0x9e   :  { %12143 = vmatmul.msk.bf16.gmra.mxu1 %vm2064_vm2, %v13183_v30 }
  0xa0   :  { %v13630_v33 = vpop.f32.mrf.mxu2 }
  0xa2   :  { %v13632_v34 = vpop.f32.mrf.mxu0 }
  0xa8   :  { %v13634_v35 = vpop.f32.mrf.mxu2 }
  0xaa   :  { %v13642_v38 = vpop.f32.mrf.mxu0 }
  0xad   :  { %11964 = vmatmul.msk.bf16.gmra.mxu0 %vm2064_vm2, %v13004_v36  ;;  %12164 = vmatmul.msk.bf16.gmra.mxu2 %vm2064_vm2, %v13204_v37  ;;  %v13012_v36 = vld [vmem:[%s21048_s0 + $0x90] sm:$0xff] }
  0xae   :  { %v13212_v37 = vld [vmem:[%s21048_s0 + $0x6d0] sm:$0xff] }
  0xb0   :  { %v13646_v39 = vpop.f32.mrf.mxu2 }
  0xb2   :  { %v13648_v40 = vpop.f32.mrf.mxu0 }
  0xb8   :  { %v13654_v42 = vpop.f32.mrf.mxu2 }
  0xba   :  { %v13662_v45 = vpop.f32.mrf.mxu0 }
  0xbd   :  { %11965 = vmatmul.msk.bf16.gmra.mxu0 %vm2064_vm2, %v13005_v43  ;;  %12165 = vmatmul.msk.bf16.gmra.mxu2 %vm2064_vm2, %v13205_v44 }
  0xc0   :  { %v13666_v46 = vpop.f32.mrf.mxu2 }
  0xc2   :  { %v13668_v47 = vpop.f32.mrf.mxu0 }
  0xc8   :  { %v13674_v49 = vpop.f32.mrf.mxu2 }
  0xca   :  { %v13682_v52 = vpop.f32.mrf.mxu0 }
  0xcd   :  { %11966 = vmatmul.msk.bf16.gmra.mxu0 %vm2064_vm2, %v13006_v50  ;;  %12166 = vmatmul.msk.bf16.gmra.mxu2 %vm2064_vm2, %v13206_v51  ;;  %v13184_v50 = vld [vmem:[%s21048_s0 + $0x5f0] sm:$0xff] }
  0xce   :  { %12144 = vmatmul.msk.bf16.gmra.mxu1 %vm2064_vm2, %v13184_v50 }
  0xd0   :  { %v13686_v53 = vpop.f32.mrf.mxu2 }
  0xd2   :  { %v13688_v54 = vpop.f32.mrf.mxu0 }
  0xd8   :  { %v13694_v56 = vpop.f32.mrf.mxu2 }
  0xda   :  { %v13702_v59 = vpop.f32.mrf.mxu0 }
  0xdd   :  { %11967 = vmatmul.msk.bf16.gmra.mxu0 %vm2064_vm2, %v13007_v57  ;;  %12167 = vmatmul.msk.bf16.gmra.mxu2 %vm2064_vm2, %v13207_v58  ;;  %v13213_v57 = vld [vmem:[%s21048_s0 + $0x6d8] sm:$0xff] }
  0xe0   :  { %v13706_v60 = vpop.f32.mrf.mxu2 }
  0xe2   :  { %v13708_v61 = vpop.f32.mrf.mxu0 }
  0xe8   :  { %v13714_v63 = vpop.f32.mrf.mxu2 }
  0xea   :  { %v13722_v2 = vpop.f32.mrf.mxu0 }
  0xed   :  { %11968 = vmatmul.msk.bf16.gmra.mxu0 %vm2064_vm2, %v13008_v0  ;;  %12168 = vmatmul.msk.bf16.gmra.mxu2 %vm2064_vm2, %v13208_v1 }
  0xf0   :  { %v13726_v3 = vpop.f32.mrf.mxu2 }
  0xf2   :  { %v13728_v4 = vpop.f32.mrf.mxu0 }
  0xf8   :  { %v13734_v6 = vpop.f32.mrf.mxu2 }
  0xfa   :  { %v13742_v9 = vpop.f32.mrf.mxu0 }
  0xfd   :  { %11969 = vmatmul.msk.bf16.gmra.mxu0 %vm2064_vm2, %v13009_v7  ;;  %12169 = vmatmul.msk.bf16.gmra.mxu2 %vm2064_vm2, %v13209_v8  ;;  %v13185_v7 = vld [vmem:[%s21048_s0 + $0x5f8] sm:$0xff]  ;;  %v13842_v8 = vld [vmem:[%s21047_s6] ss:$0 sm:$0xff] }
  0xfe   :  { %12145 = vmatmul.msk.bf16.gmra.mxu1 %vm2064_vm2, %v13185_v7  ;;  %v2948_v7 = vadd.f32 %v13842_v8, %v13616_v28 }
 0x100   :  { %v13746_v10 = vpop.f32.mrf.mxu2 }
 0x102   :  { %v13748_v11 = vpop.f32.mrf.mxu0 }
 0x108   :  { %v13754_v13 = vpop.f32.mrf.mxu2 }
 0x10a   :  { %v13762_v16 = vpop.f32.mrf.mxu0 }
 0x10d   :  { %11970 = vmatmul.msk.bf16.gmra.mxu0 %vm2064_vm2, %v13010_v14  ;;  %12170 = vmatmul.msk.bf16.gmra.mxu2 %vm2064_vm2, %v13210_v15  ;;  %v2946_v14 = vadd.f32 %v13842_v8, %v13610_v26  ;;  %v13014_v15 = vld [vmem:[%s21048_s0 + $0xa0] sm:$0xff] }
 0x110   :  { %v13766_v17 = vpop.f32.mrf.mxu2 }
 0x112   :  { %v13768_v18 = vpop.f32.mrf.mxu0 }
 0x118   :  { %v13774_v20 = vpop.f32.mrf.mxu2 }
 0x11a   :  { %v13782_v23 = vpop.f32.mrf.mxu0 }
 0x11d   :  { %11971 = vmatmul.msk.bf16.gmra.mxu0 %vm2064_vm2, %v13011_v21  ;;  %12171 = vmatmul.msk.bf16.gmra.mxu2 %vm2064_vm2, %v13211_v22  ;;  %v13855_v22 = vpop.f32.mrf.mxu1 }
 0x11e   :  { %21381 = vst [vmem:[#allocation5_spill] sm:$0xff] %v13855_v22 }
 0x120   :  { %v13786_v24 = vpop.f32.mrf.mxu2 }
 0x122   :  { %v13788_v25 = vpop.f32.mrf.mxu0 }
 0x125   :  { %v13865_v62 = vpop.f32.mrf.mxu1 }
 0x126   :  { %21382 = vst [vmem:[#allocation6_spill] sm:$0xff] %v13865_v62 }
 0x128   :  { %v13794_v31 = vpop.f32.mrf.mxu2 }
 0x12a   :  { %v13802_v41 = vpop.f32.mrf.mxu0 }
 0x12d   :  { %11972 = vmatmul.msk.bf16.gmra.mxu0 %vm2064_vm2, %v13012_v36  ;;  %12172 = vmatmul.msk.bf16.gmra.mxu2 %vm2064_vm2, %v13212_v37  ;;  %v4385_v36 = vmax.f32 %v2946_v14, 0.0  ;;  %v3946_v37 = vadd.f32 %v13842_v8, %v13614_v27  ;;  %v13186_v27 = vld [vmem:[%s21048_s0 + $0x600] sm:$0xff] }
 0x12e   :  { %12146 = vmatmul.msk.bf16.gmra.mxu1 %vm2064_vm2, %v13186_v27 }
 0x130   :  { %v13806_v43 = vpop.f32.mrf.mxu2 }
 0x132   :  { %v13808_v44 = vpop.f32.mrf.mxu0 }
 0x138   :  { %v13816_v51 = vpop.f32.mrf.mxu2 }
 0x13a   :  { %v13824_v58 = vpop.f32.mrf.mxu0 }
 0x13d   :  { %11973 = vmatmul.msk.bf16.gmra.mxu0 %vm2064_vm2, %v13013_v55  ;;  %12173 = vmatmul.msk.bf16.gmra.mxu2 %vm2064_vm2, %v13213_v57  ;;  %v4785_v57 = vmax.f32 %v3946_v37, 0.0 }
 0x140   :  { %v13830_v0 = vpop.f32.mrf.mxu2 }
 0x142   :  { %v13832_v1 = vpop.f32.mrf.mxu0 }
 0x148   :  { %v13845_v12 = vpop.f32.mrf.mxu2 }
 0x14a   :  { %v3005_v21 = vpop.f32.mrf.mxu0 }
 0x14b   :  { %v3006_v30 = vadd.f32 %v13842_v8, %v3005_v21 }
 0x14d   :  { %v4409_v50 = vmax.f32 %v3006_v30, 0.0  ;;  %11974 = vmatmul.msk.bf16.gmra.mxu0 %vm2064_vm2, %v13014_v15  ;;  %12174 = vmatmul.msk.bf16.gmra.mxu2 %vm2064_vm2, %v13214_v19  ;;  %v4386_v15 = vmax.f32 %v2948_v7, 0.0  ;;  %v3948_v19 = vadd.f32 %v13842_v8, %v13618_v29  ;;  %v13215_v7 = vld [vmem:[%s21048_s0 + $0x6e8] sm:$0xff]  ;;  %v13881_v29 = vpop.f32.mrf.mxu1 }
 0x14e   :  { %21383 = vst [vmem:[#allocation7_spill] sm:$0xff] %v13881_v29  ;;  %v13016_v29 = vld [vmem:[%s21048_s0 + $0xb0] sm:$0xff] }
 0x14f   :  { %v4961_v26 = vmax.f32 %v4385_v36, %v4409_v50  ;;  %v4786_v50 = vmax.f32 %v3948_v19, 0.0 }
 0x150   :  { %v4005_v55 = vpop.f32.mrf.mxu2 }
 0x151   :  { %v4006_v5 = vadd.f32 %v13842_v8, %v4005_v55 }
 0x152   :  { %v3007_v22 = vpop.f32.mrf.mxu0 }
 0x153   :  { %v4809_v14 = vmax.f32 %v4006_v5, 0.0  ;;  %v3008_v21 = vadd.f32 %v13842_v8, %v3007_v22  ;;  %v13015_v22 = vld [vmem:[%s21048_s0 + $0xa8] sm:$0xff] }
 0x155   :  { %v5169_v30 = vmax.f32 %v4785_v57, %v4809_v14  ;;  %v4410_v36 = vmax.f32 %v3008_v21, 0.0  ;;  %v3951_v14 = vadd.f32 %v13842_v8, %v13630_v33 }
 0x157   :  { %v4962_v28 = vmax.f32 %v4386_v15, %v4410_v36  ;;  %v2951_v15 = vadd.f32 %v13842_v8, %v13626_v32  ;;  %v4787_v36 = vmax.f32 %v3951_v14, 0.0 }
 0x158   :  { %v4007_v37 = vpop.f32.mrf.mxu2 }
 0x159   :  { %v5249_v55 = vmax.f32 %v4961_v26, %v4962_v28  ;;  %v4008_v5 = vadd.f32 %v13842_v8, %v4007_v37  ;;  %v2953_v28 = vadd.f32 %v13842_v8, %v13632_v34 }
 0x15a   :  { %v3010_v62 = vpop.f32.mrf.mxu0 }
 0x15b   :  { %v4810_v57 = vmax.f32 %v4008_v5, 0.0  ;;  %v3011_v27 = vadd.f32 %v13842_v8, %v3010_v62  ;;  %v13187_v62 = vld [vmem:[%s21048_s0 + $0x608] sm:$0xff]  ;;  %v4388_v32 = vmax.f32 %v2953_v28, 0.0 }
 0x15c   :  { %12147 = vmatmul.msk.bf16.gmra.mxu1 %vm2064_vm2, %v13187_v62 }
 0x15d   :  { %v5170_v21 = vmax.f32 %v4786_v50, %v4810_v57  ;;  %11975 = vmatmul.msk.bf16.gmra.mxu0 %vm2064_vm2, %v13015_v22  ;;  %12175 = vmatmul.msk.bf16.gmra.mxu2 %vm2064_vm2, %v13215_v7  ;;  %v13895_v50 = vpop.f32.mrf.mxu1  ;;  %v4411_v5 = vmax.f32 %v3011_v27, 0.0  ;;  %v4387_v7 = vmax.f32 %v2951_v15, 0.0  ;;  %v3953_v57 = vadd.f32 %v13842_v8, %v13634_v35  ;;  %v13216_v15 = vld [vmem:[%s21048_s0 + $0x6f0] sm:$0xff] }
 0x15e   :  { %21384 = vst [vmem:[#allocation8_spill] sm:$0xff] %v13895_v50 }
 0x15f   :  { %v13887_v26 = vmax.f32 %v5169_v30, %v5170_v21  ;;  %v4963_v21 = vmax.f32 %v4387_v7, %v4411_v5  ;;  %v4788_v27 = vmax.f32 %v3953_v57, 0.0  ;;  %v13018_v57 = vld [vmem:[%s21048_s0 + $0xc0] sm:$0xff] }
 0x160   :  { %v4010_v19 = vpop.f32.mrf.mxu2 }
 0x161   :  { %v4011_v37 = vadd.f32 %v13842_v8, %v4010_v19 }
 0x162   :  { %v3012_v33 = vpop.f32.mrf.mxu0 }
 0x163   :  { %v4811_v22 = vmax.f32 %v4011_v37, 0.0  ;;  %v3013_v30 = vadd.f32 %v13842_v8, %v3012_v33  ;;  %v5393_v37 = vpack.c.bf16 %v5249_v55, %v5249_v55 }
 0x165   :  { %v5171_v14 = vmax.f32 %v4787_v36, %v4811_v22  ;;  %v4412_v34 = vmax.f32 %v3013_v30, 0.0  ;;  %v13911_v28 = vpop.f32.mrf.mxu1  ;;  %v3956_v30 = vadd.f32 %v13842_v8, %v13646_v39  ;;  %v13915_v55 = vunpack.c.l.b16 %v5393_v37 }
 0x166   :  { %21385 = vst [vmem:[#allocation9_spill] sm:$0xff] %v13911_v28 }
 0x167   :  { %v4964_v19 = vmax.f32 %v4388_v32, %v4412_v34  ;;  %v2956_v34 = vadd.f32 %v13842_v8, %v13642_v38 }
 0x168   :  { %v4012_v50 = vpop.f32.mrf.mxu2 }
 0x169   :  { %v4013_v33 = vadd.f32 %v13842_v8, %v4012_v50  ;;  %v5250_v35 = vmax.f32 %v4963_v21, %v4964_v19  ;;  %v4789_v21 = vmax.f32 %v3956_v30, 0.0  ;;  %v2958_v19 = vadd.f32 %v13842_v8, %v13648_v40 }
 0x16a   :  { %v3015_v36 = vpop.f32.mrf.mxu0 }
 0x16b   :  { %v4812_v22 = vmax.f32 %v4013_v33, 0.0  ;;  %v5394_v5 = vpack.c.bf16 %v5250_v35, %v5250_v35  ;;  %v3016_v32 = vadd.f32 %v13842_v8, %v3015_v36  ;;  %v13188_v35 = vld [vmem:[%s21048_s0 + $0x610] sm:$0xff]  ;;  %v4389_v36 = vmax.f32 %v2956_v34, 0.0  ;;  %v13217_v34 = vld [vmem:[%s21048_s0 + $0x6f8] sm:$0xff] }
 0x16c   :  { %v4390_v38 = vmax.f32 %v2958_v19, 0.0  ;;  %12148 = vmatmul.msk.bf16.gmra.mxu1 %vm2064_vm2, %v13188_v35 }
 0x16d   :  { %v5172_v50 = vmax.f32 %v4788_v27, %v4812_v22  ;;  %11976 = vmatmul.msk.bf16.gmra.mxu0 %vm2064_vm2, %v13016_v29  ;;  %12176 = vmatmul.msk.bf16.gmra.mxu2 %vm2064_vm2, %v13216_v15  ;;  %v13919_v62 = vunpack.c.l.b16 %v5394_v5  ;;  %v13931_v37 = vpop.f32.mrf.mxu1  ;;  %v3958_v22 = vadd.f32 %v13842_v8, %v13654_v42 }
 0x16e   :  { %21386 = vst [vmem:[#allocation10_spill] sm:$0xff] %v13931_v37 }
 0x16f   :  { %v13921_v7 = vmax.f32 %v5171_v14, %v5172_v50  ;;  %v4413_v14 = vmax.f32 %v3016_v32, 0.0  ;;  %v4790_v32 = vmax.f32 %v3958_v22, 0.0 }
 0x170   :  { %v4015_v39 = vpop.f32.mrf.mxu2 }
 0x171   :  { %v4016_v29 = vadd.f32 %v13842_v8, %v4015_v39  ;;  %v4965_v30 = vmax.f32 %v4389_v36, %v4413_v14  ;;  %v3961_v14 = vadd.f32 %v13842_v8, %v13666_v46  ;;  %v2963_v46 = vadd.f32 %v13842_v8, %v13668_v47 }
 0x172   :  { %v3017_v27 = vpop.f32.mrf.mxu0  ;;  %v3963_v47 = vadd.f32 %v13842_v8, %v13674_v49 }
 0x173   :  { %v4813_v33 = vmax.f32 %v4016_v29, 0.0  ;;  %v3018_v15 = vadd.f32 %v13842_v8, %v3017_v27  ;;  %v13017_v27 = vld [vmem:[%s21048_s0 + $0xb8] sm:$0xff] }
 0x175   :  { %v5173_v5 = vmax.f32 %v4789_v21, %v4813_v33  ;;  %v4414_v40 = vmax.f32 %v3018_v15, 0.0  ;;  %v13947_v21 = vpop.f32.mrf.mxu1 }
 0x176   :  { %21387 = vst [vmem:[#allocation11_spill] sm:$0xff] %v13947_v21 }
 0x177   :  { %v4966_v50 = vmax.f32 %v4390_v38, %v4414_v40 }
 0x178   :  { %v4017_v39 = vpop.f32.mrf.mxu2 }
 0x179   :  { %v4018_v29 = vadd.f32 %v13842_v8, %v4017_v39  ;;  %v5251_v19 = vmax.f32 %v4965_v30, %v4966_v50  ;;  %v2961_v30 = vadd.f32 %v13842_v8, %v13662_v45  ;;  %v4791_v39 = vmax.f32 %v3961_v14, 0.0  ;;  %v13189_v45 = vld [vmem:[%s21048_s0 + $0x618] sm:$0xff] }
 0x17a   :  { %v3020_v42 = vpop.f32.mrf.mxu0 }
 0x17b   :  { %v4814_v33 = vmax.f32 %v4018_v29, 0.0  ;;  %v5395_v15 = vpack.c.bf16 %v5251_v19, %v5251_v19  ;;  %v3021_v22 = vadd.f32 %v13842_v8, %v3020_v42  ;;  %v4391_v42 = vmax.f32 %v2961_v30, 0.0  ;;  %v13218_v30 = vld [vmem:[%s21048_s0 + $0x700] sm:$0xff] }
 0x17c   :  { %12149 = vmatmul.msk.bf16.gmra.mxu1 %vm2064_vm2, %v13189_v45 }
 0x17d   :  { %v5174_v35 = vmax.f32 %v4790_v32, %v4814_v33  ;;  %11977 = vmatmul.msk.bf16.gmra.mxu0 %vm2064_vm2, %v13017_v27  ;;  %12177 = vmatmul.msk.bf16.gmra.mxu2 %vm2064_vm2, %v13217_v34  ;;  %v13953_v36 = vunpack.c.l.b16 %v5395_v15  ;;  %v13966_v29 = vpop.f32.mrf.mxu1  ;;  %v4415_v27 = vmax.f32 %v3021_v22, 0.0  ;;  %v4392_v33 = vmax.f32 %v2963_v46, 0.0 }
 0x17e   :  { %21388 = vst [vmem:[#allocation12_spill] sm:$0xff] %v13966_v29  ;;  %v4792_v22 = vmax.f32 %v3963_v47, 0.0 }
 0x17f   :  { %v13955_v38 = vmax.f32 %v5173_v5, %v5174_v35  ;;  %v5713_v40 = vpack.c.b16 %v13953_v36, %v13919_v62  ;;  %v4967_v35 = vmax.f32 %v4391_v42, %v4415_v27 }
 0x180   :  { %v4020_v50 = vpop.f32.mrf.mxu2 }
 0x181   :  { %v4021_v32 = vadd.f32 %v13842_v8, %v4020_v50  ;;  %5745 = vrot.lane.b32.xlu0 %v5713_v40, %s13490_s1 }
 0x182   :  { %v3022_v5 = vpop.f32.mrf.mxu0 }
 0x183   :  { %v4815_v34 = vmax.f32 %v4021_v32, 0.0  ;;  %v3023_v19 = vadd.f32 %v13842_v8, %v3022_v5 }
 0x185   :  { %v5175_v15 = vmax.f32 %v4791_v39, %v4815_v34  ;;  %v4416_v14 = vmax.f32 %v3023_v19, 0.0  ;;  %v13982_v39 = vpop.f32.mrf.mxu1 }
 0x186   :  { %21389 = vst [vmem:[#allocation13_spill] sm:$0xff] %v13982_v39 }
 0x187   :  { %v4968_v40 = vmax.f32 %v4392_v33, %v4416_v14  ;;  %v2966_v14 = vadd.f32 %v13842_v8, %v13682_v52 }
 0x188   :  { %v4022_v50 = vpop.f32.mrf.mxu2 }
 0x189   :  { %v5252_v32 = vmax.f32 %v4967_v35, %v4968_v40  ;;  %v4023_v5 = vadd.f32 %v13842_v8, %v4022_v50  ;;  %v2968_v35 = vadd.f32 %v13842_v8, %v13688_v54 }
 0x18a   :  { %v3025_v49 = vpop.f32.mrf.mxu0 }
 0x18b   :  { %v4816_v46 = vmax.f32 %v4023_v5, 0.0  ;;  %v5396_v34 = vpack.c.bf16 %v5252_v32, %v5252_v32  ;;  %v3026_v42 = vadd.f32 %v13842_v8, %v3025_v49  ;;  %v4393_v32 = vmax.f32 %v2966_v14, 0.0 }
 0x18c   :  { %v4394_v5 = vmax.f32 %v2968_v35, 0.0 }
 0x18d   :  { %v5176_v27 = vmax.f32 %v4792_v22, %v4816_v46  ;;  %11978 = vmatmul.msk.bf16.gmra.mxu0 %vm2064_vm2, %v13018_v57  ;;  %12178 = vmatmul.msk.bf16.gmra.mxu2 %vm2064_vm2, %v13218_v30  ;;  %v13986_v19 = vunpack.c.l.b16 %v5396_v34  ;;  %v13999_v40 = vpop.f32.mrf.mxu1  ;;  %v4417_v50 = vmax.f32 %v3026_v42, 0.0  ;;  %v13190_v22 = vld [vmem:[%s21048_s0 + $0x620] sm:$0xff]  ;;  %v13019_v34 = vld [vmem:[%s21048_s0 + $0xc8] sm:$0xff] }
 0x18e   :  { %21390 = vst [vmem:[#allocation14_spill] sm:$0xff] %v13999_v40  ;;  %12150 = vmatmul.msk.bf16.gmra.mxu1 %vm2064_vm2, %v13190_v22 }
 0x18f   :  { %v13988_v45 = vmax.f32 %v5175_v15, %v5176_v27  ;;  %v4969_v49 = vmax.f32 %v4393_v32, %v4417_v50  ;;  %v13219_v27 = vld [vmem:[%s21048_s0 + $0x708] sm:$0xff]  ;;  %v2971_v32 = vadd.f32 %v13842_v8, %v13702_v59 }
 0x190   :  { %v13993_v47 = vpop.f32.mrf.mxu2 }
 0x192   :  { %v3027_v57 = vpop.f32.mrf.mxu0 }
 0x193   :  { %v3028_v15 = vadd.f32 %v13842_v8, %v3027_v57 }
 0x195   :  { %v4418_v30 = vmax.f32 %v3028_v15, 0.0  ;;  %v14014_v57 = vpop.f32.mrf.mxu1 }
 0x196   :  { %21391 = vst [vmem:[#allocation15_spill] sm:$0xff] %v14014_v57 }
 0x197   :  { %v4970_v52 = vmax.f32 %v4394_v5, %v4418_v30  ;;  %v2973_v5 = vadd.f32 %v13842_v8, %v13708_v61 }
 0x198   :  { %v14006_v46 = vpop.f32.mrf.mxu2 }
 0x199   :  { %v5253_v54 = vmax.f32 %v4969_v49, %v4970_v52 }
 0x19a   :  { %v3030_v42 = vpop.f32.mrf.mxu0 }
 0x19b   :  { %v5397_v14 = vpack.c.bf16 %v5253_v54, %v5253_v54  ;;  %v3031_v50 = vadd.f32 %v13842_v8, %v3030_v42  ;;  %v4396_v42 = vmax.f32 %v2973_v5, 0.0 }
 0x19d   :  { %11979 = vmatmul.msk.bf16.gmra.mxu0 %vm2064_vm2, %v13019_v34  ;;  %12179 = vmatmul.msk.bf16.gmra.mxu2 %vm2064_vm2, %v13219_v27  ;;  %v5605_v35 = vunpack.c.l.b16 %v5397_v14  ;;  %v14027_v49 = vpop.f32.mrf.mxu1  ;;  %v4419_v52 = vmax.f32 %v3031_v50, 0.0  ;;  %v13191_v34 = vld [vmem:[%s21048_s0 + $0x628] sm:$0xff]  ;;  %v4395_v27 = vmax.f32 %v2971_v32, 0.0  ;;  %v13220_v50 = vld [vmem:[%s21048_s0 + $0x710] sm:$0xff] }
 0x19e   :  { %21392 = vst [vmem:[#allocation16_spill] sm:$0xff] %v14027_v49  ;;  %12151 = vmatmul.msk.bf16.gmra.mxu1 %vm2064_vm2, %v13191_v34 }
 0x19f   :  { %v5714_v15 = vpack.c.b16 %v5605_v35, %v13986_v19  ;;  %v4971_v59 = vmax.f32 %v4395_v27, %v4419_v52  ;;  %v2976_v27 = vadd.f32 %v13842_v8, %v13722_v2 }
 0x1a0   :  { %v14020_v22 = vpop.f32.mrf.mxu2 }
 0x1a1   :  { %5747 = vrot.lane.b32.xlu0 %v5714_v15, %s13490_s1  ;;  %v13020_v15 = vld [vmem:[%s21048_s0 + $0xd0] sm:$0xff] }
 0x1a2   :  { %v3032_v30 = vpop.f32.mrf.mxu0 }
 0x1a3   :  { %v3033_v54 = vadd.f32 %v13842_v8, %v3032_v30 }
 0x1a5   :  { %v4420_v14 = vmax.f32 %v3033_v54, 0.0  ;;  %v14042_v57 = vpop.f32.mrf.mxu1 }
 0x1a6   :  { %21393 = vst [vmem:[#allocation17_spill] sm:$0xff] %v14042_v57 }
 0x1a7   :  { %v4972_v33 = vmax.f32 %v4396_v42, %v4420_v14 }
 0x1a8   :  { %v14034_v61 = vpop.f32.mrf.mxu2 }
 0x1a9   :  { %v5254_v30 = vmax.f32 %v4971_v59, %v4972_v33  ;;  %v2978_v33 = vadd.f32 %v13842_v8, %v13728_v4 }
 0x1aa   :  { %v3035_v49 = vpop.f32.mrf.mxu0 }
 0x1ab   :  { %v5398_v32 = vpack.c.bf16 %v5254_v30, %v5254_v30  ;;  %v3036_v52 = vadd.f32 %v13842_v8, %v3035_v49  ;;  %v13192_v49 = vld [vmem:[%s21048_s0 + $0x630] sm:$0xff]  ;;  %v4398_v30 = vmax.f32 %v2978_v33, 0.0 }
 0x1ad   :  { %11980 = vmatmul.msk.bf16.gmra.mxu0 %vm2064_vm2, %v13020_v15  ;;  %12180 = vmatmul.msk.bf16.gmra.mxu2 %vm2064_vm2, %v13220_v50  ;;  %v5606_v5 = vunpack.c.l.b16 %v5398_v32  ;;  %v14055_v14 = vpop.f32.mrf.mxu1  ;;  %v4421_v59 = vmax.f32 %v3036_v52, 0.0  ;;  %v4397_v50 = vmax.f32 %v2976_v27, 0.0  ;;  %v13290_v52 = vld [vmem:[%s21049_s2 + $0x30] sm:$0xff]  ;;  %v13221_v27 = vld [vmem:[%s21048_s0 + $0x718] sm:$0xff] }
 0x1ae   :  { %21395 = vst [vmem:[#allocation19_spill] sm:$0xff] %v14055_v14  ;;  %12152 = vmatmul.msk.bf16.gmra.mxu1 %vm2064_vm2, %v13192_v49 }
 0x1af   :  { %v14047_v54 = vpack.c.b16 %v5606_v5, %v5605_v35  ;;  %v13291_v35 = vld [vmem:[%s21049_s2 + $0x38] sm:$0xff]  ;;  %v4973_v4 = vmax.f32 %v4397_v50, %v4421_v59 }
 0x1b0   :  { %v14049_v34 = vpop.f32.mrf.mxu2  ;;  %7605 = vmatpush.bf16.msrb.mxu1 %v13291_v35  ;;  %v13289_v35 = vld [vmem:[%s21049_s2 + $0x28] sm:$0xff] }
 0x1b1   :  { %21394 = vst [vmem:[#allocation18_spill] sm:$0xff] %v14047_v54 }
 0x1b2   :  { %v3037_v42 = vpop.f32.mrf.mxu0 }
 0x1b3   :  { %v3038_v15 = vadd.f32 %v13842_v8, %v3037_v42  ;;  %v13021_v42 = vld [vmem:[%s21048_s0 + $0xd8] sm:$0xff] }
 0x1b4   :  { %7606 = vmatpush.bf16.msrb.mxu1 %v13290_v52  ;;  %v2983_v52 = vadd.f32 %v13842_v8, %v13748_v11 }
 0x1b5   :  { %v4422_v2 = vmax.f32 %v3038_v15, 0.0  ;;  %v14076_v49 = vpop.f32.mrf.mxu1 }
 0x1b6   :  { %21396 = vst [vmem:[#allocation20_spill] sm:$0xff] %v14076_v49  ;;  %v13022_v49 = vld [vmem:[%s21048_s0 + $0xe0] sm:$0xff] }
 0x1b7   :  { %v4974_v32 = vmax.f32 %v4398_v30, %v4422_v2 }
 0x1b8   :  { %v14065_v14 = vpop.f32.mrf.mxu2  ;;  %7607 = vmatpush.bf16.msrb.mxu1 %v13289_v35  ;;  %v4400_v35 = vmax.f32 %v2983_v52, 0.0 }
 0x1b9   :  { %v5255_v33 = vmax.f32 %v4973_v4, %v4974_v32  ;;  %v13288_v4 = vld [vmem:[%s21049_s2 + $0x20] sm:$0xff]  ;;  %v2981_v32 = vadd.f32 %v13842_v8, %v13742_v9  ;;  %v13287_v9 = vld [vmem:[%s21049_s2 + $0x18] sm:$0xff] }
 0x1ba   :  { %v3040_v15 = vpop.f32.mrf.mxu0 }
 0x1bb   :  { %v5399_v59 = vpack.c.bf16 %v5255_v33, %v5255_v33  ;;  %v3041_v30 = vadd.f32 %v13842_v8, %v3040_v15  ;;  %v13193_v15 = vld [vmem:[%s21048_s0 + $0x638] sm:$0xff] }
 0x1bc   :  { %7608 = vmatpush.bf16.msrb.mxu1 %v13288_v4 }
 0x1bd   :  { %11981 = vmatmul.msk.bf16.gmra.mxu0 %vm2064_vm2, %v13021_v42  ;;  %12181 = vmatmul.msk.bf16.gmra.mxu2 %vm2064_vm2, %v13221_v27  ;;  %v5607_v50 = vunpack.c.l.b16 %v5399_v59  ;;  %v14094_v27 = vpop.f32.mrf.mxu1  ;;  %v4423_v33 = vmax.f32 %v3041_v30, 0.0  ;;  %v4399_v59 = vmax.f32 %v2981_v32, 0.0  ;;  %v13286_v30 = vld [vmem:[%s21049_s2 + $0x10] sm:$0xff]  ;;  %v13222_v32 = vld [vmem:[%s21048_s0 + $0x720] sm:$0xff] }
 0x1be   :  { %21397 = vst [vmem:[#allocation21_spill] sm:$0xff] %v14094_v27  ;;  %12153 = vmatmul.msk.bf16.gmra.mxu1 %vm2064_vm2, %v13193_v15  ;;  %v13285_v15 = vld [vmem:[%s21049_s2 + $0x8] sm:$0xff] }
 0x1bf   :  { %v5715_v2 = vpack.c.b16 %v5607_v50, %v5606_v5 }
 0x1c0   :  { %v14084_v57 = vpop.f32.mrf.mxu2  ;;  %7609 = vmatpush.bf16.msrb.mxu1 %v13287_v9 }
 0x1c1   :  { %5749 = vrot.lane.b32.xlu1 %v5715_v2, %s13490_s1  ;;  %v4975_v2 = vmax.f32 %v4399_v59, %v4423_v33 }
 0x1c2   :  { %v3042_v42 = vpop.f32.mrf.mxu0 }
 0x1c3   :  { %v3043_v5 = vadd.f32 %v13842_v8, %v3042_v42 }
 0x1c4   :  { %7610 = vmatpush.bf16.msrb.mxu1 %v13286_v30 }
 0x1c5   :  { %v4424_v11 = vmax.f32 %v3043_v5, 0.0  ;;  %v14115_v5 = vpop.f32.mrf.mxu1 }
 0x1c6   :  { %21398 = vst [vmem:[#allocation22_spill] sm:$0xff] %v14115_v5 }
 0x1c7   :  { %v4976_v27 = vmax.f32 %v4400_v35, %v4424_v11  ;;  %v13284_v11 = vld [vmem:[%s21049_s2] sm:$0xff] }
 0x1c8   :  { %v14104_v4 = vpop.f32.mrf.mxu2  ;;  %7611 = vmatpush.bf16.msrb.mxu1 %v13285_v15 }
 0x1c9   :  { %v5256_v42 = vmax.f32 %v4975_v2, %v4976_v27  ;;  %v2986_v2 = vadd.f32 %v13842_v8, %v13762_v16 }
 0x1ca   :  { %v3045_v52 = vpop.f32.mrf.mxu0 }
 0x1cb   :  { %v5400_v33 = vpack.c.bf16 %v5256_v42, %v5256_v42  ;;  %v3046_v9 = vadd.f32 %v13842_v8, %v3045_v52 }
 0x1cc   :  { %7612 = vmatpush.bf16.msrb.mxu1 %v13284_v11 }
 0x1cd   :  { %11982 = vmatmul.msk.bf16.gmra.mxu0 %vm2064_vm2, %v13022_v49  ;;  %12182 = vmatmul.msk.bf16.gmra.mxu2 %vm2064_vm2, %v13222_v32  ;;  %v5608_v27 = vunpack.c.l.b16 %v5400_v33  ;;  %v2988_v49 = vadd.f32 %v13842_v8, %v13768_v18  ;;  %v3905_v42 = vpop.f32.mrf.mxu1  ;;  %v4425_v32 = vmax.f32 %v3046_v9, 0.0  ;;  %v4401_v33 = vmax.f32 %v2986_v2, 0.0  ;;  %v13023_v9 = vld [vmem:[%s21048_s0 + $0xe8] sm:$0xff] }
 0x1ce   :  { %v2991_v18 = vadd.f32 %v13842_v8, %v13782_v23  ;;  %v3906_v11 = vadd.f32 %v13842_v8, %v3905_v42 }
 0x1cf   :  { %v14123_v59 = vpack.c.b16 %v5608_v27, %v5607_v50  ;;  %v3966_v50 = vadd.f32 %v13842_v8, %v13686_v53  ;;  %v4402_v15 = vmax.f32 %v2988_v49, 0.0  ;;  %v4977_v40 = vmax.f32 %v4401_v33, %v4425_v32  ;;  %v13223_v53 = vld [vmem:[%s21048_s0 + $0x728] sm:$0xff] }
 0x1d0   :  { %v14125_v35 = vpop.f32.mrf.mxu2  ;;  %v4769_v23 = vmax.f32 %v3906_v11, 0.0 }
 0x1d1   :  { %21399 = vst [vmem:[#allocation23_spill] sm:$0xff] %v14123_v59  ;;  %v4793_v16 = vmax.f32 %v3966_v50, 0.0 }
 0x1d2   :  { %v3047_v30 = vpop.f32.mrf.mxu0 }
 0x1d3   :  { %v3048_v52 = vadd.f32 %v13842_v8, %v3047_v30  ;;  %v5153_v50 = vmax.f32 %v4769_v23, %v4793_v16  ;;  %v13024_v23 = vld [vmem:[%s21048_s0 + $0xf0] sm:$0xff] }
 0x1d5   :  { %v4426_v5 = vmax.f32 %v3048_v52, 0.0  ;;  %v3907_v49 = vpop.f32.mrf.mxu1 }
 0x1d6   :  { %v3908_v37 = vadd.f32 %v13842_v8, %v3907_v49  ;;  %v3971_v49 = vadd.f32 %v13842_v8, %v13706_v60 }
 0x1d7   :  { %v4978_v39 = vmax.f32 %v4402_v15, %v4426_v5  ;;  %v3968_v5 = vadd.f32 %v13842_v8, %v13694_v56  ;;  %v2993_v56 = vadd.f32 %v13842_v8, %v13788_v25  ;;  %v2996_v25 = vadd.f32 %v13842_v8, %v13802_v41 }
 0x1d8   :  { %v14137_v29 = vpop.f32.mrf.mxu2 }
 0x1d9   :  { %v5257_v21 = vmax.f32 %v4977_v40, %v4978_v39  ;;  %v4403_v39 = vmax.f32 %v2991_v18, 0.0  ;;  %v4794_v33 = vmax.f32 %v3968_v5, 0.0 }
 0x1da   :  { %v3050_v2 = vpop.f32.mrf.mxu0 }
 0x1db   :  { %v3051_v30 = vadd.f32 %v13842_v8, %v3050_v2  ;;  %v5457_v32 = vpack.c.bf16 %v5257_v21, %v5257_v21  ;;  %v4770_v21 = vmax.f32 %v3908_v37, 0.0  ;;  %v4404_v2 = vmax.f32 %v2993_v56, 0.0 }
 0x1dc   :  { %v4405_v56 = vmax.f32 %v2996_v25, 0.0 }
 0x1dd   :  { %v4427_v40 = vmax.f32 %v3051_v30, 0.0  ;;  %11983 = vmatmul.msk.bf16.gmra.mxu0 %vm2064_vm2, %v13023_v9  ;;  %12183 = vmatmul.msk.bf16.gmra.mxu2 %vm2064_vm2, %v13223_v53  ;;  %v5705_v52 = vunpack.c.l.b16 %v5457_v32  ;;  %v3910_v11 = vpop.f32.mrf.mxu1  ;;  %v5154_v53 = vmax.f32 %v4770_v21, %v4794_v33  ;;  %v3973_v30 = vadd.f32 %v13842_v8, %v13714_v63 }
 0x1de   :  { %v4795_v63 = vmax.f32 %v3971_v49, 0.0 }
 0x1df   :  { %v4979_v15 = vmax.f32 %v4403_v39, %v4427_v40  ;;  %v5716_v42 = vpack.c.b16 %v5705_v52, %v5608_v27  ;;  %v14160_v5 = vmax.f32 %v5153_v50, %v5154_v53  ;;  %v13224_v39 = vld [vmem:[%s21048_s0 + $0x730] sm:$0xff] }
 0x1e0   :  { %v14154_v28 = vpop.f32.mrf.mxu2 }
 0x1e1   :  { %5751 = vrot.lane.b32.xlu1 %v5716_v42, %s13490_s1  ;;  %v4796_v42 = vmax.f32 %v3973_v30, 0.0  ;;  %v2998_v30 = vadd.f32 %v13842_v8, %v13808_v44 }
 0x1e2   :  { %v3052_v18 = vpop.f32.mrf.mxu0 }
 0x1e3   :  { %v3053_v9 = vadd.f32 %v13842_v8, %v3052_v18 }
 0x1e5   :  { %v4428_v16 = vmax.f32 %v3053_v9, 0.0  ;;  %v3912_v50 = vpop.f32.mrf.mxu1 }
 0x1e6   :  { %v3913_v21 = vadd.f32 %v13842_v8, %v3912_v50 }
 0x1e7   :  { %v4980_v27 = vmax.f32 %v4404_v2, %v4428_v16 }
 0x1e8   :  { %v14168_v37 = vpop.f32.mrf.mxu2  ;;  %v4772_v2 = vmax.f32 %v3913_v21, 0.0  ;;  %v3001_v21 = vadd.f32 %v13842_v8, %v13824_v58 }
 0x1e9   :  { %v5258_v32 = vmax.f32 %v4979_v15, %v4980_v27  ;;  %v3911_v15 = vadd.f32 %v13842_v8, %v3910_v11  ;;  %v3976_v27 = vadd.f32 %v13842_v8, %v13726_v3 }
 0x1ea   :  { %v3055_v40 = vpop.f32.mrf.mxu0  ;;  %v5156_v25 = vmax.f32 %v4772_v2, %v4796_v42 }
 0x1eb   :  { %v3056_v60 = vadd.f32 %v13842_v8, %v3055_v40  ;;  %v5465_v33 = vpack.c.bf16 %v5258_v32, %v5258_v32  ;;  %v4771_v53 = vmax.f32 %v3911_v15, 0.0 }
 0x1ed   :  { %v4429_v41 = vmax.f32 %v3056_v60, 0.0  ;;  %11984 = vmatmul.msk.bf16.gmra.mxu0 %vm2064_vm2, %v13024_v23  ;;  %12184 = vmatmul.msk.bf16.gmra.mxu2 %vm2064_vm2, %v13224_v39  ;;  %v14181_v18 = vunpack.c.l.b16 %v5465_v33  ;;  %v5155_v11 = vmax.f32 %v4771_v53, %v4795_v63  ;;  %v3915_v23 = vpop.f32.mrf.mxu1  ;;  %v4797_v60 = vmax.f32 %v3976_v27, 0.0 }
 0x1ee   :  { %v4406_v33 = vmax.f32 %v2998_v30, 0.0  ;;  %v3916_v44 = vadd.f32 %v13842_v8, %v3915_v23 }
 0x1ef   :  { %21400 = vst [vmem:[#allocation24_spill] sm:$0xff] %v14181_v18  ;;  %v4981_v9 = vmax.f32 %v4405_v56, %v4429_v41  ;;  %v14184_v16 = vpack.c.b16 %v14181_v18, %v5705_v52  ;;  %v14193_v50 = vmax.f32 %v5155_v11, %v5156_v25  ;;  %v21402_v52 = vpack.c.b16 %v13919_v62, %v13915_v55  ;;  %v13025_v55 = vld [vmem:[%s21048_s0 + $0xf8] sm:$0xff] }
 0x1f0   :  { %v14188_v49 = vpop.f32.mrf.mxu2  ;;  %v4773_v42 = vmax.f32 %v3916_v44, 0.0  ;;  %v3978_v41 = vadd.f32 %v13842_v8, %v13734_v6  ;;  %v13225_v62 = vld [vmem:[%s21048_s0 + $0x738] sm:$0xff] }
 0x1f1   :  { %21401 = vst [vmem:[#allocation25_spill] sm:$0xff] %v14184_v16 }
 0x1f2   :  { %v3057_v32 = vpop.f32.mrf.mxu0  ;;  %v5157_v2 = vmax.f32 %v4773_v42, %v4797_v60  ;;  %v4798_v25 = vmax.f32 %v3978_v41, 0.0  ;;  %v3981_v60 = vadd.f32 %v13842_v8, %v13746_v10  ;;  %v3983_v10 = vadd.f32 %v13842_v8, %v13754_v13 }
 0x1f3   :  { %v3058_v39 = vadd.f32 %v13842_v8, %v3057_v32  ;;  %v5746_v40 = vpop.permute.xlu0 %5745  ;;  %v4407_v32 = vmax.f32 %v3001_v21, 0.0 }
 0x1f4   :  { %v6122_v3 = vsel %vm6119_vm3, %v21402_v52, %v5746_v40  ;;  %v4799_v21 = vmax.f32 %v3981_v60, 0.0 }
 0x1f5   :  { %v4430_v56 = vmax.f32 %v3058_v39, 0.0  ;;  %7613 = vmatmul.bf16.vlgmr.msrb.gmra.mxu1 %v6122_v3  ;;  %v3917_v30 = vpop.f32.mrf.mxu1 }
 0x1f6   :  { %v3918_v58 = vadd.f32 %v13842_v8, %v3917_v30 }
 0x1f7   :  { %v4982_v63 = vmax.f32 %v4406_v33, %v4430_v56  ;;  %v3003_v33 = vadd.f32 %v13842_v8, %v13832_v1 }
 0x1f8   :  { %v14202_v15 = vpop.f32.mrf.mxu2  ;;  %v4774_v40 = vmax.f32 %v3918_v58, 0.0 }
 0x1f9   :  { %v5259_v53 = vmax.f32 %v4981_v9, %v4982_v63 }
 0x1fa   :  { %v3060_v27 = vpop.f32.mrf.mxu0  ;;  %v5158_v56 = vmax.f32 %v4774_v40, %v4798_v25  ;;  %v4800_v40 = vmax.f32 %v3983_v10, 0.0 }
 0x1fb   :  { %v3061_v11 = vadd.f32 %v13842_v8, %v3060_v27  ;;  %v5473_v6 = vpack.c.bf16 %v5259_v53, %v5259_v53  ;;  %v4408_v53 = vmax.f32 %v3003_v33, 0.0  ;;  %v4001_v33 = vadd.f32 %v13842_v8, %v13830_v0  ;;  %v13230_v0 = vld [vmem:[%s21048_s0 + $0x760] sm:$0xff] }
 0x1fc   :  { %v14227_v41 = vmax.f32 %v5157_v2, %v5158_v56  ;;  %v13226_v2 = vld [vmem:[%s21048_s0 + $0x740] sm:$0xff] }
 0x1fd   :  { %v4431_v23 = vmax.f32 %v3061_v11, 0.0  ;;  %11985 = vmatmul.msk.bf16.gmra.mxu0 %vm2064_vm2, %v13025_v55  ;;  %12185 = vmatmul.msk.bf16.gmra.mxu2 %vm2064_vm2, %v13225_v62  ;;  %v14216_v9 = vunpack.c.l.b16 %v5473_v6  ;;  %v3920_v63 = vpop.f32.mrf.mxu1  ;;  %v13026_v6 = vld [vmem:[%s21048_s0 + $0x100] sm:$0xff]  ;;  %v4807_v16 = vmax.f32 %v4001_v33, 0.0 }
 0x1fe   :  { %v3921_v62 = vadd.f32 %v13842_v8, %v3920_v63 }
 0x1ff   :  { %21403 = vst [vmem:[#allocation26_spill] sm:$0xff] %v14216_v9  ;;  %v4983_v39 = vmax.f32 %v4407_v32, %v4431_v23 }
 0x200   :  { %v14220_v3 = vpop.f32.mrf.mxu2  ;;  %v4775_v30 = vmax.f32 %v3921_v62, 0.0  ;;  %v21405_v62 = vpack.c.b16 %v13986_v19, %v13953_v36  ;;  %v13227_v36 = vld [vmem:[%s21048_s0 + $0x748] sm:$0xff] }
 0x202   :  { %v3062_v44 = vpop.f32.mrf.mxu0  ;;  %v5159_v25 = vmax.f32 %v4775_v30, %v4799_v21 }
 0x203   :  { %v3063_v42 = vadd.f32 %v13842_v8, %v3062_v44  ;;  %v3986_v44 = vadd.f32 %v13842_v8, %v13766_v17 }
 0x205   :  { %v4432_v55 = vmax.f32 %v3063_v42, 0.0  ;;  %v3922_v23 = vpop.f32.mrf.mxu1  ;;  %v4801_v30 = vmax.f32 %v3986_v44, 0.0 }
 0x206   :  { %v3923_v13 = vadd.f32 %v13842_v8, %v3922_v23 }
 0x207   :  { %v4984_v27 = vmax.f32 %v4408_v53, %v4432_v55 }
 0x208   :  { %v14230_v11 = vpop.f32.mrf.mxu2 }
 0x209   :  { %v5260_v1 = vmax.f32 %v4983_v39, %v4984_v27  ;;  %v4776_v39 = vmax.f32 %v3923_v13, 0.0 }
 0x20a   :  { %v14240_v32 = vpop.f32.mrf.mxu0 }
 0x20b   :  { %v5481_v58 = vpack.c.bf16 %v5260_v1, %v5260_v1  ;;  %v5160_v63 = vmax.f32 %v4776_v39, %v4800_v40  ;;  %v3991_v39 = vadd.f32 %v13842_v8, %v13786_v24  ;;  %v13228_v24 = vld [vmem:[%s21048_s0 + $0x750] sm:$0xff] }
 0x20d   :  { %v14242_v60 = vunpack.c.l.b16 %v5481_v58  ;;  %11986 = vmatmul.msk.bf16.gmra.mxu0 %vm2064_vm2, %v13026_v6  ;;  %12186 = vmatmul.msk.bf16.gmra.mxu2 %vm2064_vm2, %v13226_v2  ;;  %v3925_v21 = vpop.f32.mrf.mxu1  ;;  %v14255_v55 = vmax.f32 %v5159_v25, %v5160_v63  ;;  %v3988_v6 = vadd.f32 %v13842_v8, %v13774_v20  ;;  %v13027_v2 = vld [vmem:[%s21048_s0 + $0x108] sm:$0xff] }
 0x20e   :  { %v3926_v10 = vadd.f32 %v13842_v8, %v3925_v21 }
 0x20f   :  { %21404 = vst [vmem:[#allocation27_spill] sm:$0xff] %v14242_v60  ;;  %v4802_v58 = vmax.f32 %v3988_v6, 0.0  ;;  %v3993_v6 = vadd.f32 %v13842_v8, %v13794_v31 }
 0x210   :  { %v14249_v56 = vpop.f32.mrf.mxu2  ;;  %v4777_v1 = vmax.f32 %v3926_v10, 0.0 }
 0x212   :  { %v14253_v42 = vpop.f32.mrf.mxu0  ;;  %v5161_v19 = vmax.f32 %v4777_v1, %v4801_v30 }
 0x213   :  { %v5748_v53 = vpop.permute.xlu0 %5747 }
 0x214   :  { %v14261_v27 = vsel %vm6119_vm3, %v21405_v62, %v5748_v53  ;;  %v4803_v62 = vmax.f32 %v3991_v39, 0.0  ;;  %v3996_v39 = vadd.f32 %v13842_v8, %v13806_v43  ;;  %v13029_v43 = vld [vmem:[%s21048_s0 + $0x118] sm:$0xff] }
 0x215   :  { %7618 = vmatmul.bf16.gmra.mxu1 %v14261_v27  ;;  %v3927_v23 = vpop.f32.mrf.mxu1 }
 0x216   :  { %v3928_v40 = vadd.f32 %v13842_v8, %v3927_v23 }
 0x218   :  { %v14265_v17 = vpop.f32.mrf.mxu2  ;;  %v4778_v20 = vmax.f32 %v3928_v40, 0.0 }
 0x21a   :  { %v14275_v25 = vpop.f32.mrf.mxu0  ;;  %v5162_v44 = vmax.f32 %v4778_v20, %v4802_v58  ;;  %v4804_v58 = vmax.f32 %v3993_v6, 0.0 }
 0x21c   :  { %v14286_v53 = vmax.f32 %v5161_v19, %v5162_v44 }
 0x21d   :  { %11987 = vmatmul.msk.bf16.gmra.mxu0 %vm2064_vm2, %v13027_v2  ;;  %12187 = vmatmul.msk.bf16.gmra.mxu2 %vm2064_vm2, %v13227_v36  ;;  %v3930_v21 = vpop.f32.mrf.mxu1  ;;  %v13028_v2 = vld [vmem:[%s21048_s0 + $0x110] sm:$0xff] }
 0x21e   :  { %v3931_v30 = vadd.f32 %v13842_v8, %v3930_v21 }
 0x220   :  { %v14280_v13 = vpop.f32.mrf.mxu2  ;;  %v4779_v10 = vmax.f32 %v3931_v30, 0.0 }
 0x222   :  { %v14284_v63 = vpop.f32.mrf.mxu0  ;;  %v5163_v36 = vmax.f32 %v4779_v10, %v4803_v62 }
 0x225   :  { %v3932_v23 = vpop.f32.mrf.mxu1 }
 0x226   :  { %v3933_v40 = vadd.f32 %v13842_v8, %v3932_v23 }
 0x228   :  { %v14289_v1 = vpop.f32.mrf.mxu2  ;;  %v4780_v31 = vmax.f32 %v3933_v40, 0.0 }
 0x22a   :  { %v14299_v19 = vpop.f32.mrf.mxu0  ;;  %v5164_v44 = vmax.f32 %v4780_v31, %v4804_v58 }
 0x22c   :  { %v14310_v10 = vmax.f32 %v5163_v36, %v5164_v44  ;;  %v13229_v36 = vld [vmem:[%s21048_s0 + $0x758] sm:$0xff] }
 0x22d   :  { %11988 = vmatmul.msk.bf16.gmra.mxu0 %vm2064_vm2, %v13028_v2  ;;  %12188 = vmatmul.msk.bf16.gmra.mxu2 %vm2064_vm2, %v13228_v24  ;;  %v3935_v62 = vpop.f32.mrf.mxu1  ;;  %v4805_v2 = vmax.f32 %v3996_v39, 0.0  ;;  %v3998_v39 = vadd.f32 %v13842_v8, %v13816_v51 }
 0x22e   :  { %v3936_v24 = vadd.f32 %v13842_v8, %v3935_v62 }
 0x22f   :  { %v4806_v62 = vmax.f32 %v3998_v39, 0.0 }
 0x230   :  { %v14304_v20 = vpop.f32.mrf.mxu2  ;;  %v4781_v23 = vmax.f32 %v3936_v24, 0.0 }
 0x232   :  { %v14308_v21 = vpop.f32.mrf.mxu0  ;;  %v5165_v58 = vmax.f32 %v4781_v23, %v4805_v2 }
 0x233   :  { %v5750_v30 = vpop.permute.xlu1 %5749 }
 0x234   :  { %v14314_v6 = vsel %vm6119_vm3, %v14047_v54, %v5750_v30 }
 0x235   :  { %7623 = vmatmul.bf16.gmra.mxu1 %v14314_v6  ;;  %v3937_v44 = vpop.f32.mrf.mxu1 }
 0x236   :  { %v3938_v30 = vadd.f32 %v13842_v8, %v3937_v44  ;;  %v13030_v44 = vld [vmem:[%s21048_s0 + $0x120] sm:$0xff] }
 0x238   :  { %v14318_v40 = vpop.f32.mrf.mxu2  ;;  %v4782_v52 = vmax.f32 %v3938_v30, 0.0 }
 0x23a   :  { %v14326_v31 = vpop.f32.mrf.mxu0  ;;  %v5166_v23 = vmax.f32 %v4782_v52, %v4806_v62  ;;  %v4003_v52 = vadd.f32 %v13842_v8, %v13845_v12  ;;  %v14361_v62 = vld [vmem:[%s21047_s6] ss:$0 sm:$0xff] }
 0x23c   :  { %v14339_v54 = vmax.f32 %v5165_v58, %v5166_v23  ;;  %v4808_v58 = vmax.f32 %v4003_v52, 0.0  ;;  %v4028_v52 = vadd.f32 %v14361_v62, %v14006_v46 }
 0x23d   :  { %11989 = vmatmul.msk.bf16.gmra.mxu0 %vm2064_vm2, %v13029_v43  ;;  %12189 = vmatmul.msk.bf16.gmra.mxu2 %vm2064_vm2, %v13229_v36  ;;  %v3940_v60 = vpop.f32.mrf.mxu1 }
 0x23e   :  { %21406 = vst [vmem:[#allocation28_spill] sm:$0xff] %v14339_v54  ;;  %v3941_v51 = vadd.f32 %v13842_v8, %v3940_v60  ;;  %v4026_v60 = vadd.f32 %v13842_v8, %v13993_v47 }
 0x240   :  { %v14333_v24 = vpop.f32.mrf.mxu2  ;;  %v4783_v43 = vmax.f32 %v3941_v51, 0.0  ;;  %v4817_v51 = vmax.f32 %v4026_v60, 0.0 }
 0x242   :  { %v14337_v2 = vpop.f32.mrf.mxu0  ;;  %v5167_v39 = vmax.f32 %v4783_v43, %v4807_v16 }
 0x245   :  { %v3942_v33 = vpop.f32.mrf.mxu1 }
 0x246   :  { %v3943_v16 = vadd.f32 %v14361_v62, %v3942_v33 }
 0x248   :  { %v14342_v36 = vpop.f32.mrf.mxu2  ;;  %v4784_v43 = vmax.f32 %v3943_v16, 0.0 }
 0x24a   :  { %v14350_v30 = vpop.f32.mrf.mxu0 }
 0x24d   :  { %11990 = vmatmul.msk.bf16.gmra.mxu0 %vm2064_vm2, %v13030_v44  ;;  %12190 = vmatmul.msk.bf16.gmra.mxu2 %vm2064_vm2, %v13230_v0  ;;  %v5168_v44 = vmax.f32 %v4784_v43, %v4808_v58  ;;  %v13031_v58 = vld [vmem:[%s21048_s0 + $0x128] sm:$0xff] }
 0x24f   :  { %v14374_v33 = vmax.f32 %v5167_v39, %v5168_v44 }
 0x250   :  { %v4085_v23 = vpop.f32.mrf.mxu2 }
 0x251   :  { %v4086_v12 = vadd.f32 %v14361_v62, %v4085_v23  ;;  %v4818_v23 = vmax.f32 %v4028_v52, 0.0 }
 0x252   :  { %v14365_v18 = vpop.f32.mrf.mxu0 }
 0x253   :  { %v4841_v8 = vmax.f32 %v4086_v12, 0.0  ;;  %v5752_v47 = vpop.permute.xlu1 %5751  ;;  %v13231_v12 = vld [vmem:[%s21048_s0 + $0x768] sm:$0xff] }
 0x254   :  { %v14369_v0 = vsel %vm6119_vm3, %v14123_v59, %v5752_v47 }
 0x255   :  { %v5177_v9 = vmax.f32 %v4817_v51, %v4841_v8  ;;  %7628 = vmatmul.bf16.gmra.mxu1 %v14369_v0  ;;  %v4031_v51 = vadd.f32 %v14361_v62, %v14020_v22 }
 0x257   :  { %v4819_v44 = vmax.f32 %v4031_v51, 0.0  ;;  %v4036_v51 = vadd.f32 %v14361_v62, %v14049_v34 }
 0x258   :  { %v4087_v60 = vpop.f32.mrf.mxu2 }
 0x259   :  { %v4088_v16 = vadd.f32 %v14361_v62, %v4087_v60 }
 0x25a   :  { %v14383_v43 = vpop.f32.mrf.mxu0 }
 0x25b   :  { %v4842_v46 = vmax.f32 %v4088_v16, 0.0  ;;  %v4033_v16 = vadd.f32 %v14361_v62, %v14034_v61 }
 0x25d   :  { %v5178_v39 = vmax.f32 %v4818_v23, %v4842_v46  ;;  %11991 = vmatmul.msk.bf16.gmra.mxu0 %vm2064_vm2, %v13031_v58  ;;  %12191 = vmatmul.msk.bf16.gmra.mxu2 %vm2064_vm2, %v13231_v12  ;;  %v4820_v22 = vmax.f32 %v4033_v16, 0.0  ;;  %v13232_v58 = vld [vmem:[%s21048_s0 + $0x770] sm:$0xff]  ;;  %v4038_v16 = vadd.f32 %v14361_v62, %v14065_v14 }
 0x25f   :  { %v14389_v8 = vmax.f32 %v5177_v9, %v5178_v39  ;;  %v13032_v9 = vld [vmem:[%s21048_s0 + $0x130] sm:$0xff]  ;;  %v4821_v39 = vmax.f32 %v4036_v51, 0.0  ;;  %v4822_v34 = vmax.f32 %v4038_v16, 0.0  ;;  %v4041_v51 = vadd.f32 %v14361_v62, %v14084_v57 }
 0x260   :  { %v4090_v47 = vpop.f32.mrf.mxu2  ;;  %v4043_v16 = vadd.f32 %v14361_v62, %v14104_v4  ;;  %v13299_v4 = vld [vmem:[%s21049_s2 + $0x78] sm:$0xff] }
 0x261   :  { %21407 = vst [vmem:[#allocation29_spill] sm:$0xff] %v14389_v8  ;;  %v4091_v52 = vadd.f32 %v14361_v62, %v4090_v47  ;;  %7774 = vmatpush.bf16.msrb.mxu2 %v13299_v4 }
 0x262   :  { %v14392_v60 = vpop.f32.mrf.mxu0  ;;  %v4824_v57 = vmax.f32 %v4043_v16, 0.0 }
 0x263   :  { %v4843_v59 = vmax.f32 %v4091_v52, 0.0 }
 0x265   :  { %v5179_v48 = vmax.f32 %v4819_v44, %v4843_v59 }
 0x268   :  { %v4092_v54 = vpop.f32.mrf.mxu2 }
 0x269   :  { %v4093_v23 = vadd.f32 %v14361_v62, %v4092_v54 }
 0x26a   :  { %v14403_v12 = vpop.f32.mrf.mxu0 }
 0x26b   :  { %v4844_v46 = vmax.f32 %v4093_v23, 0.0 }
 0x26d   :  { %v5180_v61 = vmax.f32 %v4820_v22, %v4844_v46  ;;  %11992 = vmatmul.msk.bf16.gmra.mxu0 %vm2064_vm2, %v13032_v9  ;;  %12192 = vmatmul.msk.bf16.gmra.mxu2 %vm2064_vm2, %v13232_v58  ;;  %v13233_v9 = vld [vmem:[%s21048_s0 + $0x778] sm:$0xff] }
 0x26f   :  { %v14409_v54 = vmax.f32 %v5179_v48, %v5180_v61  ;;  %v13033_v48 = vld [vmem:[%s21048_s0 + $0x138] sm:$0xff] }
 0x270   :  { %v4095_v59 = vpop.f32.mrf.mxu2 }
 0x271   :  { %21408 = vst [vmem:[#allocation30_spill] sm:$0xff] %v14409_v54  ;;  %v4096_v47 = vadd.f32 %v14361_v62, %v4095_v59  ;;  %v4823_v59 = vmax.f32 %v4041_v51, 0.0  ;;  %v4046_v51 = vadd.f32 %v14361_v62, %v14125_v35 }
 0x272   :  { %v14412_v44 = vpop.f32.mrf.mxu0 }
 0x273   :  { %v4845_v52 = vmax.f32 %v4096_v47, 0.0 }
 0x275   :  { %v5181_v23 = vmax.f32 %v4821_v39, %v4845_v52 }
 0x278   :  { %v4097_v8 = vpop.f32.mrf.mxu2 }
 0x279   :  { %v4098_v22 = vadd.f32 %v14361_v62, %v4097_v8 }
 0x27a   :  { %v14423_v58 = vpop.f32.mrf.mxu0 }
 0x27b   :  { %v4846_v46 = vmax.f32 %v4098_v22, 0.0 }
 0x27d   :  { %v5182_v14 = vmax.f32 %v4822_v34, %v4846_v46  ;;  %11993 = vmatmul.msk.bf16.gmra.mxu0 %vm2064_vm2, %v13033_v48  ;;  %12193 = vmatmul.msk.bf16.gmra.mxu2 %vm2064_vm2, %v13233_v9  ;;  %v13234_v48 = vld [vmem:[%s21048_s0 + $0x780] sm:$0xff] }
 0x27f   :  { %v14429_v8 = vmax.f32 %v5181_v23, %v5182_v14  ;;  %v13034_v23 = vld [vmem:[%s21048_s0 + $0x140] sm:$0xff] }
 0x280   :  { %v4100_v61 = vpop.f32.mrf.mxu2 }
 0x281   :  { %21409 = vst [vmem:[#allocation31_spill] sm:$0xff] %v14429_v8  ;;  %v4101_v39 = vadd.f32 %v14361_v62, %v4100_v61 }
 0x282   :  { %v14432_v47 = vpop.f32.mrf.mxu0 }
 0x283   :  { %v4847_v52 = vmax.f32 %v4101_v39, 0.0  ;;  %v4825_v39 = vmax.f32 %v4046_v51, 0.0  ;;  %v13035_v51 = vld [vmem:[%s21048_s0 + $0x148] sm:$0xff] }
 0x285   :  { %v5183_v22 = vmax.f32 %v4823_v59, %v4847_v52  ;;  %v13298_v59 = vld [vmem:[%s21049_s2 + $0x70] sm:$0xff] }
 0x286   :  { %7775 = vmatpush.bf16.msrb.mxu2 %v13298_v59  ;;  %v13295_v59 = vld [vmem:[%s21049_s2 + $0x58] sm:$0xff] }
 0x288   :  { %v4102_v54 = vpop.f32.mrf.mxu2 }
 0x289   :  { %v4103_v34 = vadd.f32 %v14361_v62, %v4102_v54 }
 0x28a   :  { %v14443_v9 = vpop.f32.mrf.mxu0 }
 0x28b   :  { %v4848_v46 = vmax.f32 %v4103_v34, 0.0 }
 0x28d   :  { %v5184_v14 = vmax.f32 %v4824_v57, %v4848_v46  ;;  %11994 = vmatmul.msk.bf16.gmra.mxu0 %vm2064_vm2, %v13034_v23  ;;  %12194 = vmatmul.msk.bf16.gmra.mxu2 %vm2064_vm2, %v13234_v48  ;;  %v13297_v57 = vld [vmem:[%s21049_s2 + $0x68] sm:$0xff]  ;;  %v13296_v48 = vld [vmem:[%s21049_s2 + $0x60] sm:$0xff] }
 0x28e   :  { %7776 = vmatpush.bf16.msrb.mxu2 %v13297_v57 }
 0x28f   :  { %v14452_v54 = vmax.f32 %v5183_v22, %v5184_v14  ;;  %v4048_v22 = vadd.f32 %v14361_v62, %v14137_v29  ;;  %v13235_v14 = vld [vmem:[%s21048_s0 + $0x788] sm:$0xff] }
 0x290   :  { %v4105_v61 = vpop.f32.mrf.mxu2 }
 0x291   :  { %21410 = vst [vmem:[#allocation32_spill] sm:$0xff] %v14452_v54  ;;  %v4106_v52 = vadd.f32 %v14361_v62, %v4105_v61  ;;  %v4826_v46 = vmax.f32 %v4048_v22, 0.0  ;;  %v13294_v22 = vld [vmem:[%s21049_s2 + $0x50] sm:$0xff] }
 0x292   :  { %v14458_v16 = vpop.f32.mrf.mxu0  ;;  %7777 = vmatpush.bf16.msrb.mxu2 %v13296_v48 }
 0x293   :  { %v4849_v35 = vmax.f32 %v4106_v52, 0.0 }
 0x295   :  { %v5185_v34 = vmax.f32 %v4825_v39, %v4849_v35  ;;  %v4051_v39 = vadd.f32 %v14361_v62, %v14154_v28 }
 0x296   :  { %7778 = vmatpush.bf16.msrb.mxu2 %v13295_v59 }
 0x298   :  { %v4107_v23 = vpop.f32.mrf.mxu2 }
 0x299   :  { %v4108_v4 = vadd.f32 %v14361_v62, %v4107_v23  ;;  %v4827_v23 = vmax.f32 %v4051_v39, 0.0 }
 0x29a   :  { %v14475_v61 = vpop.f32.mrf.mxu0  ;;  %7779 = vmatpush.bf16.msrb.mxu2 %v13294_v22 }
 0x29b   :  { %v4850_v29 = vmax.f32 %v4108_v4, 0.0 }
 0x29d   :  { %v5186_v52 = vmax.f32 %v4826_v46, %v4850_v29  ;;  %11995 = vmatmul.msk.bf16.gmra.mxu0 %vm2064_vm2, %v13035_v51  ;;  %12195 = vmatmul.msk.bf16.gmra.mxu2 %vm2064_vm2, %v13235_v14  ;;  %v13293_v46 = vld [vmem:[%s21049_s2 + $0x48] sm:$0xff]  ;;  %v13292_v29 = vld [vmem:[%s21049_s2 + $0x40] sm:$0xff] }
 0x29e   :  { %7780 = vmatpush.bf16.msrb.mxu2 %v13293_v46 }
 0x29f   :  { %v14484_v35 = vmax.f32 %v5185_v34, %v5186_v52  ;;  %v4053_v34 = vadd.f32 %v14361_v62, %v14168_v37  ;;  %v13036_v52 = vld [vmem:[%s21048_s0 + $0x150] sm:$0xff] }
 0x2a0   :  { %v4110_v57 = vpop.f32.mrf.mxu2 }
 0x2a1   :  { %21411 = vst [vmem:[#allocation33_spill] sm:$0xff] %v14484_v35  ;;  %v4111_v48 = vadd.f32 %v14361_v62, %v4110_v57  ;;  %v4828_v59 = vmax.f32 %v4053_v34, 0.0  ;;  %v13236_v57 = vld [vmem:[%s21048_s0 + $0x790] sm:$0xff] }
 0x2a2   :  { %v14490_v4 = vpop.f32.mrf.mxu0  ;;  %7781 = vmatpush.bf16.msrb.mxu2 %v13292_v29  ;;  %v4058_v29 = vadd.f32 %v14361_v62, %v14202_v15 }
 0x2a3   :  { %v4851_v28 = vmax.f32 %v4111_v48, 0.0 }
 0x2a5   :  { %v5187_v51 = vmax.f32 %v4827_v23, %v4851_v28  ;;  %v4056_v23 = vadd.f32 %v14361_v62, %v14188_v49  ;;  %v4830_v49 = vmax.f32 %v4058_v29, 0.0  ;;  %v4063_v29 = vadd.f32 %v14361_v62, %v14230_v11 }
 0x2a6   :  { %v4066_v11 = vadd.f32 %v14361_v62, %v14249_v56 }
 0x2a7   :  { %v4829_v34 = vmax.f32 %v4056_v23, 0.0  ;;  %v4061_v23 = vadd.f32 %v14361_v62, %v14220_v3  ;;  %v4832_v3 = vmax.f32 %v4063_v29, 0.0  ;;  %v3068_v29 = vadd.f32 %v14361_v62, %v14253_v42  ;;  %v13039_v42 = vld [vmem:[%s21048_s0 + $0x168] sm:$0xff] }
 0x2a8   :  { %v4112_v14 = vpop.f32.mrf.mxu2 }
 0x2a9   :  { %v4113_v39 = vadd.f32 %v14361_v62, %v4112_v14 }
 0x2aa   :  { %v14507_v22 = vpop.f32.mrf.mxu0 }
 0x2ab   :  { %v4852_v37 = vmax.f32 %v4113_v39, 0.0 }
 0x2ad   :  { %v5188_v48 = vmax.f32 %v4828_v59, %v4852_v37  ;;  %11996 = vmatmul.msk.bf16.gmra.mxu0 %vm2064_vm2, %v13036_v52  ;;  %12196 = vmatmul.msk.bf16.gmra.mxu2 %vm2064_vm2, %v13236_v57  ;;  %v13237_v52 = vld [vmem:[%s21048_s0 + $0x798] sm:$0xff] }
 0x2af   :  { %v14513_v28 = vmax.f32 %v5187_v51, %v5188_v48  ;;  %v13037_v51 = vld [vmem:[%s21048_s0 + $0x158] sm:$0xff]  ;;  %v4831_v48 = vmax.f32 %v4061_v23, 0.0 }
 0x2b0   :  { %v4115_v46 = vpop.f32.mrf.mxu2 }
 0x2b1   :  { %21412 = vst [vmem:[#allocation34_spill] sm:$0xff] %v14513_v28  ;;  %v4116_v14 = vadd.f32 %v14361_v62, %v4115_v46 }
 0x2b2   :  { %v14516_v35 = vpop.f32.mrf.mxu0 }
 0x2b3   :  { %v4853_v54 = vmax.f32 %v4116_v14, 0.0 }
 0x2b5   :  { %v5189_v39 = vmax.f32 %v4829_v34, %v4853_v54 }
 0x2b8   :  { %v4117_v8 = vpop.f32.mrf.mxu2 }
 0x2b9   :  { %v4118_v59 = vadd.f32 %v14361_v62, %v4117_v8 }
 0x2ba   :  { %v14527_v57 = vpop.f32.mrf.mxu0 }
 0x2bb   :  { %v4854_v37 = vmax.f32 %v4118_v59, 0.0 }
 0x2bd   :  { %v5190_v15 = vmax.f32 %v4830_v49, %v4854_v37  ;;  %11997 = vmatmul.msk.bf16.gmra.mxu0 %vm2064_vm2, %v13037_v51  ;;  %12197 = vmatmul.msk.bf16.gmra.mxu2 %vm2064_vm2, %v13237_v52  ;;  %v3066_v49 = vadd.f32 %v14361_v62, %v14240_v32 }
 0x2bf   :  { %v14533_v8 = vmax.f32 %v5189_v39, %v5190_v15  ;;  %v13038_v39 = vld [vmem:[%s21048_s0 + $0x160] sm:$0xff]  ;;  %v4433_v15 = vmax.f32 %v3066_v49, 0.0 }
 0x2c0   :  { %v4120_v54 = vpop.f32.mrf.mxu2 }
 0x2c1   :  { %21413 = vst [vmem:[#allocation35_spill] sm:$0xff] %v14533_v8  ;;  %v4121_v46 = vadd.f32 %v14361_v62, %v4120_v54 }
 0x2c2   :  { %v14536_v34 = vpop.f32.mrf.mxu0 }
 0x2c3   :  { %v4855_v14 = vmax.f32 %v4121_v46, 0.0 }
 0x2c5   :  { %v5191_v59 = vmax.f32 %v4831_v48, %v4855_v14  ;;  %v4833_v14 = vmax.f32 %v4066_v11, 0.0 }
 0x2c8   :  { %v4122_v28 = vpop.f32.mrf.mxu2 }
 0x2c9   :  { %v4123_v51 = vadd.f32 %v14361_v62, %v4122_v28 }
 0x2ca   :  { %v3125_v52 = vpop.f32.mrf.mxu0 }
 0x2cb   :  { %v4856_v37 = vmax.f32 %v4123_v51, 0.0  ;;  %v3126_v23 = vadd.f32 %v14361_v62, %v3125_v52 }
 0x2cd   :  { %v5192_v54 = vmax.f32 %v4832_v3, %v4856_v37  ;;  %v4457_v48 = vmax.f32 %v3126_v23, 0.0  ;;  %11998 = vmatmul.msk.bf16.gmra.mxu0 %vm2064_vm2, %v13038_v39  ;;  %7782 = vmatmul.bf16.vlgmr.msrb.gmra.mxu2 %v14261_v27  ;;  %v4434_v3 = vmax.f32 %v3068_v29, 0.0  ;;  %v4068_v39 = vadd.f32 %v14361_v62, %v14265_v17 }
 0x2ce   :  { %v4071_v29 = vadd.f32 %v14361_v62, %v14280_v13 }
 0x2cf   :  { %v14551_v32 = vmax.f32 %v5191_v59, %v5192_v54  ;;  %v4985_v28 = vmax.f32 %v4433_v15, %v4457_v48  ;;  %v4834_v15 = vmax.f32 %v4068_v39, 0.0 }
 0x2d0   :  { %v4125_v46 = vpop.f32.mrf.mxu2 }
 0x2d1   :  { %21414 = vst [vmem:[#allocation36_spill] sm:$0xff] %v14551_v32  ;;  %v4126_v51 = vadd.f32 %v14361_v62, %v4125_v46 }
 0x2d2   :  { %v3127_v49 = vpop.f32.mrf.mxu0 }
 0x2d3   :  { %v4857_v52 = vmax.f32 %v4126_v51, 0.0  ;;  %v3128_v56 = vadd.f32 %v14361_v62, %v3127_v49 }
 0x2d5   :  { %v5193_v37 = vmax.f32 %v4833_v14, %v4857_v52  ;;  %v4458_v27 = vmax.f32 %v3128_v56, 0.0  ;;  %v3071_v14 = vadd.f32 %v14361_v62, %v14275_v25  ;;  %v4835_v52 = vmax.f32 %v4071_v29, 0.0 }
 0x2d6   :  { %v3073_v56 = vadd.f32 %v14361_v62, %v14284_v63 }
 0x2d7   :  { %v4986_v59 = vmax.f32 %v4434_v3, %v4458_v27 }
 0x2d8   :  { %v4127_v23 = vpop.f32.mrf.mxu2 }
 0x2d9   :  { %v5261_v54 = vmax.f32 %v4985_v28, %v4986_v59  ;;  %v4128_v11 = vadd.f32 %v14361_v62, %v4127_v23  ;;  %v4073_v23 = vadd.f32 %v14361_v62, %v14289_v1  ;;  %v4076_v1 = vadd.f32 %v14361_v62, %v14304_v20 }
 0x2da   :  { %v3130_v48 = vpop.f32.mrf.mxu0  ;;  %v3078_v20 = vadd.f32 %v14361_v62, %v14308_v21 }
 0x2db   :  { %v4858_v46 = vmax.f32 %v4128_v11, 0.0  ;;  %v3131_v28 = vadd.f32 %v14361_v62, %v3130_v48  ;;  %v5401_v29 = vpack.c.bf16 %v5261_v54, %v5261_v54 }
 0x2dd   :  { %v5194_v51 = vmax.f32 %v4834_v15, %v4858_v46  ;;  %11999 = vmatmul.msk.bf16.gmra.mxu0 %vm2064_vm2, %v13039_v42  ;;  %7787 = vmatmul.bf16.gmra.mxu2 %v14314_v6  ;;  %v4459_v39 = vmax.f32 %v3131_v28, 0.0  ;;  %v4435_v6 = vmax.f32 %v3071_v14, 0.0  ;;  %v4836_v46 = vmax.f32 %v4073_v23, 0.0 }
 0x2df   :  { %v14567_v17 = vmax.f32 %v5193_v37, %v5194_v51  ;;  %v4436_v37 = vmax.f32 %v3073_v56, 0.0  ;;  %v4987_v25 = vmax.f32 %v4435_v6, %v4459_v39  ;;  %v13040_v51 = vld [vmem:[%s21048_s0 + $0x170] sm:$0xff] }
 0x2e0   :  { %v4130_v49 = vpop.f32.mrf.mxu2 }
 0x2e1   :  { %21415 = vst [vmem:[#allocation37_spill] sm:$0xff] %v14567_v17  ;;  %v4131_v3 = vadd.f32 %v14361_v62, %v4130_v49  ;;  %v13063_v17 = vld [vmem:[%s21048_s0 + $0x228] sm:$0xff] }
 0x2e2   :  { %v3132_v13 = vpop.f32.mrf.mxu0 }
 0x2e3   :  { %v4859_v27 = vmax.f32 %v4131_v3, 0.0  ;;  %v3133_v59 = vadd.f32 %v14361_v62, %v3132_v13 }
 0x2e5   :  { %v5195_v15 = vmax.f32 %v4835_v52, %v4859_v27  ;;  %v4460_v11 = vmax.f32 %v3133_v59, 0.0  ;;  %v5609_v52 = vunpack.c.l.b16 %v5401_v29  ;;  %v3076_v59 = vadd.f32 %v14361_v62, %v14299_v19 }
 0x2e7   :  { %v4988_v42 = vmax.f32 %v4436_v37, %v4460_v11  ;;  %v4837_v37 = vmax.f32 %v4076_v1, 0.0 }
 0x2e8   :  { %v4132_v48 = vpop.f32.mrf.mxu2 }
 0x2e9   :  { %v4133_v63 = vadd.f32 %v14361_v62, %v4132_v48  ;;  %v5262_v28 = vmax.f32 %v4987_v25, %v4988_v42  ;;  %v4437_v42 = vmax.f32 %v3076_v59, 0.0  ;;  %v4438_v48 = vmax.f32 %v3078_v20, 0.0 }
 0x2ea   :  { %v3135_v49 = vpop.f32.mrf.mxu0 }
 0x2eb   :  { %v4860_v14 = vmax.f32 %v4133_v63, 0.0  ;;  %v5402_v56 = vpack.c.bf16 %v5262_v28, %v5262_v28  ;;  %v3136_v39 = vadd.f32 %v14361_v62, %v3135_v49 }
 0x2ed   :  { %v5196_v3 = vmax.f32 %v4836_v46, %v4860_v14  ;;  %12000 = vmatmul.msk.bf16.gmra.mxu0 %vm2064_vm2, %v13040_v51  ;;  %7792 = vmatmul.bf16.gmra.mxu2 %v14369_v0  ;;  %v5610_v54 = vunpack.c.l.b16 %v5402_v56  ;;  %v4461_v25 = vmax.f32 %v3136_v39, 0.0  ;;  %v4078_v46 = vadd.f32 %v14361_v62, %v14318_v40  ;;  %v13041_v14 = vld [vmem:[%s21048_s0 + $0x178] sm:$0xff] }
 0x2ee   :  { %v4081_v39 = vadd.f32 %v14361_v62, %v14333_v24 }
 0x2ef   :  { %v14586_v13 = vmax.f32 %v5195_v15, %v5196_v3  ;;  %v14589_v27 = vpack.c.b16 %v5610_v54, %v5609_v52  ;;  %v4989_v19 = vmax.f32 %v4437_v42, %v4461_v25  ;;  %v4838_v49 = vmax.f32 %v4078_v46, 0.0 }
 0x2f0   :  { %v4135_v6 = vpop.f32.mrf.mxu2  ;;  %v4839_v25 = vmax.f32 %v4081_v39, 0.0 }
 0x2f1   :  { %21416 = vst [vmem:[#allocation38_spill] sm:$0xff] %v14586_v13  ;;  %v4136_v23 = vadd.f32 %v14361_v62, %v4135_v6 }
 0x2f2   :  { %21417 = vst [vmem:[#allocation39_spill] sm:$0xff] %v14589_v27  ;;  %v3137_v11 = vpop.f32.mrf.mxu0 }
 0x2f3   :  { %v4861_v0 = vmax.f32 %v4136_v23, 0.0  ;;  %v3138_v15 = vadd.f32 %v14361_v62, %v3137_v11  ;;  %v3081_v23 = vadd.f32 %v14361_v62, %v14326_v31  ;;  %v4083_v31 = vadd.f32 %v14361_v62, %v14342_v36 }
 0x2f5   :  { %v5197_v29 = vmax.f32 %v4837_v37, %v4861_v0  ;;  %v4462_v63 = vmax.f32 %v3138_v15, 0.0  ;;  %v3083_v0 = vadd.f32 %v14361_v62, %v14337_v2 }
 0x2f7   :  { %v4990_v51 = vmax.f32 %v4438_v48, %v4462_v63 }
 0x2f8   :  { %v4137_v28 = vpop.f32.mrf.mxu2 }
 0x2f9   :  { %v4138_v21 = vadd.f32 %v14361_v62, %v4137_v28  ;;  %v5263_v56 = vmax.f32 %v4989_v19, %v4990_v51 }
 0x2fa   :  { %v3140_v1 = vpop.f32.mrf.mxu0 }
 0x2fb   :  { %v4862_v52 = vmax.f32 %v4138_v21, 0.0  ;;  %v5403_v3 = vpack.c.bf16 %v5263_v56, %v5263_v56  ;;  %v3141_v37 = vadd.f32 %v14361_v62, %v3140_v1  ;;  %v13042_v56 = vld [vmem:[%s21048_s0 + $0x180] sm:$0xff] }
 0x2fd   :  { %v5198_v40 = vmax.f32 %v4838_v49, %v4862_v52  ;;  %12001 = vmatmul.msk.bf16.gmra.mxu0 %vm2064_vm2, %v13041_v14  ;;  %v5611_v59 = vunpack.c.l.b16 %v5403_v3  ;;  %v4463_v42 = vmax.f32 %v3141_v37, 0.0  ;;  %v4840_v49 = vmax.f32 %v4083_v31, 0.0 }
 0x2ff   :  { %v14606_v6 = vmax.f32 %v5197_v29, %v5198_v40  ;;  %v14609_v20 = vpack.c.b16 %v5611_v59, %v5610_v54  ;;  %v4439_v54 = vmax.f32 %v3081_v23, 0.0  ;;  %v4440_v29 = vmax.f32 %v3083_v0, 0.0 }
 0x300   :  { %v4140_v11 = vpop.f32.mrf.mxu2  ;;  %v3088_v0 = vadd.f32 %v14361_v62, %v14365_v18 }
 0x301   :  { %21418 = vst [vmem:[#allocation40_spill] sm:$0xff] %v14606_v6  ;;  %v4141_v24 = vadd.f32 %v14361_v62, %v4140_v11  ;;  %5753 = vrot.lane.b32.xlu2 %v14609_v20, %s13490_s1  ;;  %v4991_v51 = vmax.f32 %v4439_v54, %v4463_v42 }
 0x302   :  { %21419 = vst [vmem:[#allocation41_spill] sm:$0xff] %v14609_v20  ;;  %v3142_v15 = vpop.f32.mrf.mxu0  ;;  %v14873_v20 = vld [vmem:[%s21047_s6] ss:$0 sm:$0xff] }
 0x303   :  { %v4863_v48 = vmax.f32 %v4141_v24, 0.0  ;;  %v3143_v46 = vadd.f32 %v14361_v62, %v3142_v15 }
 0x305   :  { %v5199_v63 = vmax.f32 %v4839_v25, %v4863_v48  ;;  %v4464_v19 = vmax.f32 %v3143_v46, 0.0  ;;  %v3086_v25 = vadd.f32 %v14361_v62, %v14350_v30  ;;  %v4442_v46 = vmax.f32 %v3088_v0, 0.0 }
 0x307   :  { %v4992_v28 = vmax.f32 %v4440_v29, %v4464_v19  ;;  %v4441_v48 = vmax.f32 %v3086_v25, 0.0  ;;  %v13043_v19 = vld [vmem:[%s21048_s0 + $0x188] sm:$0xff] }
 0x308   :  { %v4142_v2 = vpop.f32.mrf.mxu2 }
 0x309   :  { %v5264_v21 = vmax.f32 %v4991_v51, %v4992_v28  ;;  %v4143_v14 = vadd.f32 %v14361_v62, %v4142_v2 }
 0x30a   :  { %v3145_v1 = vpop.f32.mrf.mxu0 }
 0x30b   :  { %v4864_v52 = vmax.f32 %v4143_v14, 0.0  ;;  %v5404_v3 = vpack.c.bf16 %v5264_v21, %v5264_v21  ;;  %v3146_v37 = vadd.f32 %v14361_v62, %v3145_v1  ;;  %v3091_v21 = vadd.f32 %v14361_v62, %v14383_v43  ;;  %v13044_v43 = vld [vmem:[%s21048_s0 + $0x190] sm:$0xff] }
 0x30c   :  { %v3093_v14 = vadd.f32 %v14361_v62, %v14392_v60 }
 0x30d   :  { %v5200_v39 = vmax.f32 %v4840_v49, %v4864_v52  ;;  %12002 = vmatmul.msk.bf16.gmra.mxu0 %vm2064_vm2, %v13042_v56  ;;  %v5612_v36 = vunpack.c.l.b16 %v5404_v3  ;;  %v4465_v15 = vmax.f32 %v3146_v37, 0.0  ;;  %v4443_v3 = vmax.f32 %v3091_v21, 0.0 }
 0x30f   :  { %v14626_v40 = vmax.f32 %v5199_v63, %v5200_v39  ;;  %v14629_v23 = vpack.c.b16 %v5612_v36, %v5611_v59  ;;  %v4993_v29 = vmax.f32 %v4441_v48, %v4465_v15  ;;  %v4444_v39 = vmax.f32 %v3093_v14, 0.0 }
 0x310   :  { %v14631_v11 = vpop.f32.mrf.mxu2 }
 0x311   :  { %21420 = vst [vmem:[#allocation42_spill] sm:$0xff] %v14626_v40 }
 0x312   :  { %21421 = vst [vmem:[#allocation43_spill] sm:$0xff] %v14629_v23  ;;  %v3147_v24 = vpop.f32.mrf.mxu0 }
 0x313   :  { %v3148_v42 = vadd.f32 %v14361_v62, %v3147_v24 }
 0x315   :  { %v4466_v54 = vmax.f32 %v3148_v42, 0.0 }
 0x317   :  { %v4994_v31 = vmax.f32 %v4442_v46, %v4466_v54 }
 0x318   :  { %v14638_v63 = vpop.f32.mrf.mxu2 }
 0x319   :  { %v5265_v59 = vmax.f32 %v4993_v29, %v4994_v31  ;;  %v3096_v29 = vadd.f32 %v14361_v62, %v14403_v12  ;;  %v3098_v31 = vadd.f32 %v14361_v62, %v14412_v44 }
 0x31a   :  { %v3150_v30 = vpop.f32.mrf.mxu0 }
 0x31b   :  { %v5405_v51 = vpack.c.bf16 %v5265_v59, %v5265_v59  ;;  %v3151_v28 = vadd.f32 %v14361_v62, %v3150_v30 }
 0x31d   :  { %12003 = vmatmul.msk.bf16.gmra.mxu0 %vm2064_vm2, %v13043_v19  ;;  %v5613_v18 = vunpack.c.l.b16 %v5405_v51  ;;  %v4467_v1 = vmax.f32 %v3151_v28, 0.0  ;;  %v4445_v51 = vmax.f32 %v3096_v29, 0.0  ;;  %v4446_v28 = vmax.f32 %v3098_v31, 0.0 }
 0x31f   :  { %v14645_v2 = vpack.c.b16 %v5613_v18, %v5612_v36  ;;  %v4995_v36 = vmax.f32 %v4443_v3, %v4467_v1 }
 0x320   :  { %v14647_v49 = vpop.f32.mrf.mxu2 }
 0x321   :  { %21422 = vst [vmem:[#allocation44_spill] sm:$0xff] %v14645_v2  ;;  %5755 = vrot.lane.b32.xlu2 %v14645_v2, %s13490_s1 }
 0x322   :  { %v3152_v56 = vpop.f32.mrf.mxu0 }
 0x323   :  { %v3153_v52 = vadd.f32 %v14361_v62, %v3152_v56 }
 0x325   :  { %v4468_v37 = vmax.f32 %v3153_v52, 0.0  ;;  %v13045_v52 = vld [vmem:[%s21048_s0 + $0x198] sm:$0xff] }
 0x327   :  { %v4996_v25 = vmax.f32 %v4444_v39, %v4468_v37 }
 0x328   :  { %v14656_v0 = vpop.f32.mrf.mxu2 }
 0x329   :  { %v5266_v24 = vmax.f32 %v4995_v36, %v4996_v25  ;;  %v3101_v25 = vadd.f32 %v14361_v62, %v14423_v58  ;;  %v13046_v58 = vld [vmem:[%s21048_s0 + $0x1a0] sm:$0xff] }
 0x32a   :  { %v3155_v60 = vpop.f32.mrf.mxu0 }
 0x32b   :  { %v5406_v15 = vpack.c.bf16 %v5266_v24, %v5266_v24  ;;  %v3156_v48 = vadd.f32 %v14361_v62, %v3155_v60  ;;  %v3103_v24 = vadd.f32 %v14361_v62, %v14432_v47 }
 0x32d   :  { %12004 = vmatmul.msk.bf16.gmra.mxu0 %vm2064_vm2, %v13044_v43  ;;  %v5614_v42 = vunpack.c.l.b16 %v5406_v15  ;;  %v4469_v19 = vmax.f32 %v3156_v48, 0.0  ;;  %v4447_v48 = vmax.f32 %v3101_v25, 0.0  ;;  %v4448_v29 = vmax.f32 %v3103_v24, 0.0 }
 0x32f   :  { %v14663_v46 = vpack.c.b16 %v5614_v42, %v5613_v18  ;;  %v4997_v14 = vmax.f32 %v4445_v51, %v4469_v19  ;;  %v7614_v19 = vpop.f32.mrf.mxu1 }
 0x330   :  { %v14665_v54 = vpop.f32.mrf.mxu2 }
 0x331   :  { %21423 = vst [vmem:[#allocation45_spill] sm:$0xff] %v14663_v46 }
 0x332   :  { %v3157_v59 = vpop.f32.mrf.mxu0 }
 0x333   :  { %v3158_v30 = vadd.f32 %v14361_v62, %v3157_v59 }
 0x335   :  { %v4470_v21 = vmax.f32 %v3158_v30, 0.0 }
 0x337   :  { %v4998_v56 = vmax.f32 %v4446_v28, %v4470_v21  ;;  %v13473_v28 = vld [vmem:[%s21047_s6 + $0x1] ss:$0 sm:$0xff]  ;;  %v14708_v24 = vpop.f32.mrf.mxu1 }
 0x338   :  { %v14672_v1 = vpop.f32.mrf.mxu2  ;;  %21427 = vst [vmem:[#allocation49_spill] sm:$0xff] %v14708_v24 }
 0x339   :  { %v5267_v18 = vmax.f32 %v4997_v14, %v4998_v56  ;;  %v7615_v56 = vadd.f32 %v13473_v28, %v7614_v19 }
 0x33a   :  { %v3160_v12 = vpop.f32.mrf.mxu0 }
 0x33b   :  { %v5407_v3 = vpack.c.bf16 %v5267_v18, %v5267_v18  ;;  %v3161_v39 = vadd.f32 %v14361_v62, %v3160_v12 }
 0x33d   :  { %12005 = vmatmul.msk.bf16.gmra.mxu0 %vm2064_vm2, %v13045_v52  ;;  %v5615_v44 = vunpack.c.l.b16 %v5407_v3  ;;  %v4471_v60 = vmax.f32 %v3161_v39, 0.0  ;;  %v3106_v3 = vadd.f32 %v14361_v62, %v14443_v9  ;;  %v3108_v39 = vadd.f32 %v14361_v62, %v14458_v16  ;;  %v13047_v16 = vld [vmem:[%s21048_s0 + $0x1a8] sm:$0xff] }
 0x33e   :  { %v3111_v9 = vadd.f32 %v14361_v62, %v14475_v61 }
 0x33f   :  { %v14679_v37 = vpack.c.b16 %v5615_v44, %v5614_v42  ;;  %v4999_v42 = vmax.f32 %v4447_v48, %v4471_v60  ;;  %v4449_v48 = vmax.f32 %v3106_v3, 0.0 }
 0x340   :  { %v14681_v36 = vpop.f32.mrf.mxu2 }
 0x341   :  { %21424 = vst [vmem:[#allocation46_spill] sm:$0xff] %v14679_v37  ;;  %5757 = vrot.lane.b32.xlu0 %v14679_v37, %s13490_s1  ;;  %v13061_v37 = vld [vmem:[%s21048_s0 + $0x218] sm:$0xff] }
 0x342   :  { %v3162_v43 = vpop.f32.mrf.mxu0 }
 0x343   :  { %v3163_v15 = vadd.f32 %v14361_v62, %v3162_v43 }
 0x345   :  { %v4472_v31 = vmax.f32 %v3163_v15, 0.0 }
 0x347   :  { %v5000_v59 = vmax.f32 %v4448_v29, %v4472_v31  ;;  %v4450_v29 = vmax.f32 %v3108_v39, 0.0 }
 0x348   :  { %v14690_v30 = vpop.f32.mrf.mxu2 }
 0x349   :  { %v5268_v51 = vmax.f32 %v4999_v42, %v5000_v59 }
 0x34a   :  { %v3165_v47 = vpop.f32.mrf.mxu0 }
 0x34b   :  { %v5408_v21 = vpack.c.bf16 %v5268_v51, %v5268_v51  ;;  %v3166_v18 = vadd.f32 %v14361_v62, %v3165_v47  ;;  %v7619_v51 = vpop.f32.mrf.mxu1 }
 0x34c   :  { %v7620_v39 = vadd.f32 %v13473_v28, %v7619_v51 }
 0x34d   :  { %12006 = vmatmul.msk.bf16.gmra.mxu0 %vm2064_vm2, %v13046_v58  ;;  %v5616_v14 = vunpack.c.l.b16 %v5408_v21  ;;  %v4473_v60 = vmax.f32 %v3166_v18, 0.0 }
 0x34f   :  { %v14700_v52 = vpack.c.b16 %v5616_v14, %v5615_v44  ;;  %v5001_v44 = vmax.f32 %v4449_v48, %v4473_v60  ;;  %v3113_v48 = vadd.f32 %v14361_v62, %v14490_v4  ;;  %v13048_v4 = vld [vmem:[%s21048_s0 + $0x1b0] sm:$0xff] }
 0x350   :  { %v7783_v12 = vpop.f32.mrf.mxu2 }
 0x351   :  { %21425 = vst [vmem:[#allocation47_spill] sm:$0xff] %v14700_v52  ;;  %v14706_v25 = vadd.f32 %v7783_v12, %v7615_v56  ;;  %v4451_v12 = vmax.f32 %v3111_v9, 0.0  ;;  %v4452_v9 = vmax.f32 %v3113_v48, 0.0 }
 0x352   :  { %v3167_v43 = vpop.f32.mrf.mxu0 }
 0x353   :  { %21426 = vst [vmem:[#allocation48_spill] sm:$0xff] %v14706_v25  ;;  %v3168_v15 = vadd.f32 %v14361_v62, %v3167_v43 }
 0x355   :  { %v4474_v31 = vmax.f32 %v3168_v15, 0.0 }
 0x357   :  { %v5002_v42 = vmax.f32 %v4450_v29, %v4474_v31 }
 0x358   :  { %v14711_v59 = vpop.f32.mrf.mxu2 }
 0x359   :  { %21428 = vst [vmem:[#allocation50_spill] sm:$0xff] %v14711_v59  ;;  %v5269_v19 = vmax.f32 %v5001_v44, %v5002_v42  ;;  %v14731_v42 = vpop.f32.mrf.mxu1  ;;  %v13059_v59 = vld [vmem:[%s21048_s0 + $0x208] sm:$0xff] }
 0x35a   :  { %v3170_v58 = vpop.f32.mrf.mxu0  ;;  %21431 = vst [vmem:[#allocation53_spill] sm:$0xff] %v14731_v42 }
 0x35b   :  { %v3171_v47 = vadd.f32 %v14361_v62, %v3170_v58  ;;  %v5754_v21 = vpop.permute.xlu2 %5753  ;;  %v5458_v56 = vpack.c.bf16 %v5269_v19, %v5269_v19 }
 0x35c   :  { %v6138_v18 = vsel %vm6119_vm3, %v14589_v27, %v5754_v21 }
 0x35d   :  { %v4475_v3 = vmax.f32 %v3171_v47, 0.0  ;;  %12007 = vmatmul.msk.bf16.gmra.mxu0 %vm2064_vm2, %v13047_v16  ;;  %7633 = vmatmul.bf16.gmra.mxu1 %v6138_v18  ;;  %v5706_v61 = vunpack.c.l.b16 %v5458_v56 }
 0x35f   :  { %v5003_v43 = vmax.f32 %v4451_v12, %v4475_v3  ;;  %v14722_v60 = vpack.c.b16 %v5706_v61, %v5616_v14  ;;  %v3116_v14 = vadd.f32 %v14361_v62, %v14507_v22 }
 0x360   :  { %v7788_v15 = vpop.f32.mrf.mxu2 }
 0x361   :  { %21429 = vst [vmem:[#allocation51_spill] sm:$0xff] %v14722_v60  ;;  %v14726_v29 = vadd.f32 %v7788_v15, %v7620_v39  ;;  %5759 = vrot.lane.b32.xlu1 %v14722_v60, %s13490_s1  ;;  %v7624_v18 = vpop.f32.mrf.mxu1  ;;  %v4453_v12 = vmax.f32 %v3116_v14, 0.0 }
 0x362   :  { %v3172_v31 = vpop.f32.mrf.mxu0  ;;  %v7625_v15 = vadd.f32 %v13473_v28, %v7624_v18  ;;  %v13049_v28 = vld [vmem:[%s21048_s0 + $0x1b8] sm:$0xff] }
 0x363   :  { %21430 = vst [vmem:[#allocation52_spill] sm:$0xff] %v14726_v29  ;;  %v3173_v44 = vadd.f32 %v14361_v62, %v3172_v31 }
 0x365   :  { %v4476_v19 = vmax.f32 %v3173_v44, 0.0 }
 0x367   :  { %v5004_v16 = vmax.f32 %v4452_v9, %v4476_v19 }
 0x368   :  { %v14733_v51 = vpop.f32.mrf.mxu2 }
 0x369   :  { %21432 = vst [vmem:[#allocation54_spill] sm:$0xff] %v14733_v51  ;;  %v5270_v58 = vmax.f32 %v5003_v43, %v5004_v16  ;;  %v3118_v43 = vadd.f32 %v14361_v62, %v14516_v35  ;;  %v13058_v51 = vld [vmem:[%s21048_s0 + $0x200] sm:$0xff] }
 0x36a   :  { %v3175_v47 = vpop.f32.mrf.mxu0 }
 0x36b   :  { %v3176_v21 = vadd.f32 %v14361_v62, %v3175_v47  ;;  %v5466_v56 = vpack.c.bf16 %v5270_v58, %v5270_v58  ;;  %v4454_v16 = vmax.f32 %v3118_v43, 0.0 }
 0x36d   :  { %v4477_v3 = vmax.f32 %v3176_v21, 0.0  ;;  %12008 = vmatmul.msk.bf16.gmra.mxu0 %vm2064_vm2, %v13048_v4  ;;  %v5818_v39 = vunpack.c.l.b16 %v5466_v56  ;;  %v3121_v4 = vadd.f32 %v14361_v62, %v14527_v57 }
 0x36f   :  { %v5005_v48 = vmax.f32 %v4453_v12, %v4477_v3  ;;  %v14742_v31 = vpack.c.b16 %v5818_v39, %v5706_v61  ;;  %v4455_v12 = vmax.f32 %v3121_v4, 0.0  ;;  %v13050_v4 = vld [vmem:[%s21048_s0 + $0x1c0] sm:$0xff] }
 0x370   :  { %v7793_v22 = vpop.f32.mrf.mxu2 }
 0x371   :  { %21433 = vst [vmem:[#allocation55_spill] sm:$0xff] %v14742_v31  ;;  %v14746_v44 = vadd.f32 %v7793_v22, %v7625_v15  ;;  %v3123_v22 = vadd.f32 %v14361_v62, %v14536_v34 }
 0x372   :  { %v3177_v9 = vpop.f32.mrf.mxu0 }
 0x373   :  { %21434 = vst [vmem:[#allocation56_spill] sm:$0xff] %v14746_v44  ;;  %v3178_v19 = vadd.f32 %v14361_v62, %v3177_v9  ;;  %v13060_v44 = vld [vmem:[%s21048_s0 + $0x210] sm:$0xff] }
 0x375   :  { %v4478_v58 = vmax.f32 %v3178_v19, 0.0  ;;  %v4456_v19 = vmax.f32 %v3123_v22, 0.0  ;;  %v13053_v22 = vld [vmem:[%s21048_s0 + $0x1d8] sm:$0xff] }
 0x377   :  { %v5006_v14 = vmax.f32 %v4454_v16, %v4478_v58 }
 0x379   :  { %v5271_v47 = vmax.f32 %v5005_v48, %v5006_v14 }
 0x37a   :  { %v3180_v61 = vpop.f32.mrf.mxu0 }
 0x37b   :  { %v3181_v21 = vadd.f32 %v14361_v62, %v3180_v61  ;;  %v5756_v35 = vpop.permute.xlu2 %5755  ;;  %v5474_v56 = vpack.c.bf16 %v5271_v47, %v5271_v47 }
 0x37c   :  { %v14757_v18 = vsel %vm6119_vm3, %v14629_v23, %v5756_v35 }
 0x37d   :  { %21435 = vst [vmem:[#allocation57_spill] sm:$0xff] %v14757_v18  ;;  %v4479_v3 = vmax.f32 %v3181_v21, 0.0  ;;  %12009 = vmatmul.msk.bf16.gmra.mxu0 %vm2064_vm2, %v13049_v28  ;;  %7638 = vmatmul.bf16.gmra.mxu1 %v14757_v18  ;;  %v5842_v57 = vunpack.c.l.b16 %v5474_v56  ;;  %v13052_v56 = vld [vmem:[%s21048_s0 + $0x1d0] sm:$0xff] }
 0x37f   :  { %v5007_v15 = vmax.f32 %v4455_v12, %v4479_v3  ;;  %v14761_v48 = vpack.c.b16 %v5842_v57, %v5818_v39 }
 0x381   :  { %21436 = vst [vmem:[#allocation58_spill] sm:$0xff] %v14761_v48 }
 0x382   :  { %v3182_v43 = vpop.f32.mrf.mxu0 }
 0x383   :  { %v3183_v9 = vadd.f32 %v14361_v62, %v3182_v43  ;;  %v13051_v62 = vld [vmem:[%s21048_s0 + $0x1c8] sm:$0xff] }
 0x385   :  { %v4480_v16 = vmax.f32 %v3183_v9, 0.0 }
 0x387   :  { %v5008_v58 = vmax.f32 %v4456_v19, %v4480_v16  ;;  %v13054_v19 = vld [vmem:[%s21048_s0 + $0x1e0] sm:$0xff] }
 0x389   :  { %v5272_v14 = vmax.f32 %v5007_v15, %v5008_v58 }
 0x38a   :  { %v3185_v47 = vpop.f32.mrf.mxu0 }
 0x38b   :  { %v5482_v28 = vpack.c.bf16 %v5272_v14, %v5272_v14  ;;  %v3186_v29 = vadd.f32 %v14873_v20, %v3185_v47 }
 0x38d   :  { %12010 = vmatmul.msk.bf16.gmra.mxu0 %vm2064_vm2, %v13050_v4  ;;  %v5882_v39 = vunpack.c.l.b16 %v5482_v28  ;;  %v13055_v28 = vld [vmem:[%s21048_s0 + $0x1e8] sm:$0xff] }
 0x38f   :  { %v14770_v61 = vpack.c.b16 %v5882_v39, %v5842_v57 }
 0x391   :  { %21437 = vst [vmem:[#allocation59_spill] sm:$0xff] %v14770_v61 }
 0x392   :  { %v3187_v21 = vpop.f32.mrf.mxu0 }
 0x393   :  { %v3188_v61 = vadd.f32 %v14873_v20, %v3187_v21 }
 0x395   :  { %v4482_v40 = vmax.f32 %v3188_v61, 0.0 }
 0x39a   :  { %v14775_v34 = vpop.f32.mrf.mxu0 }
 0x39d   :  { %12011 = vmatmul.msk.bf16.gmra.mxu0 %vm2064_vm2, %v13051_v62 }
 0x3a2   :  { %v14778_v35 = vpop.f32.mrf.mxu0 }
 0x3aa   :  { %v14783_v12 = vpop.f32.mrf.mxu0 }
 0x3ad   :  { %12012 = vmatmul.msk.bf16.gmra.mxu0 %vm2064_vm2, %v13052_v56  ;;  %v13056_v56 = vld [vmem:[%s21048_s0 + $0x1f0] sm:$0xff] }
 0x3b2   :  { %v14786_v3 = vpop.f32.mrf.mxu0 }
 0x3b3   :  { %v5758_v57 = vpop.permute.xlu0 %5757 }
 0x3b4   :  { %v14790_v15 = vsel %vm6119_vm3, %v14663_v46, %v5758_v57 }
 0x3b5   :  { %21438 = vst [vmem:[#allocation60_spill] sm:$0xff] %v14790_v15  ;;  %7643 = vmatmul.bf16.gmra.mxu1 %v14790_v15  ;;  %v4481_v15 = vmax.f32 %v3186_v29, 0.0  ;;  %v3191_v29 = vadd.f32 %v14873_v20, %v14775_v34 }
 0x3ba   :  { %v14796_v43 = vpop.f32.mrf.mxu0 }
 0x3bd   :  { %12013 = vmatmul.msk.bf16.gmra.mxu0 %vm2064_vm2, %v13053_v22 }
 0x3c2   :  { %v14799_v9 = vpop.f32.mrf.mxu0 }
 0x3ca   :  { %v14804_v16 = vpop.f32.mrf.mxu0 }
 0x3cd   :  { %12014 = vmatmul.msk.bf16.gmra.mxu0 %vm2064_vm2, %v13054_v19  ;;  %v13057_v19 = vld [vmem:[%s21048_s0 + $0x1f8] sm:$0xff] }
 0x3d2   :  { %v14807_v58 = vpop.f32.mrf.mxu0 }
 0x3d3   :  { %v5760_v14 = vpop.permute.xlu1 %5759 }
 0x3d4   :  { %v14811_v4 = vsel %vm6119_vm3, %v14700_v52, %v5760_v14 }
 0x3d5   :  { %21439 = vst [vmem:[#allocation61_spill] sm:$0xff] %v14811_v4  ;;  %7648 = vmatmul.bf16.gmra.mxu1 %v14811_v4 }
 0x3da   :  { %v14817_v39 = vpop.f32.mrf.mxu0 }
 0x3dd   :  { %12015 = vmatmul.msk.bf16.gmra.mxu0 %vm2064_vm2, %v13055_v28 }
 0x3e2   :  { %v14820_v62 = vpop.f32.mrf.mxu0 }
 0x3ea   :  { %v14825_v57 = vpop.f32.mrf.mxu0 }
 0x3ed   :  { %12016 = vmatmul.msk.bf16.gmra.mxu0 %vm2064_vm2, %v13056_v56 }
 0x3f2   :  { %v14828_v22 = vpop.f32.mrf.mxu0 }
 0x3fa   :  { %v14833_v14 = vpop.f32.mrf.mxu0 }
 0x3fd   :  { %12017 = vmatmul.msk.bf16.gmra.mxu0 %vm2064_vm2, %v13057_v19 }
 0x402   :  { %v14836_v28 = vpop.f32.mrf.mxu0 }
 0x40a   :  { %v14841_v42 = vpop.f32.mrf.mxu0 }
 0x40d   :  { %12018 = vmatmul.msk.bf16.gmra.mxu0 %vm2064_vm2, %v13058_v51 }
 0x412   :  { %v14844_v56 = vpop.f32.mrf.mxu0 }
 0x41a   :  { %v14849_v24 = vpop.f32.mrf.mxu0 }
 0x41d   :  { %12019 = vmatmul.msk.bf16.gmra.mxu0 %vm2064_vm2, %v13059_v59 }
 0x422   :  { %v14852_v19 = vpop.f32.mrf.mxu0 }
 0x42a   :  { %v14857_v60 = vpop.f32.mrf.mxu0 }
 0x42d   :  { %12020 = vmatmul.msk.bf16.gmra.mxu0 %vm2064_vm2, %v13060_v44  ;;  %v13062_v44 = vld [vmem:[%s21048_s0 + $0x220] sm:$0xff] }
 0x432   :  { %v14860_v51 = vpop.f32.mrf.mxu0 }
 0x43a   :  { %v14865_v2 = vpop.f32.mrf.mxu0 }
 0x43d   :  { %12021 = vmatmul.msk.bf16.gmra.mxu0 %vm2064_vm2, %v13061_v37 }
 0x442   :  { %v14868_v59 = vpop.f32.mrf.mxu0 }
 0x44a   :  { %v3245_v25 = vpop.f32.mrf.mxu0 }
 0x44b   :  { %v3246_v4 = vadd.f32 %v14873_v20, %v3245_v25 }
 0x44d   :  { %v4505_v18 = vmax.f32 %v3246_v4, 0.0  ;;  %12022 = vmatmul.msk.bf16.gmra.mxu0 %vm2064_vm2, %v13062_v44 }
 0x44f   :  { %v5009_v37 = vmax.f32 %v4481_v15, %v4505_v18  ;;  %v3193_v18 = vadd.f32 %v14873_v20, %v14778_v35 }
 0x452   :  { %v3247_v31 = vpop.f32.mrf.mxu0 }
 0x453   :  { %v3248_v46 = vadd.f32 %v14873_v20, %v3247_v31 }
 0x455   :  { %v4506_v6 = vmax.f32 %v3248_v46, 0.0  ;;  %v4484_v46 = vmax.f32 %v3193_v18, 0.0 }
 0x457   :  { %v5010_v47 = vmax.f32 %v4482_v40, %v4506_v6  ;;  %v4483_v40 = vmax.f32 %v3191_v29, 0.0  ;;  %v3196_v29 = vadd.f32 %v14873_v20, %v14783_v12 }
 0x459   :  { %v5273_v13 = vmax.f32 %v5009_v37, %v5010_v47 }
 0x45a   :  { %v3250_v32 = vpop.f32.mrf.mxu0 }
 0x45b   :  { %v3251_v25 = vadd.f32 %v14873_v20, %v3250_v32  ;;  %v5409_v44 = vpack.c.bf16 %v5273_v13, %v5273_v13  ;;  %v13064_v32 = vld [vmem:[%s21048_s0 + $0x230] sm:$0xff]  ;;  %v3198_v13 = vadd.f32 %v14873_v20, %v14786_v3 }
 0x45d   :  { %12023 = vmatmul.msk.bf16.gmra.mxu0 %vm2064_vm2, %v13063_v17  ;;  %v4507_v61 = vmax.f32 %v3251_v25, 0.0  ;;  %v5617_v47 = vunpack.c.l.b16 %v5409_v44 }
 0x45f   :  { %v5011_v15 = vmax.f32 %v4483_v40, %v4507_v61  ;;  %v4485_v40 = vmax.f32 %v3196_v29, 0.0 }
 0x462   :  { %v3252_v31 = vpop.f32.mrf.mxu0 }
 0x463   :  { %v3253_v6 = vadd.f32 %v14873_v20, %v3252_v31 }
 0x465   :  { %v4508_v21 = vmax.f32 %v3253_v6, 0.0 }
 0x467   :  { %v5012_v4 = vmax.f32 %v4484_v46, %v4508_v21  ;;  %v4486_v46 = vmax.f32 %v3198_v13, 0.0 }
 0x469   :  { %v5274_v37 = vmax.f32 %v5011_v15, %v5012_v4 }
 0x46a   :  { %v3255_v17 = vpop.f32.mrf.mxu0 }
 0x46b   :  { %v5410_v34 = vpack.c.bf16 %v5274_v37, %v5274_v37  ;;  %v3256_v25 = vadd.f32 %v14873_v20, %v3255_v17  ;;  %v13065_v37 = vld [vmem:[%s21048_s0 + $0x238] sm:$0xff] }
 0x46d   :  { %12024 = vmatmul.msk.bf16.gmra.mxu0 %vm2064_vm2, %v13064_v32  ;;  %v5618_v35 = vunpack.c.l.b16 %v5410_v34  ;;  %v4509_v61 = vmax.f32 %v3256_v25, 0.0  ;;  %v3203_v25 = vadd.f32 %v14873_v20, %v14799_v9 }
 0x46f   :  { %v14898_v31 = vpack.c.b16 %v5618_v35, %v5617_v47  ;;  %v5013_v15 = vmax.f32 %v4485_v40, %v4509_v61  ;;  %v3201_v47 = vadd.f32 %v14873_v20, %v14796_v43  ;;  %v13066_v43 = vld [vmem:[%s21048_s0 + $0x240] sm:$0xff] }
 0x471   :  { %21440 = vst [vmem:[#allocation62_spill] sm:$0xff] %v14898_v31  ;;  %v4487_v61 = vmax.f32 %v3201_v47, 0.0 }
 0x472   :  { %v3257_v18 = vpop.f32.mrf.mxu0 }
 0x473   :  { %v3258_v6 = vadd.f32 %v14873_v20, %v3257_v18 }
 0x475   :  { %v4510_v21 = vmax.f32 %v3258_v6, 0.0  ;;  %v4488_v6 = vmax.f32 %v3203_v25, 0.0 }
 0x477   :  { %v5014_v4 = vmax.f32 %v4486_v46, %v4510_v21 }
 0x479   :  { %v5275_v44 = vmax.f32 %v5013_v15, %v5014_v4 }
 0x47a   :  { %v3260_v32 = vpop.f32.mrf.mxu0 }
 0x47b   :  { %v5411_v17 = vpack.c.bf16 %v5275_v44, %v5275_v44  ;;  %v3261_v3 = vadd.f32 %v14873_v20, %v3260_v32  ;;  %v3206_v32 = vadd.f32 %v14873_v20, %v14804_v16 }
 0x47d   :  { %12025 = vmatmul.msk.bf16.gmra.mxu0 %vm2064_vm2, %v13065_v37  ;;  %v5619_v12 = vunpack.c.l.b16 %v5411_v17  ;;  %v4511_v13 = vmax.f32 %v3261_v3, 0.0  ;;  %v3208_v17 = vadd.f32 %v14873_v20, %v14807_v58 }
 0x47f   :  { %v14910_v34 = vpack.c.b16 %v5619_v12, %v5618_v35  ;;  %v5015_v46 = vmax.f32 %v4487_v61, %v4511_v13  ;;  %v4490_v13 = vmax.f32 %v3208_v17, 0.0 }
 0x481   :  { %21441 = vst [vmem:[#allocation63_spill] sm:$0xff] %v14910_v34  ;;  %5761 = vrot.lane.b32.xlu2 %v14910_v34, %s13490_s1 }
 0x482   :  { %v3262_v29 = vpop.f32.mrf.mxu0 }
 0x483   :  { %v3263_v18 = vadd.f32 %v14873_v20, %v3262_v29  ;;  %v4489_v29 = vmax.f32 %v3206_v32, 0.0 }
 0x485   :  { %v4512_v40 = vmax.f32 %v3263_v18, 0.0 }
 0x487   :  { %v5016_v21 = vmax.f32 %v4488_v6, %v4512_v40 }
 0x489   :  { %v5276_v35 = vmax.f32 %v5015_v46, %v5016_v21 }
 0x48a   :  { %v3265_v15 = vpop.f32.mrf.mxu0 }
 0x48b   :  { %v5412_v4 = vpack.c.bf16 %v5276_v35, %v5276_v35  ;;  %v3266_v44 = vadd.f32 %v14873_v20, %v3265_v15  ;;  %v3213_v15 = vadd.f32 %v14873_v20, %v14820_v62 }
 0x48d   :  { %12026 = vmatmul.msk.bf16.gmra.mxu0 %vm2064_vm2, %v13066_v43  ;;  %v5620_v9 = vunpack.c.l.b16 %v5412_v4  ;;  %v4513_v47 = vmax.f32 %v3266_v44, 0.0  ;;  %v3211_v43 = vadd.f32 %v14873_v20, %v14817_v39  ;;  %v13068_v39 = vld [vmem:[%s21048_s0 + $0x250] sm:$0xff] }
 0x48f   :  { %v14924_v37 = vpack.c.b16 %v5620_v9, %v5619_v12  ;;  %v5017_v61 = vmax.f32 %v4489_v29, %v4513_v47  ;;  %v13067_v12 = vld [vmem:[%s21048_s0 + $0x248] sm:$0xff]  ;;  %v4491_v17 = vmax.f32 %v3211_v43, 0.0 }
 0x491   :  { %21442 = vst [vmem:[#allocation64_spill] sm:$0xff] %v14924_v37 }
 0x492   :  { %v3267_v3 = vpop.f32.mrf.mxu0 }
 0x493   :  { %v3268_v25 = vadd.f32 %v14873_v20, %v3267_v3  ;;  %v4492_v3 = vmax.f32 %v3213_v15, 0.0 }
 0x495   :  { %v4514_v18 = vmax.f32 %v3268_v25, 0.0 }
 0x497   :  { %v5018_v6 = vmax.f32 %v4490_v13, %v4514_v18 }
 0x499   :  { %v5277_v40 = vmax.f32 %v5017_v61, %v5018_v6 }
 0x49a   :  { %v3270_v46 = vpop.f32.mrf.mxu0 }
 0x49b   :  { %v5413_v21 = vpack.c.bf16 %v5277_v40, %v5277_v40  ;;  %v3271_v58 = vadd.f32 %v14873_v20, %v3270_v46  ;;  %v3216_v40 = vadd.f32 %v14873_v20, %v14825_v57 }
 0x49d   :  { %12027 = vmatmul.msk.bf16.gmra.mxu0 %vm2064_vm2, %v13067_v12  ;;  %v5621_v16 = vunpack.c.l.b16 %v5413_v21  ;;  %v4515_v44 = vmax.f32 %v3271_v58, 0.0  ;;  %v3218_v12 = vadd.f32 %v14873_v20, %v14828_v22  ;;  %v4493_v43 = vmax.f32 %v3216_v40, 0.0 }
 0x49f   :  { %v14936_v35 = vpack.c.b16 %v5621_v16, %v5620_v9  ;;  %v5019_v25 = vmax.f32 %v4491_v17, %v4515_v44  ;;  %v4494_v15 = vmax.f32 %v3218_v12, 0.0 }
 0x4a1   :  { %21443 = vst [vmem:[#allocation65_spill] sm:$0xff] %v14936_v35  ;;  %5763 = vrot.lane.b32.xlu0 %v14936_v35, %s13490_s1  ;;  %v13086_v35 = vld [vmem:[%s21048_s0 + $0x2e0] sm:$0xff] }
 0x4a2   :  { %v3272_v4 = vpop.f32.mrf.mxu0 }
 0x4a3   :  { %v3273_v32 = vadd.f32 %v14873_v20, %v3272_v4 }
 0x4a5   :  { %v4516_v47 = vmax.f32 %v3273_v32, 0.0 }
 0x4a7   :  { %v5020_v29 = vmax.f32 %v4492_v3, %v4516_v47 }
 0x4a9   :  { %v5278_v9 = vmax.f32 %v5019_v25, %v5020_v29  ;;  %v3221_v29 = vadd.f32 %v14873_v20, %v14833_v14  ;;  %v13070_v14 = vld [vmem:[%s21048_s0 + $0x260] sm:$0xff] }
 0x4aa   :  { %v3275_v13 = vpop.f32.mrf.mxu0 }
 0x4ab   :  { %v5414_v18 = vpack.c.bf16 %v5278_v9, %v5278_v9  ;;  %v3276_v61 = vadd.f32 %v14873_v20, %v3275_v13  ;;  %v3223_v9 = vadd.f32 %v14873_v20, %v14836_v28 }
 0x4ad   :  { %12028 = vmatmul.msk.bf16.gmra.mxu0 %vm2064_vm2, %v13068_v39  ;;  %v5622_v62 = vunpack.c.l.b16 %v5414_v18  ;;  %v4517_v21 = vmax.f32 %v3276_v61, 0.0  ;;  %v4495_v61 = vmax.f32 %v3221_v29, 0.0  ;;  %v4496_v40 = vmax.f32 %v3223_v9, 0.0 }
 0x4af   :  { %v14950_v6 = vpack.c.b16 %v5622_v62, %v5621_v16  ;;  %v5021_v44 = vmax.f32 %v4493_v43, %v4517_v21  ;;  %v13069_v16 = vld [vmem:[%s21048_s0 + $0x258] sm:$0xff] }
 0x4b1   :  { %21444 = vst [vmem:[#allocation66_spill] sm:$0xff] %v14950_v6 }
 0x4b2   :  { %v3277_v46 = vpop.f32.mrf.mxu0 }
 0x4b3   :  { %v3278_v58 = vadd.f32 %v14873_v20, %v3277_v46 }
 0x4b5   :  { %v4518_v4 = vmax.f32 %v3278_v58, 0.0 }
 0x4b7   :  { %v5022_v32 = vmax.f32 %v4494_v15, %v4518_v4 }
 0x4b9   :  { %v5279_v17 = vmax.f32 %v5021_v44, %v5022_v32  ;;  %v3226_v44 = vadd.f32 %v14873_v20, %v14841_v42  ;;  %v3228_v32 = vadd.f32 %v14873_v20, %v14844_v56  ;;  %v13071_v42 = vld [vmem:[%s21048_s0 + $0x268] sm:$0xff] }
 0x4ba   :  { %v3280_v3 = vpop.f32.mrf.mxu0 }
 0x4bb   :  { %v5415_v47 = vpack.c.bf16 %v5279_v17, %v5279_v17  ;;  %v3281_v22 = vadd.f32 %v14873_v20, %v3280_v3 }
 0x4bd   :  { %12029 = vmatmul.msk.bf16.gmra.mxu0 %vm2064_vm2, %v13069_v16  ;;  %v5623_v57 = vunpack.c.l.b16 %v5415_v47  ;;  %v4519_v13 = vmax.f32 %v3281_v22, 0.0  ;;  %v4497_v47 = vmax.f32 %v3226_v44, 0.0  ;;  %v4498_v22 = vmax.f32 %v3228_v32, 0.0 }
 0x4bf   :  { %v14962_v25 = vpack.c.b16 %v5623_v57, %v5622_v62  ;;  %v5023_v46 = vmax.f32 %v4495_v61, %v4519_v13  ;;  %v3231_v13 = vadd.f32 %v14873_v20, %v14849_v24 }
 0x4c1   :  { %21445 = vst [vmem:[#allocation67_spill] sm:$0xff] %v14962_v25  ;;  %5765 = vrot.lane.b32.xlu1 %v14962_v25, %s13490_s1 }
 0x4c2   :  { %v3282_v39 = vpop.f32.mrf.mxu0 }
 0x4c3   :  { %v3283_v18 = vadd.f32 %v14873_v20, %v3282_v39 }
 0x4c5   :  { %v4520_v12 = vmax.f32 %v3283_v18, 0.0 }
 0x4c7   :  { %v5024_v21 = vmax.f32 %v4496_v40, %v4520_v12 }
 0x4c9   :  { %v5280_v62 = vmax.f32 %v5023_v46, %v5024_v21  ;;  %v4499_v46 = vmax.f32 %v3231_v13, 0.0 }
 0x4ca   :  { %v3285_v58 = vpop.f32.mrf.mxu0 }
 0x4cb   :  { %v5416_v43 = vpack.c.bf16 %v5280_v62, %v5280_v62  ;;  %v3286_v15 = vadd.f32 %v14873_v20, %v3285_v58  ;;  %v3233_v58 = vadd.f32 %v14873_v20, %v14852_v19 }
 0x4cd   :  { %12030 = vmatmul.msk.bf16.gmra.mxu0 %vm2064_vm2, %v13070_v14  ;;  %v5624_v28 = vunpack.c.l.b16 %v5416_v43  ;;  %v4521_v16 = vmax.f32 %v3286_v15, 0.0  ;;  %v4500_v44 = vmax.f32 %v3233_v58, 0.0 }
 0x4cf   :  { %v14976_v4 = vpack.c.b16 %v5624_v28, %v5623_v57  ;;  %v5025_v9 = vmax.f32 %v4497_v47, %v4521_v16  ;;  %v3236_v16 = vadd.f32 %v14873_v20, %v14857_v60  ;;  %v3238_v60 = vadd.f32 %v14873_v20, %v14860_v51 }
 0x4d1   :  { %21446 = vst [vmem:[#allocation68_spill] sm:$0xff] %v14976_v4 }
 0x4d2   :  { %v3287_v17 = vpop.f32.mrf.mxu0 }
 0x4d3   :  { %v3288_v3 = vadd.f32 %v14873_v20, %v3287_v17 }
 0x4d5   :  { %v4522_v29 = vmax.f32 %v3288_v3, 0.0 }
 0x4d7   :  { %v5026_v39 = vmax.f32 %v4498_v22, %v4522_v29  ;;  %v4501_v29 = vmax.f32 %v3236_v16, 0.0 }
 0x4d9   :  { %v5281_v57 = vmax.f32 %v5025_v9, %v5026_v39 }
 0x4da   :  { %v3290_v18 = vpop.f32.mrf.mxu0 }
 0x4db   :  { %v3291_v56 = vadd.f32 %v14873_v20, %v3290_v18  ;;  %v5762_v61 = vpop.permute.xlu2 %5761  ;;  %v5459_v40 = vpack.c.bf16 %v5281_v57, %v5281_v57 }
 0x4dc   :  { %v14991_v12 = vsel %vm6119_vm3, %v14898_v31, %v5762_v61 }
 0x4dd   :  { %21447 = vst [vmem:[#allocation69_spill] sm:$0xff] %v14991_v12  ;;  %v4523_v21 = vmax.f32 %v3291_v56, 0.0  ;;  %12031 = vmatmul.msk.bf16.gmra.mxu0 %vm2064_vm2, %v13071_v42  ;;  %7653 = vmatmul.bf16.gmra.mxu1 %v14991_v12  ;;  %v5707_v24 = vunpack.c.l.b16 %v5459_v40  ;;  %v4502_v56 = vmax.f32 %v3238_v60, 0.0  ;;  %v13085_v12 = vld [vmem:[%s21048_s0 + $0x2d8] sm:$0xff] }
 0x4df   :  { %v5027_v62 = vmax.f32 %v4499_v46, %v4523_v21  ;;  %v14995_v14 = vpack.c.b16 %v5707_v24, %v5624_v28  ;;  %v13072_v28 = vld [vmem:[%s21048_s0 + $0x270] sm:$0xff]  ;;  %v3241_v46 = vadd.f32 %v14873_v20, %v14865_v2  ;;  %v3243_v2 = vadd.f32 %v14873_v20, %v14868_v59 }
 0x4e1   :  { %21448 = vst [vmem:[#allocation70_spill] sm:$0xff] %v14995_v14  ;;  %5767 = vrot.lane.b32.xlu2 %v14995_v14, %s13490_s1 }
 0x4e2   :  { %v3292_v43 = vpop.f32.mrf.mxu0 }
 0x4e3   :  { %v3293_v15 = vadd.f32 %v14873_v20, %v3292_v43 }
 0x4e5   :  { %v4524_v32 = vmax.f32 %v3293_v15, 0.0  ;;  %v4503_v15 = vmax.f32 %v3241_v46, 0.0  ;;  %v13076_v46 = vld [vmem:[%s21048_s0 + $0x290] sm:$0xff] }
 0x4e7   :  { %v5028_v17 = vmax.f32 %v4500_v44, %v4524_v32 }
 0x4e9   :  { %v5282_v3 = vmax.f32 %v5027_v62, %v5028_v17  ;;  %v13073_v62 = vld [vmem:[%s21048_s0 + $0x278] sm:$0xff] }
 0x4ea   :  { %v3295_v47 = vpop.f32.mrf.mxu0 }
 0x4eb   :  { %v3296_v19 = vadd.f32 %v14873_v20, %v3295_v47  ;;  %v5467_v22 = vpack.c.bf16 %v5282_v3, %v5282_v3 }
 0x4ed   :  { %v4525_v9 = vmax.f32 %v3296_v19, 0.0  ;;  %12032 = vmatmul.msk.bf16.gmra.mxu0 %vm2064_vm2, %v13072_v28  ;;  %v5819_v39 = vunpack.c.l.b16 %v5467_v22  ;;  %v4504_v28 = vmax.f32 %v3243_v2, 0.0  ;;  %v13078_v2 = vld [vmem:[%s21048_s0 + $0x2a0] sm:$0xff] }
 0x4ef   :  { %v5029_v13 = vmax.f32 %v4501_v29, %v4525_v9  ;;  %v15009_v57 = vpack.c.b16 %v5819_v39, %v5707_v24  ;;  %v13074_v29 = vld [vmem:[%s21048_s0 + $0x280] sm:$0xff] }
 0x4f1   :  { %21449 = vst [vmem:[#allocation71_spill] sm:$0xff] %v15009_v57 }
 0x4f2   :  { %v3297_v42 = vpop.f32.mrf.mxu0 }
 0x4f3   :  { %v3298_v18 = vadd.f32 %v14873_v20, %v3297_v42 }
 0x4f5   :  { %v4526_v61 = vmax.f32 %v3298_v18, 0.0 }
 0x4f7   :  { %v5030_v40 = vmax.f32 %v4502_v56, %v4526_v61  ;;  %v13075_v56 = vld [vmem:[%s21048_s0 + $0x288] sm:$0xff] }
 0x4f9   :  { %v5283_v21 = vmax.f32 %v5029_v13, %v5030_v40 }
 0x4fa   :  { %v3300_v58 = vpop.f32.mrf.mxu0 }
 0x4fb   :  { %v3301_v24 = vadd.f32 %v14873_v20, %v3300_v58  ;;  %v5475_v43 = vpack.c.bf16 %v5283_v21, %v5283_v21 }
 0x4fd   :  { %v4527_v51 = vmax.f32 %v3301_v24, 0.0  ;;  %12033 = vmatmul.msk.bf16.gmra.mxu0 %vm2064_vm2, %v13073_v62  ;;  %v5843_v44 = vunpack.c.l.b16 %v5475_v43  ;;  %v13077_v43 = vld [vmem:[%s21048_s0 + $0x298] sm:$0xff] }
 0x4ff   :  { %v5031_v32 = vmax.f32 %v4503_v15, %v4527_v51  ;;  %v15021_v17 = vpack.c.b16 %v5843_v44, %v5819_v39 }
 0x501   :  { %21450 = vst [vmem:[#allocation72_spill] sm:$0xff] %v15021_v17 }
 0x502   :  { %v3302_v16 = vpop.f32.mrf.mxu0 }
 0x503   :  { %v3303_v3 = vadd.f32 %v14873_v20, %v3302_v16 }
 0x505   :  { %v4528_v47 = vmax.f32 %v3303_v3, 0.0 }
 0x507   :  { %v5032_v19 = vmax.f32 %v4504_v28, %v4528_v47  ;;  %v13079_v28 = vld [vmem:[%s21048_s0 + $0x2a8] sm:$0xff] }
 0x509   :  { %v5284_v22 = vmax.f32 %v5031_v32, %v5032_v19 }
 0x50a   :  { %v3305_v9 = vpop.f32.mrf.mxu0 }
 0x50b   :  { %v5483_v13 = vpack.c.bf16 %v5284_v22, %v5284_v22  ;;  %v13080_v22 = vld [vmem:[%s21048_s0 + $0x2b0] sm:$0xff]  ;;  %v3306_v25 = vadd.f32 %v14873_v20, %v3305_v9 }
 0x50d   :  { %12034 = vmatmul.msk.bf16.gmra.mxu0 %vm2064_vm2, %v13074_v29  ;;  %v5883_v39 = vunpack.c.l.b16 %v5483_v13 }
 0x50f   :  { %v15030_v60 = vpack.c.b16 %v5883_v39, %v5843_v44  ;;  %v13081_v39 = vld [vmem:[%s21048_s0 + $0x2b8] sm:$0xff] }
 0x511   :  { %21451 = vst [vmem:[#allocation73_spill] sm:$0xff] %v15030_v60 }
 0x512   :  { %v3307_v42 = vpop.f32.mrf.mxu0 }
 0x513   :  { %v5764_v59 = vpop.permute.xlu0 %5763  ;;  %v3308_v57 = vadd.f32 %v14873_v20, %v3307_v42 }
 0x514   :  { %v15034_v18 = vsel %vm6119_vm3, %v14924_v37, %v5764_v59  ;;  %v13087_v37 = vld [vmem:[%s21048_s0 + $0x2e8] sm:$0xff] }
 0x515   :  { %21452 = vst [vmem:[#allocation74_spill] sm:$0xff] %v15034_v18  ;;  %7658 = vmatmul.bf16.gmra.mxu1 %v15034_v18  ;;  %v4530_v60 = vmax.f32 %v3308_v57, 0.0 }
 0x51a   :  { %v15040_v61 = vpop.f32.mrf.mxu0 }
 0x51d   :  { %12035 = vmatmul.msk.bf16.gmra.mxu0 %vm2064_vm2, %v13075_v56 }
 0x522   :  { %v15043_v40 = vpop.f32.mrf.mxu0 }
 0x52a   :  { %v15048_v21 = vpop.f32.mrf.mxu0 }
 0x52d   :  { %12036 = vmatmul.msk.bf16.gmra.mxu0 %vm2064_vm2, %v13076_v46  ;;  %v13082_v46 = vld [vmem:[%s21048_s0 + $0x2c0] sm:$0xff] }
 0x532   :  { %v15051_v62 = vpop.f32.mrf.mxu0 }
 0x533   :  { %v5766_v58 = vpop.permute.xlu1 %5765 }
 0x534   :  { %v15055_v24 = vsel %vm6119_vm3, %v14950_v6, %v5766_v58 }
 0x535   :  { %21453 = vst [vmem:[#allocation75_spill] sm:$0xff] %v15055_v24  ;;  %7663 = vmatmul.bf16.gmra.mxu1 %v15055_v24 }
 0x53a   :  { %v15061_v15 = vpop.f32.mrf.mxu0 }
 0x53b   :  { %v5768_v51 = vpop.permute.xlu2 %5767 }
 0x53c   :  { %v15068_v32 = vsel %vm6119_vm3, %v14976_v4, %v5768_v51  ;;  %v13083_v51 = vld [vmem:[%s21048_s0 + $0x2c8] sm:$0xff] }
 0x53d   :  { %12037 = vmatmul.msk.bf16.gmra.mxu0 %vm2064_vm2, %v13077_v43  ;;  %21454 = vst [vmem:[#allocation76_spill] sm:$0xff] %v15068_v32 }
 0x542   :  { %v15064_v44 = vpop.f32.mrf.mxu0 }
 0x545   :  { %7668 = vmatmul.bf16.gmra.mxu1 %v15068_v32  ;;  %v4529_v32 = vmax.f32 %v3306_v25, 0.0  ;;  %v3313_v25 = vadd.f32 %v14873_v20, %v15043_v40 }
 0x547   :  { %v4532_v42 = vmax.f32 %v3313_v25, 0.0 }
 0x54a   :  { %v15074_v16 = vpop.f32.mrf.mxu0 }
 0x54d   :  { %12038 = vmatmul.msk.bf16.gmra.mxu0 %vm2064_vm2, %v13078_v2 }
 0x552   :  { %v15077_v3 = vpop.f32.mrf.mxu0 }
 0x55a   :  { %v15082_v47 = vpop.f32.mrf.mxu0 }
 0x55d   :  { %12039 = vmatmul.msk.bf16.gmra.mxu0 %vm2064_vm2, %v13079_v28 }
 0x562   :  { %v15085_v19 = vpop.f32.mrf.mxu0 }
 0x56a   :  { %v15090_v29 = vpop.f32.mrf.mxu0 }
 0x56d   :  { %12040 = vmatmul.msk.bf16.gmra.mxu0 %vm2064_vm2, %v13080_v22  ;;  %v13084_v22 = vld [vmem:[%s21048_s0 + $0x2d0] sm:$0xff] }
 0x572   :  { %v15093_v13 = vpop.f32.mrf.mxu0 }
 0x57a   :  { %v15098_v59 = vpop.f32.mrf.mxu0 }
 0x57d   :  { %12041 = vmatmul.msk.bf16.gmra.mxu0 %vm2064_vm2, %v13081_v39 }
 0x582   :  { %v15101_v56 = vpop.f32.mrf.mxu0 }
 0x58a   :  { %v15106_v58 = vpop.f32.mrf.mxu0 }
 0x58d   :  { %12042 = vmatmul.msk.bf16.gmra.mxu0 %vm2064_vm2, %v13082_v46 }
 0x592   :  { %v15109_v43 = vpop.f32.mrf.mxu0 }
 0x59a   :  { %v15114_v2 = vpop.f32.mrf.mxu0 }
 0x59d   :  { %12043 = vmatmul.msk.bf16.gmra.mxu0 %vm2064_vm2, %v13083_v51 }
 0x5a2   :  { %v15117_v28 = vpop.f32.mrf.mxu0 }
 0x5aa   :  { %v15122_v39 = vpop.f32.mrf.mxu0 }
 0x5ad   :  { %12044 = vmatmul.msk.bf16.gmra.mxu0 %vm2064_vm2, %v13084_v22 }
 0x5b2   :  { %v15125_v46 = vpop.f32.mrf.mxu0 }
 0x5ba   :  { %v15130_v14 = vpop.f32.mrf.mxu0 }
 0x5bd   :  { %12045 = vmatmul.msk.bf16.gmra.mxu0 %vm2064_vm2, %v13085_v12 }
 0x5c2   :  { %v15133_v51 = vpop.f32.mrf.mxu0 }
 0x5ca   :  { %v3365_v34 = vpop.f32.mrf.mxu0 }
 0x5cb   :  { %v3366_v22 = vadd.f32 %v14873_v20, %v3365_v34 }
 0x5cd   :  { %v4553_v24 = vmax.f32 %v3366_v22, 0.0  ;;  %12046 = vmatmul.msk.bf16.gmra.mxu0 %vm2064_vm2, %v13086_v35  ;;  %v3311_v35 = vadd.f32 %v14873_v20, %v15040_v61 }
 0x5cf   :  { %v5033_v18 = vmax.f32 %v4529_v32, %v4553_v24 }
 0x5d2   :  { %v3367_v6 = vpop.f32.mrf.mxu0 }
 0x5d3   :  { %v3368_v12 = vadd.f32 %v14873_v20, %v3367_v6 }
 0x5d5   :  { %v4554_v17 = vmax.f32 %v3368_v12, 0.0 }
 0x5d7   :  { %v5034_v9 = vmax.f32 %v4530_v60, %v4554_v17  ;;  %v4531_v60 = vmax.f32 %v3311_v35, 0.0  ;;  %v3316_v35 = vadd.f32 %v14873_v20, %v15048_v21 }
 0x5d9   :  { %v5285_v48 = vmax.f32 %v5033_v18, %v5034_v9 }
 0x5da   :  { %v3370_v8 = vpop.f32.mrf.mxu0 }
 0x5db   :  { %v3371_v34 = vadd.f32 %v14873_v20, %v3370_v8  ;;  %v5417_v22 = vpack.c.bf16 %v5285_v48, %v5285_v48  ;;  %v13088_v8 = vld [vmem:[%s21048_s0 + $0x2f0] sm:$0xff]  ;;  %v3318_v48 = vadd.f32 %v14873_v20, %v15051_v62 }
 0x5dd   :  { %12047 = vmatmul.msk.bf16.gmra.mxu0 %vm2064_vm2, %v13087_v37  ;;  %v4555_v57 = vmax.f32 %v3371_v34, 0.0  ;;  %v5625_v9 = vunpack.c.l.b16 %v5417_v22 }
 0x5df   :  { %v5035_v24 = vmax.f32 %v4531_v60, %v4555_v57  ;;  %v4533_v60 = vmax.f32 %v3316_v35, 0.0 }
 0x5e2   :  { %v3372_v6 = vpop.f32.mrf.mxu0 }
 0x5e3   :  { %v3373_v17 = vadd.f32 %v14873_v20, %v3372_v6 }
 0x5e5   :  { %v4556_v18 = vmax.f32 %v3373_v17, 0.0 }
 0x5e7   :  { %v5036_v32 = vmax.f32 %v4532_v42, %v4556_v18  ;;  %v4534_v42 = vmax.f32 %v3318_v48, 0.0 }
 0x5e9   :  { %v5286_v12 = vmax.f32 %v5035_v24, %v5036_v32 }
 0x5ea   :  { %v3375_v37 = vpop.f32.mrf.mxu0 }
 0x5eb   :  { %v5418_v61 = vpack.c.bf16 %v5286_v12, %v5286_v12  ;;  %v3376_v34 = vadd.f32 %v14873_v20, %v3375_v37  ;;  %v13089_v12 = vld [vmem:[%s21048_s0 + $0x2f8] sm:$0xff] }
 0x5ed   :  { %12048 = vmatmul.msk.bf16.gmra.mxu0 %vm2064_vm2, %v13088_v8  ;;  %v5626_v40 = vunpack.c.l.b16 %v5418_v61  ;;  %v4557_v57 = vmax.f32 %v3376_v34, 0.0  ;;  %v3323_v34 = vadd.f32 %v14873_v20, %v15064_v44 }
 0x5ef   :  { %v15158_v6 = vpack.c.b16 %v5626_v40, %v5625_v9  ;;  %v5037_v24 = vmax.f32 %v4533_v60, %v4557_v57  ;;  %v3321_v9 = vadd.f32 %v14873_v20, %v15061_v15  ;;  %v13090_v15 = vld [vmem:[%s21048_s0 + $0x300] sm:$0xff] }
 0x5f1   :  { %21455 = vst [vmem:[#allocation77_spill] sm:$0xff] %v15158_v6  ;;  %v4535_v57 = vmax.f32 %v3321_v9, 0.0 }
 0x5f2   :  { %v3377_v25 = vpop.f32.mrf.mxu0 }
 0x5f3   :  { %v3378_v17 = vadd.f32 %v14873_v20, %v3377_v25 }
 0x5f5   :  { %v4558_v18 = vmax.f32 %v3378_v17, 0.0  ;;  %v4536_v17 = vmax.f32 %v3323_v34, 0.0 }
 0x5f7   :  { %v5038_v32 = vmax.f32 %v4534_v42, %v4558_v18 }
 0x5f9   :  { %v5287_v22 = vmax.f32 %v5037_v24, %v5038_v32 }
 0x5fa   :  { %v3380_v8 = vpop.f32.mrf.mxu0 }
 0x5fb   :  { %v5419_v37 = vpack.c.bf16 %v5287_v22, %v5287_v22  ;;  %v3381_v62 = vadd.f32 %v14873_v20, %v3380_v8  ;;  %v3326_v8 = vadd.f32 %v14873_v20, %v15074_v16 }
 0x5fd   :  { %12049 = vmatmul.msk.bf16.gmra.mxu0 %vm2064_vm2, %v13089_v12  ;;  %v5627_v21 = vunpack.c.l.b16 %v5419_v37  ;;  %v4559_v48 = vmax.f32 %v3381_v62, 0.0  ;;  %v3328_v37 = vadd.f32 %v14873_v20, %v15077_v3 }
 0x5ff   :  { %v15170_v61 = vpack.c.b16 %v5627_v21, %v5626_v40  ;;  %v5039_v42 = vmax.f32 %v4535_v57, %v4559_v48  ;;  %v4538_v48 = vmax.f32 %v3328_v37, 0.0 }
 0x601   :  { %21456 = vst [vmem:[#allocation78_spill] sm:$0xff] %v15170_v61  ;;  %5769 = vrot.lane.b32.xlu0 %v15170_v61, %s13490_s1  ;;  %v13110_v61 = vld [vmem:[%s21048_s0 + $0x3a0] sm:$0xff] }
 0x602   :  { %v3382_v35 = vpop.f32.mrf.mxu0 }
 0x603   :  { %v3383_v25 = vadd.f32 %v14873_v20, %v3382_v35  ;;  %v4537_v35 = vmax.f32 %v3326_v8, 0.0 }
 0x605   :  { %v4560_v60 = vmax.f32 %v3383_v25, 0.0 }
 0x607   :  { %v5040_v18 = vmax.f32 %v4536_v17, %v4560_v60 }
 0x609   :  { %v5288_v40 = vmax.f32 %v5039_v42, %v5040_v18 }
 0x60a   :  { %v3385_v24 = vpop.f32.mrf.mxu0 }
 0x60b   :  { %v5420_v32 = vpack.c.bf16 %v5288_v40, %v5288_v40  ;;  %v3386_v22 = vadd.f32 %v14873_v20, %v3385_v24  ;;  %v3333_v24 = vadd.f32 %v14873_v20, %v15085_v19 }
 0x60d   :  { %12050 = vmatmul.msk.bf16.gmra.mxu0 %vm2064_vm2, %v13090_v15  ;;  %v5628_v44 = vunpack.c.l.b16 %v5420_v32  ;;  %v4561_v9 = vmax.f32 %v3386_v22, 0.0  ;;  %v3331_v15 = vadd.f32 %v14873_v20, %v15082_v47  ;;  %v13092_v47 = vld [vmem:[%s21048_s0 + $0x310] sm:$0xff] }
 0x60f   :  { %v15184_v12 = vpack.c.b16 %v5628_v44, %v5627_v21  ;;  %v5041_v57 = vmax.f32 %v4537_v35, %v4561_v9  ;;  %v13091_v21 = vld [vmem:[%s21048_s0 + $0x308] sm:$0xff]  ;;  %v4539_v37 = vmax.f32 %v3331_v15, 0.0 }
 0x611   :  { %21457 = vst [vmem:[#allocation79_spill] sm:$0xff] %v15184_v12 }
 0x612   :  { %v3387_v62 = vpop.f32.mrf.mxu0 }
 0x613   :  { %v3388_v34 = vadd.f32 %v14873_v20, %v3387_v62  ;;  %v4540_v62 = vmax.f32 %v3333_v24, 0.0 }
 0x615   :  { %v4562_v25 = vmax.f32 %v3388_v34, 0.0 }
 0x617   :  { %v5042_v17 = vmax.f32 %v4538_v48, %v4562_v25 }
 0x619   :  { %v5289_v60 = vmax.f32 %v5041_v57, %v5042_v17 }
 0x61a   :  { %v3390_v42 = vpop.f32.mrf.mxu0 }
 0x61b   :  { %v5421_v18 = vpack.c.bf16 %v5289_v60, %v5289_v60  ;;  %v3391_v3 = vadd.f32 %v14873_v20, %v3390_v42  ;;  %v3336_v60 = vadd.f32 %v14873_v20, %v15090_v29 }
 0x61d   :  { %12051 = vmatmul.msk.bf16.gmra.mxu0 %vm2064_vm2, %v13091_v21  ;;  %v5629_v16 = vunpack.c.l.b16 %v5421_v18  ;;  %v4563_v22 = vmax.f32 %v3391_v3, 0.0  ;;  %v3338_v21 = vadd.f32 %v14873_v20, %v15093_v13  ;;  %v4541_v15 = vmax.f32 %v3336_v60, 0.0 }
 0x61f   :  { %v15196_v40 = vpack.c.b16 %v5629_v16, %v5628_v44  ;;  %v5043_v34 = vmax.f32 %v4539_v37, %v4563_v22  ;;  %v4542_v24 = vmax.f32 %v3338_v21, 0.0 }
 0x621   :  { %21458 = vst [vmem:[#allocation80_spill] sm:$0xff] %v15196_v40  ;;  %5771 = vrot.lane.b32.xlu1 %v15196_v40, %s13490_s1  ;;  %v15408_v40 = vld [vmem:[%s21047_s6] ss:$0 sm:$0xff] }
 0x622   :  { %v3392_v32 = vpop.f32.mrf.mxu0 }
 0x623   :  { %v3393_v8 = vadd.f32 %v14873_v20, %v3392_v32 }
 0x625   :  { %v4564_v9 = vmax.f32 %v3393_v8, 0.0 }
 0x627   :  { %v5044_v35 = vmax.f32 %v4540_v62, %v4564_v9 }
 0x629   :  { %v5290_v44 = vmax.f32 %v5043_v34, %v5044_v35  ;;  %v3341_v35 = vadd.f32 %v14873_v20, %v15098_v59  ;;  %v13094_v59 = vld [vmem:[%s21048_s0 + $0x320] sm:$0xff] }
 0x62a   :  { %v3395_v48 = vpop.f32.mrf.mxu0 }
 0x62b   :  { %v5422_v25 = vpack.c.bf16 %v5290_v44, %v5290_v44  ;;  %v3396_v57 = vadd.f32 %v14873_v20, %v3395_v48  ;;  %v3343_v44 = vadd.f32 %v14873_v20, %v15101_v56 }
 0x62d   :  { %12052 = vmatmul.msk.bf16.gmra.mxu0 %vm2064_vm2, %v13092_v47  ;;  %v5630_v19 = vunpack.c.l.b16 %v5422_v25  ;;  %v4565_v18 = vmax.f32 %v3396_v57, 0.0  ;;  %v4543_v57 = vmax.f32 %v3341_v35, 0.0  ;;  %v4544_v60 = vmax.f32 %v3343_v44, 0.0 }
 0x62f   :  { %v15210_v17 = vpack.c.b16 %v5630_v19, %v5629_v16  ;;  %v5045_v22 = vmax.f32 %v4541_v15, %v4565_v18  ;;  %v13093_v16 = vld [vmem:[%s21048_s0 + $0x318] sm:$0xff] }
 0x631   :  { %21459 = vst [vmem:[#allocation81_spill] sm:$0xff] %v15210_v17 }
 0x632   :  { %v3397_v42 = vpop.f32.mrf.mxu0 }
 0x633   :  { %v3398_v3 = vadd.f32 %v14873_v20, %v3397_v42 }
 0x635   :  { %v4566_v32 = vmax.f32 %v3398_v3, 0.0 }
 0x637   :  { %v5046_v8 = vmax.f32 %v4542_v24, %v4566_v32 }
 0x639   :  { %v5291_v37 = vmax.f32 %v5045_v22, %v5046_v8  ;;  %v3346_v22 = vadd.f32 %v14873_v20, %v15106_v58  ;;  %v3348_v8 = vadd.f32 %v14873_v20, %v15109_v43  ;;  %v13095_v58 = vld [vmem:[%s21048_s0 + $0x328] sm:$0xff] }
 0x63a   :  { %v3400_v62 = vpop.f32.mrf.mxu0 }
 0x63b   :  { %v5423_v9 = vpack.c.bf16 %v5291_v37, %v5291_v37  ;;  %v3401_v13 = vadd.f32 %v14873_v20, %v3400_v62 }
 0x63d   :  { %12053 = vmatmul.msk.bf16.gmra.mxu0 %vm2064_vm2, %v13093_v16  ;;  %v5631_v29 = vunpack.c.l.b16 %v5423_v9  ;;  %v4567_v48 = vmax.f32 %v3401_v13, 0.0  ;;  %v4545_v9 = vmax.f32 %v3346_v22, 0.0  ;;  %v4546_v13 = vmax.f32 %v3348_v8, 0.0 }
 0x63e   :  { %v3356_v8 = vadd.f32 %v14873_v20, %v15122_v39  ;;  %v3358_v39 = vadd.f32 %v14873_v20, %v15125_v46  ;;  %v13097_v46 = vld [vmem:[%s21048_s0 + $0x338] sm:$0xff] }
 0x63f   :  { %v15222_v34 = vpack.c.b16 %v5631_v29, %v5630_v19  ;;  %v5047_v42 = vmax.f32 %v4543_v57, %v4567_v48  ;;  %v3351_v48 = vadd.f32 %v14873_v20, %v15114_v2  ;;  %v3353_v2 = vadd.f32 %v14873_v20, %v15117_v28 }
 0x641   :  { %21460 = vst [vmem:[#allocation82_spill] sm:$0xff] %v15222_v34  ;;  %5773 = vrot.lane.b32.xlu2 %v15222_v34, %s13490_s1 }
 0x642   :  { %v3402_v47 = vpop.f32.mrf.mxu0 }
 0x643   :  { %v3403_v25 = vadd.f32 %v14873_v20, %v3402_v47 }
 0x645   :  { %v4568_v21 = vmax.f32 %v3403_v25, 0.0 }
 0x647   :  { %v5048_v18 = vmax.f32 %v4544_v60, %v4568_v21  ;;  %v4547_v60 = vmax.f32 %v3351_v48, 0.0 }
 0x649   :  { %v5292_v19 = vmax.f32 %v5047_v42, %v5048_v18 }
 0x64a   :  { %v3405_v3 = vpop.f32.mrf.mxu0 }
 0x64b   :  { %v5424_v15 = vpack.c.bf16 %v5292_v19, %v5292_v19  ;;  %v3406_v24 = vadd.f32 %v14873_v20, %v3405_v3 }
 0x64d   :  { %12054 = vmatmul.msk.bf16.gmra.mxu0 %vm2064_vm2, %v13094_v59  ;;  %v5632_v56 = vunpack.c.l.b16 %v5424_v15  ;;  %v4569_v16 = vmax.f32 %v3406_v24, 0.0  ;;  %v4548_v15 = vmax.f32 %v3353_v2, 0.0 }
 0x64f   :  { %v15236_v32 = vpack.c.b16 %v5632_v56, %v5631_v29  ;;  %v5049_v44 = vmax.f32 %v4545_v9, %v4569_v16  ;;  %v4549_v9 = vmax.f32 %v3356_v8, 0.0 }
 0x651   :  { %21461 = vst [vmem:[#allocation83_spill] sm:$0xff] %v15236_v32 }
 0x652   :  { %v3407_v37 = vpop.f32.mrf.mxu0 }
 0x653   :  { %v3408_v62 = vadd.f32 %v14873_v20, %v3407_v37 }
 0x655   :  { %v4570_v35 = vmax.f32 %v3408_v62, 0.0 }
 0x657   :  { %v5050_v47 = vmax.f32 %v4546_v13, %v4570_v35 }
 0x659   :  { %v5293_v29 = vmax.f32 %v5049_v44, %v5050_v47 }
 0x65a   :  { %v3410_v25 = vpop.f32.mrf.mxu0 }
 0x65b   :  { %v3411_v43 = vadd.f32 %v14873_v20, %v3410_v25  ;;  %v5460_v57 = vpack.c.bf16 %v5293_v29, %v5293_v29 }
 0x65d   :  { %v4571_v21 = vmax.f32 %v3411_v43, 0.0  ;;  %12055 = vmatmul.msk.bf16.gmra.mxu0 %vm2064_vm2, %v13095_v58  ;;  %v5708_v42 = vunpack.c.l.b16 %v5460_v57  ;;  %v4550_v43 = vmax.f32 %v3358_v39, 0.0 }
 0x65f   :  { %v5051_v18 = vmax.f32 %v4547_v60, %v4571_v21  ;;  %v15250_v19 = vpack.c.b16 %v5708_v42, %v5632_v56  ;;  %v13096_v56 = vld [vmem:[%s21048_s0 + $0x330] sm:$0xff]  ;;  %v3361_v21 = vadd.f32 %v14873_v20, %v15130_v14  ;;  %v3363_v14 = vadd.f32 %v14873_v20, %v15133_v51 }
 0x661   :  { %21462 = vst [vmem:[#allocation84_spill] sm:$0xff] %v15250_v19  ;;  %5775 = vrot.lane.b32.xlu0 %v15250_v19, %s13490_s1 }
 0x662   :  { %v3412_v59 = vpop.f32.mrf.mxu0 }
 0x663   :  { %v3413_v3 = vadd.f32 %v14873_v20, %v3412_v59 }
 0x665   :  { %v4572_v24 = vmax.f32 %v3413_v3, 0.0  ;;  %v4551_v3 = vmax.f32 %v3361_v21, 0.0 }
 0x667   :  { %v5052_v22 = vmax.f32 %v4548_v15, %v4572_v24 }
 0x669   :  { %v5294_v37 = vmax.f32 %v5051_v18, %v5052_v22 }
 0x66a   :  { %v3415_v16 = vpop.f32.mrf.mxu0 }
 0x66b   :  { %v3416_v28 = vadd.f32 %v14873_v20, %v3415_v16  ;;  %v5468_v62 = vpack.c.bf16 %v5294_v37, %v5294_v37  ;;  %v4552_v16 = vmax.f32 %v3363_v14, 0.0 }
 0x66d   :  { %v4573_v13 = vmax.f32 %v3416_v28, 0.0  ;;  %12056 = vmatmul.msk.bf16.gmra.mxu0 %vm2064_vm2, %v13096_v56  ;;  %v5820_v35 = vunpack.c.l.b16 %v5468_v62 }
 0x66f   :  { %v5053_v44 = vmax.f32 %v4549_v9, %v4573_v13  ;;  %v15264_v47 = vpack.c.b16 %v5820_v35, %v5708_v42  ;;  %v13098_v13 = vld [vmem:[%s21048_s0 + $0x340] sm:$0xff] }
 0x671   :  { %21463 = vst [vmem:[#allocation85_spill] sm:$0xff] %v15264_v47 }
 0x672   :  { %v3417_v48 = vpop.f32.mrf.mxu0 }
 0x673   :  { %v3418_v29 = vadd.f32 %v14873_v20, %v3417_v48  ;;  %v5770_v58 = vpop.permute.xlu0 %5769 }
 0x674   :  { %v15271_v25 = vsel %vm6119_vm3, %v15158_v6, %v5770_v58  ;;  %v13099_v58 = vld [vmem:[%s21048_s0 + $0x348] sm:$0xff] }
 0x675   :  { %21464 = vst [vmem:[#allocation86_spill] sm:$0xff] %v15271_v25  ;;  %v4574_v57 = vmax.f32 %v3418_v29, 0.0  ;;  %7673 = vmatmul.bf16.gmra.mxu1 %v15271_v25  ;;  %v13108_v25 = vld [vmem:[%s21048_s0 + $0x390] sm:$0xff] }
 0x677   :  { %v5054_v60 = vmax.f32 %v4550_v43, %v4574_v57 }
 0x679   :  { %v5295_v42 = vmax.f32 %v5053_v44, %v5054_v60 }
 0x67a   :  { %v3420_v18 = vpop.f32.mrf.mxu0 }
 0x67b   :  { %v3421_v2 = vadd.f32 %v14873_v20, %v3420_v18  ;;  %v5476_v59 = vpack.c.bf16 %v5295_v42, %v5295_v42  ;;  %v15313_v42 = vpop.f32.mrf.mxu1 }
 0x67c   :  { %21469 = vst [vmem:[#allocation91_spill] sm:$0xff] %v15313_v42  ;;  %v13109_v42 = vld [vmem:[%s21048_s0 + $0x398] sm:$0xff] }
 0x67d   :  { %v4575_v15 = vmax.f32 %v3421_v2, 0.0  ;;  %12057 = vmatmul.msk.bf16.gmra.mxu0 %vm2064_vm2, %v13097_v46  ;;  %v5844_v24 = vunpack.c.l.b16 %v5476_v59  ;;  %v13100_v46 = vld [vmem:[%s21048_s0 + $0x350] sm:$0xff]  ;;  %v13101_v59 = vld [vmem:[%s21048_s0 + $0x358] sm:$0xff] }
 0x67f   :  { %v5055_v22 = vmax.f32 %v4551_v3, %v4575_v15  ;;  %v15281_v8 = vpack.c.b16 %v5844_v24, %v5820_v35 }
 0x681   :  { %21465 = vst [vmem:[#allocation87_spill] sm:$0xff] %v15281_v8 }
 0x682   :  { %v3422_v37 = vpop.f32.mrf.mxu0 }
 0x683   :  { %v3423_v56 = vadd.f32 %v14873_v20, %v3422_v37  ;;  %v15337_v14 = vpop.f32.mrf.mxu1 }
 0x684   :  { %21470 = vst [vmem:[#allocation92_spill] sm:$0xff] %v15337_v14 }
 0x685   :  { %v4576_v28 = vmax.f32 %v3423_v56, 0.0 }
 0x687   :  { %v5056_v62 = vmax.f32 %v4552_v16, %v4576_v28 }
 0x689   :  { %v5296_v9 = vmax.f32 %v5055_v22, %v5056_v62  ;;  %v13103_v62 = vld [vmem:[%s21048_s0 + $0x368] sm:$0xff] }
 0x68a   :  { %v15289_v44 = vpop.f32.mrf.mxu0 }
 0x68b   :  { %v5484_v39 = vpack.c.bf16 %v5296_v9, %v5296_v9  ;;  %v15346_v28 = vpop.f32.mrf.mxu1 }
 0x68c   :  { %21472 = vst [vmem:[#allocation94_spill] sm:$0xff] %v15346_v28 }
 0x68d   :  { %12058 = vmatmul.msk.bf16.gmra.mxu0 %vm2064_vm2, %v13098_v13  ;;  %v5884_v35 = vunpack.c.l.b16 %v5484_v39  ;;  %v13104_v39 = vld [vmem:[%s21048_s0 + $0x370] sm:$0xff] }
 0x68f   :  { %v15292_v48 = vpack.c.b16 %v5884_v35, %v5844_v24  ;;  %v13102_v24 = vld [vmem:[%s21048_s0 + $0x360] sm:$0xff] }
 0x691   :  { %21466 = vst [vmem:[#allocation88_spill] sm:$0xff] %v15292_v48 }
 0x692   :  { %v15294_v51 = vpop.f32.mrf.mxu0 }
 0x693   :  { %v5772_v29 = vpop.permute.xlu1 %5771  ;;  %v3428_v14 = vadd.f32 %v15408_v40, %v15294_v51 }
 0x694   :  { %v15298_v20 = vsel %vm6119_vm3, %v15184_v12, %v5772_v29 }
 0x695   :  { %21467 = vst [vmem:[#allocation89_spill] sm:$0xff] %v15298_v20  ;;  %7678 = vmatmul.bf16.gmra.mxu1 %v15298_v20 }
 0x69a   :  { %v15304_v43 = vpop.f32.mrf.mxu0 }
 0x69b   :  { %v5774_v57 = vpop.permute.xlu2 %5773 }
 0x69c   :  { %v15311_v21 = vsel %vm6119_vm3, %v15210_v17, %v5774_v57  ;;  %v4578_v17 = vmax.f32 %v3428_v14, 0.0 }
 0x69d   :  { %12059 = vmatmul.msk.bf16.gmra.mxu0 %vm2064_vm2, %v13099_v58  ;;  %21468 = vst [vmem:[#allocation90_spill] sm:$0xff] %v15311_v21  ;;  %v13105_v58 = vld [vmem:[%s21048_s0 + $0x378] sm:$0xff] }
 0x6a2   :  { %v15307_v60 = vpop.f32.mrf.mxu0 }
 0x6a3   :  { %v3433_v51 = vadd.f32 %v15408_v40, %v15307_v60 }
 0x6a5   :  { %7683 = vmatmul.bf16.gmra.mxu1 %v15311_v21 }
 0x6aa   :  { %v15319_v18 = vpop.f32.mrf.mxu0 }
 0x6ad   :  { %12060 = vmatmul.msk.bf16.gmra.mxu0 %vm2064_vm2, %v13100_v46 }
 0x6b2   :  { %v15322_v2 = vpop.f32.mrf.mxu0 }
 0x6ba   :  { %v15327_v3 = vpop.f32.mrf.mxu0 }
 0x6bd   :  { %12061 = vmatmul.msk.bf16.gmra.mxu0 %vm2064_vm2, %v13101_v59  ;;  %v13106_v59 = vld [vmem:[%s21048_s0 + $0x380] sm:$0xff] }
 0x6c2   :  { %v15330_v15 = vpop.f32.mrf.mxu0 }
 0x6ca   :  { %v15335_v22 = vpop.f32.mrf.mxu0 }
 0x6cd   :  { %12062 = vmatmul.msk.bf16.gmra.mxu0 %vm2064_vm2, %v13102_v24 }
 0x6d2   :  { %v15340_v37 = vpop.f32.mrf.mxu0 }
 0x6d3   :  { %v5776_v56 = vpop.permute.xlu0 %5775 }
 0x6d4   :  { %v15344_v16 = vsel %vm6119_vm3, %v15236_v32, %v5776_v56  ;;  %v13111_v32 = vld [vmem:[%s21048_s0 + $0x3a8] sm:$0xff] }
 0x6d5   :  { %21471 = vst [vmem:[#allocation93_spill] sm:$0xff] %v15344_v16  ;;  %7688 = vmatmul.bf16.gmra.mxu1 %v15344_v16 }
 0x6da   :  { %v15352_v9 = vpop.f32.mrf.mxu0 }
 0x6dd   :  { %12063 = vmatmul.msk.bf16.gmra.mxu0 %vm2064_vm2, %v13103_v62  ;;  %v13107_v62 = vld [vmem:[%s21048_s0 + $0x388] sm:$0xff] }
 0x6e2   :  { %v15355_v13 = vpop.f32.mrf.mxu0 }
 0x6ea   :  { %v15360_v35 = vpop.f32.mrf.mxu0 }
 0x6ed   :  { %12064 = vmatmul.msk.bf16.gmra.mxu0 %vm2064_vm2, %v13104_v39 }
 0x6f2   :  { %v15363_v29 = vpop.f32.mrf.mxu0 }
 0x6fa   :  { %v15368_v57 = vpop.f32.mrf.mxu0 }
 0x6fd   :  { %12065 = vmatmul.msk.bf16.gmra.mxu0 %vm2064_vm2, %v13105_v58 }
 0x702   :  { %v15371_v46 = vpop.f32.mrf.mxu0 }
 0x70a   :  { %v15376_v24 = vpop.f32.mrf.mxu0 }
 0x70d   :  { %12066 = vmatmul.msk.bf16.gmra.mxu0 %vm2064_vm2, %v13106_v59 }
 0x712   :  { %v15379_v56 = vpop.f32.mrf.mxu0 }
 0x71a   :  { %v15384_v39 = vpop.f32.mrf.mxu0 }
 0x71d   :  { %12067 = vmatmul.msk.bf16.gmra.mxu0 %vm2064_vm2, %v13107_v62 }
 0x722   :  { %v15387_v58 = vpop.f32.mrf.mxu0 }
 0x72a   :  { %v15392_v19 = vpop.f32.mrf.mxu0 }
 0x72d   :  { %12068 = vmatmul.msk.bf16.gmra.mxu0 %vm2064_vm2, %v13108_v25  ;;  %v3426_v25 = vadd.f32 %v15408_v40, %v15289_v44 }
 0x72f   :  { %v4577_v21 = vmax.f32 %v3426_v25, 0.0 }
 0x732   :  { %v15395_v59 = vpop.f32.mrf.mxu0 }
 0x73a   :  { %v15400_v34 = vpop.f32.mrf.mxu0 }
 0x73d   :  { %12069 = vmatmul.msk.bf16.gmra.mxu0 %vm2064_vm2, %v13109_v42 }
 0x742   :  { %v15403_v62 = vpop.f32.mrf.mxu0 }
 0x74a   :  { %v3485_v28 = vpop.f32.mrf.mxu0 }
 0x74b   :  { %v3486_v16 = vadd.f32 %v15408_v40, %v3485_v28 }
 0x74d   :  { %v4601_v20 = vmax.f32 %v3486_v16, 0.0  ;;  %12070 = vmatmul.msk.bf16.gmra.mxu0 %vm2064_vm2, %v13110_v61 }
 0x74f   :  { %v5057_v42 = vmax.f32 %v4577_v21, %v4601_v20  ;;  %v3431_v20 = vadd.f32 %v15408_v40, %v15304_v43 }
 0x752   :  { %v3487_v48 = vpop.f32.mrf.mxu0 }
 0x753   :  { %v3488_v47 = vadd.f32 %v15408_v40, %v3487_v48 }
 0x755   :  { %v4602_v44 = vmax.f32 %v3488_v47, 0.0  ;;  %v4579_v47 = vmax.f32 %v3431_v20, 0.0  ;;  %v3436_v20 = vadd.f32 %v15408_v40, %v15319_v18 }
 0x757   :  { %v5058_v8 = vmax.f32 %v4578_v17, %v4602_v44 }
 0x759   :  { %v5297_v12 = vmax.f32 %v5057_v42, %v5058_v8  ;;  %v4580_v8 = vmax.f32 %v3433_v51, 0.0 }
 0x75a   :  { %v3490_v28 = vpop.f32.mrf.mxu0 }
 0x75b   :  { %v3491_v61 = vadd.f32 %v15408_v40, %v3490_v28  ;;  %v5425_v42 = vpack.c.bf16 %v5297_v12, %v5297_v12  ;;  %v3438_v12 = vadd.f32 %v15408_v40, %v15322_v2 }
 0x75d   :  { %12071 = vmatmul.msk.bf16.gmra.mxu0 %vm2064_vm2, %v13111_v32  ;;  %v4603_v21 = vmax.f32 %v3491_v61, 0.0  ;;  %v13112_v32 = vld [vmem:[%s21048_s0 + $0x3b0] sm:$0xff]  ;;  %v5633_v23 = vunpack.c.l.b16 %v5425_v42 }
 0x75f   :  { %v5059_v16 = vmax.f32 %v4579_v47, %v4603_v21  ;;  %v4581_v47 = vmax.f32 %v3436_v20, 0.0 }
 0x762   :  { %v3492_v48 = vpop.f32.mrf.mxu0 }
 0x763   :  { %v3493_v17 = vadd.f32 %v15408_v40, %v3492_v48 }
 0x765   :  { %v4604_v14 = vmax.f32 %v3493_v17, 0.0 }
 0x767   :  { %v5060_v25 = vmax.f32 %v4580_v8, %v4604_v14  ;;  %v4582_v8 = vmax.f32 %v3438_v12, 0.0 }
 0x769   :  { %v5298_v44 = vmax.f32 %v5059_v16, %v5060_v25 }
 0x76a   :  { %v3495_v28 = vpop.f32.mrf.mxu0 }
 0x76b   :  { %v5426_v43 = vpack.c.bf16 %v5298_v44, %v5298_v44  ;;  %v3496_v61 = vadd.f32 %v15408_v40, %v3495_v28 }
 0x76d   :  { %12072 = vmatmul.msk.bf16.gmra.mxu0 %vm2064_vm2, %v13112_v32  ;;  %v5634_v60 = vunpack.c.l.b16 %v5426_v43  ;;  %v4605_v21 = vmax.f32 %v3496_v61, 0.0  ;;  %v3441_v43 = vadd.f32 %v15408_v40, %v15327_v3  ;;  %v3443_v61 = vadd.f32 %v15408_v40, %v15330_v15  ;;  %v13114_v3 = vld [vmem:[%s21048_s0 + $0x3c0] sm:$0xff] }
 0x76f   :  { %v15435_v48 = vpack.c.b16 %v5634_v60, %v5633_v23  ;;  %v5061_v16 = vmax.f32 %v4581_v47, %v4605_v21  ;;  %v13113_v23 = vld [vmem:[%s21048_s0 + $0x3b8] sm:$0xff]  ;;  %v4583_v21 = vmax.f32 %v3441_v43, 0.0 }
 0x771   :  { %21473 = vst [vmem:[#allocation95_spill] sm:$0xff] %v15435_v48 }
 0x772   :  { %v3497_v51 = vpop.f32.mrf.mxu0 }
 0x773   :  { %v3498_v17 = vadd.f32 %v15408_v40, %v3497_v51 }
 0x775   :  { %v4606_v14 = vmax.f32 %v3498_v17, 0.0  ;;  %v4584_v17 = vmax.f32 %v3443_v61, 0.0 }
 0x777   :  { %v5062_v25 = vmax.f32 %v4582_v8, %v4606_v14 }
 0x779   :  { %v5299_v42 = vmax.f32 %v5061_v16, %v5062_v25 }
 0x77a   :  { %v3500_v44 = vpop.f32.mrf.mxu0 }
 0x77b   :  { %v5427_v32 = vpack.c.bf16 %v5299_v42, %v5299_v42  ;;  %v3501_v2 = vadd.f32 %v15408_v40, %v3500_v44  ;;  %v3446_v44 = vadd.f32 %v15408_v40, %v15335_v22 }
 0x77d   :  { %12073 = vmatmul.msk.bf16.gmra.mxu0 %vm2064_vm2, %v13113_v23  ;;  %v5635_v18 = vunpack.c.l.b16 %v5427_v32  ;;  %v4607_v12 = vmax.f32 %v3501_v2, 0.0  ;;  %v3448_v32 = vadd.f32 %v15408_v40, %v15340_v37 }
 0x77f   :  { %v15447_v28 = vpack.c.b16 %v5635_v18, %v5634_v60  ;;  %v5063_v8 = vmax.f32 %v4583_v21, %v4607_v12  ;;  %v4586_v12 = vmax.f32 %v3448_v32, 0.0 }
 0x781   :  { %21474 = vst [vmem:[#allocation96_spill] sm:$0xff] %v15447_v28  ;;  %5777 = vrot.lane.b32.xlu1 %v15447_v28, %s13490_s1  ;;  %v13131_v28 = vld [vmem:[%s21048_s0 + $0x448] sm:$0xff] }
 0x782   :  { %v3502_v20 = vpop.f32.mrf.mxu0 }
 0x783   :  { %v3503_v51 = vadd.f32 %v15408_v40, %v3502_v20  ;;  %v4585_v20 = vmax.f32 %v3446_v44, 0.0 }
 0x785   :  { %v4608_v47 = vmax.f32 %v3503_v51, 0.0 }
 0x787   :  { %v5064_v14 = vmax.f32 %v4584_v17, %v4608_v47 }
 0x789   :  { %v5300_v60 = vmax.f32 %v5063_v8, %v5064_v14 }
 0x78a   :  { %v3505_v16 = vpop.f32.mrf.mxu0 }
 0x78b   :  { %v5428_v25 = vpack.c.bf16 %v5300_v60, %v5300_v60  ;;  %v3506_v42 = vadd.f32 %v15408_v40, %v3505_v16  ;;  %v3453_v16 = vadd.f32 %v15408_v40, %v15355_v13 }
 0x78d   :  { %12074 = vmatmul.msk.bf16.gmra.mxu0 %vm2064_vm2, %v13114_v3  ;;  %v5636_v15 = vunpack.c.l.b16 %v5428_v25  ;;  %v4609_v43 = vmax.f32 %v3506_v42, 0.0  ;;  %v3451_v3 = vadd.f32 %v15408_v40, %v15352_v9  ;;  %v13116_v9 = vld [vmem:[%s21048_s0 + $0x3d0] sm:$0xff] }
 0x78f   :  { %v15461_v23 = vpack.c.b16 %v5636_v15, %v5635_v18  ;;  %v5065_v21 = vmax.f32 %v4585_v20, %v4609_v43  ;;  %v13115_v18 = vld [vmem:[%s21048_s0 + $0x3c8] sm:$0xff]  ;;  %v4587_v32 = vmax.f32 %v3451_v3, 0.0 }
 0x791   :  { %21475 = vst [vmem:[#allocation97_spill] sm:$0xff] %v15461_v23 }
 0x792   :  { %v3507_v2 = vpop.f32.mrf.mxu0 }
 0x793   :  { %v3508_v61 = vadd.f32 %v15408_v40, %v3507_v2  ;;  %v4588_v2 = vmax.f32 %v3453_v16, 0.0 }
 0x795   :  { %v4610_v51 = vmax.f32 %v3508_v61, 0.0 }
 0x797   :  { %v5066_v17 = vmax.f32 %v4586_v12, %v4610_v51 }
 0x799   :  { %v5301_v47 = vmax.f32 %v5065_v21, %v5066_v17 }
 0x79a   :  { %v3510_v8 = vpop.f32.mrf.mxu0 }
 0x79b   :  { %v5429_v14 = vpack.c.bf16 %v5301_v47, %v5301_v47  ;;  %v3511_v37 = vadd.f32 %v15408_v40, %v3510_v8  ;;  %v3456_v47 = vadd.f32 %v15408_v40, %v15360_v35 }
 0x79d   :  { %12075 = vmatmul.msk.bf16.gmra.mxu0 %vm2064_vm2, %v13115_v18  ;;  %v5637_v22 = vunpack.c.l.b16 %v5429_v14  ;;  %v4611_v42 = vmax.f32 %v3511_v37, 0.0  ;;  %v3458_v18 = vadd.f32 %v15408_v40, %v15363_v29  ;;  %v4589_v3 = vmax.f32 %v3456_v47, 0.0 }
 0x79f   :  { %v15473_v60 = vpack.c.b16 %v5637_v22, %v5636_v15  ;;  %v5067_v61 = vmax.f32 %v4587_v32, %v4611_v42  ;;  %v4590_v16 = vmax.f32 %v3458_v18, 0.0 }
 0x7a1   :  { %21476 = vst [vmem:[#allocation98_spill] sm:$0xff] %v15473_v60  ;;  %5779 = vrot.lane.b32.xlu2 %v15473_v60, %s13490_s1 }
 0x7a2   :  { %v3512_v25 = vpop.f32.mrf.mxu0 }
 0x7a3   :  { %v3513_v44 = vadd.f32 %v15408_v40, %v3512_v25 }
 0x7a5   :  { %v4612_v43 = vmax.f32 %v3513_v44, 0.0 }
 0x7a7   :  { %v5068_v20 = vmax.f32 %v4588_v2, %v4612_v43 }
 0x7a9   :  { %v5302_v15 = vmax.f32 %v5067_v61, %v5068_v20  ;;  %v3461_v20 = vadd.f32 %v15408_v40, %v15368_v57  ;;  %v13118_v57 = vld [vmem:[%s21048_s0 + $0x3e0] sm:$0xff] }
 0x7aa   :  { %v3515_v12 = vpop.f32.mrf.mxu0 }
 0x7ab   :  { %v5430_v51 = vpack.c.bf16 %v5302_v15, %v5302_v15  ;;  %v3516_v21 = vadd.f32 %v15408_v40, %v3515_v12  ;;  %v3463_v15 = vadd.f32 %v15408_v40, %v15371_v46 }
 0x7ad   :  { %12076 = vmatmul.msk.bf16.gmra.mxu0 %vm2064_vm2, %v13116_v9  ;;  %v5638_v13 = vunpack.c.l.b16 %v5430_v51  ;;  %v4613_v14 = vmax.f32 %v3516_v21, 0.0  ;;  %v4591_v21 = vmax.f32 %v3461_v20, 0.0  ;;  %v4592_v47 = vmax.f32 %v3463_v15, 0.0 }
 0x7af   :  { %v15487_v17 = vpack.c.b16 %v5638_v13, %v5637_v22  ;;  %v5069_v42 = vmax.f32 %v4589_v3, %v4613_v14  ;;  %v13117_v22 = vld [vmem:[%s21048_s0 + $0x3d8] sm:$0xff] }
 0x7b1   :  { %21477 = vst [vmem:[#allocation99_spill] sm:$0xff] %v15487_v17 }
 0x7b2   :  { %v3517_v8 = vpop.f32.mrf.mxu0 }
 0x7b3   :  { %v3518_v37 = vadd.f32 %v15408_v40, %v3517_v8 }
 0x7b5   :  { %v4614_v25 = vmax.f32 %v3518_v37, 0.0 }
 0x7b7   :  { %v5070_v44 = vmax.f32 %v4590_v16, %v4614_v25 }
 0x7b9   :  { %v5303_v32 = vmax.f32 %v5069_v42, %v5070_v44  ;;  %v3466_v42 = vadd.f32 %v15408_v40, %v15376_v24  ;;  %v3468_v44 = vadd.f32 %v15408_v40, %v15379_v56  ;;  %v13119_v24 = vld [vmem:[%s21048_s0 + $0x3e8] sm:$0xff] }
 0x7ba   :  { %v3520_v2 = vpop.f32.mrf.mxu0 }
 0x7bb   :  { %v5431_v43 = vpack.c.bf16 %v5303_v32, %v5303_v32  ;;  %v3521_v29 = vadd.f32 %v15408_v40, %v3520_v2 }
 0x7bd   :  { %12077 = vmatmul.msk.bf16.gmra.mxu0 %vm2064_vm2, %v13117_v22  ;;  %v5639_v35 = vunpack.c.l.b16 %v5431_v43  ;;  %v4615_v12 = vmax.f32 %v3521_v29, 0.0  ;;  %v4593_v43 = vmax.f32 %v3466_v42, 0.0  ;;  %v4594_v29 = vmax.f32 %v3468_v44, 0.0  ;;  %v15534_v44 = vpop.f32.mrf.mxu1 }
 0x7be   :  { %21481 = vst [vmem:[#allocation103_spill] sm:$0xff] %v15534_v44 }
 0x7bf   :  { %v15499_v61 = vpack.c.b16 %v5639_v35, %v5638_v13  ;;  %v5071_v8 = vmax.f32 %v4591_v21, %v4615_v12  ;;  %v3471_v12 = vadd.f32 %v15408_v40, %v15384_v39  ;;  %v3473_v39 = vadd.f32 %v15408_v40, %v15387_v58 }
 0x7c1   :  { %21478 = vst [vmem:[#allocation100_spill] sm:$0xff] %v15499_v61  ;;  %5781 = vrot.lane.b32.xlu0 %v15499_v61, %s13490_s1  ;;  %v13130_v61 = vld [vmem:[%s21048_s0 + $0x440] sm:$0xff] }
 0x7c2   :  { %v3522_v9 = vpop.f32.mrf.mxu0 }
 0x7c3   :  { %v3523_v51 = vadd.f32 %v15408_v40, %v3522_v9 }
 0x7c5   :  { %v4616_v18 = vmax.f32 %v3523_v51, 0.0 }
 0x7c7   :  { %v5072_v14 = vmax.f32 %v4592_v47, %v4616_v18  ;;  %v4595_v47 = vmax.f32 %v3471_v12, 0.0 }
 0x7c9   :  { %v5304_v13 = vmax.f32 %v5071_v8, %v5072_v14 }
 0x7ca   :  { %v3525_v37 = vpop.f32.mrf.mxu0 }
 0x7cb   :  { %v5432_v3 = vpack.c.bf16 %v5304_v13, %v5304_v13  ;;  %v3526_v16 = vadd.f32 %v15408_v40, %v3525_v37 }
 0x7cd   :  { %12078 = vmatmul.msk.bf16.gmra.mxu0 %vm2064_vm2, %v13118_v57  ;;  %v5640_v46 = vunpack.c.l.b16 %v5432_v3  ;;  %v4617_v22 = vmax.f32 %v3526_v16, 0.0  ;;  %v4596_v3 = vmax.f32 %v3473_v39, 0.0 }
 0x7cf   :  { %v15513_v25 = vpack.c.b16 %v5640_v46, %v5639_v35  ;;  %v5073_v15 = vmax.f32 %v4593_v43, %v4617_v22 }
 0x7d1   :  { %21479 = vst [vmem:[#allocation101_spill] sm:$0xff] %v15513_v25 }
 0x7d2   :  { %v3527_v32 = vpop.f32.mrf.mxu0 }
 0x7d3   :  { %v3528_v2 = vadd.f32 %v15408_v40, %v3527_v32  ;;  %v3476_v32 = vadd.f32 %v15408_v40, %v15392_v19  ;;  %v3478_v19 = vadd.f32 %v15408_v40, %v15395_v59  ;;  %v13121_v59 = vld [vmem:[%s21048_s0 + $0x3f8] sm:$0xff] }
 0x7d5   :  { %v4618_v20 = vmax.f32 %v3528_v2, 0.0 }
 0x7d7   :  { %v5074_v9 = vmax.f32 %v4594_v29, %v4618_v20  ;;  %v4597_v29 = vmax.f32 %v3476_v32, 0.0 }
 0x7d9   :  { %v5305_v35 = vmax.f32 %v5073_v15, %v5074_v9 }
 0x7da   :  { %v3530_v51 = vpop.f32.mrf.mxu0 }
 0x7db   :  { %v3531_v56 = vadd.f32 %v15408_v40, %v3530_v51  ;;  %v5461_v21 = vpack.c.bf16 %v5305_v35, %v5305_v35 }
 0x7dd   :  { %v4619_v18 = vmax.f32 %v3531_v56, 0.0  ;;  %12079 = vmatmul.msk.bf16.gmra.mxu0 %vm2064_vm2, %v13119_v24  ;;  %v5709_v8 = vunpack.c.l.b16 %v5461_v21  ;;  %v15547_v24 = vpop.f32.mrf.mxu1 }
 0x7de   :  { %21483 = vst [vmem:[#allocation105_spill] sm:$0xff] %v15547_v24  ;;  %v13133_v24 = vld [vmem:[%s21048_s0 + $0x458] sm:$0xff] }
 0x7df   :  { %v5075_v14 = vmax.f32 %v4595_v47, %v4619_v18  ;;  %v15527_v13 = vpack.c.b16 %v5709_v8, %v5640_v46  ;;  %v13120_v46 = vld [vmem:[%s21048_s0 + $0x3f0] sm:$0xff]  ;;  %v4598_v47 = vmax.f32 %v3478_v19, 0.0 }
 0x7e1   :  { %21480 = vst [vmem:[#allocation102_spill] sm:$0xff] %v15527_v13  ;;  %5783 = vrot.lane.b32.xlu1 %v15527_v13, %s13490_s1 }
 0x7e2   :  { %v3532_v57 = vpop.f32.mrf.mxu0 }
 0x7e3   :  { %v3533_v37 = vadd.f32 %v15408_v40, %v3532_v57 }
 0x7e5   :  { %v4620_v16 = vmax.f32 %v3533_v37, 0.0  ;;  %v15560_v37 = vpop.f32.mrf.mxu1 }
 0x7e6   :  { %21485 = vst [vmem:[#allocation107_spill] sm:$0xff] %v15560_v37 }
 0x7e7   :  { %v5076_v42 = vmax.f32 %v4596_v3, %v4620_v16 }
 0x7e9   :  { %v5306_v22 = vmax.f32 %v5075_v14, %v5076_v42 }
 0x7ea   :  { %v3535_v58 = vpop.f32.mrf.mxu0 }
 0x7eb   :  { %v3536_v2 = vadd.f32 %v15408_v40, %v3535_v58  ;;  %v5469_v43 = vpack.c.bf16 %v5306_v22, %v5306_v22 }
 0x7ed   :  { %v4621_v20 = vmax.f32 %v3536_v2, 0.0  ;;  %12080 = vmatmul.msk.bf16.gmra.mxu0 %vm2064_vm2, %v13120_v46  ;;  %v5821_v15 = vunpack.c.l.b16 %v5469_v43 }
 0x7ef   :  { %v5077_v9 = vmax.f32 %v4597_v29, %v4621_v20  ;;  %v15543_v12 = vpack.c.b16 %v5821_v15, %v5709_v8  ;;  %v3481_v8 = vadd.f32 %v15408_v40, %v15400_v34  ;;  %v3483_v34 = vadd.f32 %v15408_v40, %v15403_v62  ;;  %v13122_v62 = vld [vmem:[%s21048_s0 + $0x400] sm:$0xff] }
 0x7f1   :  { %21482 = vst [vmem:[#allocation104_spill] sm:$0xff] %v15543_v12  ;;  %v4599_v42 = vmax.f32 %v3481_v8, 0.0  ;;  %v4600_v19 = vmax.f32 %v3483_v34, 0.0 }
 0x7f2   :  { %v3537_v35 = vpop.f32.mrf.mxu0 }
 0x7f3   :  { %v3538_v51 = vadd.f32 %v15408_v40, %v3537_v35  ;;  %v5778_v56 = vpop.permute.xlu1 %5777 }
 0x7f4   :  { %v15552_v21 = vsel %vm6119_vm3, %v15435_v48, %v5778_v56 }
 0x7f5   :  { %21484 = vst [vmem:[#allocation106_spill] sm:$0xff] %v15552_v21  ;;  %v4622_v18 = vmax.f32 %v3538_v51, 0.0  ;;  %7693 = vmatmul.bf16.gmra.mxu1 %v15552_v21  ;;  %v13129_v21 = vld [vmem:[%s21048_s0 + $0x438] sm:$0xff] }
 0x7f7   :  { %v5078_v14 = vmax.f32 %v4598_v47, %v4622_v18 }
 0x7f9   :  { %v5307_v39 = vmax.f32 %v5077_v9, %v5078_v14  ;;  %v15573_v9 = vpop.f32.mrf.mxu1 }
 0x7fa   :  { %v3540_v57 = vpop.f32.mrf.mxu0  ;;  %21488 = vst [vmem:[#allocation110_spill] sm:$0xff] %v15573_v9 }
 0x7fb   :  { %v3541_v3 = vadd.f32 %v15408_v40, %v3540_v57  ;;  %v5477_v16 = vpack.c.bf16 %v5307_v39, %v5307_v39  ;;  %v5780_v2 = vpop.permute.xlu2 %5779  ;;  %v13123_v39 = vld [vmem:[%s21048_s0 + $0x408] sm:$0xff] }
 0x7fc   :  { %v15571_v20 = vsel %vm6119_vm3, %v15461_v23, %v5780_v2  ;;  %v13125_v2 = vld [vmem:[%s21048_s0 + $0x418] sm:$0xff] }
 0x7fd   :  { %v4623_v32 = vmax.f32 %v3541_v3, 0.0  ;;  %12081 = vmatmul.msk.bf16.gmra.mxu0 %vm2064_vm2, %v13121_v59  ;;  %v5845_v22 = vunpack.c.l.b16 %v5477_v16  ;;  %21487 = vst [vmem:[#allocation109_spill] sm:$0xff] %v15571_v20  ;;  %v13124_v3 = vld [vmem:[%s21048_s0 + $0x410] sm:$0xff] }
 0x7ff   :  { %v5079_v46 = vmax.f32 %v4599_v42, %v4623_v32  ;;  %v15564_v58 = vpack.c.b16 %v5845_v22, %v5821_v15 }
 0x801   :  { %21486 = vst [vmem:[#allocation108_spill] sm:$0xff] %v15564_v58  ;;  %v15597_v42 = vpop.f32.mrf.mxu1 }
 0x802   :  { %v3542_v43 = vpop.f32.mrf.mxu0  ;;  %21490 = vst [vmem:[#allocation112_spill] sm:$0xff] %v15597_v42 }
 0x803   :  { %v3543_v29 = vadd.f32 %v15408_v40, %v3542_v43 }
 0x805   :  { %v4624_v35 = vmax.f32 %v3543_v29, 0.0  ;;  %7698 = vmatmul.bf16.gmra.mxu1 %v15571_v20  ;;  %v13134_v20 = vld [vmem:[%s21048_s0 + $0x460] sm:$0xff] }
 0x807   :  { %v5080_v51 = vmax.f32 %v4600_v19, %v4624_v35  ;;  %v13126_v19 = vld [vmem:[%s21048_s0 + $0x420] sm:$0xff] }
 0x809   :  { %v5308_v15 = vmax.f32 %v5079_v46, %v5080_v51  ;;  %v15606_v34 = vpop.f32.mrf.mxu1 }
 0x80a   :  { %v3545_v56 = vpop.f32.mrf.mxu0  ;;  %21492 = vst [vmem:[#allocation114_spill] sm:$0xff] %v15606_v34  ;;  %v13132_v34 = vld [vmem:[%s21048_s0 + $0x450] sm:$0xff] }
 0x80b   :  { %v5485_v47 = vpack.c.bf16 %v5308_v15, %v5308_v15 }
 0x80d   :  { %12082 = vmatmul.msk.bf16.gmra.mxu0 %vm2064_vm2, %v13122_v62  ;;  %v5885_v18 = vunpack.c.l.b16 %v5485_v47 }
 0x80f   :  { %v15580_v14 = vpack.c.b16 %v5885_v18, %v5845_v22 }
 0x811   :  { %21489 = vst [vmem:[#allocation111_spill] sm:$0xff] %v15580_v14  ;;  %v15622_v51 = vpop.f32.mrf.mxu1 }
 0x812   :  { %v15582_v8 = vpop.f32.mrf.mxu0  ;;  %21493 = vst [vmem:[#allocation115_spill] sm:$0xff] %v15622_v51 }
 0x813   :  { %v3548_v12 = vadd.f32 %v15408_v40, %v15582_v8 }
 0x815   :  { %v4626_v14 = vmax.f32 %v3548_v12, 0.0 }
 0x819   :  { %v15631_v18 = vpop.f32.mrf.mxu1 }
 0x81a   :  { %v15587_v59 = vpop.f32.mrf.mxu0  ;;  %21495 = vst [vmem:[#allocation117_spill] sm:$0xff] %v15631_v18 }
 0x81d   :  { %12083 = vmatmul.msk.bf16.gmra.mxu0 %vm2064_vm2, %v13123_v39  ;;  %v13127_v39 = vld [vmem:[%s21048_s0 + $0x428] sm:$0xff] }
 0x822   :  { %v15590_v57 = vpop.f32.mrf.mxu0 }
 0x823   :  { %v3553_v8 = vadd.f32 %v15408_v40, %v15590_v57  ;;  %v13136_v57 = vld [vmem:[%s21048_s0 + $0x470] sm:$0xff] }
 0x82a   :  { %v15595_v16 = vpop.f32.mrf.mxu0 }
 0x82d   :  { %12084 = vmatmul.msk.bf16.gmra.mxu0 %vm2064_vm2, %v13124_v3 }
 0x832   :  { %v15600_v32 = vpop.f32.mrf.mxu0 }
 0x833   :  { %v5782_v22 = vpop.permute.xlu0 %5781 }
 0x834   :  { %v15604_v46 = vsel %vm6119_vm3, %v15487_v17, %v5782_v22 }
 0x835   :  { %21491 = vst [vmem:[#allocation113_spill] sm:$0xff] %v15604_v46  ;;  %7703 = vmatmul.bf16.gmra.mxu1 %v15604_v46  ;;  %v3546_v46 = vadd.f32 %v15408_v40, %v3545_v56 }
 0x837   :  { %v4625_v42 = vmax.f32 %v3546_v46, 0.0 }
 0x83a   :  { %v15612_v43 = vpop.f32.mrf.mxu0 }
 0x83d   :  { %12085 = vmatmul.msk.bf16.gmra.mxu0 %vm2064_vm2, %v13125_v2  ;;  %v13128_v2 = vld [vmem:[%s21048_s0 + $0x430] sm:$0xff] }
 0x842   :  { %v15615_v29 = vpop.f32.mrf.mxu0 }
 0x84a   :  { %v15620_v35 = vpop.f32.mrf.mxu0 }
 0x84d   :  { %12086 = vmatmul.msk.bf16.gmra.mxu0 %vm2064_vm2, %v13126_v19 }
 0x852   :  { %v15625_v15 = vpop.f32.mrf.mxu0 }
 0x853   :  { %v5784_v62 = vpop.permute.xlu1 %5783 }
 0x854   :  { %v15629_v47 = vsel %vm6119_vm3, %v15513_v25, %v5784_v62  ;;  %v13135_v25 = vld [vmem:[%s21048_s0 + $0x468] sm:$0xff] }
 0x855   :  { %21494 = vst [vmem:[#allocation116_spill] sm:$0xff] %v15629_v47  ;;  %7708 = vmatmul.bf16.gmra.mxu1 %v15629_v47 }
 0x85a   :  { %v15637_v3 = vpop.f32.mrf.mxu0 }
 0x85d   :  { %12087 = vmatmul.msk.bf16.gmra.mxu0 %vm2064_vm2, %v13127_v39 }
 0x862   :  { %v15640_v22 = vpop.f32.mrf.mxu0 }
 0x86a   :  { %v15645_v19 = vpop.f32.mrf.mxu0 }
 0x86d   :  { %12088 = vmatmul.msk.bf16.gmra.mxu0 %vm2064_vm2, %v13128_v2 }
 0x872   :  { %v15648_v62 = vpop.f32.mrf.mxu0 }
 0x87a   :  { %v15653_v13 = vpop.f32.mrf.mxu0 }
 0x87d   :  { %12089 = vmatmul.msk.bf16.gmra.mxu0 %vm2064_vm2, %v13129_v21 }
 0x882   :  { %v15656_v39 = vpop.f32.mrf.mxu0 }
 0x88a   :  { %v15661_v60 = vpop.f32.mrf.mxu0 }
 0x88d   :  { %12090 = vmatmul.msk.bf16.gmra.mxu0 %vm2064_vm2, %v13130_v61 }
 0x892   :  { %v15664_v2 = vpop.f32.mrf.mxu0 }
 0x89a   :  { %v15669_v18 = vpop.f32.mrf.mxu0 }
 0x89d   :  { %12091 = vmatmul.msk.bf16.gmra.mxu0 %vm2064_vm2, %v13131_v28 }
 0x8a2   :  { %v15672_v21 = vpop.f32.mrf.mxu0 }
 0x8aa   :  { %v15677_v9 = vpop.f32.mrf.mxu0 }
 0x8ad   :  { %12092 = vmatmul.msk.bf16.gmra.mxu0 %vm2064_vm2, %v13132_v34 }
 0x8b2   :  { %v15680_v61 = vpop.f32.mrf.mxu0 }
 0x8ba   :  { %v15685_v47 = vpop.f32.mrf.mxu0 }
 0x8bd   :  { %12093 = vmatmul.msk.bf16.gmra.mxu0 %vm2064_vm2, %v13133_v24 }
 0x8c2   :  { %v15688_v28 = vpop.f32.mrf.mxu0 }
 0x8ca   :  { %v3605_v51 = vpop.f32.mrf.mxu0 }
 0x8cb   :  { %v3606_v34 = vadd.f32 %v15408_v40, %v3605_v51 }
 0x8cd   :  { %v4649_v37 = vmax.f32 %v3606_v34, 0.0  ;;  %12094 = vmatmul.msk.bf16.gmra.mxu0 %vm2064_vm2, %v13134_v20 }
 0x8cf   :  { %v5081_v44 = vmax.f32 %v4625_v42, %v4649_v37  ;;  %v3551_v37 = vadd.f32 %v15408_v40, %v15587_v59 }
 0x8d2   :  { %v3607_v24 = vpop.f32.mrf.mxu0 }
 0x8d3   :  { %v3608_v17 = vadd.f32 %v15408_v40, %v3607_v24 }
 0x8d5   :  { %v4650_v56 = vmax.f32 %v3608_v17, 0.0 }
 0x8d7   :  { %v5082_v58 = vmax.f32 %v4626_v14, %v4650_v56  ;;  %v4628_v14 = vmax.f32 %v3553_v8, 0.0 }
 0x8d9   :  { %v5309_v23 = vmax.f32 %v5081_v44, %v5082_v58  ;;  %v13238_v44 = vld [vmem:[%s21048_s0 + $0x7a0] sm:$0xff]  ;;  %v4627_v58 = vmax.f32 %v3551_v37, 0.0 }
 0x8da   :  { %v3610_v51 = vpop.f32.mrf.mxu0  ;;  %12198 = vmatmul.msk.bf16.vlgmr.msra.gmra.mxu3 %vm2064_vm2, %v13238_v44 }
 0x8db   :  { %v3611_v20 = vadd.f32 %v15408_v40, %v3610_v51  ;;  %v5433_v24 = vpack.c.bf16 %v5309_v23, %v5309_v23  ;;  %v3558_v23 = vadd.f32 %v15408_v40, %v15600_v32 }
 0x8dd   :  { %12095 = vmatmul.msk.bf16.gmra.mxu0 %vm2064_vm2, %v13135_v25  ;;  %v4651_v12 = vmax.f32 %v3611_v20, 0.0  ;;  %v5641_v20 = vunpack.c.l.b16 %v5433_v24 }
 0x8df   :  { %v5083_v25 = vmax.f32 %v4627_v58, %v4651_v12  ;;  %v3556_v12 = vadd.f32 %v15408_v40, %v15595_v16  ;;  %v13137_v16 = vld [vmem:[%s21048_s0 + $0x478] sm:$0xff] }
 0x8e2   :  { %v3612_v42 = vpop.f32.mrf.mxu0 }
 0x8e3   :  { %v3613_v17 = vadd.f32 %v15408_v40, %v3612_v42 }
 0x8e5   :  { %v4652_v46 = vmax.f32 %v3613_v17, 0.0 }
 0x8e7   :  { %v5084_v34 = vmax.f32 %v4628_v14, %v4652_v46  ;;  %v13239_v14 = vld [vmem:[%s21048_s0 + $0x7a8] sm:$0xff]  ;;  %v4629_v46 = vmax.f32 %v3556_v12, 0.0  ;;  %v3561_v12 = vadd.f32 %v15408_v40, %v15612_v43 }
 0x8e9   :  { %v5310_v59 = vmax.f32 %v5083_v25, %v5084_v34  ;;  %v4630_v25 = vmax.f32 %v3558_v23, 0.0  ;;  %v3563_v23 = vadd.f32 %v15408_v40, %v15615_v29  ;;  %v13138_v29 = vld [vmem:[%s21048_s0 + $0x480] sm:$0xff] }
 0x8ea   :  { %v3615_v56 = vpop.f32.mrf.mxu0  ;;  %12199 = vmatmul.msk.bf16.gmra.mxu3 %vm2064_vm2, %v13239_v14  ;;  %v13240_v14 = vld [vmem:[%s21048_s0 + $0x7b0] sm:$0xff] }
 0x8eb   :  { %v5434_v51 = vpack.c.bf16 %v5310_v59, %v5310_v59  ;;  %v3616_v37 = vadd.f32 %v15408_v40, %v3615_v56 }
 0x8ed   :  { %12096 = vmatmul.msk.bf16.gmra.mxu0 %vm2064_vm2, %v13136_v57  ;;  %v5642_v42 = vunpack.c.l.b16 %v5434_v51  ;;  %v4653_v44 = vmax.f32 %v3616_v37, 0.0 }
 0x8ef   :  { %v15718_v8 = vpack.c.b16 %v5642_v42, %v5641_v20  ;;  %v5085_v24 = vmax.f32 %v4629_v46, %v4653_v44  ;;  %v4631_v46 = vmax.f32 %v3561_v12, 0.0  ;;  %v3568_v12 = vadd.f32 %v15408_v40, %v15625_v15 }
 0x8f1   :  { %21496 = vst [vmem:[#allocation118_spill] sm:$0xff] %v15718_v8 }
 0x8f2   :  { %v3617_v17 = vpop.f32.mrf.mxu0 }
 0x8f3   :  { %v3618_v58 = vadd.f32 %v15408_v40, %v3617_v17 }
 0x8f5   :  { %v4654_v34 = vmax.f32 %v3618_v58, 0.0 }
 0x8f7   :  { %v5086_v59 = vmax.f32 %v4630_v25, %v4654_v34 }
 0x8f9   :  { %v5311_v57 = vmax.f32 %v5085_v24, %v5086_v59 }
 0x8fa   :  { %v3620_v32 = vpop.f32.mrf.mxu0  ;;  %12200 = vmatmul.msk.bf16.gmra.mxu3 %vm2064_vm2, %v13240_v14 }
 0x8fb   :  { %v5435_v56 = vpack.c.bf16 %v5311_v57, %v5311_v57  ;;  %v3621_v20 = vadd.f32 %v15408_v40, %v3620_v32 }
 0x8fd   :  { %12097 = vmatmul.msk.bf16.gmra.mxu0 %vm2064_vm2, %v13137_v16  ;;  %v5643_v51 = vunpack.c.l.b16 %v5435_v56  ;;  %v4655_v44 = vmax.f32 %v3621_v20, 0.0  ;;  %v3566_v20 = vadd.f32 %v15408_v40, %v15620_v35  ;;  %v13139_v35 = vld [vmem:[%s21048_s0 + $0x488] sm:$0xff] }
 0x8ff   :  { %v15734_v37 = vpack.c.b16 %v5643_v51, %v5642_v42  ;;  %v4632_v42 = vmax.f32 %v3563_v23, 0.0  ;;  %v5087_v43 = vmax.f32 %v4631_v46, %v4655_v44  ;;  %v4633_v14 = vmax.f32 %v3566_v20, 0.0 }
 0x900   :  { %v4634_v46 = vmax.f32 %v3568_v12, 0.0 }
 0x901   :  { %21497 = vst [vmem:[#allocation119_spill] sm:$0xff] %v15734_v37  ;;  %5785 = vrot.lane.b32.xlu2 %v15734_v37, %s13490_s1 }
 0x902   :  { %v3622_v17 = vpop.f32.mrf.mxu0 }
 0x903   :  { %v3623_v58 = vadd.f32 %v15408_v40, %v3622_v17 }
 0x905   :  { %v4656_v25 = vmax.f32 %v3623_v58, 0.0  ;;  %v13241_v58 = vld [vmem:[%s21048_s0 + $0x7b8] sm:$0xff] }
 0x907   :  { %v5088_v34 = vmax.f32 %v4632_v42, %v4656_v25 }
 0x909   :  { %v5312_v24 = vmax.f32 %v5087_v43, %v5088_v34 }
 0x90a   :  { %v3625_v59 = vpop.f32.mrf.mxu0  ;;  %12201 = vmatmul.msk.bf16.gmra.mxu3 %vm2064_vm2, %v13241_v58 }
 0x90b   :  { %v5436_v57 = vpack.c.bf16 %v5312_v24, %v5312_v24  ;;  %v3626_v32 = vadd.f32 %v15408_v40, %v3625_v59 }
 0x90d   :  { %12098 = vmatmul.msk.bf16.gmra.mxu0 %vm2064_vm2, %v13138_v29  ;;  %v5644_v16 = vunpack.c.l.b16 %v5436_v57  ;;  %v4657_v17 = vmax.f32 %v3626_v32, 0.0  ;;  %v3571_v57 = vadd.f32 %v15408_v40, %v15637_v3  ;;  %v3573_v32 = vadd.f32 %v15408_v40, %v15640_v22  ;;  %v13140_v22 = vld [vmem:[%s21048_s0 + $0x490] sm:$0xff] }
 0x90f   :  { %v15752_v56 = vpack.c.b16 %v5644_v16, %v5643_v51  ;;  %v5089_v51 = vmax.f32 %v4633_v14, %v4657_v17  ;;  %v13242_v17 = vld [vmem:[%s21048_s0 + $0x7c0] sm:$0xff] }
 0x911   :  { %21498 = vst [vmem:[#allocation120_spill] sm:$0xff] %v15752_v56 }
 0x912   :  { %v3627_v23 = vpop.f32.mrf.mxu0 }
 0x913   :  { %v3628_v44 = vadd.f32 %v15408_v40, %v3627_v23 }
 0x915   :  { %v4658_v42 = vmax.f32 %v3628_v44, 0.0  ;;  %v4635_v44 = vmax.f32 %v3571_v57, 0.0 }
 0x917   :  { %v5090_v25 = vmax.f32 %v4634_v46, %v4658_v42 }
 0x919   :  { %v5313_v43 = vmax.f32 %v5089_v51, %v5090_v25 }
 0x91a   :  { %v3630_v15 = vpop.f32.mrf.mxu0  ;;  %12202 = vmatmul.msk.bf16.gmra.mxu3 %vm2064_vm2, %v13242_v17 }
 0x91b   :  { %v5437_v34 = vpack.c.bf16 %v5313_v43, %v5313_v43  ;;  %v3631_v29 = vadd.f32 %v15408_v40, %v3630_v15  ;;  %v3576_v15 = vadd.f32 %v15408_v40, %v15645_v19  ;;  %v13141_v19 = vld [vmem:[%s21048_s0 + $0x498] sm:$0xff] }
 0x91d   :  { %12099 = vmatmul.msk.bf16.gmra.mxu0 %vm2064_vm2, %v13139_v35  ;;  %v5645_v24 = vunpack.c.l.b16 %v5437_v34  ;;  %v4659_v12 = vmax.f32 %v3631_v29, 0.0  ;;  %v3578_v34 = vadd.f32 %v15408_v40, %v15648_v62 }
 0x91f   :  { %v15768_v59 = vpack.c.b16 %v5645_v24, %v5644_v16  ;;  %v4636_v16 = vmax.f32 %v3573_v32, 0.0  ;;  %v5091_v3 = vmax.f32 %v4635_v44, %v4659_v12  ;;  %v4637_v12 = vmax.f32 %v3576_v15, 0.0 }
 0x921   :  { %21499 = vst [vmem:[#allocation121_spill] sm:$0xff] %v15768_v59  ;;  %5787 = vrot.lane.b32.xlu0 %v15768_v59, %s13490_s1 }
 0x922   :  { %v3632_v20 = vpop.f32.mrf.mxu0 }
 0x923   :  { %v3633_v23 = vadd.f32 %v15408_v40, %v3632_v20  ;;  %v13243_v20 = vld [vmem:[%s21048_s0 + $0x7c8] sm:$0xff] }
 0x925   :  { %v4660_v58 = vmax.f32 %v3633_v23, 0.0  ;;  %v4638_v23 = vmax.f32 %v3578_v34, 0.0  ;;  %v13244_v34 = vld [vmem:[%s21048_s0 + $0x7d0] sm:$0xff] }
 0x927   :  { %v5092_v14 = vmax.f32 %v4636_v16, %v4660_v58 }
 0x929   :  { %v5314_v46 = vmax.f32 %v5091_v3, %v5092_v14 }
 0x92a   :  { %v3635_v42 = vpop.f32.mrf.mxu0  ;;  %12203 = vmatmul.msk.bf16.gmra.mxu3 %vm2064_vm2, %v13243_v20 }
 0x92b   :  { %v5438_v51 = vpack.c.bf16 %v5314_v46, %v5314_v46  ;;  %v3636_v43 = vadd.f32 %v15408_v40, %v3635_v42  ;;  %v3583_v42 = vadd.f32 %v15408_v40, %v15656_v39  ;;  %v13142_v39 = vld [vmem:[%s21048_s0 + $0x4a0] sm:$0xff] }
 0x92d   :  { %12100 = vmatmul.msk.bf16.gmra.mxu0 %vm2064_vm2, %v13140_v22  ;;  %v5646_v25 = vunpack.c.l.b16 %v5438_v51  ;;  %v4661_v57 = vmax.f32 %v3636_v43, 0.0  ;;  %v3581_v22 = vadd.f32 %v15408_v40, %v15653_v13 }
 0x92f   :  { %v15786_v35 = vpack.c.b16 %v5646_v25, %v5645_v24  ;;  %v5093_v24 = vmax.f32 %v4637_v12, %v4661_v57 }
 0x931   :  { %21500 = vst [vmem:[#allocation122_spill] sm:$0xff] %v15786_v35 }
 0x932   :  { %v3637_v29 = vpop.f32.mrf.mxu0 }
 0x933   :  { %v3638_v32 = vadd.f32 %v15408_v40, %v3637_v29  ;;  %v4639_v29 = vmax.f32 %v3581_v22, 0.0 }
 0x935   :  { %v4662_v17 = vmax.f32 %v3638_v32, 0.0 }
 0x937   :  { %v5094_v44 = vmax.f32 %v4638_v23, %v4662_v17 }
 0x939   :  { %v5315_v16 = vmax.f32 %v5093_v24, %v5094_v44 }
 0x93a   :  { %v3640_v62 = vpop.f32.mrf.mxu0  ;;  %12204 = vmatmul.msk.bf16.gmra.mxu3 %vm2064_vm2, %v13244_v34 }
 0x93b   :  { %v5439_v58 = vpack.c.bf16 %v5315_v16, %v5315_v16  ;;  %v3641_v14 = vadd.f32 %v15408_v40, %v3640_v62  ;;  %v3586_v16 = vadd.f32 %v15408_v40, %v15661_v60 }
 0x93d   :  { %12101 = vmatmul.msk.bf16.gmra.mxu0 %vm2064_vm2, %v13141_v19  ;;  %v5647_v3 = vunpack.c.l.b16 %v5439_v58  ;;  %v4663_v43 = vmax.f32 %v3641_v14, 0.0  ;;  %v3588_v19 = vadd.f32 %v15408_v40, %v15664_v2  ;;  %v15826_v58 = vpop.f32.mrf.mxu1  ;;  %v3591_v2 = vadd.f32 %v15408_v40, %v15669_v18 }
 0x93e   :  { %21503 = vst [vmem:[#allocation125_spill] sm:$0xff] %v15826_v58  ;;  %v13254_v58 = vld [vmem:[%s21048_s0 + $0x820] sm:$0xff] }
 0x93f   :  { %v15802_v46 = vpack.c.b16 %v5647_v3, %v5646_v25  ;;  %v4640_v25 = vmax.f32 %v3583_v42, 0.0  ;;  %v5095_v13 = vmax.f32 %v4639_v29, %v4663_v43  ;;  %v13245_v42 = vld [vmem:[%s21048_s0 + $0x7d8] sm:$0xff]  ;;  %v4642_v43 = vmax.f32 %v3588_v19, 0.0  ;;  %v13143_v29 = vld [vmem:[%s21048_s0 + $0x4a8] sm:$0xff] }
 0x940   :  { %v3593_v19 = vadd.f32 %v15408_v40, %v15672_v21  ;;  %v3596_v21 = vadd.f32 %v15408_v40, %v15677_v9  ;;  %v3598_v9 = vadd.f32 %v15408_v40, %v15680_v61 }
 0x941   :  { %21501 = vst [vmem:[#allocation123_spill] sm:$0xff] %v15802_v46  ;;  %5789 = vrot.lane.b32.xlu1 %v15802_v46, %s13490_s1 }
 0x942   :  { %v3642_v51 = vpop.f32.mrf.mxu0 }
 0x943   :  { %v3643_v15 = vadd.f32 %v15408_v40, %v3642_v51  ;;  %v4641_v51 = vmax.f32 %v3586_v16, 0.0 }
 0x945   :  { %v4664_v57 = vmax.f32 %v3643_v15, 0.0 }
 0x947   :  { %v5096_v32 = vmax.f32 %v4640_v25, %v4664_v57 }
 0x949   :  { %v5316_v20 = vmax.f32 %v5095_v13, %v5096_v32 }
 0x94a   :  { %v3645_v12 = vpop.f32.mrf.mxu0  ;;  %12205 = vmatmul.msk.bf16.gmra.mxu3 %vm2064_vm2, %v13245_v42  ;;  %v4644_v42 = vmax.f32 %v3593_v19, 0.0  ;;  %v13247_v19 = vld [vmem:[%s21048_s0 + $0x7e8] sm:$0xff] }
 0x94b   :  { %v5440_v23 = vpack.c.bf16 %v5316_v20, %v5316_v20  ;;  %v3646_v24 = vadd.f32 %v15408_v40, %v3645_v12  ;;  %v4643_v12 = vmax.f32 %v3591_v2, 0.0 }
 0x94d   :  { %12102 = vmatmul.msk.bf16.gmra.mxu0 %vm2064_vm2, %v13142_v39  ;;  %v5648_v17 = vunpack.c.l.b16 %v5440_v23  ;;  %v4665_v14 = vmax.f32 %v3646_v24, 0.0  ;;  %v15843_v39 = vpop.f32.mrf.mxu1 }
 0x94e   :  { %21505 = vst [vmem:[#allocation127_spill] sm:$0xff] %v15843_v39 }
 0x94f   :  { %v15820_v44 = vpack.c.b16 %v5648_v17, %v5647_v3  ;;  %v5097_v15 = vmax.f32 %v4641_v51, %v4665_v14 }
 0x951   :  { %21502 = vst [vmem:[#allocation124_spill] sm:$0xff] %v15820_v44 }
 0x952   :  { %v3647_v62 = vpop.f32.mrf.mxu0 }
 0x953   :  { %v3648_v22 = vadd.f32 %v15408_v40, %v3647_v62 }
 0x955   :  { %v4666_v3 = vmax.f32 %v3648_v22, 0.0  ;;  %v13246_v22 = vld [vmem:[%s21048_s0 + $0x7e0] sm:$0xff] }
 0x957   :  { %v5098_v60 = vmax.f32 %v4642_v43, %v4666_v3 }
 0x959   :  { %v5317_v34 = vmax.f32 %v5097_v15, %v5098_v60  ;;  %v13144_v15 = vld [vmem:[%s21048_s0 + $0x4b0] sm:$0xff] }
 0x95a   :  { %v3650_v25 = vpop.f32.mrf.mxu0  ;;  %12206 = vmatmul.msk.bf16.gmra.mxu3 %vm2064_vm2, %v13246_v22 }
 0x95b   :  { %v3651_v57 = vadd.f32 %v15408_v40, %v3650_v25  ;;  %v5786_v13 = vpop.permute.xlu2 %5785  ;;  %v5462_v32 = vpack.c.bf16 %v5317_v34, %v5317_v34 }
 0x95c   :  { %v15841_v20 = vsel %vm6119_vm3, %v15718_v8, %v5786_v13 }
 0x95d   :  { %21504 = vst [vmem:[#allocation126_spill] sm:$0xff] %v15841_v20  ;;  %v4667_v23 = vmax.f32 %v3651_v57, 0.0  ;;  %12103 = vmatmul.msk.bf16.gmra.mxu0 %vm2064_vm2, %v13143_v29  ;;  %7713 = vmatmul.bf16.gmra.mxu1 %v15841_v20  ;;  %v5710_v18 = vunpack.c.l.b16 %v5462_v32  ;;  %v4645_v29 = vmax.f32 %v3596_v21, 0.0 }
 0x95f   :  { %v5099_v24 = vmax.f32 %v4643_v12, %v4667_v23  ;;  %v15847_v16 = vpack.c.b16 %v5710_v18, %v5648_v17  ;;  %v15858_v17 = vpop.f32.mrf.mxu3 }
 0x961   :  { %21506 = vst [vmem:[#allocation128_spill] sm:$0xff] %v15847_v16  ;;  %5791 = vrot.lane.b32.xlu2 %v15847_v16, %s13490_s1  ;;  %v13149_v16 = vld [vmem:[%s21048_s0 + $0x4d8] sm:$0xff] }
 0x962   :  { %v3652_v62 = vpop.f32.mrf.mxu0 }
 0x963   :  { %v3653_v14 = vadd.f32 %v15408_v40, %v3652_v62  ;;  %v4646_v62 = vmax.f32 %v3598_v9, 0.0 }
 0x965   :  { %v4668_v51 = vmax.f32 %v3653_v14, 0.0 }
 0x967   :  { %v5100_v43 = vmax.f32 %v4644_v42, %v4668_v51  ;;  %v15869_v12 = vpop.f32.mrf.mxu3  ;;  %v13145_v51 = vld [vmem:[%s21048_s0 + $0x4b8] sm:$0xff] }
 0x969   :  { %v5318_v3 = vmax.f32 %v5099_v24, %v5100_v43 }
 0x96a   :  { %v3655_v60 = vpop.f32.mrf.mxu0  ;;  %12207 = vmatmul.msk.bf16.gmra.mxu3 %vm2064_vm2, %v13247_v19 }
 0x96b   :  { %v3656_v2 = vadd.f32 %v15408_v40, %v3655_v60  ;;  %v5470_v34 = vpack.c.bf16 %v5318_v3, %v5318_v3 }
 0x96d   :  { %v4669_v25 = vmax.f32 %v3656_v2, 0.0  ;;  %12104 = vmatmul.msk.bf16.gmra.mxu0 %vm2064_vm2, %v13144_v15  ;;  %v5822_v57 = vunpack.c.l.b16 %v5470_v34 }
 0x96f   :  { %v5101_v13 = vmax.f32 %v4645_v29, %v4669_v25  ;;  %v15867_v32 = vpack.c.b16 %v5822_v57, %v5710_v18  ;;  %v15878_v42 = vpop.f32.mrf.mxu3  ;;  %v15883_v18 = vld [vmem:[%s21047_s6] ss:$0 sm:$0xff] }
 0x970   :  { %v3601_v61 = vadd.f32 %v15883_v18, %v15685_v47  ;;  %v3603_v47 = vadd.f32 %v15883_v18, %v15688_v28 }
 0x971   :  { %21507 = vst [vmem:[#allocation129_spill] sm:$0xff] %v15867_v32  ;;  %v13152_v32 = vld [vmem:[%s21048_s0 + $0x4f0] sm:$0xff] }
 0x972   :  { %v3657_v23 = vpop.f32.mrf.mxu0  ;;  %v4647_v15 = vmax.f32 %v3601_v61, 0.0  ;;  %v15910_v61 = vpop.f32.mrf.mxu1 }
 0x973   :  { %v3658_v24 = vadd.f32 %v15408_v40, %v3657_v23  ;;  %v13248_v23 = vld [vmem:[%s21048_s0 + $0x7f0] sm:$0xff]  ;;  %21509 = vst [vmem:[#allocation131_spill] sm:$0xff] %v15910_v61 }
 0x975   :  { %v4670_v14 = vmax.f32 %v3658_v24, 0.0  ;;  %v4648_v24 = vmax.f32 %v3603_v47, 0.0 }
 0x977   :  { %v5102_v22 = vmax.f32 %v4646_v62, %v4670_v14  ;;  %v15894_v25 = vpop.f32.mrf.mxu3 }
 0x979   :  { %v5319_v40 = vmax.f32 %v5101_v13, %v5102_v22  ;;  %v13146_v22 = vld [vmem:[%s21048_s0 + $0x4c0] sm:$0xff] }
 0x97a   :  { %v3660_v43 = vpop.f32.mrf.mxu0  ;;  %12208 = vmatmul.msk.bf16.gmra.mxu3 %vm2064_vm2, %v13248_v23  ;;  %v15926_v47 = vpop.f32.mrf.mxu1 }
 0x97b   :  { %v3661_v21 = vadd.f32 %v15883_v18, %v3660_v43  ;;  %v5478_v3 = vpack.c.bf16 %v5319_v40, %v5319_v40  ;;  %21512 = vst [vmem:[#allocation134_spill] sm:$0xff] %v15926_v47  ;;  %v13252_v47 = vld [vmem:[%s21048_s0 + $0x810] sm:$0xff] }
 0x97d   :  { %v4671_v60 = vmax.f32 %v3661_v21, 0.0  ;;  %12105 = vmatmul.msk.bf16.gmra.mxu0 %vm2064_vm2, %v13145_v51  ;;  %v5846_v2 = vunpack.c.l.b16 %v5478_v3 }
 0x97f   :  { %v5103_v34 = vmax.f32 %v4647_v15, %v4671_v60  ;;  %v15892_v29 = vpack.c.b16 %v5846_v2, %v5822_v57  ;;  %v15903_v14 = vpop.f32.mrf.mxu3  ;;  %v13249_v60 = vld [vmem:[%s21048_s0 + $0x7f8] sm:$0xff] }
 0x981   :  { %21508 = vst [vmem:[#allocation130_spill] sm:$0xff] %v15892_v29  ;;  %v4148_v29 = vadd.f32 %v15883_v18, %v14638_v63 }
 0x982   :  { %v3662_v13 = vpop.f32.mrf.mxu0 }
 0x983   :  { %v3663_v9 = vadd.f32 %v15883_v18, %v3662_v13  ;;  %v13147_v13 = vld [vmem:[%s21048_s0 + $0x4c8] sm:$0xff]  ;;  %v4866_v8 = vmax.f32 %v4148_v29, 0.0  ;;  %v13153_v29 = vld [vmem:[%s21048_s0 + $0x4f8] sm:$0xff] }
 0x985   :  { %v4672_v19 = vmax.f32 %v3663_v9, 0.0 }
 0x987   :  { %v5104_v62 = vmax.f32 %v4648_v24, %v4672_v19  ;;  %v15915_v21 = vpop.f32.mrf.mxu3  ;;  %v13250_v19 = vld [vmem:[%s21048_s0 + $0x800] sm:$0xff] }
 0x989   :  { %v5320_v57 = vmax.f32 %v5103_v34, %v5104_v62  ;;  %v15946_v62 = vpop.f32.mrf.mxu1 }
 0x98a   :  { %v15908_v28 = vpop.f32.mrf.mxu0  ;;  %12209 = vmatmul.msk.bf16.gmra.mxu3 %vm2064_vm2, %v13249_v60  ;;  %21513 = vst [vmem:[#allocation135_spill] sm:$0xff] %v15946_v62 }
 0x98b   :  { %v5486_v40 = vpack.c.bf16 %v5320_v57, %v5320_v57 }
 0x98d   :  { %12106 = vmatmul.msk.bf16.gmra.mxu0 %vm2064_vm2, %v13146_v22  ;;  %v5886_v51 = vunpack.c.l.b16 %v5486_v40  ;;  %v13148_v22 = vld [vmem:[%s21048_s0 + $0x4d0] sm:$0xff] }
 0x98f   :  { %v15913_v43 = vpack.c.b16 %v5886_v51, %v5846_v2  ;;  %v15930_v2 = vpop.f32.mrf.mxu3 }
 0x991   :  { %21510 = vst [vmem:[#allocation132_spill] sm:$0xff] %v15913_v43 }
 0x992   :  { %v15917_v3 = vpop.f32.mrf.mxu0 }
 0x993   :  { %v5788_v15 = vpop.permute.xlu0 %5787 }
 0x994   :  { %v15924_v34 = vsel %vm6119_vm3, %v15752_v56, %v5788_v15  ;;  %v15958_v15 = vpop.f32.mrf.mxu1 }
 0x995   :  { %21511 = vst [vmem:[#allocation133_spill] sm:$0xff] %v15924_v34  ;;  %7718 = vmatmul.bf16.gmra.mxu1 %v15924_v34 }
 0x996   :  { %21514 = vst [vmem:[#allocation136_spill] sm:$0xff] %v15958_v15 }
 0x997   :  { %v15938_v23 = vpop.f32.mrf.mxu3 }
 0x99a   :  { %v15935_v9 = vpop.f32.mrf.mxu0  ;;  %12210 = vmatmul.msk.bf16.gmra.mxu3 %vm2064_vm2, %v13250_v19  ;;  %v13251_v19 = vld [vmem:[%s21048_s0 + $0x808] sm:$0xff] }
 0x99c   :  { %v15978_v59 = vpop.f32.mrf.mxu1 }
 0x99d   :  { %12107 = vmatmul.msk.bf16.gmra.mxu0 %vm2064_vm2, %v13147_v13  ;;  %21516 = vst [vmem:[#allocation138_spill] sm:$0xff] %v15978_v59 }
 0x99f   :  { %v15948_v57 = vpop.f32.mrf.mxu3 }
 0x9a2   :  { %v15940_v24 = vpop.f32.mrf.mxu0 }
 0x9a7   :  { %v15956_v51 = vpop.f32.mrf.mxu3 }
 0x9aa   :  { %v15953_v40 = vpop.f32.mrf.mxu0  ;;  %12211 = vmatmul.msk.bf16.gmra.mxu3 %vm2064_vm2, %v13251_v19 }
 0x9ad   :  { %12108 = vmatmul.msk.bf16.gmra.mxu0 %vm2064_vm2, %v13148_v22 }
 0x9af   :  { %v15971_v22 = vpop.f32.mrf.mxu3 }
 0x9b2   :  { %v15960_v60 = vpop.f32.mrf.mxu0 }
 0x9b3   :  { %v5790_v13 = vpop.permute.xlu1 %5789 }
 0x9b4   :  { %v15967_v20 = vsel %vm6119_vm3, %v15786_v35, %v5790_v13  ;;  %v13307_v13 = vld [vmem:[%s21049_s2 + $0xb8] sm:$0xff] }
 0x9b5   :  { %21515 = vst [vmem:[#allocation137_spill] sm:$0xff] %v15967_v20  ;;  %7723 = vmatmul.bf16.gmra.mxu1 %v15967_v20  ;;  %7943 = vmatpush.bf16.msrb.mxu3 %v13307_v13  ;;  %v15995_v20 = vpop.f32.mrf.mxu1  ;;  %v13150_v13 = vld [vmem:[%s21048_s0 + $0x4e0] sm:$0xff] }
 0x9b6   :  { %21518 = vst [vmem:[#allocation140_spill] sm:$0xff] %v15995_v20  ;;  %v13253_v20 = vld [vmem:[%s21048_s0 + $0x818] sm:$0xff] }
 0x9b7   :  { %v15984_v37 = vpop.f32.mrf.mxu3 }
 0x9ba   :  { %v15976_v46 = vpop.f32.mrf.mxu0  ;;  %12212 = vmatmul.msk.bf16.gmra.mxu3 %vm2064_vm2, %v13252_v47 }
 0x9bb   :  { %v5792_v19 = vpop.permute.xlu2 %5791 }
 0x9bc   :  { %v15993_v39 = vsel %vm6119_vm3, %v15820_v44, %v5792_v19 }
 0x9bd   :  { %12109 = vmatmul.msk.bf16.gmra.mxu0 %vm2064_vm2, %v13149_v16  ;;  %21517 = vst [vmem:[#allocation139_spill] sm:$0xff] %v15993_v39 }
 0x9bf   :  { %v15999_v16 = vpop.f32.mrf.mxu3 }
 0x9c2   :  { %v15986_v15 = vpop.f32.mrf.mxu0 }
 0x9c5   :  { %7728 = vmatmul.bf16.gmra.mxu1 %v15993_v39  ;;  %v13151_v39 = vld [vmem:[%s21048_s0 + $0x4e8] sm:$0xff] }
 0x9c7   :  { %v16007_v59 = vpop.f32.mrf.mxu3 }
 0x9ca   :  { %v16004_v34 = vpop.f32.mrf.mxu0  ;;  %12213 = vmatmul.msk.bf16.gmra.mxu3 %vm2064_vm2, %v13253_v20 }
 0x9cd   :  { %12110 = vmatmul.msk.bf16.gmra.mxu0 %vm2064_vm2, %v13150_v13 }
 0x9cf   :  { %v16015_v47 = vpop.f32.mrf.mxu3 }
 0x9d2   :  { %v16009_v19 = vpop.f32.mrf.mxu0 }
 0x9d7   :  { %v16023_v13 = vpop.f32.mrf.mxu3 }
 0x9da   :  { %v16020_v62 = vpop.f32.mrf.mxu0  ;;  %12214 = vmatmul.msk.bf16.gmra.mxu3 %vm2064_vm2, %v13254_v58 }
 0x9dd   :  { %12111 = vmatmul.msk.bf16.gmra.mxu0 %vm2064_vm2, %v13151_v39  ;;  %v4146_v39 = vadd.f32 %v15883_v18, %v14631_v11  ;;  %v13255_v11 = vld [vmem:[%s21048_s0 + $0x828] sm:$0xff] }
 0x9df   :  { %v4205_v20 = vpop.f32.mrf.mxu3  ;;  %v4865_v56 = vmax.f32 %v4146_v39, 0.0 }
 0x9e0   :  { %v4206_v43 = vadd.f32 %v15883_v18, %v4205_v20 }
 0x9e2   :  { %v16025_v61 = vpop.f32.mrf.mxu0  ;;  %v4889_v44 = vmax.f32 %v4206_v43, 0.0 }
 0x9e4   :  { %v5201_v4 = vmax.f32 %v4865_v56, %v4889_v44  ;;  %v4151_v56 = vadd.f32 %v15883_v18, %v14647_v49  ;;  %v4153_v44 = vadd.f32 %v15883_v18, %v14656_v0  ;;  %v13256_v49 = vld [vmem:[%s21048_s0 + $0x830] sm:$0xff] }
 0x9e6   :  { %v4868_v39 = vmax.f32 %v4153_v44, 0.0  ;;  %v4156_v44 = vadd.f32 %v15883_v18, %v14665_v54  ;;  %v13257_v54 = vld [vmem:[%s21048_s0 + $0x838] sm:$0xff] }
 0x9e7   :  { %v4207_v58 = vpop.f32.mrf.mxu3 }
 0x9e8   :  { %v4208_v48 = vadd.f32 %v15883_v18, %v4207_v58 }
 0x9ea   :  { %v16034_v35 = vpop.f32.mrf.mxu0  ;;  %v4890_v31 = vmax.f32 %v4208_v48, 0.0  ;;  %12215 = vmatmul.msk.bf16.gmra.mxu3 %vm2064_vm2, %v13255_v11 }
 0x9ec   :  { %v5202_v20 = vmax.f32 %v4866_v8, %v4890_v31  ;;  %v4867_v31 = vmax.f32 %v4151_v56, 0.0  ;;  %v13154_v56 = vld [vmem:[%s21048_s0 + $0x500] sm:$0xff] }
 0x9ed   :  { %12112 = vmatmul.msk.bf16.gmra.mxu0 %vm2064_vm2, %v13152_v32 }
 0x9ee   :  { %v16049_v63 = vmax.f32 %v5201_v4, %v5202_v20 }
 0x9ef   :  { %v4210_v32 = vpop.f32.mrf.mxu3 }
 0x9f0   :  { %v4211_v48 = vadd.f32 %v15883_v18, %v4210_v32 }
 0x9f2   :  { %v16043_v6 = vpop.f32.mrf.mxu0  ;;  %v4891_v4 = vmax.f32 %v4211_v48, 0.0 }
 0x9f4   :  { %v5203_v20 = vmax.f32 %v4867_v31, %v4891_v4  ;;  %v4158_v4 = vadd.f32 %v15883_v18, %v14672_v1  ;;  %v13306_v1 = vld [vmem:[%s21049_s2 + $0xb0] sm:$0xff] }
 0x9f5   :  { %7944 = vmatpush.bf16.msrb.mxu3 %v13306_v1 }
 0x9f7   :  { %v4212_v8 = vpop.f32.mrf.mxu3 }
 0x9f8   :  { %v4213_v58 = vadd.f32 %v15883_v18, %v4212_v8 }
 0x9fa   :  { %v16054_v43 = vpop.f32.mrf.mxu0  ;;  %v4892_v52 = vmax.f32 %v4213_v58, 0.0  ;;  %12216 = vmatmul.msk.bf16.gmra.mxu3 %vm2064_vm2, %v13256_v49  ;;  %v4870_v58 = vmax.f32 %v4158_v4, 0.0 }
 0x9fc   :  { %v5204_v32 = vmax.f32 %v4868_v39, %v4892_v52  ;;  %v4869_v52 = vmax.f32 %v4156_v44, 0.0 }
 0x9fd   :  { %12113 = vmatmul.msk.bf16.gmra.mxu0 %vm2064_vm2, %v13153_v29 }
 0x9fe   :  { %v16069_v0 = vmax.f32 %v5203_v20, %v5204_v32 }
 0x9ff   :  { %v4215_v29 = vpop.f32.mrf.mxu3 }
 0xa00   :  { %v4216_v31 = vadd.f32 %v15883_v18, %v4215_v29 }
 0xa02   :  { %v16063_v11 = vpop.f32.mrf.mxu0  ;;  %v4893_v8 = vmax.f32 %v4216_v31, 0.0  ;;  %v13155_v31 = vld [vmem:[%s21048_s0 + $0x508] sm:$0xff] }
 0xa04   :  { %v5205_v32 = vmax.f32 %v4869_v52, %v4893_v8  ;;  %v4161_v52 = vadd.f32 %v15883_v18, %v14681_v36  ;;  %v4163_v8 = vadd.f32 %v15883_v18, %v14690_v30  ;;  %v13258_v36 = vld [vmem:[%s21048_s0 + $0x840] sm:$0xff] }
 0xa07   :  { %v4217_v39 = vpop.f32.mrf.mxu3 }
 0xa08   :  { %v4218_v20 = vadd.f32 %v15883_v18, %v4217_v39  ;;  %v4871_v39 = vmax.f32 %v4161_v52, 0.0 }
 0xa0a   :  { %v16074_v48 = vpop.f32.mrf.mxu0  ;;  %v4894_v27 = vmax.f32 %v4218_v20, 0.0  ;;  %12217 = vmatmul.msk.bf16.gmra.mxu3 %vm2064_vm2, %v13257_v54 }
 0xa0c   :  { %v5206_v29 = vmax.f32 %v4870_v58, %v4894_v27 }
 0xa0d   :  { %12114 = vmatmul.msk.bf16.gmra.mxu0 %vm2064_vm2, %v13154_v56 }
 0xa0e   :  { %v16092_v56 = vmax.f32 %v5205_v32, %v5206_v29  ;;  %v4872_v32 = vmax.f32 %v4163_v8, 0.0  ;;  %v13156_v8 = vld [vmem:[%s21048_s0 + $0x510] sm:$0xff] }
 0xa0f   :  { %v4220_v44 = vpop.f32.mrf.mxu3 }
 0xa10   :  { %21519 = vst [vmem:[#allocation141_spill] sm:$0xff] %v16092_v56  ;;  %v4221_v27 = vadd.f32 %v15883_v18, %v4220_v44  ;;  %v4166_v44 = vadd.f32 %v15883_v18, %v15858_v17 }
 0xa12   :  { %v16083_v49 = vpop.f32.mrf.mxu0  ;;  %v4895_v58 = vmax.f32 %v4221_v27, 0.0  ;;  %v4873_v27 = vmax.f32 %v4166_v44, 0.0 }
 0xa14   :  { %v5207_v1 = vmax.f32 %v4871_v39, %v4895_v58 }
 0xa17   :  { %v4222_v20 = vpop.f32.mrf.mxu3 }
 0xa18   :  { %v4223_v54 = vadd.f32 %v15883_v18, %v4222_v20 }
 0xa1a   :  { %v16097_v4 = vpop.f32.mrf.mxu0  ;;  %v4896_v56 = vmax.f32 %v4223_v54, 0.0  ;;  %12218 = vmatmul.msk.bf16.gmra.mxu3 %vm2064_vm2, %v13258_v36  ;;  %v4168_v54 = vadd.f32 %v15883_v18, %v15869_v12  ;;  %v4171_v12 = vadd.f32 %v15883_v18, %v15878_v42 }
 0xa1c   :  { %v5208_v30 = vmax.f32 %v4872_v32, %v4896_v56  ;;  %v4874_v32 = vmax.f32 %v4168_v54, 0.0  ;;  %v4173_v54 = vadd.f32 %v15883_v18, %v15894_v25  ;;  %v5498_v25 = vpack.c.bf16 %v13921_v7, %v13921_v7 }
 0xa1d   :  { %12115 = vmatmul.msk.bf16.gmra.mxu0 %vm2064_vm2, %v13155_v31  ;;  %v5497_v7 = vpack.c.bf16 %v13887_v26, %v13887_v26 }
 0xa1e   :  { %v5372_v31 = vmax.f32 %v5207_v1, %v5208_v30  ;;  %v13259_v30 = vld [vmem:[%s21048_s0 + $0x848] sm:$0xff] }
 0xa1f   :  { %v4225_v52 = vpop.f32.mrf.mxu3 }
 0xa20   :  { %v4226_v39 = vadd.f32 %v15883_v18, %v4225_v52 }
 0xa22   :  { %v16106_v29 = vpop.f32.mrf.mxu0  ;;  %v4897_v20 = vmax.f32 %v4226_v39, 0.0 }
 0xa23   :  { %21520 = vst [vmem:[#allocation142_spill] sm:$0xff] %v16106_v29 }
 0xa24   :  { %v5209_v17 = vmax.f32 %v4873_v27, %v4897_v20  ;;  %v13157_v27 = vld [vmem:[%s21048_s0 + $0x518] sm:$0xff]  ;;  %v4875_v20 = vmax.f32 %v4171_v12, 0.0  ;;  %v13260_v12 = vld [vmem:[%s21048_s0 + $0x850] sm:$0xff] }
 0xa27   :  { %v4227_v56 = vpop.f32.mrf.mxu3 }
 0xa28   :  { %v4228_v1 = vadd.f32 %v15883_v18, %v4227_v56 }
 0xa2a   :  { %v16118_v58 = vpop.f32.mrf.mxu0  ;;  %v4898_v44 = vmax.f32 %v4228_v1, 0.0  ;;  %12219 = vmatmul.msk.bf16.gmra.mxu3 %vm2064_vm2, %v13259_v30  ;;  %v4876_v1 = vmax.f32 %v4173_v54, 0.0 }
 0xa2b   :  { %21521 = vst [vmem:[#allocation143_spill] sm:$0xff] %v16118_v58 }
 0xa2c   :  { %v5210_v52 = vmax.f32 %v4874_v32, %v4898_v44 }
 0xa2d   :  { %12116 = vmatmul.msk.bf16.gmra.mxu0 %vm2064_vm2, %v13156_v8 }
 0xa2e   :  { %v5373_v39 = vmax.f32 %v5209_v17, %v5210_v52 }
 0xa2f   :  { %v4230_v58 = vpop.f32.mrf.mxu3 }
 0xa30   :  { %v4231_v56 = vadd.f32 %v15883_v18, %v4230_v58  ;;  %v4176_v58 = vadd.f32 %v15883_v18, %v15903_v14 }
 0xa32   :  { %v16124_v36 = vpop.f32.mrf.mxu0  ;;  %v4899_v32 = vmax.f32 %v4231_v56, 0.0 }
 0xa33   :  { %21522 = vst [vmem:[#allocation144_spill] sm:$0xff] %v16124_v36 }
 0xa34   :  { %v5211_v44 = vmax.f32 %v4875_v20, %v4899_v32  ;;  %v3666_v20 = vadd.f32 %v15883_v18, %v15908_v28  ;;  %v5988_v32 = vunpack.c.l.b16 %v5498_v25 }
 0xa37   :  { %v4232_v17 = vpop.f32.mrf.mxu3 }
 0xa38   :  { %v4233_v42 = vadd.f32 %v15883_v18, %v4232_v17 }
 0xa3a   :  { %v16135_v8 = vpop.f32.mrf.mxu0  ;;  %v4900_v52 = vmax.f32 %v4233_v42, 0.0  ;;  %12220 = vmatmul.msk.bf16.gmra.mxu3 %vm2064_vm2, %v13260_v12  ;;  %v5516_v12 = vpack.c.bf16 %v5372_v31, %v5372_v31 }
 0xa3b   :  { %21523 = vst [vmem:[#allocation145_spill] sm:$0xff] %v16135_v8  ;;  %v5517_v8 = vpack.c.bf16 %v5373_v39, %v5373_v39 }
 0xa3c   :  { %v5212_v54 = vmax.f32 %v4876_v1, %v4900_v52  ;;  %v5982_v52 = vunpack.c.l.b16 %v5497_v7  ;;  %v16168_v26 = vunpack.c.l.b16 %v5516_v12 }
 0xa3d   :  { %12117 = vmatmul.msk.bf16.gmra.mxu0 %vm2064_vm2, %v13157_v27  ;;  %v5496_v27 = vpack.c.bf16 %v14374_v33, %v14374_v33  ;;  %v13158_v33 = vld [vmem:[%s21048_s0 + $0x520] sm:$0xff] }
 0xa3e   :  { %v5374_v56 = vmax.f32 %v5211_v44, %v5212_v54  ;;  %v4673_v44 = vmax.f32 %v3666_v20, 0.0  ;;  %v16170_v36 = vpack.c.b16 %v5988_v32, %v5982_v52 }
 0xa3f   :  { %v16156_v17 = vunpack.c.l.b16 %v5496_v27  ;;  %v4235_v42 = vpop.f32.mrf.mxu3 }
 0xa40   :  { %v4236_v14 = vadd.f32 %v15883_v18, %v4235_v42  ;;  %v5518_v28 = vpack.c.bf16 %v5374_v56, %v5374_v56  ;;  %21526 = vst [vmem:[#allocation148_spill] sm:$0xff] %v16170_v36  ;;  %v4178_v42 = vadd.f32 %v15883_v18, %v15915_v21 }
 0xa41   :  { %v16166_v54 = vpack.c.b16 %v5982_v52, %v16156_v17 }
 0xa42   :  { %v16142_v30 = vpop.f32.mrf.mxu0  ;;  %v4901_v27 = vmax.f32 %v4236_v14, 0.0  ;;  %v6096_v39 = vunpack.c.l.b16 %v5518_v28 }
 0xa43   :  { %21524 = vst [vmem:[#allocation146_spill] sm:$0xff] %v16142_v30  ;;  %v4877_v30 = vmax.f32 %v4176_v58, 0.0  ;;  %v6095_v58 = vunpack.c.l.b16 %v5517_v8  ;;  %v3668_v8 = vadd.f32 %v15883_v18, %v15917_v3 }
 0xa44   :  { %21525 = vst [vmem:[#allocation147_spill] sm:$0xff] %v16166_v54 }
 0xa45   :  { %v5213_v31 = vmax.f32 %v4877_v30, %v4901_v27  ;;  %v16176_v20 = vpack.c.b16 %v6095_v58, %v16168_v26  ;;  %v16178_v7 = vpack.c.b16 %v6096_v39, %v6095_v58  ;;  %v13261_v30 = vld [vmem:[%s21048_s0 + $0x858] sm:$0xff] }
 0xa47   :  { %21527 = vst [vmem:[#allocation149_spill] sm:$0xff] %v16176_v20  ;;  %v4237_v14 = vpop.f32.mrf.mxu3  ;;  %v21584_v20 = vld [vmem:[#allocation31_spill] sm:$0xff] }
 0xa48   :  { %21528 = vst [vmem:[#allocation150_spill] sm:$0xff] %v16178_v7  ;;  %v4238_v52 = vadd.f32 %v15883_v18, %v4237_v14 }
 0xa4a   :  { %v3725_v1 = vpop.f32.mrf.mxu0  ;;  %12221 = vmatmul.msk.bf16.gmra.mxu3 %vm2064_vm2, %v13261_v30 }
 0xa4b   :  { %v3726_v25 = vadd.f32 %v15883_v18, %v3725_v1  ;;  %v4878_v1 = vmax.f32 %v4178_v42, 0.0  ;;  %v5499_v42 = vpack.c.bf16 %v13955_v38, %v13955_v38 }
 0xa4d   :  { %v4697_v29 = vmax.f32 %v3726_v25, 0.0  ;;  %12118 = vmatmul.msk.bf16.gmra.mxu0 %vm2064_vm2, %v13158_v33  ;;  %v4902_v25 = vmax.f32 %v4238_v52, 0.0  ;;  %v4674_v33 = vmax.f32 %v3668_v8, 0.0 }
 0xa4f   :  { %v5105_v56 = vmax.f32 %v4673_v44, %v4697_v29  ;;  %v4181_v29 = vadd.f32 %v15883_v18, %v15930_v2  ;;  %v5214_v44 = vmax.f32 %v4878_v1, %v4902_v25  ;;  %v4240_v58 = vpop.f32.mrf.mxu3  ;;  %v6007_v2 = vunpack.c.l.b16 %v5499_v42 }
 0xa50   :  { %v4241_v8 = vadd.f32 %v15883_v18, %v4240_v58 }
 0xa51   :  { %v5375_v27 = vmax.f32 %v5213_v31, %v5214_v44  ;;  %v4879_v14 = vmax.f32 %v4181_v29, 0.0  ;;  %v16196_v30 = vpack.c.b16 %v6007_v2, %v5988_v32  ;;  %v4183_v31 = vadd.f32 %v15883_v18, %v15938_v23 }
 0xa52   :  { %v3727_v12 = vpop.f32.mrf.mxu0  ;;  %v4903_v1 = vmax.f32 %v4241_v8, 0.0  ;;  %v3671_v29 = vadd.f32 %v15883_v18, %v15935_v9  ;;  %v3673_v44 = vadd.f32 %v15883_v18, %v15940_v24  ;;  %v4186_v9 = vadd.f32 %v15883_v18, %v15948_v57 }
 0xa53   :  { %v3728_v21 = vadd.f32 %v15883_v18, %v3727_v12  ;;  %v13159_v12 = vld [vmem:[%s21048_s0 + $0x528] sm:$0xff]  ;;  %21529 = vst [vmem:[#allocation151_spill] sm:$0xff] %v16196_v30 }
 0xa54   :  { %v5215_v38 = vmax.f32 %v4879_v14, %v4903_v1  ;;  %v4676_v14 = vmax.f32 %v3673_v44, 0.0 }
 0xa55   :  { %v4698_v28 = vmax.f32 %v3728_v21, 0.0  ;;  %v5519_v21 = vpack.c.bf16 %v5375_v27, %v5375_v27 }
 0xa57   :  { %v5106_v3 = vmax.f32 %v4674_v33, %v4698_v28  ;;  %v6097_v25 = vunpack.c.l.b16 %v5519_v21  ;;  %v4242_v28 = vpop.f32.mrf.mxu3 }
 0xa58   :  { %v4243_v32 = vadd.f32 %v15883_v18, %v4242_v28  ;;  %v4881_v28 = vmax.f32 %v4186_v9, 0.0 }
 0xa59   :  { %v5321_v52 = vmax.f32 %v5105_v56, %v5106_v3  ;;  %v16201_v56 = vpack.c.b16 %v6097_v25, %v6096_v39  ;;  %v4880_v3 = vmax.f32 %v4183_v31, 0.0  ;;  %v13262_v39 = vld [vmem:[%s21048_s0 + $0x860] sm:$0xff] }
 0xa5a   :  { %v3730_v7 = vpop.f32.mrf.mxu0  ;;  %v4904_v42 = vmax.f32 %v4243_v32, 0.0  ;;  %12222 = vmatmul.msk.bf16.gmra.mxu3 %vm2064_vm2, %v13262_v39 }
 0xa5b   :  { %21530 = vst [vmem:[#allocation152_spill] sm:$0xff] %v16201_v56  ;;  %v3731_v33 = vadd.f32 %v15883_v18, %v3730_v7  ;;  %v4675_v7 = vmax.f32 %v3671_v29, 0.0  ;;  %v5441_v32 = vpack.c.bf16 %v5321_v52, %v5321_v52  ;;  %v13160_v29 = vld [vmem:[%s21048_s0 + $0x530] sm:$0xff] }
 0xa5c   :  { %v5216_v8 = vmax.f32 %v4880_v3, %v4904_v42 }
 0xa5d   :  { %12119 = vmatmul.msk.bf16.gmra.mxu0 %vm2064_vm2, %v13159_v12  ;;  %v4699_v58 = vmax.f32 %v3731_v33, 0.0  ;;  %v5500_v33 = vpack.c.bf16 %v13988_v45, %v13988_v45  ;;  %v4188_v45 = vadd.f32 %v15883_v18, %v15956_v51  ;;  %v3678_v51 = vadd.f32 %v15883_v18, %v15960_v60 }
 0xa5e   :  { %v5376_v1 = vmax.f32 %v5215_v38, %v5216_v8  ;;  %v13305_v8 = vld [vmem:[%s21049_s2 + $0xa8] sm:$0xff] }
 0xa5f   :  { %v5107_v24 = vmax.f32 %v4675_v7, %v4699_v58  ;;  %v4245_v31 = vpop.f32.mrf.mxu3  ;;  %v6010_v3 = vunpack.c.l.b16 %v5500_v33  ;;  %v5649_v7 = vunpack.c.l.b16 %v5441_v32  ;;  %7945 = vmatpush.bf16.msrb.mxu3 %v13305_v8 }
 0xa60   :  { %v4246_v57 = vadd.f32 %v15883_v18, %v4245_v31 }
 0xa61   :  { %v16222_v39 = vpack.c.b16 %v6010_v3, %v6007_v2  ;;  %v3676_v2 = vadd.f32 %v15883_v18, %v15953_v40  ;;  %v4191_v40 = vadd.f32 %v15883_v18, %v15971_v22 }
 0xa62   :  { %v3732_v27 = vpop.f32.mrf.mxu0  ;;  %v4905_v58 = vmax.f32 %v4246_v57, 0.0  ;;  %v4678_v57 = vmax.f32 %v3678_v51, 0.0 }
 0xa63   :  { %v3733_v23 = vadd.f32 %v15883_v18, %v3732_v27  ;;  %21531 = vst [vmem:[#allocation153_spill] sm:$0xff] %v16222_v39 }
 0xa65   :  { %v4700_v12 = vmax.f32 %v3733_v23, 0.0  ;;  %v5520_v23 = vpack.c.bf16 %v5376_v1, %v5376_v1  ;;  %v4882_v1 = vmax.f32 %v4188_v45, 0.0  ;;  %v4883_v45 = vmax.f32 %v4191_v40, 0.0 }
 0xa67   :  { %v5108_v21 = vmax.f32 %v4676_v14, %v4700_v12  ;;  %v6098_v38 = vunpack.c.l.b16 %v5520_v23  ;;  %v5217_v14 = vmax.f32 %v4881_v28, %v4905_v58 }
 0xa69   :  { %v5322_v27 = vmax.f32 %v5107_v24, %v5108_v21  ;;  %v16227_v9 = vpack.c.b16 %v6098_v38, %v6097_v25  ;;  %v4247_v21 = vpop.f32.mrf.mxu3 }
 0xa6a   :  { %v3735_v44 = vpop.f32.mrf.mxu0  ;;  %v4248_v25 = vadd.f32 %v15883_v18, %v4247_v21 }
 0xa6b   :  { %v5442_v42 = vpack.c.bf16 %v5322_v27, %v5322_v27  ;;  %21532 = vst [vmem:[#allocation154_spill] sm:$0xff] %v16227_v9  ;;  %v3736_v12 = vadd.f32 %v15883_v18, %v3735_v44  ;;  %v13263_v27 = vld [vmem:[%s21048_s0 + $0x868] sm:$0xff] }
 0xa6c   :  { %v4906_v32 = vmax.f32 %v4248_v25, 0.0  ;;  %12223 = vmatmul.msk.bf16.gmra.mxu3 %vm2064_vm2, %v13263_v27  ;;  %v3681_v27 = vadd.f32 %v15883_v18, %v15976_v46 }
 0xa6d   :  { %12120 = vmatmul.msk.bf16.gmra.mxu0 %vm2064_vm2, %v13160_v29  ;;  %v5650_v52 = vunpack.c.l.b16 %v5442_v42  ;;  %v4701_v33 = vmax.f32 %v3736_v12, 0.0  ;;  %v4677_v29 = vmax.f32 %v3676_v2, 0.0  ;;  %v13161_v12 = vld [vmem:[%s21048_s0 + $0x538] sm:$0xff] }
 0xa6e   :  { %v5218_v60 = vmax.f32 %v4882_v1, %v4906_v32  ;;  %v4193_v1 = vadd.f32 %v15883_v18, %v15984_v37  ;;  %v4679_v46 = vmax.f32 %v3681_v27, 0.0 }
 0xa6f   :  { %v16233_v24 = vpack.c.b16 %v5650_v52, %v5649_v7  ;;  %v5109_v3 = vmax.f32 %v4677_v29, %v4701_v33 }
 0xa70   :  { %v5377_v42 = vmax.f32 %v5217_v14, %v5218_v60  ;;  %v4884_v40 = vmax.f32 %v4193_v1, 0.0  ;;  %v13315_v1 = vld [vmem:[%s21049_s2 + $0xf8] sm:$0xff] }
 0xa71   :  { %v4250_v58 = vpop.f32.mrf.mxu3  ;;  %8112 = vmatpush.bf16.msra.mxu1 %v13315_v1 }
 0xa72   :  { %v3737_v31 = vpop.f32.mrf.mxu0  ;;  %v4251_v8 = vadd.f32 %v15883_v18, %v4250_v58  ;;  %v5521_v21 = vpack.c.bf16 %v5377_v42, %v5377_v42 }
 0xa73   :  { %v3738_v28 = vadd.f32 %v15883_v18, %v3737_v31 }
 0xa74   :  { %v4907_v22 = vmax.f32 %v4251_v8, 0.0  ;;  %v6587_v25 = vunpack.c.l.b16 %v5521_v21  ;;  %v5490_v21 = vpack.c.bf16 %v14193_v50, %v14193_v50 }
 0xa75   :  { %v4702_v44 = vmax.f32 %v3738_v28, 0.0 }
 0xa76   :  { %v5219_v31 = vmax.f32 %v4883_v45, %v4907_v22  ;;  %v16254_v33 = vpack.c.b16 %v6587_v25, %v6098_v38 }
 0xa77   :  { %v5110_v23 = vmax.f32 %v4678_v57, %v4702_v44  ;;  %v3683_v57 = vadd.f32 %v15883_v18, %v15986_v15  ;;  %v4196_v15 = vadd.f32 %v15883_v18, %v15999_v16  ;;  %v13162_v16 = vld [vmem:[%s21048_s0 + $0x540] sm:$0xff] }
 0xa78   :  { %21533 = vst [vmem:[#allocation155_spill] sm:$0xff] %v16254_v33 }
 0xa79   :  { %v5323_v7 = vmax.f32 %v5109_v3, %v5110_v23  ;;  %v4252_v29 = vpop.f32.mrf.mxu3  ;;  %v4680_v23 = vmax.f32 %v3683_v57, 0.0 }
 0xa7a   :  { %v3740_v2 = vpop.f32.mrf.mxu0  ;;  %v4253_v37 = vadd.f32 %v15883_v18, %v4252_v29  ;;  %v5906_v29 = vunpack.c.l.b16 %v5490_v21 }
 0xa7b   :  { %v5443_v51 = vpack.c.bf16 %v5323_v7, %v5323_v7  ;;  %v3741_v28 = vadd.f32 %v15883_v18, %v3740_v2  ;;  %v5489_v2 = vpack.c.bf16 %v14160_v5, %v14160_v5 }
 0xa7c   :  { %v4908_v3 = vmax.f32 %v4253_v37, 0.0 }
 0xa7d   :  { %12121 = vmatmul.msk.bf16.gmra.mxu0 %vm2064_vm2, %v13161_v12  ;;  %v5651_v14 = vunpack.c.l.b16 %v5443_v51  ;;  %v4703_v38 = vmax.f32 %v3741_v28, 0.0  ;;  %v4885_v51 = vmax.f32 %v4196_v15, 0.0  ;;  %v5905_v27 = vunpack.c.l.b16 %v5489_v2 }
 0xa7e   :  { %v5220_v58 = vmax.f32 %v4884_v40, %v4908_v3 }
 0xa7f   :  { %v16257_v32 = vpack.c.b16 %v5651_v14, %v5650_v52  ;;  %v13264_v52 = vld [vmem:[%s21048_s0 + $0x870] sm:$0xff]  ;;  %v5111_v45 = vmax.f32 %v4679_v46, %v4703_v38  ;;  %v16284_v50 = vpack.c.b16 %v5906_v29, %v5905_v27 }
 0xa80   :  { %12224 = vmatmul.msk.bf16.gmra.mxu3 %vm2064_vm2, %v13264_v52  ;;  %v5378_v12 = vmax.f32 %v5219_v31, %v5220_v58 }
 0xa81   :  { %21534 = vst [vmem:[#allocation156_spill] sm:$0xff] %v16257_v32  ;;  %5793 = vrot.lane.b32.xlu0 %v16257_v32, %s13490_s1  ;;  %v4255_v8 = vpop.f32.mrf.mxu3 }
 0xa82   :  { %v3742_v44 = vpop.f32.mrf.mxu0  ;;  %v4256_v28 = vadd.f32 %v15883_v18, %v4255_v8  ;;  %v5522_v57 = vpack.c.bf16 %v5378_v12, %v5378_v12  ;;  %21535 = vst [vmem:[#allocation157_spill] sm:$0xff] %v16284_v50 }
 0xa83   :  { %v3743_v60 = vadd.f32 %v15883_v18, %v3742_v44  ;;  %v4198_v44 = vadd.f32 %v15883_v18, %v16007_v59 }
 0xa84   :  { %v4909_v40 = vmax.f32 %v4256_v28, 0.0  ;;  %v6593_v37 = vunpack.c.l.b16 %v5522_v57  ;;  %v5491_v28 = vpack.c.bf16 %v14227_v41, %v14227_v41  ;;  %v13163_v57 = vld [vmem:[%s21048_s0 + $0x548] sm:$0xff] }
 0xa85   :  { %v4704_v42 = vmax.f32 %v3743_v60, 0.0  ;;  %v4886_v58 = vmax.f32 %v4198_v44, 0.0 }
 0xa86   :  { %v5221_v60 = vmax.f32 %v4885_v51, %v4909_v40  ;;  %v16289_v3 = vpack.c.b16 %v6593_v37, %v6587_v25  ;;  %v5907_v40 = vunpack.c.l.b16 %v5491_v28  ;;  %v5492_v28 = vpack.c.bf16 %v14255_v55, %v14255_v55 }
 0xa87   :  { %v5112_v7 = vmax.f32 %v4680_v23, %v4704_v42  ;;  %v3686_v23 = vadd.f32 %v15883_v18, %v16004_v34  ;;  %v3688_v42 = vadd.f32 %v15883_v18, %v16009_v19  ;;  %v4201_v34 = vadd.f32 %v15883_v18, %v16015_v47 }
 0xa88   :  { %21536 = vst [vmem:[#allocation158_spill] sm:$0xff] %v16289_v3 }
 0xa89   :  { %v5324_v22 = vmax.f32 %v5111_v45, %v5112_v7  ;;  %v4257_v15 = vpop.f32.mrf.mxu3  ;;  %v4681_v8 = vmax.f32 %v3686_v23, 0.0  ;;  %v4682_v2 = vmax.f32 %v3688_v42, 0.0  ;;  %v4203_v42 = vadd.f32 %v15883_v18, %v16023_v13 }
 0xa8a   :  { %v3745_v31 = vpop.f32.mrf.mxu0  ;;  %v4258_v59 = vadd.f32 %v15883_v18, %v4257_v15  ;;  %v16312_v15 = vpack.c.b16 %v5907_v40, %v5906_v29  ;;  %v3693_v29 = vadd.f32 %v15883_v18, %v16025_v61 }
 0xa8b   :  { %v5444_v5 = vpack.c.bf16 %v5324_v22, %v5324_v22  ;;  %v3746_v52 = vadd.f32 %v15883_v18, %v3745_v31  ;;  %v4887_v31 = vmax.f32 %v4201_v34, 0.0 }
 0xa8c   :  { %v4910_v25 = vmax.f32 %v4258_v59, 0.0  ;;  %21537 = vst [vmem:[#allocation159_spill] sm:$0xff] %v16312_v15 }
 0xa8d   :  { %12122 = vmatmul.msk.bf16.gmra.mxu0 %vm2064_vm2, %v13162_v16  ;;  %v5652_v38 = vunpack.c.l.b16 %v5444_v5  ;;  %v4705_v7 = vmax.f32 %v3746_v52, 0.0 }
 0xa8e   :  { %v5222_v51 = vmax.f32 %v4886_v58, %v4910_v25  ;;  %v3691_v25 = vadd.f32 %v15883_v18, %v16020_v62  ;;  %v4684_v62 = vmax.f32 %v3693_v29, 0.0  ;;  %v3698_v29 = vadd.f32 %v15883_v18, %v16043_v6 }
 0xa8f   :  { %v16292_v46 = vpack.c.b16 %v5652_v38, %v5651_v14  ;;  %v13265_v14 = vld [vmem:[%s21048_s0 + $0x878] sm:$0xff]  ;;  %v5113_v19 = vmax.f32 %v4681_v8, %v4705_v7  ;;  %v5493_v6 = vpack.c.bf16 %v14286_v53, %v14286_v53  ;;  %v3701_v53 = vadd.f32 %v15883_v18, %v16054_v43 }
 0xa90   :  { %12225 = vmatmul.msk.bf16.gmra.mxu3 %vm2064_vm2, %v13265_v14  ;;  %v5379_v16 = vmax.f32 %v5221_v60, %v5222_v51  ;;  %v4888_v14 = vmax.f32 %v4203_v42, 0.0 }
 0xa91   :  { %v4260_v1 = vpop.f32.mrf.mxu3 }
 0xa92   :  { %v3747_v45 = vpop.f32.mrf.mxu0  ;;  %v4261_v5 = vadd.f32 %v15883_v18, %v4260_v1  ;;  %v5523_v44 = vpack.c.bf16 %v5379_v16, %v5379_v16 }
 0xa93   :  { %v3748_v12 = vadd.f32 %v15883_v18, %v3747_v45 }
 0xa94   :  { %v4911_v23 = vmax.f32 %v4261_v5, 0.0  ;;  %v6600_v60 = vunpack.c.l.b16 %v5523_v44  ;;  %v5908_v5 = vunpack.c.l.b16 %v5492_v28 }
 0xa95   :  { %v4706_v21 = vmax.f32 %v3748_v12, 0.0 }
 0xa96   :  { %v5223_v58 = vmax.f32 %v4887_v31, %v4911_v23  ;;  %v16317_v59 = vpack.c.b16 %v6600_v60, %v6593_v37 }
 0xa97   :  { %v5114_v22 = vmax.f32 %v4682_v2, %v4706_v21  ;;  %v4683_v21 = vmax.f32 %v3691_v25, 0.0  ;;  %v3696_v25 = vadd.f32 %v15883_v18, %v16034_v35 }
 0xa98   :  { %21538 = vst [vmem:[#allocation160_spill] sm:$0xff] %v16317_v59 }
 0xa99   :  { %v5325_v27 = vmax.f32 %v5113_v19, %v5114_v22  ;;  %v4262_v12 = vpop.f32.mrf.mxu3 }
 0xa9a   :  { %v3750_v47 = vpop.f32.mrf.mxu0  ;;  %v4263_v13 = vadd.f32 %v15883_v18, %v4262_v12 }
 0xa9b   :  { %v5445_v52 = vpack.c.bf16 %v5325_v27, %v5325_v27  ;;  %v3751_v45 = vadd.f32 %v15883_v18, %v3750_v47  ;;  %v13164_v27 = vld [vmem:[%s21048_s0 + $0x550] sm:$0xff] }
 0xa9c   :  { %v4912_v34 = vmax.f32 %v4263_v13, 0.0 }
 0xa9d   :  { %12123 = vmatmul.msk.bf16.gmra.mxu0 %vm2064_vm2, %v13163_v57  ;;  %v5653_v41 = vunpack.c.l.b16 %v5445_v52  ;;  %v4707_v37 = vmax.f32 %v3751_v45, 0.0  ;;  %v16341_v52 = vpack.c.b16 %v5908_v5, %v5907_v40 }
 0xa9e   :  { %v5224_v19 = vmax.f32 %v4888_v14, %v4912_v34 }
 0xa9f   :  { %v16320_v7 = vpack.c.b16 %v5653_v41, %v5652_v38  ;;  %v13266_v38 = vld [vmem:[%s21048_s0 + $0x880] sm:$0xff]  ;;  %v5115_v61 = vmax.f32 %v4683_v21, %v4707_v37  ;;  %21540 = vst [vmem:[#allocation162_spill] sm:$0xff] %v16341_v52  ;;  %v4686_v37 = vmax.f32 %v3698_v29, 0.0  ;;  %v13165_v21 = vld [vmem:[%s21048_s0 + $0x558] sm:$0xff] }
 0xaa0   :  { %12226 = vmatmul.msk.bf16.gmra.mxu3 %vm2064_vm2, %v13266_v38  ;;  %v5380_v16 = vmax.f32 %v5223_v58, %v5224_v19 }
 0xaa1   :  { %21539 = vst [vmem:[#allocation161_spill] sm:$0xff] %v16320_v7  ;;  %5795 = vrot.lane.b32.xlu1 %v16320_v7, %s13490_s1  ;;  %v16334_v1 = vpop.f32.mrf.mxu3  ;;  %v13172_v7 = vld [vmem:[%s21048_s0 + $0x590] sm:$0xff] }
 0xaa2   :  { %v3752_v8 = vpop.f32.mrf.mxu0  ;;  %v5524_v47 = vpack.c.bf16 %v5380_v16, %v5380_v16 }
 0xaa3   :  { %v3753_v2 = vadd.f32 %v15883_v18, %v3752_v8  ;;  %v4685_v8 = vmax.f32 %v3696_v25, 0.0 }
 0xaa4   :  { %v6603_v23 = vunpack.c.l.b16 %v5524_v47 }
 0xaa5   :  { %v4708_v51 = vmax.f32 %v3753_v2, 0.0 }
 0xaa6   :  { %v16344_v58 = vpack.c.b16 %v6603_v23, %v6600_v60  ;;  %v13267_v60 = vld [vmem:[%s21048_s0 + $0x888] sm:$0xff]  ;;  %v5494_v23 = vpack.c.bf16 %v14310_v10, %v14310_v10  ;;  %v13314_v10 = vld [vmem:[%s21049_s2 + $0xf0] sm:$0xff] }
 0xaa7   :  { %v5116_v22 = vmax.f32 %v4684_v62, %v4708_v51  ;;  %v5909_v51 = vunpack.c.l.b16 %v5493_v6  ;;  %8113 = vmatpush.bf16.msra.mxu1 %v13314_v10 }
 0xaa8   :  { %21541 = vst [vmem:[#allocation163_spill] sm:$0xff] %v16344_v58  ;;  %v5910_v29 = vunpack.c.l.b16 %v5494_v23 }
 0xaa9   :  { %v5326_v31 = vmax.f32 %v5115_v61, %v5116_v22  ;;  %v16349_v12 = vpop.f32.mrf.mxu3  ;;  %v16367_v61 = vpack.c.b16 %v5909_v51, %v5908_v5 }
 0xaaa   :  { %v3755_v57 = vpop.f32.mrf.mxu0  ;;  %v16403_v6 = vpack.c.b16 %v5910_v29, %v5909_v51 }
 0xaab   :  { %v5446_v44 = vpack.c.bf16 %v5326_v31, %v5326_v31  ;;  %v3756_v45 = vadd.f32 %v15883_v18, %v3755_v57  ;;  %21543 = vst [vmem:[#allocation165_spill] sm:$0xff] %v16367_v61 }
 0xaac   :  { %21545 = vst [vmem:[#allocation167_spill] sm:$0xff] %v16403_v6  ;;  %v21577_v6 = vld [vmem:[#allocation29_spill] sm:$0xff] }
 0xaad   :  { %12124 = vmatmul.msk.bf16.gmra.mxu0 %vm2064_vm2, %v13164_v27  ;;  %v5654_v42 = vunpack.c.l.b16 %v5446_v44  ;;  %v4709_v14 = vmax.f32 %v3756_v45, 0.0  ;;  %v3703_v27 = vadd.f32 %v15883_v18, %v16063_v11  ;;  %v13268_v44 = vld [vmem:[%s21048_s0 + $0x890] sm:$0xff] }
 0xaaf   :  { %v16347_v55 = vpack.c.b16 %v5654_v42, %v5653_v41  ;;  %v5117_v2 = vmax.f32 %v4685_v8, %v4709_v14  ;;  %v4688_v45 = vmax.f32 %v3703_v27, 0.0  ;;  %v5513_v8 = vpack.c.bf16 %v16049_v63, %v16049_v63 }
 0xab0   :  { %12227 = vmatmul.msk.bf16.gmra.mxu3 %vm2064_vm2, %v13267_v60 }
 0xab1   :  { %21542 = vst [vmem:[#allocation164_spill] sm:$0xff] %v16347_v55  ;;  %v16360_v38 = vpop.f32.mrf.mxu3 }
 0xab2   :  { %v3757_v40 = vpop.f32.mrf.mxu0 }
 0xab3   :  { %v3758_v13 = vadd.f32 %v15883_v18, %v3757_v40 }
 0xab5   :  { %v4710_v41 = vmax.f32 %v3758_v13, 0.0  ;;  %v13304_v13 = vld [vmem:[%s21049_s2 + $0xa0] sm:$0xff] }
 0xab6   :  { %7946 = vmatpush.bf16.msrb.mxu3 %v13304_v13  ;;  %v21549_v13 = vld [vmem:[#allocation141_spill] sm:$0xff] }
 0xab7   :  { %v5118_v34 = vmax.f32 %v4686_v37, %v4710_v41  ;;  %v5514_v37 = vpack.c.bf16 %v16069_v0, %v16069_v0  ;;  %v5515_v10 = vpack.c.bf16 %v21549_v13, %v21549_v13 }
 0xab9   :  { %v5327_v35 = vmax.f32 %v5117_v2, %v5118_v34  ;;  %v16373_v31 = vpop.f32.mrf.mxu3  ;;  %v6091_v2 = vunpack.c.l.b16 %v5513_v8  ;;  %v6092_v34 = vunpack.c.l.b16 %v5514_v37  ;;  %v6093_v37 = vunpack.c.l.b16 %v5515_v10 }
 0xaba   :  { %v3760_v62 = vpop.f32.mrf.mxu0 }
 0xabb   :  { %v5447_v19 = vpack.c.bf16 %v5327_v35, %v5327_v35  ;;  %v3761_v16 = vadd.f32 %v15883_v18, %v3760_v62  ;;  %v16411_v62 = vld [vmem:[%s21047_s6] ss:$0 sm:$0xff] }
 0xabc   :  { %v3706_v51 = vadd.f32 %v16411_v62, %v16074_v48 }
 0xabd   :  { %12125 = vmatmul.msk.bf16.gmra.mxu0 %vm2064_vm2, %v13165_v21  ;;  %v5655_v22 = vunpack.c.l.b16 %v5447_v19  ;;  %v4711_v5 = vmax.f32 %v3761_v16, 0.0  ;;  %v16406_v21 = vpack.c.b16 %v6092_v34, %v6091_v2  ;;  %v3708_v16 = vadd.f32 %v16411_v62, %v16083_v49 }
 0xabf   :  { %v16371_v28 = vpack.c.b16 %v5655_v22, %v5654_v42  ;;  %v4687_v42 = vmax.f32 %v3701_v53, 0.0  ;;  %21546 = vst [vmem:[#allocation168_spill] sm:$0xff] %v16406_v21  ;;  %v4690_v23 = vmax.f32 %v3708_v16, 0.0 }
 0xac0   :  { %12228 = vmatmul.msk.bf16.gmra.mxu3 %vm2064_vm2, %v13268_v44  ;;  %v4689_v44 = vmax.f32 %v3706_v51, 0.0  ;;  %v16442_v51 = vpack.c.b16 %v6093_v37, %v6092_v34 }
 0xac1   :  { %21544 = vst [vmem:[#allocation166_spill] sm:$0xff] %v16371_v28  ;;  %5797 = vrot.lane.b32.xlu2 %v16371_v28, %s13490_s1  ;;  %v5119_v11 = vmax.f32 %v4687_v42, %v4711_v5  ;;  %v16388_v40 = vpop.f32.mrf.mxu3  ;;  %v13269_v5 = vld [vmem:[%s21048_s0 + $0x898] sm:$0xff]  ;;  %v21572_v28 = vld [vmem:[#allocation2_spill] sm:$0xff] }
 0xac2   :  { %v3762_v57 = vpop.f32.mrf.mxu0  ;;  %21551 = vst [vmem:[#allocation141_spill] sm:$0xff] %v16442_v51 }
 0xac3   :  { %v3763_v47 = vadd.f32 %v15883_v18, %v3762_v57  ;;  %v13166_v18 = vld [vmem:[%s21048_s0 + $0x560] sm:$0xff] }
 0xac5   :  { %v4712_v43 = vmax.f32 %v3763_v47, 0.0  ;;  %v21548_v47 = vld [vmem:[#allocation28_spill] sm:$0xff] }
 0xac7   :  { %v5120_v25 = vmax.f32 %v4688_v45, %v4712_v43 }
 0xac9   :  { %v5328_v14 = vmax.f32 %v5119_v11, %v5120_v25  ;;  %v16416_v19 = vpop.f32.mrf.mxu3  ;;  %v3711_v11 = vadd.f32 %v16411_v62, %v16097_v4 }
 0xaca   :  { %v3765_v60 = vpop.f32.mrf.mxu0 }
 0xacb   :  { %v5448_v41 = vpack.c.bf16 %v5328_v14, %v5328_v14  ;;  %v3766_v63 = vadd.f32 %v16411_v62, %v3765_v60  ;;  %v13167_v14 = vld [vmem:[%s21048_s0 + $0x568] sm:$0xff]  ;;  %v4691_v2 = vmax.f32 %v3711_v11, 0.0  ;;  %v13168_v11 = vld [vmem:[%s21048_s0 + $0x570] sm:$0xff] }
 0xacd   :  { %12126 = vmatmul.msk.bf16.gmra.mxu0 %vm2064_vm2, %v13166_v18  ;;  %v5656_v35 = vunpack.c.l.b16 %v5448_v41  ;;  %v4713_v27 = vmax.f32 %v3766_v63, 0.0 }
 0xacf   :  { %v16414_v0 = vpack.c.b16 %v5656_v35, %v5655_v22  ;;  %v5495_v22 = vpack.c.bf16 %v21548_v47, %v21548_v47  ;;  %v5121_v48 = vmax.f32 %v4689_v44, %v4713_v27 }
 0xad0   :  { %12229 = vmatmul.msk.bf16.gmra.mxu3 %vm2064_vm2, %v13269_v5 }
 0xad1   :  { %21547 = vst [vmem:[#allocation169_spill] sm:$0xff] %v16414_v0  ;;  %v5911_v43 = vunpack.c.l.b16 %v5495_v22  ;;  %v16429_v49 = vpop.f32.mrf.mxu3  ;;  %v13270_v22 = vld [vmem:[%s21048_s0 + $0x8a0] sm:$0xff] }
 0xad2   :  { %v3767_v53 = vpop.f32.mrf.mxu0 }
 0xad3   :  { %v3768_v57 = vadd.f32 %v16411_v62, %v3767_v53  ;;  %v16439_v41 = vpack.c.b16 %v5911_v43, %v5910_v29  ;;  %v16468_v10 = vpack.c.b16 %v16156_v17, %v5911_v43 }
 0xad5   :  { %v4714_v42 = vmax.f32 %v3768_v57, 0.0  ;;  %21550 = vst [vmem:[#allocation28_spill] sm:$0xff] %v16439_v41  ;;  %v21553_v57 = vld [vmem:[#allocation142_spill] sm:$0xff] }
 0xad6   :  { %v3713_v5 = vadd.f32 %v16411_v62, %v21553_v57 }
 0xad7   :  { %v5122_v45 = vmax.f32 %v4690_v23, %v4714_v42  ;;  %v21554_v42 = vld [vmem:[#allocation143_spill] sm:$0xff] }
 0xad8   :  { %v4692_v34 = vmax.f32 %v3713_v5, 0.0  ;;  %21556 = vst [vmem:[#allocation143_spill] sm:$0xff] %v16468_v10 }
 0xad9   :  { %v5329_v25 = vmax.f32 %v5121_v48, %v5122_v45  ;;  %v16446_v27 = vpop.f32.mrf.mxu3  ;;  %v3716_v48 = vadd.f32 %v16411_v62, %v21554_v42 }
 0xada   :  { %v3770_v18 = vpop.f32.mrf.mxu0 }
 0xadb   :  { %v3771_v60 = vadd.f32 %v16411_v62, %v3770_v18  ;;  %v5463_v8 = vpack.c.bf16 %v5329_v25, %v5329_v25 }
 0xadd   :  { %v4715_v63 = vmax.f32 %v3771_v60, 0.0  ;;  %12127 = vmatmul.msk.bf16.gmra.mxu0 %vm2064_vm2, %v13167_v14  ;;  %v5711_v4 = vunpack.c.l.b16 %v5463_v8  ;;  %v16464_v14 = vpop.f32.mrf.mxu1  ;;  %v4693_v60 = vmax.f32 %v3716_v48, 0.0  ;;  %v21562_v48 = vld [vmem:[#allocation145_spill] sm:$0xff] }
 0xade   :  { %21555 = vst [vmem:[#allocation142_spill] sm:$0xff] %v16464_v14 }
 0xadf   :  { %v5123_v16 = vmax.f32 %v4691_v2, %v4715_v63  ;;  %v16444_v53 = vpack.c.b16 %v5711_v4, %v5656_v35  ;;  %v16472_v63 = vpack.c.b16 %v16168_v26, %v6093_v37 }
 0xae0   :  { %12230 = vmatmul.msk.bf16.gmra.mxu3 %vm2064_vm2, %v13270_v22 }
 0xae1   :  { %21552 = vst [vmem:[#allocation170_spill] sm:$0xff] %v16444_v53  ;;  %5799 = vrot.lane.b32.xlu0 %v16444_v53, %s13490_s1  ;;  %v16457_v23 = vpop.f32.mrf.mxu3 }
 0xae2   :  { %v3772_v29 = vpop.f32.mrf.mxu0  ;;  %21557 = vst [vmem:[#allocation171_spill] sm:$0xff] %v16472_v63 }
 0xae3   :  { %v3773_v47 = vadd.f32 %v16411_v62, %v3772_v29  ;;  %v21559_v29 = vld [vmem:[#allocation144_spill] sm:$0xff] }
 0xae5   :  { %v4716_v44 = vmax.f32 %v3773_v47, 0.0  ;;  %v3718_v47 = vadd.f32 %v16411_v62, %v21559_v29  ;;  %v16488_v37 = vpop.f32.mrf.mxu1 }
 0xae6   :  { %21561 = vst [vmem:[#allocation173_spill] sm:$0xff] %v16488_v37 }
 0xae7   :  { %v5124_v35 = vmax.f32 %v4692_v34, %v4716_v44  ;;  %v13271_v34 = vld [vmem:[%s21048_s0 + $0x8a8] sm:$0xff] }
 0xae9   :  { %v5330_v45 = vmax.f32 %v5123_v16, %v5124_v35  ;;  %v16476_v5 = vpop.f32.mrf.mxu3 }
 0xaea   :  { %v3775_v25 = vpop.f32.mrf.mxu0 }
 0xaeb   :  { %v3776_v18 = vadd.f32 %v16411_v62, %v3775_v25  ;;  %v5471_v13 = vpack.c.bf16 %v5330_v45, %v5330_v45  ;;  %v3721_v45 = vadd.f32 %v16411_v62, %v21562_v48  ;;  %v13169_v25 = vld [vmem:[%s21048_s0 + $0x578] sm:$0xff] }
 0xaed   :  { %v4717_v8 = vmax.f32 %v3776_v18, 0.0  ;;  %12128 = vmatmul.msk.bf16.gmra.mxu0 %vm2064_vm2, %v13168_v11  ;;  %v5823_v2 = vunpack.c.l.b16 %v5471_v13 }
 0xaef   :  { %v5125_v16 = vmax.f32 %v4693_v60, %v4717_v8  ;;  %v16474_v57 = vpack.c.b16 %v5823_v2, %v5711_v4  ;;  %v4694_v4 = vmax.f32 %v3718_v47, 0.0  ;;  %v4695_v8 = vmax.f32 %v3721_v45, 0.0 }
 0xaf0   :  { %12231 = vmatmul.msk.bf16.gmra.mxu3 %vm2064_vm2, %v13271_v34  ;;  %v21564_v34 = vld [vmem:[#allocation146_spill] sm:$0xff] }
 0xaf1   :  { %21558 = vst [vmem:[#allocation172_spill] sm:$0xff] %v16474_v57  ;;  %v16492_v42 = vpop.f32.mrf.mxu3  ;;  %v5503_v57 = vpack.c.bf16 %v21584_v20, %v21584_v20  ;;  %v21587_v20 = vld [vmem:[#allocation8_spill] sm:$0xff] }
 0xaf2   :  { %v3777_v22 = vpop.f32.mrf.mxu0 }
 0xaf3   :  { %v3778_v17 = vadd.f32 %v16411_v62, %v3777_v22  ;;  %v5794_v43 = vpop.permute.xlu0 %5793 }
 0xaf4   :  { %v16486_v26 = vsel %vm6119_vm3, %v16233_v24, %v5794_v43 }
 0xaf5   :  { %21560 = vst [vmem:[#allocation144_spill] sm:$0xff] %v16486_v26  ;;  %v4718_v44 = vmax.f32 %v3778_v17, 0.0  ;;  %7733 = vmatmul.bf16.gmra.mxu1 %v16486_v26 }
 0xaf7   :  { %v5126_v35 = vmax.f32 %v4694_v4, %v4718_v44 }
 0xaf9   :  { %v5331_v11 = vmax.f32 %v5125_v16, %v5126_v35  ;;  %v16503_v43 = vpop.f32.mrf.mxu3  ;;  %v3723_v16 = vadd.f32 %v16411_v62, %v21564_v34  ;;  %v13272_v35 = vld [vmem:[%s21048_s0 + $0x8b0] sm:$0xff] }
 0xafa   :  { %v3780_v18 = vpop.f32.mrf.mxu0 }
 0xafb   :  { %v3781_v13 = vadd.f32 %v16411_v62, %v3780_v18  ;;  %v5479_v60 = vpack.c.bf16 %v5331_v11, %v5331_v11  ;;  %v4696_v48 = vmax.f32 %v3723_v16, 0.0  ;;  %v16515_v11 = vpop.f32.mrf.mxu1 }
 0xafc   :  { %21565 = vst [vmem:[#allocation146_spill] sm:$0xff] %v16515_v11  ;;  %v13275_v11 = vld [vmem:[%s21048_s0 + $0x8c8] sm:$0xff] }
 0xafd   :  { %v4719_v29 = vmax.f32 %v3781_v13, 0.0  ;;  %12129 = vmatmul.msk.bf16.gmra.mxu0 %vm2064_vm2, %v13169_v25  ;;  %v5847_v47 = vunpack.c.l.b16 %v5479_v60  ;;  %v13170_v60 = vld [vmem:[%s21048_s0 + $0x580] sm:$0xff] }
 0xaff   :  { %v5127_v22 = vmax.f32 %v4695_v8, %v4719_v29  ;;  %v16501_v17 = vpack.c.b16 %v5847_v47, %v5823_v2  ;;  %v13313_v2 = vld [vmem:[%s21049_s2 + $0xe8] sm:$0xff] }
 0xb00   :  { %12232 = vmatmul.msk.bf16.gmra.mxu3 %vm2064_vm2, %v13272_v35  ;;  %8114 = vmatpush.bf16.msra.mxu1 %v13313_v2  ;;  %v13171_v2 = vld [vmem:[%s21048_s0 + $0x588] sm:$0xff] }
 0xb01   :  { %21563 = vst [vmem:[#allocation145_spill] sm:$0xff] %v16501_v17 }
 0xb02   :  { %v3782_v4 = vpop.f32.mrf.mxu0 }
 0xb03   :  { %v3783_v44 = vadd.f32 %v16411_v62, %v3782_v4  ;;  %v16517_v18 = vpop.f32.mrf.mxu3 }
 0xb05   :  { %v4720_v45 = vmax.f32 %v3783_v44, 0.0  ;;  %v16529_v44 = vpop.f32.mrf.mxu1 }
 0xb06   :  { %21567 = vst [vmem:[#allocation175_spill] sm:$0xff] %v16529_v44 }
 0xb07   :  { %v5128_v25 = vmax.f32 %v4696_v48, %v4720_v45 }
 0xb09   :  { %v5332_v13 = vmax.f32 %v5127_v22, %v5128_v25  ;;  %v13273_v22 = vld [vmem:[%s21048_s0 + $0x8b8] sm:$0xff] }
 0xb0a   :  { %v16522_v8 = vpop.f32.mrf.mxu0 }
 0xb0b   :  { %v5487_v29 = vpack.c.bf16 %v5332_v13, %v5332_v13  ;;  %v16527_v4 = vpop.f32.mrf.mxu3 }
 0xb0d   :  { %12130 = vmatmul.msk.bf16.gmra.mxu0 %vm2064_vm2, %v13170_v60  ;;  %v5887_v34 = vunpack.c.l.b16 %v5487_v29  ;;  %v16549_v13 = vpop.f32.mrf.mxu1  ;;  %v13303_v60 = vld [vmem:[%s21049_s2 + $0x98] sm:$0xff] }
 0xb0e   :  { %21569 = vst [vmem:[#allocation177_spill] sm:$0xff] %v16549_v13  ;;  %7947 = vmatpush.bf16.msrb.mxu3 %v13303_v60  ;;  %v3856_v60 = vadd.f32 %v16411_v62, %v21572_v28 }
 0xb0f   :  { %v16525_v16 = vpack.c.b16 %v5887_v34, %v5847_v47 }
 0xb10   :  { %12233 = vmatmul.msk.bf16.gmra.mxu3 %vm2064_vm2, %v13273_v22  ;;  %v13274_v22 = vld [vmem:[%s21048_s0 + $0x8c0] sm:$0xff] }
 0xb11   :  { %21566 = vst [vmem:[#allocation174_spill] sm:$0xff] %v16525_v16 }
 0xb12   :  { %v16531_v35 = vpop.f32.mrf.mxu0 }
 0xb13   :  { %v5796_v48 = vpop.permute.xlu1 %5795  ;;  %v16542_v47 = vpop.f32.mrf.mxu3 }
 0xb14   :  { %v16538_v45 = vsel %vm6119_vm3, %v16292_v46, %v5796_v48 }
 0xb15   :  { %21568 = vst [vmem:[#allocation176_spill] sm:$0xff] %v16538_v45  ;;  %7738 = vmatmul.bf16.gmra.mxu1 %v16538_v45  ;;  %v16566_v53 = vpop.f32.mrf.mxu1 }
 0xb16   :  { %21571 = vst [vmem:[#allocation179_spill] sm:$0xff] %v16566_v53 }
 0xb1a   :  { %v16547_v25 = vpop.f32.mrf.mxu0 }
 0xb1b   :  { %v16555_v29 = vpop.f32.mrf.mxu3  ;;  %v5798_v34 = vpop.permute.xlu2 %5797 }
 0xb1c   :  { %v16564_v26 = vsel %vm6119_vm3, %v16347_v55, %v5798_v34  ;;  %v4749_v34 = vmax.f32 %v3856_v60, 0.0 }
 0xb1d   :  { %12131 = vmatmul.msk.bf16.gmra.mxu0 %vm2064_vm2, %v13171_v2  ;;  %21570 = vst [vmem:[#allocation178_spill] sm:$0xff] %v16564_v26 }
 0xb20   :  { %12234 = vmatmul.msk.bf16.gmra.mxu3 %vm2064_vm2, %v13274_v22  ;;  %v21573_v22 = vld [vmem:[#allocation3_spill] sm:$0xff] }
 0xb21   :  { %v3858_v45 = vadd.f32 %v16411_v62, %v21573_v22  ;;  %v21574_v22 = vld [vmem:[#allocation4_spill] sm:$0xff] }
 0xb22   :  { %v16557_v48 = vpop.f32.mrf.mxu0 }
 0xb23   :  { %v16570_v2 = vpop.f32.mrf.mxu3  ;;  %v4750_v14 = vmax.f32 %v3858_v45, 0.0  ;;  %v3861_v45 = vadd.f32 %v16411_v62, %v21574_v22  ;;  %v21576_v22 = vld [vmem:[#allocation30_spill] sm:$0xff] }
 0xb25   :  { %7743 = vmatmul.bf16.gmra.mxu1 %v16564_v26  ;;  %v4751_v56 = vmax.f32 %v3861_v45, 0.0  ;;  %v13174_v45 = vld [vmem:[%s21048_s0 + $0x5a0] sm:$0xff] }
 0xb2a   :  { %v3795_v32 = vpop.f32.mrf.mxu0 }
 0xb2b   :  { %v3796_v44 = vadd.f32 %v16411_v62, %v3795_v32  ;;  %v16579_v26 = vpop.f32.mrf.mxu3 }
 0xb2d   :  { %v4725_v37 = vmax.f32 %v3796_v44, 0.0  ;;  %12132 = vmatmul.msk.bf16.gmra.mxu0 %vm2064_vm2, %v13172_v7 }
 0xb2f   :  { %v5133_v53 = vmax.f32 %v4725_v37, %v4749_v34  ;;  %v13173_v37 = vld [vmem:[%s21048_s0 + $0x598] sm:$0xff] }
 0xb30   :  { %12235 = vmatmul.msk.bf16.gmra.mxu3 %vm2064_vm2, %v13275_v11 }
 0xb32   :  { %v3797_v13 = vpop.f32.mrf.mxu0 }
 0xb33   :  { %v3798_v28 = vadd.f32 %v16411_v62, %v3797_v13  ;;  %v16588_v44 = vpop.f32.mrf.mxu3 }
 0xb35   :  { %v4726_v58 = vmax.f32 %v3798_v28, 0.0  ;;  %v21575_v28 = vld [vmem:[#allocation5_spill] sm:$0xff] }
 0xb37   :  { %v5134_v32 = vmax.f32 %v4726_v58, %v4750_v14  ;;  %v3863_v58 = vadd.f32 %v16411_v62, %v21575_v28  ;;  %v5502_v28 = vpack.c.bf16 %v21576_v22, %v21576_v22 }
 0xb39   :  { %v5335_v7 = vmax.f32 %v5133_v53, %v5134_v32  ;;  %v13276_v32 = vld [vmem:[%s21048_s0 + $0x8d0] sm:$0xff] }
 0xb3a   :  { %v3800_v60 = vpop.f32.mrf.mxu0 }
 0xb3b   :  { %v3801_v13 = vadd.f32 %v16411_v62, %v3800_v60  ;;  %v16595_v34 = vpop.f32.mrf.mxu3 }
 0xb3d   :  { %12133 = vmatmul.msk.bf16.gmra.mxu0 %vm2064_vm2, %v13173_v37  ;;  %v4727_v11 = vmax.f32 %v3801_v13, 0.0  ;;  %v4752_v37 = vmax.f32 %v3863_v58, 0.0  ;;  %v5501_v13 = vpack.c.bf16 %v21577_v6, %v21577_v6 }
 0xb3f   :  { %v5135_v60 = vmax.f32 %v4727_v11, %v4751_v56  ;;  %v6036_v41 = vunpack.c.l.b16 %v5501_v13  ;;  %v13312_v56 = vld [vmem:[%s21049_s2 + $0xe0] sm:$0xff] }
 0xb40   :  { %12236 = vmatmul.msk.bf16.gmra.mxu3 %vm2064_vm2, %v13276_v32  ;;  %v16615_v32 = vpop.f32.mrf.mxu1  ;;  %8115 = vmatpush.bf16.msra.mxu1 %v13312_v56 }
 0xb41   :  { %21578 = vst [vmem:[#allocation2_spill] sm:$0xff] %v16615_v32 }
 0xb42   :  { %v3802_v14 = vpop.f32.mrf.mxu0 }
 0xb43   :  { %v3803_v53 = vadd.f32 %v16411_v62, %v3802_v14  ;;  %v16606_v36 = vpop.f32.mrf.mxu3  ;;  %v5451_v14 = vpack.c.bf16 %v5335_v7, %v5335_v7 }
 0xb45   :  { %v4728_v30 = vmax.f32 %v3803_v53, 0.0  ;;  %v6037_v53 = vunpack.c.l.b16 %v5502_v28  ;;  %v21581_v28 = vld [vmem:[#allocation7_spill] sm:$0xff] }
 0xb47   :  { %v5136_v16 = vmax.f32 %v4728_v30, %v4752_v37  ;;  %v16620_v11 = vpack.c.b16 %v6037_v53, %v6036_v41  ;;  %v16622_v37 = vunpack.c.l.b16 %v5451_v14  ;;  %v3868_v41 = vadd.f32 %v16411_v62, %v21581_v28 }
 0xb48   :  { %v16643_v51 = vpop.f32.mrf.mxu1 }
 0xb49   :  { %v5336_v33 = vmax.f32 %v5135_v60, %v5136_v16  ;;  %21579 = vst [vmem:[#allocation3_spill] sm:$0xff] %v16620_v11  ;;  %v4754_v59 = vmax.f32 %v3868_v41, 0.0 }
 0xb4a   :  { %v3805_v58 = vpop.f32.mrf.mxu0  ;;  %21583 = vst [vmem:[#allocation5_spill] sm:$0xff] %v16643_v51 }
 0xb4b   :  { %v5452_v30 = vpack.c.bf16 %v5336_v33, %v5336_v33  ;;  %v3806_v16 = vadd.f32 %v16411_v62, %v3805_v58  ;;  %v16629_v60 = vpop.f32.mrf.mxu3  ;;  %v21580_v33 = vld [vmem:[#allocation6_spill] sm:$0xff]  ;;  %v13277_v58 = vld [vmem:[%s21048_s0 + $0x8d8] sm:$0xff] }
 0xb4c   :  { %v3866_v22 = vadd.f32 %v16411_v62, %v21580_v33 }
 0xb4d   :  { %12134 = vmatmul.msk.bf16.gmra.mxu0 %vm2064_vm2, %v13174_v45  ;;  %v5660_v6 = vunpack.c.l.b16 %v5452_v30  ;;  %v4729_v14 = vmax.f32 %v3806_v16, 0.0 }
 0xb4e   :  { %v4753_v56 = vmax.f32 %v3866_v22, 0.0  ;;  %v13175_v22 = vld [vmem:[%s21048_s0 + $0x5a8] sm:$0xff] }
 0xb4f   :  { %v16627_v7 = vpack.c.b16 %v5660_v6, %v16622_v37 }
 0xb50   :  { %12237 = vmatmul.msk.bf16.gmra.mxu3 %vm2064_vm2, %v13277_v58  ;;  %v5137_v16 = vmax.f32 %v4729_v14, %v4753_v56 }
 0xb52   :  { %v3807_v13 = vpop.f32.mrf.mxu0 }
 0xb53   :  { %v3808_v32 = vadd.f32 %v16411_v62, %v3807_v13  ;;  %v5800_v45 = vpop.permute.xlu0 %5799  ;;  %v16647_v13 = vpop.f32.mrf.mxu3 }
 0xb54   :  { %v16641_v30 = vsel %vm6119_vm3, %v16414_v0, %v5800_v45  ;;  %v6038_v45 = vunpack.c.l.b16 %v5503_v57 }
 0xb55   :  { %21582 = vst [vmem:[#allocation4_spill] sm:$0xff] %v16641_v30  ;;  %v4730_v33 = vmax.f32 %v3808_v32, 0.0  ;;  %7748 = vmatmul.bf16.gmra.mxu1 %v16641_v30 }
 0xb56   :  { %v16654_v32 = vpack.c.b16 %v6038_v45, %v6037_v53 }
 0xb57   :  { %v5138_v28 = vmax.f32 %v4730_v33, %v4754_v59  ;;  %v3871_v33 = vadd.f32 %v16411_v62, %v21587_v20 }
 0xb58   :  { %21585 = vst [vmem:[#allocation30_spill] sm:$0xff] %v16654_v32 }
 0xb59   :  { %v5337_v9 = vmax.f32 %v5137_v16, %v5138_v28  ;;  %v21588_v16 = vld [vmem:[#allocation9_spill] sm:$0xff] }
 0xb5a   :  { %v3810_v41 = vpop.f32.mrf.mxu0  ;;  %v3873_v28 = vadd.f32 %v16411_v62, %v21588_v16  ;;  %v21589_v16 = vld [vmem:[#allocation32_spill] sm:$0xff] }
 0xb5b   :  { %v5453_v51 = vpack.c.bf16 %v5337_v9, %v5337_v9  ;;  %v3811_v59 = vadd.f32 %v16411_v62, %v3810_v41  ;;  %v16660_v56 = vpop.f32.mrf.mxu3  ;;  %v5504_v55 = vpack.c.bf16 %v21589_v16, %v21589_v16 }
 0xb5d   :  { %12135 = vmatmul.msk.bf16.gmra.mxu0 %vm2064_vm2, %v13175_v22  ;;  %v5661_v58 = vunpack.c.l.b16 %v5453_v51  ;;  %v4731_v57 = vmax.f32 %v3811_v59, 0.0  ;;  %v13278_v51 = vld [vmem:[%s21048_s0 + $0x8e0] sm:$0xff]  ;;  %v4756_v22 = vmax.f32 %v3873_v28, 0.0  ;;  %v4266_v59 = vadd.f32 %v16411_v62, %v16334_v1 }
 0xb5e   :  { %v6039_v63 = vunpack.c.l.b16 %v5504_v55  ;;  %v21594_v55 = vld [vmem:[#allocation11_spill] sm:$0xff] }
 0xb5f   :  { %v16658_v14 = vpack.c.b16 %v5661_v58, %v5660_v6  ;;  %v4755_v6 = vmax.f32 %v3871_v33, 0.0 }
 0xb60   :  { %12238 = vmatmul.msk.bf16.gmra.mxu3 %vm2064_vm2, %v13278_v51  ;;  %v16679_v28 = vpack.c.b16 %v6039_v63, %v6038_v45  ;;  %v3878_v45 = vadd.f32 %v16411_v62, %v21594_v55 }
 0xb61   :  { %21586 = vst [vmem:[#allocation29_spill] sm:$0xff] %v16658_v14  ;;  %5803 = vrot.lane.b32.xlu2 %v16658_v14, %s13490_s1  ;;  %v5139_v20 = vmax.f32 %v4731_v57, %v4755_v6  ;;  %v4268_v57 = vadd.f32 %v16411_v62, %v16349_v12 }
 0xb62   :  { %v3812_v9 = vpop.f32.mrf.mxu0  ;;  %21591 = vst [vmem:[#allocation6_spill] sm:$0xff] %v16679_v28 }
 0xb63   :  { %v3813_v53 = vadd.f32 %v16411_v62, %v3812_v9  ;;  %v4325_v3 = vpop.f32.mrf.mxu3  ;;  %v21590_v9 = vld [vmem:[#allocation39_spill] sm:$0xff] }
 0xb64   :  { %v4326_v6 = vadd.f32 %v16411_v62, %v4325_v3 }
 0xb65   :  { %v4732_v41 = vmax.f32 %v3813_v53, 0.0  ;;  %v4913_v53 = vmax.f32 %v4266_v59, 0.0  ;;  %v21595_v59 = vld [vmem:[#allocation47_spill] sm:$0xff] }
 0xb66   :  { %v4937_v1 = vmax.f32 %v4326_v6, 0.0  ;;  %v13279_v6 = vld [vmem:[%s21048_s0 + $0x8e8] sm:$0xff] }
 0xb67   :  { %v5140_v30 = vmax.f32 %v4732_v41, %v4756_v22 }
 0xb68   :  { %v5225_v12 = vmax.f32 %v4913_v53, %v4937_v1  ;;  %v4271_v1 = vadd.f32 %v16411_v62, %v16360_v38  ;;  %v13302_v38 = vld [vmem:[%s21049_s2 + $0x90] sm:$0xff] }
 0xb69   :  { %v5338_v14 = vmax.f32 %v5139_v20, %v5140_v30  ;;  %5917 = vrot.lane.b32.xlu2 %v21590_v9, %s13490_s1  ;;  %v21593_v30 = vld [vmem:[#allocation10_spill] sm:$0xff]  ;;  %7948 = vmatpush.bf16.msrb.mxu3 %v13302_v38 }
 0xb6a   :  { %v3815_v21 = vpop.f32.mrf.mxu0  ;;  %v3876_v20 = vadd.f32 %v16411_v62, %v21593_v30 }
 0xb6b   :  { %v5454_v33 = vpack.c.bf16 %v5338_v14, %v5338_v14  ;;  %v3816_v22 = vadd.f32 %v16411_v62, %v3815_v21  ;;  %v4327_v16 = vpop.f32.mrf.mxu3  ;;  %v4914_v14 = vmax.f32 %v4268_v57, 0.0 }
 0xb6c   :  { %v4328_v9 = vadd.f32 %v16411_v62, %v4327_v16  ;;  %v4757_v30 = vmax.f32 %v3876_v20, 0.0  ;;  %v21596_v16 = vld [vmem:[#allocation33_spill] sm:$0xff]  ;;  %v21598_v20 = vld [vmem:[#allocation62_spill] sm:$0xff] }
 0xb6d   :  { %v5662_v51 = vunpack.c.l.b16 %v5454_v33  ;;  %v4733_v33 = vmax.f32 %v3816_v22, 0.0 }
 0xb6f   :  { %v16685_v41 = vpack.c.b16 %v5662_v51, %v5661_v58  ;;  %v4938_v58 = vmax.f32 %v4328_v9, 0.0  ;;  %v5141_v57 = vmax.f32 %v4733_v33, %v4757_v30  ;;  %v5505_v9 = vpack.c.bf16 %v21596_v16, %v21596_v16 }
 0xb70   :  { %12239 = vmatmul.msk.bf16.gmra.mxu3 %vm2064_vm2, %v13279_v6 }
 0xb71   :  { %21592 = vst [vmem:[#allocation7_spill] sm:$0xff] %v16685_v41  ;;  %5923 = vrot.lane.b32.xlu2 %v21595_v59, %s13490_s1  ;;  %v4758_v41 = vmax.f32 %v3878_v45, 0.0  ;;  %v5226_v55 = vmax.f32 %v4914_v14, %v4938_v58  ;;  %v6040_v14 = vunpack.c.l.b16 %v5505_v9 }
 0xb72   :  { %v3817_v3 = vpop.f32.mrf.mxu0 }
 0xb73   :  { %v3818_v21 = vadd.f32 %v16411_v62, %v3817_v3  ;;  %v5381_v53 = vmax.f32 %v5225_v12, %v5226_v55  ;;  %v4330_v22 = vpop.f32.mrf.mxu3  ;;  %v21597_v3 = vld [vmem:[#allocation12_spill] sm:$0xff]  ;;  %v16712_v33 = vpack.c.b16 %v6040_v14, %v6039_v63 }
 0xb74   :  { %v3881_v28 = vadd.f32 %v16411_v62, %v21597_v3  ;;  %v4331_v12 = vadd.f32 %v16411_v62, %v4330_v22  ;;  %v21601_v3 = vld [vmem:[#allocation13_spill] sm:$0xff]  ;;  %v21602_v63 = vld [vmem:[#allocation68_spill] sm:$0xff] }
 0xb75   :  { %v4734_v11 = vmax.f32 %v3818_v21, 0.0  ;;  %21599 = vst [vmem:[#allocation31_spill] sm:$0xff] %v16712_v33 }
 0xb76   :  { %v4759_v58 = vmax.f32 %v3881_v28, 0.0  ;;  %v4939_v55 = vmax.f32 %v4331_v12, 0.0  ;;  %v4276_v12 = vadd.f32 %v16411_v62, %v16388_v40 }
 0xb77   :  { %v5142_v59 = vmax.f32 %v4734_v11, %v4758_v41  ;;  %v4915_v41 = vmax.f32 %v4271_v1, 0.0  ;;  %v3883_v1 = vadd.f32 %v16411_v62, %v21601_v3  ;;  %v21604_v3 = vld [vmem:[#allocation34_spill] sm:$0xff] }
 0xb79   :  { %v5339_v39 = vmax.f32 %v5141_v57, %v5142_v59  ;;  %5925 = vrot.lane.b32.xlu2 %v21598_v20, %s13490_s1  ;;  %v4273_v59 = vadd.f32 %v16411_v62, %v16373_v31  ;;  %v5227_v16 = vmax.f32 %v4915_v41, %v4939_v55  ;;  %v5525_v41 = vpack.c.bf16 %v5381_v53, %v5381_v53 }
 0xb7a   :  { %v3820_v45 = vpop.f32.mrf.mxu0 }
 0xb7b   :  { %v5455_v21 = vpack.c.bf16 %v5339_v39, %v5339_v39  ;;  %v3821_v11 = vadd.f32 %v16411_v62, %v3820_v45  ;;  %v4332_v9 = vpop.f32.mrf.mxu3  ;;  %v4916_v20 = vmax.f32 %v4273_v59, 0.0 }
 0xb7c   :  { %v4333_v31 = vadd.f32 %v16411_v62, %v4332_v9 }
 0xb7d   :  { %v4735_v6 = vmax.f32 %v3821_v11, 0.0  ;;  %v5663_v30 = vunpack.c.l.b16 %v5455_v21  ;;  %v4760_v21 = vmax.f32 %v3883_v1, 0.0  ;;  %v21605_v1 = vld [vmem:[#allocation77_spill] sm:$0xff] }
 0xb7e   :  { %v4940_v45 = vmax.f32 %v4333_v31, 0.0  ;;  %v5506_v31 = vpack.c.bf16 %v21604_v3, %v21604_v3 }
 0xb7f   :  { %v5143_v39 = vmax.f32 %v4735_v6, %v4759_v58  ;;  %v16716_v57 = vpack.c.b16 %v5663_v30, %v5662_v51  ;;  %v13280_v51 = vld [vmem:[%s21048_s0 + $0x8f0] sm:$0xff]  ;;  %v21603_v6 = vld [vmem:[#allocation14_spill] sm:$0xff] }
 0xb80   :  { %v5228_v38 = vmax.f32 %v4916_v20, %v4940_v45  ;;  %12240 = vmatmul.msk.bf16.gmra.mxu3 %vm2064_vm2, %v13280_v51  ;;  %v3886_v55 = vadd.f32 %v16411_v62, %v21603_v6  ;;  %v21606_v20 = vld [vmem:[#allocation43_spill] sm:$0xff]  ;;  %v6041_v40 = vunpack.c.l.b16 %v5506_v31 }
 0xb81   :  { %21600 = vst [vmem:[#allocation8_spill] sm:$0xff] %v16716_v57  ;;  %5931 = vrot.lane.b32.xlu2 %v21602_v63, %s13490_s1  ;;  %5805 = vrot.lane.b32.xlu0 %v16716_v57, %s13490_s1  ;;  %v21618_v63 = vld [vmem:[#allocation95_spill] sm:$0xff] }
 0xb82   :  { %v3822_v28 = vpop.f32.mrf.mxu0  ;;  %v5382_v59 = vmax.f32 %v5227_v16, %v5228_v38  ;;  %v4917_v16 = vmax.f32 %v4276_v12, 0.0  ;;  %v4761_v38 = vmax.f32 %v3886_v55, 0.0  ;;  %v21611_v55 = vld [vmem:[#allocation15_spill] sm:$0xff] }
 0xb83   :  { %v3823_v22 = vadd.f32 %v16411_v62, %v3822_v28  ;;  %v4335_v9 = vpop.f32.mrf.mxu3 }
 0xb84   :  { %v5526_v45 = vpack.c.bf16 %v5382_v59, %v5382_v59 }
 0xb85   :  { %v4736_v11 = vmax.f32 %v3823_v22, 0.0  ;;  %v16740_v22 = vunpack.c.l.b16 %v5525_v41  ;;  %v4278_v41 = vadd.f32 %v16411_v62, %v16416_v19  ;;  %v21613_v19 = vld [vmem:[#allocation26_spill] sm:$0xff] }
 0xb86   :  { %v16749_v6 = vunpack.c.l.b16 %v5526_v45  ;;  %v21612_v45 = vld [vmem:[#allocation83_spill] sm:$0xff] }
 0xb87   :  { %v5144_v58 = vmax.f32 %v4736_v11, %v4760_v21  ;;  %21607 = vst [vmem:[#allocation9_spill] sm:$0xff] %v16740_v22  ;;  %v13311_v11 = vld [vmem:[%s21049_s2 + $0xd8] sm:$0xff]  ;;  %v21617_v22 = vld [vmem:[#allocation16_spill] sm:$0xff] }
 0xb88   :  { %21609 = vst [vmem:[#allocation39_spill] sm:$0xff] %v16749_v6  ;;  %8116 = vmatpush.bf16.msra.mxu1 %v13311_v11 }
 0xb89   :  { %v5340_v28 = vmax.f32 %v5143_v39, %v5144_v58  ;;  %5933 = vrot.lane.b32.xlu2 %v21605_v1, %s13490_s1  ;;  %5919 = vrot.lane.b32.xlu0 %v21606_v20, %s13490_s1  ;;  %v4336_v39 = vadd.f32 %v16411_v62, %v4335_v9  ;;  %v16747_v58 = vpack.c.b16 %v6041_v40, %v6040_v14 }
 0xb8a   :  { %v3825_v53 = vpop.f32.mrf.mxu0  ;;  %v3888_v14 = vadd.f32 %v16411_v62, %v21611_v55 }
 0xb8b   :  { %v5456_v51 = vpack.c.bf16 %v5340_v28, %v5340_v28  ;;  %v3826_v21 = vadd.f32 %v16411_v62, %v3825_v53  ;;  %21608 = vst [vmem:[#allocation32_spill] sm:$0xff] %v16747_v58  ;;  %v4941_v12 = vmax.f32 %v4336_v39, 0.0  ;;  %v4337_v9 = vpop.f32.mrf.mxu3  ;;  %v4918_v53 = vmax.f32 %v4278_v41, 0.0  ;;  %v21646_v58 = vld [vmem:[#allocation120_spill] sm:$0xff] }
 0xb8c   :  { %v4338_v11 = vadd.f32 %v16411_v62, %v4337_v9 }
 0xb8d   :  { %v5664_v3 = vunpack.c.l.b16 %v5456_v51  ;;  %v4737_v59 = vmax.f32 %v3826_v21, 0.0  ;;  %v5229_v1 = vmax.f32 %v4917_v16, %v4941_v12  ;;  %v21614_v51 = vld [vmem:[#allocation24_spill] sm:$0xff]  ;;  %v4762_v12 = vmax.f32 %v3888_v14, 0.0 }
 0xb8e   :  { %v21615_v21 = vpack.c.b16 %v21613_v19, %v21614_v51  ;;  %v4281_v51 = vadd.f32 %v16411_v62, %v16429_v49  ;;  %v21619_v14 = vld [vmem:[#allocation64_spill] sm:$0xff] }
 0xb8f   :  { %v5145_v28 = vmax.f32 %v4737_v59, %v4761_v38  ;;  %v16755_v20 = vpack.c.b16 %v5664_v3, %v5663_v30  ;;  %v4942_v30 = vmax.f32 %v4338_v11, 0.0  ;;  %v13281_v38 = vld [vmem:[%s21048_s0 + $0x8f8] sm:$0xff]  ;;  %v21616_v59 = vld [vmem:[#allocation35_spill] sm:$0xff]  ;;  %v3891_v11 = vadd.f32 %v16411_v62, %v21617_v22 }
 0xb90   :  { %v5507_v41 = vpack.c.bf16 %v21616_v59, %v21616_v59  ;;  %12241 = vmatmul.msk.bf16.gmra.mxu3 %vm2064_vm2, %v13281_v38  ;;  %v13301_v22 = vld [vmem:[%s21049_s2 + $0x88] sm:$0xff] }
 0xb91   :  { %21610 = vst [vmem:[#allocation10_spill] sm:$0xff] %v16755_v20  ;;  %5939 = vrot.lane.b32.xlu2 %v21612_v45, %s13490_s1  ;;  %5857 = vrot.lane.b32.xlu0 %v21615_v21, %s13490_s1  ;;  %v5230_v31 = vmax.f32 %v4918_v53, %v4942_v30  ;;  %v4919_v30 = vmax.f32 %v4281_v51, 0.0 }
 0xb92   :  { %v3827_v39 = vpop.f32.mrf.mxu0  ;;  %7949 = vmatpush.bf16.msrb.mxu3 %v13301_v22 }
 0xb93   :  { %v3828_v16 = vadd.f32 %v16411_v62, %v3827_v39  ;;  %v5383_v21 = vmax.f32 %v5229_v1, %v5230_v31  ;;  %v6042_v39 = vunpack.c.l.b16 %v5507_v41  ;;  %v4340_v57 = vpop.f32.mrf.mxu3  ;;  %v4763_v1 = vmax.f32 %v3891_v11, 0.0  ;;  %v21623_v11 = vld [vmem:[#allocation17_spill] sm:$0xff] }
 0xb94   :  { %v4341_v31 = vadd.f32 %v16411_v62, %v4340_v57 }
 0xb95   :  { %v4738_v55 = vmax.f32 %v3828_v16, 0.0  ;;  %v5527_v16 = vpack.c.bf16 %v5383_v21, %v5383_v21 }
 0xb97   :  { %v5146_v9 = vmax.f32 %v4738_v55, %v4762_v12  ;;  %v16788_v59 = vunpack.c.l.b16 %v5527_v16  ;;  %v4943_v12 = vmax.f32 %v4341_v31, 0.0  ;;  %v21625_v16 = vld [vmem:[#allocation58_spill] sm:$0xff] }
 0xb99   :  { %v5341_v45 = vmax.f32 %v5145_v28, %v5146_v9  ;;  %5941 = vrot.lane.b32.xlu2 %v21618_v63, %s13490_s1  ;;  %5927 = vrot.lane.b32.xlu0 %v21619_v14, %s13490_s1  ;;  %v16786_v28 = vpack.c.b16 %v6042_v39, %v6041_v40  ;;  %21621 = vst [vmem:[#allocation33_spill] sm:$0xff] %v16788_v59  ;;  %v13300_v40 = vld [vmem:[%s21049_s2 + $0x80] sm:$0xff] }
 0xb9a   :  { %v3830_v53 = vpop.f32.mrf.mxu0  ;;  %v4283_v63 = vadd.f32 %v16411_v62, %v16446_v27  ;;  %v5231_v51 = vmax.f32 %v4919_v30, %v4943_v12  ;;  %v3893_v14 = vadd.f32 %v16411_v62, %v21623_v11  ;;  %7950 = vmatpush.bf16.msrb.mxu3 %v13300_v40  ;;  %v21626_v11 = vld [vmem:[#allocation19_spill] sm:$0xff]  ;;  %v21628_v40 = vld [vmem:[#allocation118_spill] sm:$0xff] }
 0xb9b   :  { %v5464_v38 = vpack.c.bf16 %v5341_v45, %v5341_v45  ;;  %v3831_v49 = vadd.f32 %v16411_v62, %v3830_v53  ;;  %21620 = vst [vmem:[#allocation11_spill] sm:$0xff] %v16786_v28  ;;  %v4342_v21 = vpop.f32.mrf.mxu3  ;;  %v21624_v53 = vld [vmem:[#allocation101_spill] sm:$0xff]  ;;  %v3896_v45 = vadd.f32 %v16411_v62, %v21626_v11 }
 0xb9c   :  { %v4920_v27 = vmax.f32 %v4283_v63, 0.0  ;;  %v4764_v31 = vmax.f32 %v3893_v14, 0.0  ;;  %v21629_v14 = vld [vmem:[#allocation79_spill] sm:$0xff] }
 0xb9d   :  { %v4739_v41 = vmax.f32 %v3831_v49, 0.0  ;;  %v5712_v55 = vunpack.c.l.b16 %v5464_v38  ;;  %v4343_v38 = vadd.f32 %v16411_v62, %v4342_v21 }
 0xb9f   :  { %v5147_v57 = vmax.f32 %v4739_v41, %v4763_v1  ;;  %v16794_v9 = vpack.c.b16 %v5712_v55, %v5664_v3  ;;  %v4944_v49 = vmax.f32 %v4343_v38, 0.0  ;;  %v4286_v41 = vadd.f32 %v16411_v62, %v16457_v23 }
 0xba1   :  { %21622 = vst [vmem:[#allocation12_spill] sm:$0xff] %v16794_v9  ;;  %5947 = vrot.lane.b32.xlu2 %v21624_v53, %s13490_s1  ;;  %5859 = vrot.lane.b32.xlu0 %v21625_v16, %s13490_s1  ;;  %v5232_v22 = vmax.f32 %v4920_v27, %v4944_v49  ;;  %v21627_v16 = vld [vmem:[#allocation36_spill] sm:$0xff]  ;;  %v4921_v23 = vmax.f32 %v4286_v41, 0.0 }
 0xba2   :  { %v3832_v30 = vpop.f32.mrf.mxu0  ;;  %v5508_v21 = vpack.c.bf16 %v21627_v16, %v21627_v16 }
 0xba3   :  { %v3833_v3 = vadd.f32 %v16411_v62, %v3832_v30  ;;  %v5384_v12 = vmax.f32 %v5231_v51, %v5232_v22  ;;  %v4345_v53 = vpop.f32.mrf.mxu3 }
 0xba4   :  { %v6043_v38 = vunpack.c.l.b16 %v5508_v21  ;;  %v4346_v49 = vadd.f32 %v16411_v62, %v4345_v53  ;;  %v21633_v53 = vld [vmem:[#allocation20_spill] sm:$0xff] }
 0xba5   :  { %v4740_v1 = vmax.f32 %v3833_v3, 0.0  ;;  %v5528_v30 = vpack.c.bf16 %v5384_v12, %v5384_v12 }
 0xba7   :  { %v5148_v63 = vmax.f32 %v4740_v1, %v4764_v31  ;;  %v4765_v31 = vmax.f32 %v3896_v45, 0.0  ;;  %v16819_v1 = vpack.c.b16 %v6043_v38, %v6042_v39  ;;  %v16821_v16 = vunpack.c.l.b16 %v5528_v30 }
 0xba8   :  { %v3898_v39 = vadd.f32 %v16411_v62, %v21633_v53 }
 0xba9   :  { %v5342_v6 = vmax.f32 %v5147_v57, %v5148_v63  ;;  %5949 = vrot.lane.b32.xlu2 %v21628_v40, %s13490_s1  ;;  %5935 = vrot.lane.b32.xlu0 %v21629_v14, %s13490_s1  ;;  %21630 = vst [vmem:[#allocation62_spill] sm:$0xff] %v16819_v1  ;;  %v4288_v57 = vadd.f32 %v16411_v62, %v16476_v5  ;;  %v4945_v63 = vmax.f32 %v4346_v49, 0.0  ;;  %v21634_v14 = vld [vmem:[#allocation124_spill] sm:$0xff] }
 0xbaa   :  { %v3835_v27 = vpop.f32.mrf.mxu0  ;;  %21631 = vst [vmem:[#allocation13_spill] sm:$0xff] %v16821_v16  ;;  %v21635_v5 = vld [vmem:[#allocation72_spill] sm:$0xff] }
 0xbab   :  { %v5472_v3 = vpack.c.bf16 %v5342_v6, %v5342_v6  ;;  %v3836_v51 = vadd.f32 %v16411_v62, %v3835_v27  ;;  %v5233_v6 = vmax.f32 %v4921_v23, %v4945_v63  ;;  %v4347_v40 = vpop.f32.mrf.mxu3  ;;  %v4922_v45 = vmax.f32 %v4288_v57, 0.0  ;;  %v21636_v63 = vld [vmem:[#allocation21_spill] sm:$0xff] }
 0xbac   :  { %v4348_v27 = vadd.f32 %v16411_v62, %v4347_v40  ;;  %v4766_v23 = vmax.f32 %v3898_v39, 0.0  ;;  %v3901_v53 = vadd.f32 %v16411_v62, %v21636_v63  ;;  %v21638_v39 = vld [vmem:[#allocation97_spill] sm:$0xff] }
 0xbad   :  { %v4741_v22 = vmax.f32 %v3836_v51, 0.0  ;;  %v5824_v11 = vunpack.c.l.b16 %v5472_v3 }
 0xbae   :  { %v4946_v51 = vmax.f32 %v4348_v27, 0.0 }
 0xbaf   :  { %v5149_v41 = vmax.f32 %v4741_v22, %v4765_v31  ;;  %v16827_v21 = vpack.c.b16 %v5824_v11, %v5712_v55  ;;  %v4291_v31 = vadd.f32 %v16411_v62, %v16492_v42 }
 0xbb0   :  { %v5234_v49 = vmax.f32 %v4922_v45, %v4946_v51 }
 0xbb1   :  { %21632 = vst [vmem:[#allocation14_spill] sm:$0xff] %v16827_v21  ;;  %5955 = vrot.lane.b32.xlu2 %v21634_v14, %s13490_s1  ;;  %5861 = vrot.lane.b32.xlu0 %v21635_v5, %s13490_s1  ;;  %v21637_v14 = vld [vmem:[#allocation37_spill] sm:$0xff]  ;;  %v4923_v42 = vmax.f32 %v4291_v31, 0.0 }
 0xbb2   :  { %v3837_v30 = vpop.f32.mrf.mxu0  ;;  %v5385_v57 = vmax.f32 %v5233_v6, %v5234_v49  ;;  %v5509_v5 = vpack.c.bf16 %v21637_v14, %v21637_v14 }
 0xbb3   :  { %v3838_v3 = vadd.f32 %v16411_v62, %v3837_v30  ;;  %v4350_v12 = vpop.f32.mrf.mxu3 }
 0xbb4   :  { %v6049_v27 = vunpack.c.l.b16 %v5509_v5  ;;  %v5529_v30 = vpack.c.bf16 %v5385_v57, %v5385_v57  ;;  %v4293_v5 = vadd.f32 %v16411_v62, %v16503_v43  ;;  %v21643_v43 = vld [vmem:[#allocation87_spill] sm:$0xff] }
 0xbb5   :  { %v4742_v55 = vmax.f32 %v3838_v3, 0.0 }
 0xbb6   :  { %v16853_v14 = vpack.c.b16 %v6049_v27, %v6043_v38 }
 0xbb7   :  { %v5150_v22 = vmax.f32 %v4742_v55, %v4766_v23  ;;  %v4351_v23 = vadd.f32 %v16411_v62, %v4350_v12  ;;  %v4767_v55 = vmax.f32 %v3901_v53, 0.0 }
 0xbb8   :  { %21640 = vst [vmem:[#allocation77_spill] sm:$0xff] %v16853_v14 }
 0xbb9   :  { %v5343_v40 = vmax.f32 %v5149_v41, %v5150_v22  ;;  %5957 = vrot.lane.b32.xlu2 %v16233_v24, %s13490_s1  ;;  %5943 = vrot.lane.b32.xlu0 %v21638_v39, %s13490_s1  ;;  %v16855_v24 = vunpack.c.l.b16 %v5529_v30  ;;  %v4947_v31 = vmax.f32 %v4351_v23, 0.0  ;;  %v21642_v39 = vld [vmem:[#allocation22_spill] sm:$0xff] }
 0xbba   :  { %v3840_v45 = vpop.f32.mrf.mxu0  ;;  %v3903_v38 = vadd.f32 %v16411_v62, %v21642_v39 }
 0xbbb   :  { %v5480_v3 = vpack.c.bf16 %v5343_v40, %v5343_v40  ;;  %v3841_v6 = vadd.f32 %v16411_v62, %v3840_v45  ;;  %v5804_v51 = vpop.permute.xlu2 %5803  ;;  %v5235_v12 = vmax.f32 %v4923_v42, %v4947_v31  ;;  %v4352_v40 = vpop.f32.mrf.mxu3  ;;  %v4924_v45 = vmax.f32 %v4293_v5, 0.0 }
 0xbbc   :  { %v16851_v41 = vsel %vm6119_vm3, %v16627_v7, %v5804_v51  ;;  %v4353_v30 = vadd.f32 %v16411_v62, %v4352_v40  ;;  %v4768_v5 = vmax.f32 %v3903_v38, 0.0  ;;  %v13310_v38 = vld [vmem:[%s21049_s2 + $0xd0] sm:$0xff] }
 0xbbd   :  { %21639 = vst [vmem:[#allocation34_spill] sm:$0xff] %v16851_v41  ;;  %v4743_v49 = vmax.f32 %v3841_v6, 0.0  ;;  %v5848_v22 = vunpack.c.l.b16 %v5480_v3  ;;  %8117 = vmatpush.bf16.msra.mxu1 %v13310_v38 }
 0xbbe   :  { %v4948_v42 = vmax.f32 %v4353_v30, 0.0 }
 0xbbf   :  { %v5151_v63 = vmax.f32 %v4743_v49, %v4767_v55  ;;  %v16861_v53 = vpack.c.b16 %v5848_v22, %v5824_v11  ;;  %v21644_v11 = vld [vmem:[#allocation38_spill] sm:$0xff] }
 0xbc0   :  { %v5510_v23 = vpack.c.bf16 %v21644_v11, %v21644_v11  ;;  %v21645_v55 = vld [vmem:[#allocation18_spill] sm:$0xff]  ;;  %v5236_v39 = vmax.f32 %v4924_v45, %v4948_v42  ;;  %v4296_v11 = vadd.f32 %v16411_v62, %v16517_v18 }
 0xbc1   :  { %21641 = vst [vmem:[#allocation43_spill] sm:$0xff] %v16861_v53  ;;  %5963 = vrot.lane.b32.xlu2 %v16414_v0, %s13490_s1  ;;  %5863 = vrot.lane.b32.xlu0 %v21643_v43, %s13490_s1 }
 0xbc2   :  { %v3842_v3 = vpop.f32.mrf.mxu0  ;;  %v5386_v0 = vmax.f32 %v5235_v12, %v5236_v39  ;;  %v6071_v43 = vunpack.c.l.b16 %v5510_v23  ;;  %v4925_v18 = vmax.f32 %v4296_v11, 0.0  ;;  %v3788_v23 = vadd.f32 %v16411_v62, %v16531_v35 }
 0xbc3   :  { %v3843_v6 = vadd.f32 %v16411_v62, %v3842_v3  ;;  %v5918_v51 = vpop.permute.xlu2 %5917  ;;  %v4355_v59 = vpop.f32.mrf.mxu3 }
 0xbc4   :  { %v6281_v49 = vsel %vm6119_vm3, %v21645_v55, %v5918_v51  ;;  %v5530_v30 = vpack.c.bf16 %v5386_v0, %v5386_v0  ;;  %v4356_v45 = vadd.f32 %v16411_v62, %v4355_v59  ;;  %v3786_v59 = vadd.f32 %v16411_v62, %v16522_v8 }
 0xbc5   :  { %v4744_v31 = vmax.f32 %v3843_v6, 0.0  ;;  %7951 = vmatmul.bf16.vlgmr.msrb.gmra.mxu3 %v6281_v49  ;;  %v16883_v6 = vpack.c.b16 %v6071_v43, %v6049_v27  ;;  %v4301_v8 = vadd.f32 %v16411_v62, %v16542_v47 }
 0xbc6   :  { %v16885_v12 = vunpack.c.l.b16 %v5530_v30  ;;  %v4949_v51 = vmax.f32 %v4356_v45, 0.0 }
 0xbc7   :  { %v5152_v57 = vmax.f32 %v4744_v31, %v4768_v5  ;;  %21647 = vst [vmem:[#allocation15_spill] sm:$0xff] %v16883_v6 }
 0xbc8   :  { %v16891_v0 = vpack.c.b16 %v16885_v12, %v16855_v24  ;;  %v5237_v39 = vmax.f32 %v4925_v18, %v4949_v51  ;;  %v16913_v18 = vld [vmem:[%s21047_s6] ss:$0 sm:$0xff] }
 0xbc9   :  { %v5344_v40 = vmax.f32 %v5151_v63, %v5152_v57  ;;  %5951 = vrot.lane.b32.xlu0 %v21646_v58, %s13490_s1  ;;  %v4298_v57 = vadd.f32 %v16411_v62, %v16527_v4 }
 0xbca   :  { %v3845_v3 = vpop.f32.mrf.mxu0  ;;  %21648 = vst [vmem:[#allocation26_spill] sm:$0xff] %v16891_v0  ;;  %v4927_v0 = vmax.f32 %v4301_v8, 0.0  ;;  %v21653_v8 = vld [vmem:[#allocation130_spill] sm:$0xff] }
 0xbcb   :  { %v5488_v28 = vpack.c.bf16 %v5344_v40, %v5344_v40  ;;  %v3846_v63 = vadd.f32 %v16411_v62, %v3845_v3  ;;  %v4357_v27 = vpop.f32.mrf.mxu3  ;;  %v4926_v4 = vmax.f32 %v4298_v57, 0.0  ;;  %v4721_v40 = vmax.f32 %v3786_v59, 0.0 }
 0xbcc   :  { %v4358_v55 = vadd.f32 %v16411_v62, %v4357_v27  ;;  %v4722_v3 = vmax.f32 %v3788_v23, 0.0 }
 0xbcd   :  { %v5888_v58 = vunpack.c.l.b16 %v5488_v28  ;;  %v21650_v28 = vld [vmem:[#allocation108_spill] sm:$0xff]  ;;  %v4745_v5 = vmax.f32 %v3846_v63, 0.0 }
 0xbcf   :  { %v16894_v42 = vpack.c.b16 %v5888_v58, %v5848_v22  ;;  %v4950_v22 = vmax.f32 %v4358_v55, 0.0  ;;  %v5129_v35 = vmax.f32 %v4721_v40, %v4745_v5  ;;  %v21651_v58 = vld [vmem:[#allocation40_spill] sm:$0xff] }
 0xbd0   :  { %v5511_v27 = vpack.c.bf16 %v21651_v58, %v21651_v58 }
 0xbd1   :  { %21649 = vst [vmem:[#allocation24_spill] sm:$0xff] %v16894_v42  ;;  %5865 = vrot.lane.b32.xlu0 %v21650_v28, %s13490_s1  ;;  %v5238_v11 = vmax.f32 %v4926_v4, %v4950_v22  ;;  %v3791_v22 = vadd.f32 %v16913_v18, %v16547_v25  ;;  %v4306_v25 = vadd.f32 %v16913_v18, %v16570_v2  ;;  %v21687_v28 = vld [vmem:[#allocation48_spill] sm:$0xff] }
 0xbd2   :  { %v3847_v49 = vpop.f32.mrf.mxu0  ;;  %v6074_v59 = vunpack.c.l.b16 %v5511_v27 }
 0xbd3   :  { %v3848_v31 = vadd.f32 %v16411_v62, %v3847_v49  ;;  %v5387_v45 = vmax.f32 %v5237_v39, %v5238_v11  ;;  %v4360_v57 = vpop.f32.mrf.mxu3  ;;  %v4303_v49 = vadd.f32 %v16913_v18, %v16555_v29 }
 0xbd4   :  { %v4361_v62 = vadd.f32 %v16913_v18, %v4360_v57  ;;  %v16918_v55 = vpack.c.b16 %v6074_v59, %v6071_v43 }
 0xbd5   :  { %v4746_v30 = vmax.f32 %v3848_v31, 0.0  ;;  %v5531_v51 = vpack.c.bf16 %v5387_v45, %v5387_v45  ;;  %v16924_v31 = vpop.permute.xlu2 %5923  ;;  %v4928_v43 = vmax.f32 %v4303_v49, 0.0  ;;  %v4929_v49 = vmax.f32 %v4306_v25, 0.0 }
 0xbd6   :  { %v4951_v23 = vmax.f32 %v4361_v62, 0.0  ;;  %21652 = vst [vmem:[#allocation35_spill] sm:$0xff] %v16918_v55 }
 0xbd7   :  { %v5130_v38 = vmax.f32 %v4722_v3, %v4746_v30  ;;  %v16916_v4 = vunpack.c.l.b16 %v5531_v51  ;;  %v3793_v3 = vadd.f32 %v16913_v18, %v16557_v48  ;;  %v21654_v51 = vld [vmem:[#allocation42_spill] sm:$0xff] }
 0xbd8   :  { %v5239_v5 = vmax.f32 %v4927_v0, %v4951_v23  ;;  %v5512_v23 = vpack.c.bf16 %v21654_v51, %v21654_v51 }
 0xbd9   :  { %v5333_v63 = vmax.f32 %v5129_v35, %v5130_v38  ;;  %5959 = vrot.lane.b32.xlu0 %v16292_v46, %s13490_s1  ;;  %v4723_v38 = vmax.f32 %v3791_v22, 0.0  ;;  %v4724_v45 = vmax.f32 %v3793_v3, 0.0 }
 0xbda   :  { %v3850_v47 = vpop.f32.mrf.mxu0  ;;  %v6081_v2 = vunpack.c.l.b16 %v5512_v23  ;;  %v4311_v23 = vadd.f32 %v16913_v18, %v16588_v44 }
 0xbdb   :  { %v3851_v39 = vadd.f32 %v16913_v18, %v3850_v47  ;;  %v4362_v40 = vpop.f32.mrf.mxu3 }
 0xbdc   :  { %v4363_v29 = vadd.f32 %v16913_v18, %v4362_v40  ;;  %v5449_v40 = vpack.c.bf16 %v5333_v63, %v5333_v63  ;;  %v4931_v44 = vmax.f32 %v4311_v23, 0.0 }
 0xbdd   :  { %v4747_v30 = vmax.f32 %v3851_v39, 0.0  ;;  %v16939_v39 = vpop.permute.xlu2 %5925 }
 0xbde   :  { %v4952_v35 = vmax.f32 %v4363_v29, 0.0  ;;  %v5657_v63 = vunpack.c.l.b16 %v5449_v40 }
 0xbdf   :  { %v5131_v27 = vmax.f32 %v4723_v38, %v4747_v30  ;;  %v16944_v30 = vpack.c.b16 %v6081_v2, %v6074_v59 }
 0xbe0   :  { %v5240_v58 = vmax.f32 %v4928_v43, %v4952_v35 }
 0xbe1   :  { %5867 = vrot.lane.b32.xlu0 %v21653_v8, %s13490_s1  ;;  %21655 = vst [vmem:[#allocation16_spill] sm:$0xff] %v16944_v30 }
 0xbe2   :  { %v3852_v0 = vpop.f32.mrf.mxu0  ;;  %v5388_v62 = vmax.f32 %v5239_v5, %v5240_v58 }
 0xbe3   :  { %v3853_v11 = vadd.f32 %v16913_v18, %v3852_v0  ;;  %v4365_v47 = vpop.f32.mrf.mxu3 }
 0xbe4   :  { %v4366_v22 = vadd.f32 %v16913_v18, %v4365_v47  ;;  %v5532_v3 = vpack.c.bf16 %v5388_v62, %v5388_v62 }
 0xbe5   :  { %v4748_v57 = vmax.f32 %v3853_v11, 0.0  ;;  %v4308_v11 = vadd.f32 %v16913_v18, %v16579_v26  ;;  %v16966_v58 = vpop.permute.xlu2 %5931 }
 0xbe6   :  { %v4953_v29 = vmax.f32 %v4366_v22, 0.0  ;;  %v16946_v5 = vunpack.c.l.b16 %v5532_v3  ;;  %v4313_v3 = vadd.f32 %v16913_v18, %v16595_v34 }
 0xbe7   :  { %v5132_v48 = vmax.f32 %v4724_v45, %v4748_v57  ;;  %v4930_v59 = vmax.f32 %v4308_v11, 0.0 }
 0xbe8   :  { %v5241_v38 = vmax.f32 %v4929_v49, %v4953_v29  ;;  %v16952_v45 = vpack.c.b16 %v16946_v5, %v16916_v4 }
 0xbe9   :  { %v5334_v0 = vmax.f32 %v5131_v27, %v5132_v48  ;;  %5967 = vrot.lane.b32.xlu0 %v16627_v7, %s13490_s1 }
 0xbea   :  { %21656 = vst [vmem:[#allocation95_spill] sm:$0xff] %v16952_v45 }
 0xbeb   :  { %v5450_v43 = vpack.c.bf16 %v5334_v0, %v5334_v0  ;;  %v4367_v57 = vpop.f32.mrf.mxu3  ;;  %v21658_v0 = vld [vmem:[#allocation23_spill] sm:$0xff] }
 0xbec   :  { %v4368_v26 = vadd.f32 %v16913_v18, %v4367_v57 }
 0xbed   :  { %v5658_v35 = vunpack.c.l.b16 %v5450_v43  ;;  %v16988_v43 = vpop.permute.xlu2 %5933 }
 0xbee   :  { %v4954_v48 = vmax.f32 %v4368_v26, 0.0 }
 0xbef   :  { %v16954_v7 = vpack.c.b16 %v5658_v35, %v5657_v63  ;;  %v16957_v25 = vpack.c.b16 %v16622_v37, %v5658_v35  ;;  %v4932_v35 = vmax.f32 %v4313_v3, 0.0  ;;  %v21662_v3 = vld [vmem:[#allocation73_spill] sm:$0xff] }
 0xbf0   :  { %v5242_v37 = vmax.f32 %v4930_v59, %v4954_v48  ;;  %v16999_v48 = vpop.f32.mrf.mxu1 }
 0xbf1   :  { %21657 = vst [vmem:[#allocation64_spill] sm:$0xff] %v16957_v25  ;;  %5965 = vrot.lane.b32.xlu2 %v16954_v7, %s13490_s1  ;;  %5801 = vrot.lane.b32.xlu1 %v16957_v25, %s13490_s1 }
 0xbf2   :  { %5869 = vrot.lane.b32.xlu0 %v16501_v17, %s13490_s1  ;;  %v5389_v62 = vmax.f32 %v5241_v38, %v5242_v37  ;;  %v21659_v38 = vld [vmem:[#allocation45_spill] sm:$0xff] }
 0xbf3   :  { %v16968_v27 = vpop.permute.xlu0 %5805  ;;  %v4370_v47 = vpop.f32.mrf.mxu3  ;;  %v21660_v37 = vld [vmem:[#allocation25_spill] sm:$0xff] }
 0xbf4   :  { %v5533_v51 = vpack.c.bf16 %v5389_v62, %v5389_v62  ;;  %v4371_v40 = vadd.f32 %v16913_v18, %v4370_v47 }
 0xbf5   :  { %v17006_v23 = vpop.permute.xlu2 %5939 }
 0xbf6   :  { %v16984_v2 = vunpack.c.l.b16 %v5533_v51  ;;  %v4955_v11 = vmax.f32 %v4371_v40, 0.0  ;;  %v13309_v51 = vld [vmem:[%s21049_s2 + $0xc8] sm:$0xff] }
 0xbf7   :  { %8118 = vmatpush.bf16.msra.mxu1 %v13309_v51 }
 0xbf8   :  { %v5243_v59 = vmax.f32 %v4931_v44, %v4955_v11  ;;  %v4316_v11 = vadd.f32 %v16913_v18, %v16606_v36  ;;  %v21665_v36 = vld [vmem:[#allocation59_spill] sm:$0xff] }
 0xbf9   :  { %5971 = vrot.lane.b32.xlu2 %v16755_v20, %s13490_s1  ;;  %5807 = vrot.lane.b32.xlu1 %v16794_v9, %s13490_s1 }
 0xbfa   :  { %5975 = vrot.lane.b32.xlu0 %v16341_v52, %s13490_s1 }
 0xbfb   :  { %v16978_v49 = vpop.permute.xlu0 %5919  ;;  %v4372_v63 = vpop.f32.mrf.mxu3 }
 0xbfc   :  { %v6284_v22 = vsel %vm6119_vm3, %v21658_v0, %v16978_v49  ;;  %v4373_v57 = vadd.f32 %v16913_v18, %v4372_v63 }
 0xbfd   :  { %7956 = vmatmul.bf16.gmra.mxu3 %v6284_v22  ;;  %v21661_v22 = vld [vmem:[#allocation55_spill] sm:$0xff] }
 0xbfe   :  { %v4956_v26 = vmax.f32 %v4373_v57, 0.0  ;;  %v4318_v57 = vadd.f32 %v16913_v18, %v16629_v60 }
 0xc00   :  { %v5244_v47 = vmax.f32 %v4932_v35, %v4956_v26  ;;  %v4933_v26 = vmax.f32 %v4316_v11, 0.0  ;;  %v4934_v51 = vmax.f32 %v4318_v57, 0.0  ;;  %v4321_v11 = vadd.f32 %v16913_v18, %v16647_v13 }
 0xc01   :  { %5973 = vrot.lane.b32.xlu2 %v16284_v50, %s13490_s1  ;;  %5921 = vrot.lane.b32.xlu1 %v21659_v38, %s13490_s1  ;;  %v21669_v50 = vld [vmem:[#allocation111_spill] sm:$0xff] }
 0xc02   :  { %5871 = vrot.lane.b32.xlu0 %v16861_v53, %s13490_s1  ;;  %v5390_v40 = vmax.f32 %v5243_v59, %v5244_v47  ;;  %v4935_v52 = vmax.f32 %v4321_v11, 0.0  ;;  %v21675_v11 = vld [vmem:[#allocation85_spill] sm:$0xff] }
 0xc03   :  { %v5858_v34 = vpop.permute.xlu0 %5857  ;;  %v4375_v0 = vpop.f32.mrf.mxu3 }
 0xc04   :  { %v6250_v62 = vsel %vm6119_vm3, %v21660_v37, %v5858_v34  ;;  %v5534_v44 = vpack.c.bf16 %v5390_v40, %v5390_v40  ;;  %v4376_v63 = vadd.f32 %v16913_v18, %v4375_v0  ;;  %v17021_v34 = vpop.f32.mrf.mxu1  ;;  %v17027_v40 = vpop.permute.xlu2 %5941  ;;  %v21666_v0 = vld [vmem:[#allocation66_spill] sm:$0xff] }
 0xc05   :  { %7797 = vmatmul.bf16.gmra.mxu2 %v6250_v62  ;;  %21663 = vst [vmem:[#allocation17_spill] sm:$0xff] %v17021_v34 }
 0xc06   :  { %v17017_v35 = vunpack.c.l.b16 %v5534_v44  ;;  %v4957_v62 = vmax.f32 %v4376_v63, 0.0  ;;  %v21667_v44 = vld [vmem:[#allocation132_spill] sm:$0xff]  ;;  %v21668_v63 = vld [vmem:[#allocation57_spill] sm:$0xff] }
 0xc08   :  { %v17025_v59 = vpack.c.b16 %v17017_v35, %v16984_v2  ;;  %v5245_v29 = vmax.f32 %v4933_v26, %v4957_v62 }
 0xc09   :  { %5979 = vrot.lane.b32.xlu2 %v16468_v10, %s13490_s1  ;;  %5990 = vrot.lane.b32.xlu1 %v21661_v22, %s13490_s1 }
 0xc0a   :  { %6014 = vrot.lane.b32.xlu0 %v21662_v3, %s13490_s1  ;;  %21664 = vst [vmem:[#allocation19_spill] sm:$0xff] %v17025_v59 }
 0xc0b   :  { %v4377_v47 = vpop.f32.mrf.mxu3 }
 0xc0c   :  { %v4378_v60 = vadd.f32 %v16913_v18, %v4377_v47  ;;  %v17039_v45 = vpop.f32.mrf.mxu1  ;;  %v21670_v47 = vld [vmem:[#allocation71_spill] sm:$0xff]  ;;  %v17048_v62 = vpop.permute.xlu2 %5947 }
 0xc0e   :  { %v4958_v46 = vmax.f32 %v4378_v60, 0.0 }
 0xc10   :  { %v5246_v57 = vmax.f32 %v4934_v51, %v4958_v46  ;;  %v4323_v51 = vadd.f32 %v16913_v18, %v16660_v56 }
 0xc11   :  { %6012 = vrot.lane.b32.xlu2 %v21665_v36, %s13490_s1  ;;  %5929 = vrot.lane.b32.xlu1 %v21666_v0, %s13490_s1 }
 0xc12   :  { %6020 = vrot.lane.b32.xlu0 %v21667_v44, %s13490_s1  ;;  %v5391_v59 = vmax.f32 %v5245_v29, %v5246_v57  ;;  %v4936_v57 = vmax.f32 %v4323_v51, 0.0 }
 0xc13   :  { %v4380_v10 = vpop.f32.mrf.mxu3 }
 0xc14   :  { %v4381_v26 = vadd.f32 %v16913_v18, %v4380_v10  ;;  %v5535_v13 = vpack.c.bf16 %v5391_v59, %v5391_v59  ;;  %v21672_v10 = vld [vmem:[#allocation81_spill] sm:$0xff] }
 0xc15   :  { %7802 = vmatmul.bf16.gmra.mxu2 %v21668_v63 }
 0xc16   :  { %v4959_v46 = vmax.f32 %v4381_v26, 0.0  ;;  %v17050_v29 = vunpack.c.l.b16 %v5535_v13  ;;  %v17061_v26 = vpop.f32.mrf.mxu1  ;;  %v21674_v13 = vld [vmem:[#allocation60_spill] sm:$0xff] }
 0xc17   :  { %21673 = vst [vmem:[#allocation118_spill] sm:$0xff] %v17061_v26  ;;  %v21709_v26 = vld [vmem:[#allocation155_spill] sm:$0xff] }
 0xc18   :  { %21671 = vst [vmem:[#allocation36_spill] sm:$0xff] %v17050_v29  ;;  %v5247_v60 = vmax.f32 %v4935_v52, %v4959_v46  ;;  %v17065_v52 = vpop.permute.xlu2 %5949 }
 0xc19   :  { %6018 = vrot.lane.b32.xlu2 %v21669_v50, %s13490_s1  ;;  %5992 = vrot.lane.b32.xlu1 %v21670_v47, %s13490_s1 }
 0xc1a   :  { %6056 = vrot.lane.b32.xlu0 %v16367_v61, %s13490_s1 }
 0xc1b   :  { %v4382_v63 = vpop.f32.mrf.mxu3 }
 0xc1c   :  { %v4383_v59 = vadd.f32 %v16913_v18, %v4382_v63 }
 0xc1e   :  { %v4960_v56 = vmax.f32 %v4383_v59, 0.0  ;;  %v17072_v18 = vpop.f32.mrf.mxu1  ;;  %v21681_v59 = vld [vmem:[#allocation104_spill] sm:$0xff] }
 0xc20   :  { %v5248_v46 = vmax.f32 %v4936_v57, %v4960_v56  ;;  %v21678_v57 = vld [vmem:[#allocation153_spill] sm:$0xff] }
 0xc21   :  { %6054 = vrot.lane.b32.xlu2 %v16312_v15, %s13490_s1  ;;  %5937 = vrot.lane.b32.xlu1 %v21672_v10, %s13490_s1  ;;  %v21691_v15 = vld [vmem:[#allocation168_spill] sm:$0xff] }
 0xc22   :  { %6024 = vrot.lane.b32.xlu0 %v16894_v42, %s13490_s1  ;;  %v5392_v51 = vmax.f32 %v5247_v60, %v5248_v46  ;;  %v21677_v60 = vld [vmem:[#allocation99_spill] sm:$0xff]  ;;  %v21680_v46 = vld [vmem:[#allocation61_spill] sm:$0xff]  ;;  %v21698_v42 = vld [vmem:[#allocation172_spill] sm:$0xff] }
 0xc24   :  { %v5536_v53 = vpack.c.bf16 %v5392_v51, %v5392_v51 }
 0xc25   :  { %7807 = vmatmul.bf16.gmra.mxu2 %v21674_v13  ;;  %v17080_v13 = vpop.permute.xlu2 %5955 }
 0xc26   :  { %v17076_v63 = vunpack.c.l.b16 %v5536_v53  ;;  %v17088_v56 = vpop.f32.mrf.mxu1  ;;  %v17091_v53 = vpop.permute.xlu0 %5927 }
 0xc27   :  { %21679 = vst [vmem:[#allocation20_spill] sm:$0xff] %v17088_v56  ;;  %v21705_v56 = vld [vmem:[#allocation28_spill] sm:$0xff] }
 0xc28   :  { %21676 = vst [vmem:[#allocation79_spill] sm:$0xff] %v17076_v63  ;;  %v21682_v63 = vld [vmem:[#allocation6_spill] sm:$0xff] }
 0xc29   :  { %6060 = vrot.lane.b32.xlu2 %v16166_v54, %s13490_s1  ;;  %5994 = vrot.lane.b32.xlu1 %v21675_v11, %s13490_s1 }
 0xc2a   :  { %6064 = vrot.lane.b32.xlu0 %v16712_v33, %s13490_s1 }
 0xc2d   :  { %v17093_v51 = vpop.permute.xlu2 %5957 }
 0xc2e   :  { %v17101_v33 = vpop.f32.mrf.mxu1 }
 0xc31   :  { %6062 = vrot.lane.b32.xlu2 %v16654_v32, %s13490_s1  ;;  %5945 = vrot.lane.b32.xlu1 %v21677_v60, %s13490_s1  ;;  %v5860_v32 = vpop.permute.xlu0 %5859 }
 0xc32   :  { %6026 = vrot.lane.b32.xlu0 %v21678_v57, %s13490_s1  ;;  %v21683_v57 = vld [vmem:[#allocation3_spill] sm:$0xff] }
 0xc35   :  { %7812 = vmatmul.bf16.gmra.mxu2 %v21680_v46  ;;  %v21684_v46 = vld [vmem:[#allocation122_spill] sm:$0xff]  ;;  %v17109_v17 = vpop.permute.xlu2 %5963 }
 0xc36   :  { %21685 = vst [vmem:[#allocation21_spill] sm:$0xff] %v17109_v17  ;;  %v17116_v8 = vpop.f32.mrf.mxu1 }
 0xc37   :  { %21686 = vst [vmem:[#allocation37_spill] sm:$0xff] %v17116_v8 }
 0xc39   :  { %6068 = vrot.lane.b32.xlu2 %v16853_v14, %s13490_s1  ;;  %5996 = vrot.lane.b32.xlu1 %v21681_v59, %s13490_s1  ;;  %v6254_v14 = vsel %vm6119_vm3, %v21661_v22, %v5860_v32  ;;  %v21689_v32 = vld [vmem:[#allocation171_spill] sm:$0xff] }
 0xc3a   :  { %6105 = vrot.lane.b32.xlu0 %v21682_v63, %s13490_s1  ;;  %v13308_v63 = vld [vmem:[%s21049_s2 + $0xc0] sm:$0xff] }
 0xc3b   :  { %8119 = vmatpush.bf16.msra.mxu1 %v13308_v63  ;;  %v21692_v63 = vld [vmem:[#allocation164_spill] sm:$0xff] }
 0xc3e   :  { %v17129_v61 = vpop.f32.mrf.mxu1 }
 0xc41   :  { %6103 = vrot.lane.b32.xlu2 %v21683_v57, %s13490_s1  ;;  %5953 = vrot.lane.b32.xlu1 %v21684_v46, %s13490_s1 }
 0xc42   :  { %6595 = vrot.lane.b32.xlu0 %v16883_v6, %s13490_s1  ;;  %v21688_v6 = vld [vmem:[#allocation129_spill] sm:$0xff] }
 0xc45   :  { %7817 = vmatmul.bf16.gmra.mxu2 %v6254_v14 }
 0xc46   :  { %v17140_v9 = vpop.f32.mrf.mxu1 }
 0xc47   :  { %21696 = vst [vmem:[#allocation38_spill] sm:$0xff] %v17140_v9  ;;  %v21703_v9 = vld [vmem:[#allocation160_spill] sm:$0xff] }
 0xc48   :  { %v7952_v57 = vpop.f32.mrf.mxu3 }
 0xc49   :  { %v17119_v54 = vadd.f32 %v7952_v57, %v21687_v28  ;;  %6109 = vrot.lane.b32.xlu2 %v16819_v1, %s13490_s1  ;;  %5998 = vrot.lane.b32.xlu1 %v21688_v6, %s13490_s1  ;;  %v21693_v28 = vld [vmem:[#allocation158_spill] sm:$0xff] }
 0xc4a   :  { %6113 = vrot.lane.b32.xlu0 %v21689_v32, %s13490_s1  ;;  %v21695_v1 = vld [vmem:[#allocation74_spill] sm:$0xff] }
 0xc4b   :  { %v17127_v14 = vpop.permute.xlu2 %5965  ;;  %v21697_v32 = vld [vmem:[#allocation154_spill] sm:$0xff] }
 0xc4c   :  { %21690 = vst [vmem:[#allocation97_spill] sm:$0xff] %v17127_v14 }
 0xc4e   :  { %v17150_v8 = vpop.f32.mrf.mxu1 }
 0xc51   :  { %6111 = vrot.lane.b32.xlu2 %v21691_v15, %s13490_s1  ;;  %5961 = vrot.lane.b32.xlu1 %v21692_v63, %s13490_s1  ;;  %v21699_v15 = vld [vmem:[#allocation149_spill] sm:$0xff] }
 0xc52   :  { %6597 = vrot.lane.b32.xlu0 %v21693_v28, %s13490_s1  ;;  %v21701_v28 = vld [vmem:[#allocation141_spill] sm:$0xff] }
 0xc53   :  { %v17137_v57 = vpop.permute.xlu2 %5971 }
 0xc54   :  { %21694 = vst [vmem:[#allocation22_spill] sm:$0xff] %v17137_v57 }
 0xc55   :  { %7822 = vmatmul.bf16.gmra.mxu2 %v21695_v1  ;;  %v21702_v1 = vld [vmem:[#allocation7_spill] sm:$0xff] }
 0xc59   :  { %6117 = vrot.lane.b32.xlu2 %v21697_v32, %s13490_s1  ;;  %6000 = vrot.lane.b32.xlu1 %v21698_v42, %s13490_s1 }
 0xc5a   :  { %6637 = vrot.lane.b32.xlu0 %v21699_v15, %s13490_s1 }
 0xc5b   :  { %v17148_v25 = vpop.permute.xlu2 %5973 }
 0xc5c   :  { %21700 = vst [vmem:[#allocation18_spill] sm:$0xff] %v17148_v25 }
 0xc61   :  { %6635 = vrot.lane.b32.xlu2 %v21701_v28, %s13490_s1  ;;  %5969 = vrot.lane.b32.xlu1 %v21702_v1, %s13490_s1  ;;  %v21708_v28 = vld [vmem:[#allocation75_spill] sm:$0xff] }
 0xc62   :  { %6657 = vrot.lane.b32.xlu0 %v21703_v9, %s13490_s1  ;;  %v17175_v9 = vpop.f32.mrf.mxu1 }
 0xc63   :  { %v17158_v32 = vpop.permute.xlu2 %5979  ;;  %v5802_v57 = vpop.permute.xlu1 %5801  ;;  %21710 = vst [vmem:[#allocation23_spill] sm:$0xff] %v17175_v9 }
 0xc64   :  { %21704 = vst [vmem:[#allocation120_spill] sm:$0xff] %v17158_v32  ;;  %v17163_v15 = vsel %vm6119_vm3, %v21705_v56, %v17158_v32  ;;  %v17167_v25 = vsel %vm6119_vm3, %v16954_v7, %v5802_v57  ;;  %v21713_v57 = vpack.c.b16 %v16855_v24, %v16821_v16  ;;  %v17200_v24 = vpop.permute.xlu0 %5935  ;;  %v21720_v16 = vld [vmem:[#allocation148_spill] sm:$0xff] }
 0xc65   :  { %21706 = vst [vmem:[#allocation40_spill] sm:$0xff] %v17163_v15  ;;  %7753 = vmatmul.bf16.gmra.mxu1 %v17167_v25  ;;  %7827 = vmatmul.bf16.gmra.mxu2 %v21708_v28  ;;  %v21711_v15 = vpack.c.b16 %v16916_v4, %v16885_v12  ;;  %v21717_v12 = vld [vmem:[#allocation76_spill] sm:$0xff]  ;;  %v17202_v4 = vpop.f32.mrf.mxu3 }
 0xc66   :  { %21707 = vst [vmem:[#allocation42_spill] sm:$0xff] %v17167_v25 }
 0xc67   :  { %21718 = vst [vmem:[#allocation73_spill] sm:$0xff] %v17202_v4  ;;  %v21724_v4 = vld [vmem:[#allocation88_spill] sm:$0xff] }
 0xc69   :  { %6641 = vrot.lane.b32.xlu2 %v21709_v26, %s13490_s1  ;;  %6002 = vrot.lane.b32.xlu1 %v16827_v21, %s13490_s1  ;;  %v21714_v26 = vld [vmem:[#allocation167_spill] sm:$0xff] }
 0xc6a   :  { %6647 = vrot.lane.b32.xlu0 %v21711_v15, %s13490_s1  ;;  %v17189_v25 = vpop.f32.mrf.mxu1 }
 0xc6b   :  { %v17181_v32 = vpop.permute.xlu2 %6012  ;;  %v5808_v7 = vpop.permute.xlu1 %5807  ;;  %21715 = vst [vmem:[#allocation25_spill] sm:$0xff] %v17189_v25 }
 0xc6c   :  { %21712 = vst [vmem:[#allocation45_spill] sm:$0xff] %v17181_v32 }
 0xc71   :  { %6645 = vrot.lane.b32.xlu2 %v21713_v57, %s13490_s1  ;;  %5977 = vrot.lane.b32.xlu1 %v21714_v26, %s13490_s1  ;;  %v21719_v57 = vpack.c.b16 %v17050_v29, %v17017_v35  ;;  %v21723_v29 = vld [vmem:[#allocation52_spill] sm:$0xff] }
 0xc73   :  { %v17191_v28 = vpop.permute.xlu2 %6018  ;;  %v17193_v9 = vpop.permute.xlu1 %5921 }
 0xc74   :  { %21716 = vst [vmem:[#allocation55_spill] sm:$0xff] %v17191_v28  ;;  %v6287_v15 = vsel %vm6119_vm3, %v21660_v37, %v17193_v9  ;;  %v13323_v37 = vld [vmem:[%s21049_s2 + $0x138] sm:$0xff] }
 0xc75   :  { %7758 = vmatmul.bf16.gmra.mxu1 %v16851_v41  ;;  %7832 = vmatmul.bf16.gmra.mxu2 %v21717_v12  ;;  %v13331_v28 = vld [vmem:[%s21049_s2 + $0x178] sm:$0xff]  ;;  %v17220_v12 = vpop.f32.mrf.mxu2 }
 0xc76   :  { %7961 = vmatmul.bf16.gmra.mxu3 %v6287_v15  ;;  %8281 = vmatpush.bf16.msra.mxu2 %v13323_v37  ;;  %v17215_v15 = vpop.f32.mrf.mxu1  ;;  %v17232_v37 = vsel %vm6119_vm3, %v21702_v1, %v16968_v27  ;;  %v13339_v27 = vld [vmem:[%s21049_s2 + $0x1b8] sm:$0xff] }
 0xc77   :  { %21722 = vst [vmem:[#allocation66_spill] sm:$0xff] %v17215_v15  ;;  %8450 = vmatpush.bf16.msra.mxu3 %v13331_v28  ;;  %v21731_v15 = vld [vmem:[#allocation92_spill] sm:$0xff]  ;;  %8619 = vmatpush.bf16.msrb.mxu1 %v13339_v27  ;;  %v21738_v27 = vld [vmem:[#allocation103_spill] sm:$0xff] }
 0xc78   :  { %21726 = vst [vmem:[#allocation71_spill] sm:$0xff] %v17232_v37 }
 0xc79   :  { %6659 = vrot.lane.b32.xlu2 %v21719_v57, %s13490_s1  ;;  %6004 = vrot.lane.b32.xlu1 %v21720_v16, %s13490_s1  ;;  %v5862_v57 = vpop.permute.xlu0 %5861 }
 0xc7a   :  { %v17236_v28 = vsel %vm6119_vm3, %v21670_v47, %v5862_v57  ;;  %v17253_v57 = vld [vmem:[%s21047_s6 + $0x1] ss:$0 sm:$0xff] }
 0xc7b   :  { %v17213_v26 = vpop.permute.xlu2 %6054  ;;  %21727 = vst [vmem:[#allocation81_spill] sm:$0xff] %v17236_v28  ;;  %v5991_v14 = vpop.permute.xlu1 %5990 }
 0xc7c   :  { %21721 = vst [vmem:[#allocation59_spill] sm:$0xff] %v17213_v26 }
 0xc80   :  { %v7957_v35 = vpop.f32.mrf.mxu3 }
 0xc81   :  { %v17223_v16 = vadd.f32 %v7957_v35, %v21723_v29  ;;  %6016 = vrot.lane.b32.xlu1 %v21724_v4, %s13490_s1  ;;  %v21728_v29 = vld [vmem:[#allocation27_spill] sm:$0xff] }
 0xc82   :  { %v21729_v35 = vpack.c.b16 %v21728_v29, %v21613_v19  ;;  %v21732_v29 = vld [vmem:[#allocation174_spill] sm:$0xff] }
 0xc83   :  { %v17227_v32 = vpop.permute.xlu2 %6060 }
 0xc84   :  { %21725 = vst [vmem:[#allocation57_spill] sm:$0xff] %v17227_v32  ;;  %v6291_v26 = vsel %vm6119_vm3, %v21729_v35, %v16924_v31  ;;  %v17245_v32 = vpop.f32.mrf.mxu1 }
 0xc85   :  { %7763 = vmatmul.bf16.gmra.mxu1 %v17232_v37  ;;  %7837 = vmatmul.bf16.gmra.mxu2 %v17236_v28  ;;  %21730 = vst [vmem:[#allocation60_spill] sm:$0xff] %v17245_v32  ;;  %v7630_v28 = vadd.f32 %v17253_v57, %v21731_v15  ;;  %v17273_v15 = vsel %vm6119_vm3, %v16755_v20, %v5808_v7  ;;  %v21740_v7 = vld [vmem:[#allocation151_spill] sm:$0xff] }
 0xc86   :  { %7966 = vmatmul.bf16.gmra.mxu3 %v6291_v26  ;;  %21736 = vst [vmem:[#allocation28_spill] sm:$0xff] %v17273_v15 }
 0xc88   :  { %v7798_v1 = vpop.f32.mrf.mxu2 }
 0xc89   :  { %v17257_v19 = vadd.f32 %v7798_v1, %v7630_v28  ;;  %6022 = vrot.lane.b32.xlu1 %v21732_v29, %s13490_s1  ;;  %v21737_v1 = vld [vmem:[#allocation89_spill] sm:$0xff]  ;;  %v6294_v28 = vsel %vm6119_vm3, %v21659_v38, %v16939_v39 }
 0xc8b   :  { %v17261_v26 = vpop.permute.xlu2 %6062 }
 0xc8c   :  { %21733 = vst [vmem:[#allocation85_spill] sm:$0xff] %v17261_v26  ;;  %v17263_v35 = vpop.f32.mrf.mxu1  ;;  %v7635_v26 = vadd.f32 %v17253_v57, %v21738_v27 }
 0xc8d   :  { %21734 = vst [vmem:[#allocation61_spill] sm:$0xff] %v17263_v35 }
 0xc90   :  { %v17265_v34 = vpop.f32.mrf.mxu2 }
 0xc91   :  { %6058 = vrot.lane.b32.xlu1 %v21705_v56, %s13490_s1 }
 0xc93   :  { %v17269_v63 = vpop.permute.xlu2 %6068 }
 0xc94   :  { %21735 = vst [vmem:[#allocation48_spill] sm:$0xff] %v17269_v63  ;;  %v17282_v35 = vpop.f32.mrf.mxu1 }
 0xc95   :  { %7768 = vmatmul.bf16.gmra.mxu1 %v17273_v15  ;;  %7842 = vmatmul.bf16.gmra.mxu2 %v21737_v1  ;;  %21739 = vst [vmem:[#allocation52_spill] sm:$0xff] %v17282_v35  ;;  %v21742_v1 = vld [vmem:[#allocation11_spill] sm:$0xff] }
 0xc96   :  { %7971 = vmatmul.bf16.gmra.mxu3 %v6294_v28  ;;  %v21745_v28 = vld [vmem:[#allocation41_spill] sm:$0xff] }
 0xc97   :  { %v6385_v27 = vsel %vm6119_vm3, %v21745_v28, %v16978_v49 }
 0xc98   :  { %v7803_v56 = vpop.f32.mrf.mxu2 }
 0xc99   :  { %v17284_v63 = vadd.f32 %v7803_v56, %v7635_v26  ;;  %6076 = vrot.lane.b32.xlu1 %v21740_v7, %s13490_s1  ;;  %v21747_v56 = vld [vmem:[#allocation90_spill] sm:$0xff] }
 0xc9b   :  { %v17288_v20 = vpop.permute.xlu2 %6103 }
 0xc9c   :  { %21741 = vst [vmem:[#allocation88_spill] sm:$0xff] %v17288_v20  ;;  %v17294_v39 = vpop.f32.mrf.mxu1  ;;  %v21748_v20 = vld [vmem:[#allocation47_spill] sm:$0xff] }
 0xc9d   :  { %21743 = vst [vmem:[#allocation27_spill] sm:$0xff] %v17294_v39  ;;  %v6297_v7 = vsel %vm6119_vm3, %v21748_v20, %v17091_v53  ;;  %v21749_v39 = vld [vmem:[#allocation107_spill] sm:$0xff]  ;;  %v21752_v20 = vld [vmem:[#allocation32_spill] sm:$0xff] }
 0xc9e   :  { %v7640_v35 = vadd.f32 %v17253_v57, %v21749_v39 }
 0xca0   :  { %v17290_v29 = vpop.f32.mrf.mxu2 }
 0xca1   :  { %6066 = vrot.lane.b32.xlu1 %v21742_v1, %s13490_s1 }
 0xca3   :  { %v17296_v38 = vpop.permute.xlu2 %6109 }
 0xca4   :  { %21744 = vst [vmem:[#allocation92_spill] sm:$0xff] %v17296_v38  ;;  %v17304_v26 = vsel %vm6119_vm3, %v21742_v1, %v17296_v38  ;;  %v17316_v49 = vpop.f32.mrf.mxu1 }
 0xca5   :  { %21746 = vst [vmem:[#allocation103_spill] sm:$0xff] %v17304_v26  ;;  %7847 = vmatmul.bf16.gmra.mxu2 %v21747_v56  ;;  %8120 = vmatmul.bf16.vlgmr.msra.gmra.mxu1 %v6385_v27 }
 0xca6   :  { %7976 = vmatmul.bf16.gmra.mxu3 %v6297_v7  ;;  %21750 = vst [vmem:[#allocation11_spill] sm:$0xff] %v17316_v49  ;;  %v17324_v7 = vpop.permute.xlu1 %5929 }
 0xca7   :  { %v6300_v38 = vsel %vm6119_vm3, %v21661_v22, %v17324_v7  ;;  %v13330_v22 = vld [vmem:[%s21049_s2 + $0x170] sm:$0xff] }
 0xca8   :  { %v7808_v32 = vpop.f32.mrf.mxu2  ;;  %8451 = vmatpush.bf16.msra.mxu3 %v13330_v22  ;;  %v6304_v22 = vsel %vm6119_vm3, %v21665_v36, %v16966_v58 }
 0xca9   :  { %v17312_v44 = vadd.f32 %v7808_v32, %v7640_v35  ;;  %6078 = vrot.lane.b32.xlu1 %v16918_v55, %s13490_s1  ;;  %v21755_v32 = vld [vmem:[#allocation44_spill] sm:$0xff] }
 0xcaa   :  { %v17333_v35 = vsel %vm6119_vm3, %v21755_v32, %v17193_v9  ;;  %v21757_v55 = vld [vmem:[#allocation152_spill] sm:$0xff] }
 0xcab   :  { %v17318_v1 = vpop.permute.xlu2 %6111  ;;  %21756 = vst [vmem:[#allocation44_spill] sm:$0xff] %v17333_v35 }
 0xcac   :  { %21751 = vst [vmem:[#allocation41_spill] sm:$0xff] %v17318_v1  ;;  %v17328_v39 = vpop.f32.mrf.mxu1  ;;  %v21759_v1 = vld [vmem:[#allocation93_spill] sm:$0xff] }
 0xcad   :  { %21754 = vst [vmem:[#allocation107_spill] sm:$0xff] %v17328_v39  ;;  %v17347_v39 = vpop.permute.xlu0 %5943 }
 0xcb0   :  { %v17320_v28 = vpop.f32.mrf.mxu2 }
 0xcb1   :  { %6107 = vrot.lane.b32.xlu1 %v21752_v20, %s13490_s1  ;;  %v21760_v20 = vld [vmem:[#allocation112_spill] sm:$0xff] }
 0xcb2   :  { %v7645_v56 = vadd.f32 %v17253_v57, %v21760_v20 }
 0xcb3   :  { %v17326_v27 = vpop.permute.xlu2 %6117 }
 0xcb4   :  { %21753 = vst [vmem:[#allocation47_spill] sm:$0xff] %v17326_v27  ;;  %v17338_v26 = vsel %vm6119_vm3, %v21757_v55, %v17326_v27 }
 0xcb5   :  { %21758 = vst [vmem:[#allocation152_spill] sm:$0xff] %v17338_v26  ;;  %7852 = vmatmul.bf16.gmra.mxu2 %v21759_v1  ;;  %8125 = vmatmul.bf16.gmra.mxu1 %v17333_v35  ;;  %v13322_v26 = vld [vmem:[%s21049_s2 + $0x130] sm:$0xff]  ;;  %v5864_v27 = vpop.permute.xlu0 %5863 }
 0xcb6   :  { %7981 = vmatmul.bf16.gmra.mxu3 %v6300_v38  ;;  %8282 = vmatpush.bf16.msra.mxu2 %v13322_v26  ;;  %v17359_v38 = vpop.f32.mrf.mxu1 }
 0xcb7   :  { %21761 = vst [vmem:[#allocation112_spill] sm:$0xff] %v17359_v38 }
 0xcb8   :  { %v7813_v9 = vpop.f32.mrf.mxu2 }
 0xcb9   :  { %v17349_v32 = vadd.f32 %v7813_v9, %v7645_v56  ;;  %6605 = vrot.lane.b32.xlu1 %v16944_v30, %s13490_s1  ;;  %v21762_v56 = vld [vmem:[#allocation150_spill] sm:$0xff]  ;;  %v17367_v9 = vsel %vm6119_vm3, %v21675_v11, %v5864_v27  ;;  %v21766_v27 = vld [vmem:[#allocation115_spill] sm:$0xff] }
 0xcba   :  { %21763 = vst [vmem:[#allocation180_spill] sm:$0xff] %v17367_v9  ;;  %v21764_v30 = vld [vmem:[#allocation46_spill] sm:$0xff]  ;;  %v7650_v1 = vadd.f32 %v17253_v57, %v21766_v27  ;;  %v21772_v27 = vld [vmem:[#allocation109_spill] sm:$0xff] }
 0xcbb   :  { %v17372_v26 = vsel %vm6119_vm3, %v21764_v30, %v16924_v31 }
 0xcbc   :  { %21765 = vst [vmem:[#allocation46_spill] sm:$0xff] %v17372_v26 }
 0xcbe   :  { %v17384_v38 = vpop.f32.mrf.mxu1 }
 0xcbf   :  { %21767 = vst [vmem:[#allocation115_spill] sm:$0xff] %v17384_v38 }
 0xcc0   :  { %v17361_v20 = vpop.f32.mrf.mxu2 }
 0xcc1   :  { %6115 = vrot.lane.b32.xlu1 %v21762_v56, %s13490_s1  ;;  %v13338_v56 = vld [vmem:[%s21049_s2 + $0x1b0] sm:$0xff] }
 0xcc2   :  { %8620 = vmatpush.bf16.msrb.mxu1 %v13338_v56  ;;  %v21774_v56 = vld [vmem:[#allocation125_spill] sm:$0xff] }
 0xcc5   :  { %7857 = vmatmul.bf16.gmra.mxu2 %v17367_v9  ;;  %8130 = vmatmul.bf16.gmra.mxu1 %v17372_v26  ;;  %v21768_v9 = vld [vmem:[#allocation163_spill] sm:$0xff] }
 0xcc6   :  { %7986 = vmatmul.bf16.gmra.mxu3 %v6304_v22  ;;  %v17390_v36 = vpop.f32.mrf.mxu1  ;;  %v21770_v22 = vld [vmem:[#allocation51_spill] sm:$0xff] }
 0xcc7   :  { %21769 = vst [vmem:[#allocation181_spill] sm:$0xff] %v17390_v36  ;;  %v17398_v26 = vsel %vm6119_vm3, %v21770_v22, %v5991_v14  ;;  %v21775_v14 = vld [vmem:[#allocation33_spill] sm:$0xff]  ;;  %v21776_v22 = vld [vmem:[#allocation39_spill] sm:$0xff] }
 0xcc8   :  { %v7818_v31 = vpop.f32.mrf.mxu2  ;;  %21771 = vst [vmem:[#allocation51_spill] sm:$0xff] %v17398_v26  ;;  %v21777_v38 = vpack.c.b16 %v21775_v14, %v21776_v22  ;;  %v21783_v14 = vld [vmem:[#allocation68_spill] sm:$0xff]  ;;  %v21785_v22 = vld [vmem:[#allocation131_spill] sm:$0xff] }
 0xcc9   :  { %v17386_v30 = vadd.f32 %v7818_v31, %v7650_v1  ;;  %6607 = vrot.lane.b32.xlu1 %v21768_v9, %s13490_s1  ;;  %v17404_v1 = vsel %vm6119_vm3, %v21666_v0, %v16988_v43  ;;  %v7655_v31 = vadd.f32 %v17253_v57, %v21774_v56  ;;  %v21779_v43 = vpack.c.b16 %v16984_v2, %v16946_v5  ;;  %v21781_v56 = vld [vmem:[#allocation63_spill] sm:$0xff]  ;;  %v5993_v2 = vpop.permute.xlu1 %5992 }
 0xcca   :  { %21773 = vst [vmem:[#allocation182_spill] sm:$0xff] %v17404_v1  ;;  %v7660_v5 = vadd.f32 %v17253_v57, %v21785_v22  ;;  %v21791_v22 = vld [vmem:[#allocation116_spill] sm:$0xff] }
 0xcd0   :  { %v17392_v49 = vpop.f32.mrf.mxu2 }
 0xcd1   :  { %6639 = vrot.lane.b32.xlu1 %v21757_v55, %s13490_s1 }
 0xcd5   :  { %7862 = vmatmul.bf16.gmra.mxu2 %v21772_v27  ;;  %8135 = vmatmul.bf16.gmra.mxu1 %v17398_v26  ;;  %v17416_v27 = vpop.f32.mrf.mxu1 }
 0xcd6   :  { %7991 = vmatmul.bf16.gmra.mxu3 %v17404_v1  ;;  %21778 = vst [vmem:[#allocation125_spill] sm:$0xff] %v17416_v27 }
 0xcd8   :  { %v7823_v9 = vpop.f32.mrf.mxu2 }
 0xcd9   :  { %v17410_v55 = vadd.f32 %v7823_v9, %v7655_v31  ;;  %6643 = vrot.lane.b32.xlu1 %v21777_v38, %s13490_s1  ;;  %v6398_v9 = vsel %vm6119_vm3, %v21781_v56, %v17091_v53  ;;  %v21782_v31 = vld [vmem:[#allocation113_spill] sm:$0xff]  ;;  %v17433_v38 = vsel %vm6119_vm3, %v21783_v14, %v17200_v24  ;;  %v17444_v56 = vpop.f32.mrf.mxu3 }
 0xcda   :  { %21784 = vst [vmem:[#allocation63_spill] sm:$0xff] %v17433_v38 }
 0xcdb   :  { %21787 = vst [vmem:[#allocation131_spill] sm:$0xff] %v17444_v56 }
 0xce0   :  { %v17418_v36 = vpop.f32.mrf.mxu2 }
 0xce1   :  { %6649 = vrot.lane.b32.xlu1 %v21779_v43, %s13490_s1 }
 0xce2   :  { %v17424_v0 = vpop.f32.mrf.mxu1 }
 0xce3   :  { %21780 = vst [vmem:[#allocation183_spill] sm:$0xff] %v17424_v0 }
 0xce5   :  { %7867 = vmatmul.bf16.gmra.mxu2 %v21782_v31  ;;  %8140 = vmatmul.bf16.gmra.mxu1 %v6398_v9  ;;  %v17446_v31 = vpop.permute.xlu1 %5937  ;;  %v21789_v9 = vld [vmem:[#allocation65_spill] sm:$0xff] }
 0xce6   :  { %7996 = vmatmul.bf16.gmra.mxu3 %v17433_v38  ;;  %v17453_v38 = vsel %vm6119_vm3, %v21789_v9, %v17324_v7  ;;  %v21794_v9 = vld [vmem:[#allocation56_spill] sm:$0xff] }
 0xce7   :  { %21790 = vst [vmem:[#allocation65_spill] sm:$0xff] %v17453_v38 }
 0xce8   :  { %v7828_v43 = vpop.f32.mrf.mxu2 }
 0xce9   :  { %v17438_v1 = vadd.f32 %v7828_v43, %v7660_v5  ;;  %v17459_v5 = vsel %vm6119_vm3, %v21670_v47, %v17446_v31  ;;  %v21793_v43 = vld [vmem:[#allocation135_spill] sm:$0xff] }
 0xcea   :  { %v17440_v27 = vpop.f32.mrf.mxu1  ;;  %21792 = vst [vmem:[#allocation185_spill] sm:$0xff] %v17459_v5  ;;  %v7665_v56 = vadd.f32 %v17253_v57, %v21793_v43  ;;  %v13321_v47 = vld [vmem:[%s21049_s2 + $0x128] sm:$0xff] }
 0xceb   :  { %21786 = vst [vmem:[#allocation68_spill] sm:$0xff] %v17440_v27  ;;  %8283 = vmatpush.bf16.msra.mxu2 %v13321_v47  ;;  %v13337_v47 = vld [vmem:[%s21049_s2 + $0x1a8] sm:$0xff] }
 0xcec   :  { %8621 = vmatpush.bf16.msrb.mxu1 %v13337_v47 }
 0xcf0   :  { %v17442_v53 = vpop.f32.mrf.mxu2 }
 0xcf2   :  { %v17448_v14 = vpop.f32.mrf.mxu1 }
 0xcf3   :  { %21788 = vst [vmem:[#allocation184_spill] sm:$0xff] %v17448_v14  ;;  %v17465_v14 = vpop.permute.xlu0 %5951 }
 0xcf5   :  { %7872 = vmatmul.bf16.gmra.mxu2 %v21791_v22  ;;  %8145 = vmatmul.bf16.gmra.mxu1 %v17453_v38 }
 0xcf6   :  { %8001 = vmatmul.bf16.gmra.mxu3 %v17459_v5  ;;  %v13329_v5 = vld [vmem:[%s21049_s2 + $0x168] sm:$0xff] }
 0xcf7   :  { %8452 = vmatpush.bf16.msra.mxu3 %v13329_v5  ;;  %v17499_v5 = vsel %vm6119_vm3, %v21662_v3, %v17006_v23 }
 0xcf8   :  { %v7833_v27 = vpop.f32.mrf.mxu2  ;;  %21800 = vst [vmem:[#allocation187_spill] sm:$0xff] %v17499_v5 }
 0xcf9   :  { %v17467_v0 = vadd.f32 %v7833_v27, %v7665_v56  ;;  %v7962_v7 = vpop.f32.mrf.mxu3 }
 0xcfa   :  { %v17470_v22 = vadd.f32 %v7962_v7, %v21794_v9  ;;  %v17472_v26 = vpop.f32.mrf.mxu1  ;;  %v21798_v9 = vld [vmem:[#allocation67_spill] sm:$0xff] }
 0xcfb   :  { %21795 = vst [vmem:[#allocation135_spill] sm:$0xff] %v17472_v26  ;;  %v5866_v27 = vpop.permute.xlu0 %5865  ;;  %v17493_v26 = vsel %vm6119_vm3, %v21798_v9, %v16966_v58 }
 0xcfc   :  { %v17488_v7 = vsel %vm6119_vm3, %v21681_v59, %v5866_v27  ;;  %21799 = vst [vmem:[#allocation67_spill] sm:$0xff] %v17493_v26  ;;  %v21801_v27 = vld [vmem:[#allocation138_spill] sm:$0xff] }
 0xcfd   :  { %21797 = vst [vmem:[#allocation186_spill] sm:$0xff] %v17488_v7 }
 0xd00   :  { %v17480_v43 = vpop.f32.mrf.mxu2 }
 0xd01   :  { %v17482_v56 = vpop.f32.mrf.mxu3 }
 0xd02   :  { %v17484_v38 = vpop.f32.mrf.mxu1 }
 0xd03   :  { %21796 = vst [vmem:[#allocation56_spill] sm:$0xff] %v17484_v38  ;;  %v7670_v38 = vadd.f32 %v17253_v57, %v21801_v27 }
 0xd05   :  { %7877 = vmatmul.bf16.gmra.mxu2 %v17488_v7  ;;  %8150 = vmatmul.bf16.gmra.mxu1 %v17493_v26  ;;  %v21803_v26 = vld [vmem:[#allocation94_spill] sm:$0xff] }
 0xd06   :  { %8006 = vmatmul.bf16.gmra.mxu3 %v17499_v5  ;;  %v7632_v5 = vadd.f32 %v17253_v57, %v21803_v26 }
 0xd08   :  { %v7838_v58 = vpop.f32.mrf.mxu2  ;;  %v7801_v17 = vadd.f32 %v17265_v34, %v7632_v5  ;;  %v21809_v34 = vld [vmem:[#allocation142_spill] sm:$0xff] }
 0xd09   :  { %v17508_v9 = vadd.f32 %v7838_v58, %v7670_v38  ;;  %v7967_v7 = vpop.f32.mrf.mxu3  ;;  %v21805_v38 = vld [vmem:[#allocation70_spill] sm:$0xff] }
 0xd0a   :  { %v17511_v35 = vadd.f32 %v7967_v7, %v17257_v19  ;;  %v17513_v3 = vpop.f32.mrf.mxu1  ;;  %v17526_v47 = vsel %vm6119_vm3, %v21805_v38, %v5993_v2  ;;  %v21807_v19 = vld [vmem:[#allocation133_spill] sm:$0xff]  ;;  %v17532_v7 = vsel %vm6119_vm3, %v21672_v10, %v17027_v40 }
 0xd0b   :  { %21802 = vst [vmem:[#allocation138_spill] sm:$0xff] %v17513_v3  ;;  %v21811_v38 = vld [vmem:[#allocation105_spill] sm:$0xff] }
 0xd0c   :  { %21806 = vst [vmem:[#allocation70_spill] sm:$0xff] %v17526_v47  ;;  %v7637_v40 = vadd.f32 %v17253_v57, %v21811_v38  ;;  %v21816_v38 = vld [vmem:[#allocation83_spill] sm:$0xff] }
 0xd0d   :  { %21808 = vst [vmem:[#allocation188_spill] sm:$0xff] %v17532_v7 }
 0xd0e   :  { %v7806_v10 = vadd.f32 %v17290_v29, %v7637_v40  ;;  %v17564_v29 = vsel %vm6119_vm3, %v21816_v38, %v17347_v39  ;;  %v17570_v40 = vpop.permute.xlu1 %5994  ;;  %v21820_v38 = vld [vmem:[#allocation110_spill] sm:$0xff] }
 0xd0f   :  { %21817 = vst [vmem:[#allocation83_spill] sm:$0xff] %v17564_v29 }
 0xd10   :  { %v17518_v21 = vpop.f32.mrf.mxu2 }
 0xd11   :  { %v7969_v25 = vpop.f32.mrf.mxu3 }
 0xd12   :  { %v17520_v15 = vadd.f32 %v7969_v25, %v7801_v17  ;;  %v17522_v27 = vpop.f32.mrf.mxu1  ;;  %v7675_v17 = vadd.f32 %v17253_v57, %v21809_v34 }
 0xd13   :  { %21804 = vst [vmem:[#allocation94_spill] sm:$0xff] %v17522_v27 }
 0xd15   :  { %7882 = vmatmul.bf16.gmra.mxu2 %v21807_v19  ;;  %8155 = vmatmul.bf16.gmra.mxu1 %v17526_v47  ;;  %v21830_v47 = vld [vmem:[#allocation82_spill] sm:$0xff] }
 0xd16   :  { %8011 = vmatmul.bf16.gmra.mxu3 %v17532_v7 }
 0xd18   :  { %v7843_v25 = vpop.f32.mrf.mxu2 }
 0xd19   :  { %v17538_v26 = vadd.f32 %v7843_v25, %v7675_v17  ;;  %v7972_v5 = vpop.f32.mrf.mxu3  ;;  %v21813_v25 = vld [vmem:[#allocation78_spill] sm:$0xff] }
 0xd1a   :  { %v17541_v2 = vadd.f32 %v7972_v5, %v17284_v63  ;;  %v17543_v58 = vpop.f32.mrf.mxu1  ;;  %v17558_v63 = vsel %vm6119_vm3, %v21813_v25, %v17200_v24  ;;  %v21815_v5 = vld [vmem:[#allocation137_spill] sm:$0xff] }
 0xd1b   :  { %21810 = vst [vmem:[#allocation142_spill] sm:$0xff] %v17543_v58 }
 0xd1c   :  { %21814 = vst [vmem:[#allocation78_spill] sm:$0xff] %v17558_v63 }
 0xd20   :  { %v17548_v19 = vpop.f32.mrf.mxu2 }
 0xd21   :  { %v7974_v7 = vpop.f32.mrf.mxu3 }
 0xd22   :  { %v17550_v27 = vadd.f32 %v7974_v7, %v7806_v10  ;;  %v8121_v34 = vpop.f32.mrf.mxu1  ;;  %v21818_v7 = vld [vmem:[#allocation146_spill] sm:$0xff] }
 0xd23   :  { %v17553_v17 = vadd.f32 %v8121_v34, %v17119_v54  ;;  %v7680_v54 = vadd.f32 %v17253_v57, %v21818_v7  ;;  %v17584_v7 = vpop.permute.xlu1 %5945 }
 0xd25   :  { %21812 = vst [vmem:[#allocation105_spill] sm:$0xff] %v17553_v17  ;;  %7887 = vmatmul.bf16.gmra.mxu2 %v21815_v5  ;;  %8160 = vmatmul.bf16.gmra.mxu1 %v17558_v63  ;;  %v7642_v17 = vadd.f32 %v17253_v57, %v21820_v38 }
 0xd26   :  { %8016 = vmatmul.bf16.gmra.mxu3 %v17564_v29 }
 0xd27   :  { %v7811_v63 = vadd.f32 %v17320_v28, %v7642_v17  ;;  %v17600_v28 = vsel %vm6119_vm3, %v21675_v11, %v17584_v7  ;;  %v17606_v17 = vpop.permute.xlu0 %5959  ;;  %v13320_v11 = vld [vmem:[%s21049_s2 + $0x120] sm:$0xff] }
 0xd28   :  { %v7848_v10 = vpop.f32.mrf.mxu2  ;;  %21825 = vst [vmem:[#allocation189_spill] sm:$0xff] %v17600_v28  ;;  %8284 = vmatpush.bf16.msra.mxu2 %v13320_v11  ;;  %v17634_v11 = vsel %vm6119_vm3, %v21830_v47, %v17006_v23  ;;  %v13336_v23 = vld [vmem:[%s21049_s2 + $0x1a0] sm:$0xff] }
 0xd29   :  { %v17572_v34 = vadd.f32 %v7848_v10, %v7680_v54  ;;  %v7977_v24 = vpop.f32.mrf.mxu3  ;;  %21831 = vst [vmem:[#allocation82_spill] sm:$0xff] %v17634_v11  ;;  %v21835_v47 = vld [vmem:[#allocation2_spill] sm:$0xff]  ;;  %8622 = vmatpush.bf16.msrb.mxu1 %v13336_v23 }
 0xd2a   :  { %v17575_v25 = vadd.f32 %v7977_v24, %v17312_v44  ;;  %v17577_v5 = vpop.f32.mrf.mxu1  ;;  %v21822_v44 = vld [vmem:[#allocation80_spill] sm:$0xff] }
 0xd2b   :  { %21819 = vst [vmem:[#allocation146_spill] sm:$0xff] %v17577_v5  ;;  %v17594_v24 = vsel %vm6119_vm3, %v21822_v44, %v17446_v31  ;;  %v21824_v5 = vld [vmem:[#allocation139_spill] sm:$0xff] }
 0xd2c   :  { %21823 = vst [vmem:[#allocation80_spill] sm:$0xff] %v17594_v24 }
 0xd30   :  { %v17582_v29 = vpop.f32.mrf.mxu2 }
 0xd31   :  { %v7979_v58 = vpop.f32.mrf.mxu3 }
 0xd32   :  { %v17586_v3 = vadd.f32 %v7979_v58, %v7811_v63  ;;  %v8126_v54 = vpop.f32.mrf.mxu1  ;;  %v21826_v58 = vld [vmem:[#allocation177_spill] sm:$0xff] }
 0xd33   :  { %v17589_v10 = vadd.f32 %v8126_v54, %v17223_v16  ;;  %v7685_v16 = vadd.f32 %v17253_v57, %v21826_v58  ;;  %v21828_v58 = vld [vmem:[#allocation114_spill] sm:$0xff] }
 0xd35   :  { %21821 = vst [vmem:[#allocation110_spill] sm:$0xff] %v17589_v10  ;;  %7892 = vmatmul.bf16.gmra.mxu2 %v21824_v5  ;;  %8165 = vmatmul.bf16.gmra.mxu1 %v17594_v24 }
 0xd36   :  { %8021 = vmatmul.bf16.gmra.mxu3 %v17600_v28  ;;  %v13328_v28 = vld [vmem:[%s21049_s2 + $0x160] sm:$0xff] }
 0xd37   :  { %8453 = vmatpush.bf16.msra.mxu3 %v13328_v28 }
 0xd38   :  { %v7853_v63 = vpop.f32.mrf.mxu2 }
 0xd39   :  { %v17608_v38 = vadd.f32 %v7853_v63, %v7685_v16  ;;  %v7982_v31 = vpop.f32.mrf.mxu3  ;;  %v7647_v16 = vadd.f32 %v17253_v57, %v21828_v58 }
 0xd3a   :  { %v17611_v54 = vadd.f32 %v7982_v31, %v17349_v32  ;;  %v17613_v44 = vpop.f32.mrf.mxu1  ;;  %v5868_v32 = vpop.permute.xlu0 %5867 }
 0xd3b   :  { %21827 = vst [vmem:[#allocation177_spill] sm:$0xff] %v17613_v44  ;;  %v7816_v63 = vadd.f32 %v17361_v20, %v7647_v16  ;;  %v17638_v28 = vsel %vm6119_vm3, %v21688_v6, %v5868_v32  ;;  %v21833_v20 = vld [vmem:[#allocation91_spill] sm:$0xff]  ;;  %v17646_v16 = vsel %vm6119_vm3, %v21724_v4, %v17048_v62 }
 0xd3c   :  { %21832 = vst [vmem:[#allocation190_spill] sm:$0xff] %v17638_v28  ;;  %v7627_v58 = vadd.f32 %v17253_v57, %v21833_v20 }
 0xd3d   :  { %21834 = vst [vmem:[#allocation91_spill] sm:$0xff] %v17646_v16 }
 0xd40   :  { %v17624_v5 = vpop.f32.mrf.mxu2 }
 0xd41   :  { %v7984_v31 = vpop.f32.mrf.mxu3 }
 0xd42   :  { %v17626_v44 = vadd.f32 %v7984_v31, %v7816_v63  ;;  %v8131_v10 = vpop.f32.mrf.mxu1 }
 0xd43   :  { %v17629_v24 = vadd.f32 %v8131_v10, %v17470_v22  ;;  %v7796_v22 = vadd.f32 %v17220_v12, %v7627_v58  ;;  %v7690_v10 = vadd.f32 %v17253_v57, %v21835_v47 }
 0xd45   :  { %21829 = vst [vmem:[#allocation114_spill] sm:$0xff] %v17629_v24  ;;  %7897 = vmatmul.bf16.gmra.mxu2 %v17638_v28  ;;  %8170 = vmatmul.bf16.gmra.mxu1 %v17634_v11  ;;  %v7965_v32 = vadd.f32 %v17482_v56, %v7796_v22  ;;  %v21836_v24 = vld [vmem:[#allocation117_spill] sm:$0xff] }
 0xd46   :  { %8026 = vmatmul.bf16.gmra.mxu3 %v17646_v16  ;;  %v7652_v11 = vadd.f32 %v17253_v57, %v21836_v24 }
 0xd48   :  { %v7858_v63 = vpop.f32.mrf.mxu2  ;;  %v7821_v12 = vadd.f32 %v17392_v49, %v7652_v11  ;;  %v17683_v49 = vsel %vm6119_vm3, %v21677_v60, %v17065_v52  ;;  %v21841_v52 = vld [vmem:[#allocation127_spill] sm:$0xff] }
 0xd49   :  { %v17657_v31 = vadd.f32 %v7858_v63, %v7690_v10  ;;  %v7987_v4 = vpop.f32.mrf.mxu3  ;;  %21840 = vst [vmem:[#allocation117_spill] sm:$0xff] %v17683_v49 }
 0xd4a   :  { %v17660_v20 = vadd.f32 %v7987_v4, %v17386_v30  ;;  %v8133_v16 = vpop.f32.mrf.mxu1  ;;  %v21837_v30 = vld [vmem:[#allocation84_spill] sm:$0xff] }
 0xd4b   :  { %v17662_v28 = vadd.f32 %v8133_v16, %v7965_v32  ;;  %v17677_v10 = vsel %vm6119_vm3, %v21837_v30, %v17570_v40  ;;  %v21839_v16 = vld [vmem:[#allocation176_spill] sm:$0xff] }
 0xd4c   :  { %21838 = vst [vmem:[#allocation2_spill] sm:$0xff] %v17677_v10 }
 0xd50   :  { %v17667_v58 = vpop.f32.mrf.mxu2 }
 0xd51   :  { %v7989_v47 = vpop.f32.mrf.mxu3 }
 0xd52   :  { %v17669_v23 = vadd.f32 %v7989_v47, %v7821_v12  ;;  %v8136_v56 = vpop.f32.mrf.mxu1  ;;  %v7657_v12 = vadd.f32 %v17253_v57, %v21841_v52  ;;  %v17722_v52 = vpop.permute.xlu1 %5996 }
 0xd53   :  { %v17672_v22 = vadd.f32 %v8136_v56, %v17511_v35  ;;  %v7695_v35 = vadd.f32 %v17253_v57, %v16999_v48 }
 0xd54   :  { %v7826_v47 = vadd.f32 %v17418_v36, %v7657_v12 }
 0xd55   :  { %7902 = vmatmul.bf16.gmra.mxu2 %v21839_v16  ;;  %8175 = vmatmul.bf16.gmra.mxu1 %v17677_v10  ;;  %v21854_v16 = vld [vmem:[#allocation100_spill] sm:$0xff] }
 0xd56   :  { %8031 = vmatmul.bf16.gmra.mxu3 %v17683_v49 }
 0xd58   :  { %v7863_v24 = vpop.f32.mrf.mxu2 }
 0xd59   :  { %v17689_v11 = vadd.f32 %v7863_v24, %v7695_v35  ;;  %v7992_v63 = vpop.f32.mrf.mxu3 }
 0xd5a   :  { %v17692_v40 = vadd.f32 %v7992_v63, %v17410_v55  ;;  %v8138_v32 = vpop.f32.mrf.mxu1  ;;  %v21842_v55 = vld [vmem:[#allocation96_spill] sm:$0xff]  ;;  %v17737_v49 = vpop.permute.xlu1 %5953 }
 0xd5b   :  { %v17695_v4 = vadd.f32 %v8138_v32, %v17520_v15  ;;  %v17710_v63 = vsel %vm6119_vm3, %v21842_v55, %v17347_v39  ;;  %v21844_v15 = vld [vmem:[#allocation178_spill] sm:$0xff]  ;;  %v21845_v32 = vld [vmem:[#allocation101_spill] sm:$0xff] }
 0xd5c   :  { %21843 = vst [vmem:[#allocation84_spill] sm:$0xff] %v17710_v63  ;;  %v17716_v36 = vsel %vm6119_vm3, %v21845_v32, %v17465_v14  ;;  %v21847_v32 = vld [vmem:[#allocation134_spill] sm:$0xff] }
 0xd5d   :  { %21846 = vst [vmem:[#allocation127_spill] sm:$0xff] %v17716_v36  ;;  %v7662_v60 = vadd.f32 %v17253_v57, %v21847_v32 }
 0xd60   :  { %v17700_v56 = vpop.f32.mrf.mxu2 }
 0xd61   :  { %v7994_v30 = vpop.f32.mrf.mxu3 }
 0xd62   :  { %v17702_v48 = vadd.f32 %v7994_v30, %v7826_v47  ;;  %v8141_v35 = vpop.f32.mrf.mxu1 }
 0xd63   :  { %v17705_v24 = vadd.f32 %v8141_v35, %v17541_v2  ;;  %v7700_v2 = vadd.f32 %v17253_v57, %v17039_v45 }
 0xd65   :  { %7907 = vmatmul.bf16.gmra.mxu2 %v21844_v15  ;;  %8180 = vmatmul.bf16.gmra.mxu1 %v17710_v63  ;;  %v7831_v63 = vadd.f32 %v17442_v53, %v7662_v60  ;;  %v17753_v60 = vsel %vm6119_vm3, %v21681_v59, %v17737_v49  ;;  %v7705_v53 = vadd.f32 %v17253_v57, %v17072_v18  ;;  %v13319_v59 = vld [vmem:[%s21049_s2 + $0x118] sm:$0xff] }
 0xd66   :  { %8036 = vmatmul.bf16.gmra.mxu3 %v17716_v36  ;;  %21851 = vst [vmem:[#allocation134_spill] sm:$0xff] %v17753_v60  ;;  %v13327_v18 = vld [vmem:[%s21049_s2 + $0x158] sm:$0xff]  ;;  %8285 = vmatpush.bf16.msra.mxu2 %v13319_v59  ;;  %v17788_v59 = vsel %vm6119_vm3, %v21854_v16, %v17048_v62 }
 0xd67   :  { %8454 = vmatpush.bf16.msra.mxu3 %v13327_v18  ;;  %v13335_v62 = vld [vmem:[%s21049_s2 + $0x198] sm:$0xff] }
 0xd68   :  { %v7868_v12 = vpop.f32.mrf.mxu2  ;;  %8623 = vmatpush.bf16.msrb.mxu1 %v13335_v62 }
 0xd69   :  { %v17724_v47 = vadd.f32 %v7868_v12, %v7700_v2  ;;  %v7997_v39 = vpop.f32.mrf.mxu3 }
 0xd6a   :  { %v17727_v30 = vadd.f32 %v7997_v39, %v17438_v1  ;;  %v8143_v35 = vpop.f32.mrf.mxu1  ;;  %v21848_v39 = vld [vmem:[#allocation98_spill] sm:$0xff] }
 0xd6b   :  { %v17730_v55 = vadd.f32 %v8143_v35, %v17550_v27  ;;  %v17747_v27 = vsel %vm6119_vm3, %v21848_v39, %v17584_v7  ;;  %v21850_v35 = vld [vmem:[#allocation4_spill] sm:$0xff] }
 0xd6c   :  { %21849 = vst [vmem:[#allocation96_spill] sm:$0xff] %v17747_v27 }
 0xd70   :  { %v17735_v36 = vpop.f32.mrf.mxu2 }
 0xd71   :  { %v7999_v45 = vpop.f32.mrf.mxu3 }
 0xd72   :  { %v17739_v2 = vadd.f32 %v7999_v45, %v7831_v63  ;;  %v8146_v12 = vpop.f32.mrf.mxu1 }
 0xd73   :  { %v17742_v1 = vadd.f32 %v8146_v12, %v17575_v25  ;;  %v17759_v25 = vpop.permute.xlu0 %5967 }
 0xd75   :  { %7912 = vmatmul.bf16.gmra.mxu2 %v21850_v35  ;;  %8185 = vmatmul.bf16.gmra.mxu1 %v17747_v27 }
 0xd76   :  { %8041 = vmatmul.bf16.gmra.mxu3 %v17753_v60 }
 0xd78   :  { %v7873_v63 = vpop.f32.mrf.mxu2 }
 0xd79   :  { %v17761_v32 = vadd.f32 %v7873_v63, %v7705_v53  ;;  %v8002_v7 = vpop.f32.mrf.mxu3  ;;  %v21852_v53 = vld [vmem:[#allocation136_spill] sm:$0xff] }
 0xd7a   :  { %v17764_v45 = vadd.f32 %v8002_v7, %v17467_v0  ;;  %v8148_v12 = vpop.f32.mrf.mxu1  ;;  %v7667_v63 = vadd.f32 %v17253_v57, %v21852_v53  ;;  %21855 = vst [vmem:[#allocation136_spill] sm:$0xff] %v17788_v59 }
 0xd7b   :  { %v17767_v39 = vadd.f32 %v8148_v12, %v17586_v3  ;;  %v5870_v60 = vpop.permute.xlu0 %5869 }
 0xd7c   :  { %v7836_v0 = vadd.f32 %v17480_v43, %v7667_v63  ;;  %v17792_v18 = vsel %vm6119_vm3, %v21698_v42, %v5870_v60  ;;  %v17798_v43 = vsel %vm6119_vm3, %v21669_v50, %v17080_v13 }
 0xd7d   :  { %21856 = vst [vmem:[#allocation100_spill] sm:$0xff] %v17792_v18 }
 0xd7e   :  { %21857 = vst [vmem:[#allocation191_spill] sm:$0xff] %v17798_v43 }
 0xd80   :  { %v17778_v7 = vpop.f32.mrf.mxu2 }
 0xd81   :  { %v8004_v3 = vpop.f32.mrf.mxu3 }
 0xd82   :  { %v17780_v12 = vadd.f32 %v8004_v3, %v7836_v0  ;;  %v8151_v35 = vpop.f32.mrf.mxu1  ;;  %v21858_v3 = vld [vmem:[#allocation140_spill] sm:$0xff] }
 0xd83   :  { %v17783_v15 = vadd.f32 %v8151_v35, %v17611_v54  ;;  %v7710_v54 = vadd.f32 %v17253_v57, %v17101_v33  ;;  %v7672_v50 = vadd.f32 %v17253_v57, %v21858_v3 }
 0xd85   :  { %21853 = vst [vmem:[#allocation98_spill] sm:$0xff] %v17783_v15  ;;  %7917 = vmatmul.bf16.gmra.mxu2 %v17792_v18  ;;  %8190 = vmatmul.bf16.gmra.mxu1 %v17788_v59 }
 0xd86   :  { %8046 = vmatmul.bf16.gmra.mxu3 %v17798_v43  ;;  %v7841_v43 = vadd.f32 %v17518_v21, %v7672_v50  ;;  %v17834_v50 = vsel %vm6119_vm3, %v21684_v46, %v17093_v51  ;;  %v7715_v21 = vadd.f32 %v17253_v57, %v17129_v61  ;;  %v21862_v51 = vld [vmem:[#allocation173_spill] sm:$0xff] }
 0xd87   :  { %v7677_v3 = vadd.f32 %v17253_v57, %v21862_v51 }
 0xd88   :  { %v7878_v16 = vpop.f32.mrf.mxu2 }
 0xd89   :  { %v17807_v35 = vadd.f32 %v7878_v16, %v7710_v54  ;;  %v8007_v60 = vpop.f32.mrf.mxu3 }
 0xd8a   :  { %v17810_v53 = vadd.f32 %v8007_v60, %v17508_v9  ;;  %v8153_v63 = vpop.f32.mrf.mxu1  ;;  %v21859_v9 = vld [vmem:[#allocation102_spill] sm:$0xff] }
 0xd8b   :  { %v17813_v0 = vadd.f32 %v8153_v63, %v17626_v44  ;;  %v17828_v16 = vsel %vm6119_vm3, %v21859_v9, %v17722_v52  ;;  %21861 = vst [vmem:[#allocation102_spill] sm:$0xff] %v17834_v50 }
 0xd8c   :  { %21860 = vst [vmem:[#allocation140_spill] sm:$0xff] %v17828_v16 }
 0xd90   :  { %v17818_v18 = vpop.f32.mrf.mxu2 }
 0xd91   :  { %v8009_v33 = vpop.f32.mrf.mxu3 }
 0xd92   :  { %v17820_v15 = vadd.f32 %v8009_v33, %v7841_v43  ;;  %v8156_v62 = vpop.f32.mrf.mxu1  ;;  %v7846_v33 = vadd.f32 %v17548_v19, %v7677_v3 }
 0xd93   :  { %v17823_v54 = vadd.f32 %v8156_v62, %v17660_v20 }
 0xd95   :  { %7922 = vmatmul.bf16.gmra.mxu2 %v16851_v41  ;;  %8195 = vmatmul.bf16.gmra.mxu1 %v17828_v16 }
 0xd96   :  { %8051 = vmatmul.bf16.gmra.mxu3 %v17834_v50  ;;  %v21876_v50 = vld [vmem:[#allocation179_spill] sm:$0xff] }
 0xd98   :  { %v7883_v44 = vpop.f32.mrf.mxu2 }
 0xd99   :  { %v17840_v20 = vadd.f32 %v7883_v44, %v7715_v21  ;;  %v8012_v43 = vpop.f32.mrf.mxu3 }
 0xd9a   :  { %v17843_v52 = vadd.f32 %v8012_v43, %v17538_v26  ;;  %v8158_v60 = vpop.f32.mrf.mxu1  ;;  %v21863_v26 = vld [vmem:[#allocation119_spill] sm:$0xff] }
 0xd9b   :  { %v17846_v63 = vadd.f32 %v8158_v60, %v17669_v23  ;;  %v17861_v43 = vsel %vm6119_vm3, %v21863_v26, %v17465_v14  ;;  %v21865_v23 = vld [vmem:[#allocation124_spill] sm:$0xff]  ;;  %v17873_v60 = vpop.permute.xlu1 %5998 }
 0xd9c   :  { %21864 = vst [vmem:[#allocation173_spill] sm:$0xff] %v17861_v43  ;;  %v17867_v19 = vsel %vm6119_vm3, %v21865_v23, %v17606_v17  ;;  %v21868_v23 = vld [vmem:[#allocation175_spill] sm:$0xff] }
 0xd9d   :  { %21866 = vst [vmem:[#allocation119_spill] sm:$0xff] %v17867_v19 }
 0xda0   :  { %v17851_v62 = vpop.f32.mrf.mxu2 }
 0xda1   :  { %v8014_v9 = vpop.f32.mrf.mxu3 }
 0xda2   :  { %v17853_v61 = vadd.f32 %v8014_v9, %v7846_v33  ;;  %v8161_v21 = vpop.f32.mrf.mxu1  ;;  %v13318_v33 = vld [vmem:[%s21049_s2 + $0x110] sm:$0xff] }
 0xda3   :  { %v17856_v44 = vadd.f32 %v8161_v21, %v17692_v40  ;;  %v7720_v40 = vadd.f32 %v17253_v57, %v17150_v8  ;;  %8286 = vmatpush.bf16.msra.mxu2 %v13318_v33  ;;  %v13317_v8 = vld [vmem:[%s21049_s2 + $0x108] sm:$0xff] }
 0xda5   :  { %7927 = vmatmul.bf16.gmra.mxu2 %v17232_v37  ;;  %8200 = vmatmul.bf16.gmra.mxu1 %v17861_v43 }
 0xda6   :  { %8056 = vmatmul.bf16.gmra.mxu3 %v17867_v19 }
 0xda7   :  { %8287 = vmatpush.bf16.msra.mxu2 %v13317_v8  ;;  %v21872_v8 = vld [vmem:[#allocation28_spill] sm:$0xff] }
 0xda8   :  { %v7888_v51 = vpop.f32.mrf.mxu2 }
 0xda9   :  { %v17875_v3 = vadd.f32 %v7888_v51, %v7720_v40  ;;  %v8017_v14 = vpop.f32.mrf.mxu3  ;;  %v7682_v40 = vadd.f32 %v17253_v57, %v21868_v23  ;;  %v21870_v23 = vld [vmem:[#allocation121_spill] sm:$0xff] }
 0xdaa   :  { %v17881_v9 = vadd.f32 %v8017_v14, %v17572_v34  ;;  %v8163_v21 = vpop.f32.mrf.mxu1  ;;  %v13316_v34 = vld [vmem:[%s21049_s2 + $0x100] sm:$0xff] }
 0xdab   :  { %v17884_v26 = vadd.f32 %v8163_v21, %v17702_v48  ;;  %v7851_v51 = vadd.f32 %v17582_v29, %v7682_v40  ;;  %v17897_v48 = vpop.permute.xlu1 %5961  ;;  %8288 = vmatpush.bf16.msra.mxu2 %v13316_v34  ;;  %v17907_v29 = vsel %vm6119_vm3, %v21870_v23, %v17737_v49 }
 0xdac   :  { %21871 = vst [vmem:[#allocation121_spill] sm:$0xff] %v17907_v29  ;;  %v17913_v40 = vsel %vm6119_vm3, %v21688_v6, %v17897_v48 }
 0xdad   :  { %21867 = vst [vmem:[#allocation192_spill] sm:$0xff] %v17884_v26 }
 0xdae   :  { %21873 = vst [vmem:[#allocation193_spill] sm:$0xff] %v17913_v40 }
 0xdb0   :  { %v17892_v46 = vpop.f32.mrf.mxu2 }
 0xdb1   :  { %v8019_v43 = vpop.f32.mrf.mxu3 }
 0xdb2   :  { %v17899_v14 = vadd.f32 %v8019_v43, %v7851_v51  ;;  %v8166_v33 = vpop.f32.mrf.mxu1  ;;  %v21874_v43 = vld [vmem:[#allocation25_spill] sm:$0xff]  ;;  %v17919_v51 = vpop.permute.xlu0 %5975 }
 0xdb3   :  { %v17902_v21 = vadd.f32 %v8166_v33, %v17727_v30  ;;  %v7725_v30 = vadd.f32 %v17253_v57, %v21874_v43  ;;  %v7687_v43 = vadd.f32 %v17253_v57, %v21876_v50 }
 0xdb5   :  { %21869 = vst [vmem:[#allocation175_spill] sm:$0xff] %v17902_v21  ;;  %7932 = vmatmul.bf16.gmra.mxu2 %v21872_v8  ;;  %8205 = vmatmul.bf16.gmra.mxu1 %v17907_v29  ;;  %v7856_v8 = vadd.f32 %v17624_v5, %v7687_v43  ;;  %v21882_v5 = vld [vmem:[#allocation21_spill] sm:$0xff]  ;;  %v21883_v43 = vld [vmem:[#allocation132_spill] sm:$0xff] }
 0xdb6   :  { %8061 = vmatmul.bf16.gmra.mxu3 %v17913_v40  ;;  %v13326_v40 = vld [vmem:[%s21049_s2 + $0x150] sm:$0xff] }
 0xdb7   :  { %8455 = vmatpush.bf16.msra.mxu3 %v13326_v40  ;;  %v21880_v40 = vld [vmem:[#allocation14_spill] sm:$0xff] }
 0xdb8   :  { %v7893_v34 = vpop.f32.mrf.mxu2 }
 0xdb9   :  { %v17921_v33 = vadd.f32 %v7893_v34, %v7725_v30  ;;  %v8022_v49 = vpop.f32.mrf.mxu3 }
 0xdba   :  { %v17924_v23 = vadd.f32 %v8022_v49, %v17608_v38  ;;  %v8168_v19 = vpop.f32.mrf.mxu1  ;;  %v5872_v34 = vpop.permute.xlu0 %5871 }
 0xdbb   :  { %v17927_v6 = vadd.f32 %v8168_v19, %v17739_v2  ;;  %v21878_v19 = vld [vmem:[#allocation123_spill] sm:$0xff]  ;;  %v17949_v50 = vsel %vm6119_vm3, %v21880_v40, %v5872_v34 }
 0xdbc   :  { %v17945_v41 = vsel %vm6119_vm3, %v21878_v19, %v17080_v13  ;;  %21881 = vst [vmem:[#allocation194_spill] sm:$0xff] %v17949_v50  ;;  %v13334_v13 = vld [vmem:[%s21049_s2 + $0x190] sm:$0xff] }
 0xdbd   :  { %21875 = vst [vmem:[#allocation25_spill] sm:$0xff] %v17927_v6  ;;  %8624 = vmatpush.bf16.msrb.mxu1 %v13334_v13 }
 0xdbe   :  { %21879 = vst [vmem:[#allocation123_spill] sm:$0xff] %v17945_v41 }
 0xdc0   :  { %v17935_v30 = vpop.f32.mrf.mxu2 }
 0xdc1   :  { %v8024_v37 = vpop.f32.mrf.mxu3 }
 0xdc2   :  { %v17937_v38 = vadd.f32 %v8024_v37, %v7856_v8  ;;  %v8171_v49 = vpop.f32.mrf.mxu1  ;;  %v17955_v37 = vsel %vm6119_vm3, %v21883_v43, %v21882_v5 }
 0xdc3   :  { %v17940_v2 = vadd.f32 %v8171_v49, %v17764_v45  ;;  %21884 = vst [vmem:[#allocation21_spill] sm:$0xff] %v17955_v37  ;;  %v21885_v45 = vld [vmem:[#allocation60_spill] sm:$0xff] }
 0xdc4   :  { %v7730_v8 = vadd.f32 %v17253_v57, %v21885_v45 }
 0xdc5   :  { %21877 = vst [vmem:[#allocation179_spill] sm:$0xff] %v17940_v2  ;;  %7937 = vmatmul.bf16.gmra.mxu2 %v17949_v50  ;;  %8210 = vmatmul.bf16.gmra.mxu1 %v17945_v41 }
 0xdc6   :  { %8066 = vmatmul.bf16.gmra.mxu3 %v17955_v37  ;;  %v21886_v37 = vld [vmem:[#allocation5_spill] sm:$0xff] }
 0xdc7   :  { %v7692_v6 = vadd.f32 %v17253_v57, %v21886_v37 }
 0xdc8   :  { %v7898_v34 = vpop.f32.mrf.mxu2 }
 0xdc9   :  { %v17964_v49 = vadd.f32 %v7898_v34, %v7730_v8  ;;  %v8027_v19 = vpop.f32.mrf.mxu3  ;;  %v7861_v21 = vadd.f32 %v17667_v58, %v7692_v6  ;;  %v21893_v6 = vld [vmem:[#allocation44_spill] sm:$0xff] }
 0xdca   :  { %v17967_v50 = vadd.f32 %v8027_v19, %v17657_v31  ;;  %v8173_v43 = vpop.f32.mrf.mxu1  ;;  %v21888_v31 = vld [vmem:[#allocation128_spill] sm:$0xff] }
 0xdcb   :  { %v17970_v2 = vadd.f32 %v8173_v43, %v17780_v12  ;;  %v17985_v34 = vsel %vm6119_vm3, %v21888_v31, %v17873_v60  ;;  %v21890_v12 = vld [vmem:[#allocation97_spill] sm:$0xff]  ;;  %v21891_v43 = vld [vmem:[#allocation164_spill] sm:$0xff] }
 0xdcc   :  { %21889 = vst [vmem:[#allocation5_spill] sm:$0xff] %v17985_v34  ;;  %v17990_v37 = vsel %vm6119_vm3, %v21891_v43, %v21890_v12  ;;  %v21894_v58 = vld [vmem:[#allocation52_spill] sm:$0xff]  ;;  %v21896_v12 = vld [vmem:[#allocation17_spill] sm:$0xff] }
 0xdcd   :  { %21892 = vst [vmem:[#allocation128_spill] sm:$0xff] %v17990_v37  ;;  %v7697_v43 = vadd.f32 %v17253_v57, %v21896_v12 }
 0xdd0   :  { %v17975_v41 = vpop.f32.mrf.mxu2 }
 0xdd1   :  { %v8029_v45 = vpop.f32.mrf.mxu3 }
 0xdd2   :  { %v17977_v26 = vadd.f32 %v8029_v45, %v7861_v21  ;;  %v8176_v13 = vpop.f32.mrf.mxu1 }
 0xdd3   :  { %v17980_v8 = vadd.f32 %v8176_v13, %v17810_v53  ;;  %v7735_v53 = vadd.f32 %v17253_v57, %v21894_v58 }
 0xdd5   :  { %21887 = vst [vmem:[#allocation60_spill] sm:$0xff] %v17980_v8  ;;  %8215 = vmatmul.bf16.gmra.mxu1 %v17985_v34  ;;  %8289 = vmatmul.bf16.vlgmr.msra.gmra.mxu2 %v21893_v6  ;;  %v7866_v6 = vadd.f32 %v17700_v56, %v7697_v43  ;;  %v21902_v56 = vld [vmem:[#allocation46_spill] sm:$0xff]  ;;  %v6001_v43 = vpop.permute.xlu1 %6000 }
 0xdd6   :  { %8071 = vmatmul.bf16.gmra.mxu3 %v17990_v37 }
 0xdd8   :  { %v7903_v21 = vpop.f32.mrf.mxu2 }
 0xdd9   :  { %v17997_v19 = vadd.f32 %v7903_v21, %v7735_v53  ;;  %v8032_v45 = vpop.f32.mrf.mxu3 }
 0xdda   :  { %v18000_v60 = vadd.f32 %v8032_v45, %v17689_v11  ;;  %v8178_v13 = vpop.f32.mrf.mxu1  ;;  %v21898_v11 = vld [vmem:[#allocation156_spill] sm:$0xff] }
 0xddb   :  { %v18003_v31 = vadd.f32 %v8178_v13, %v17820_v15  ;;  %v18018_v45 = vsel %vm6119_vm3, %v21898_v11, %v17606_v17  ;;  %v21900_v15 = vld [vmem:[#allocation169_spill] sm:$0xff] }
 0xddc   :  { %21899 = vst [vmem:[#allocation52_spill] sm:$0xff] %v18018_v45  ;;  %v18023_v13 = vsel %vm6119_vm3, %v21900_v15, %v17759_v25 }
 0xddd   :  { %21895 = vst [vmem:[#allocation97_spill] sm:$0xff] %v18003_v31  ;;  %v18043_v31 = vpop.permute.xlu1 %5969 }
 0xdde   :  { %21901 = vst [vmem:[#allocation17_spill] sm:$0xff] %v18023_v13 }
 0xde0   :  { %v18008_v37 = vpop.f32.mrf.mxu2 }
 0xde1   :  { %v8034_v8 = vpop.f32.mrf.mxu3 }
 0xde2   :  { %v18010_v58 = vadd.f32 %v8034_v8, %v7866_v6  ;;  %v8181_v53 = vpop.f32.mrf.mxu1  ;;  %v21903_v8 = vld [vmem:[#allocation11_spill] sm:$0xff] }
 0xde3   :  { %v18013_v21 = vadd.f32 %v8181_v53, %v17843_v52  ;;  %v7740_v52 = vadd.f32 %v17253_v57, %v21903_v8 }
 0xde5   :  { %21897 = vst [vmem:[#allocation44_spill] sm:$0xff] %v18013_v21  ;;  %8220 = vmatmul.bf16.gmra.mxu1 %v18018_v45  ;;  %8294 = vmatmul.bf16.gmra.mxu2 %v21902_v56  ;;  %v21905_v45 = vld [vmem:[#allocation118_spill] sm:$0xff] }
 0xde6   :  { %8076 = vmatmul.bf16.gmra.mxu3 %v18023_v13  ;;  %v7702_v56 = vadd.f32 %v17253_v57, %v21905_v45  ;;  %v21910_v45 = vld [vmem:[#allocation51_spill] sm:$0xff] }
 0xde8   :  { %v7908_v12 = vpop.f32.mrf.mxu2  ;;  %v7871_v13 = vadd.f32 %v17735_v36, %v7702_v56  ;;  %v18058_v36 = vsel %vm6119_vm3, %v21698_v42, %v18043_v31  ;;  %v21913_v42 = vld [vmem:[#allocation20_spill] sm:$0xff] }
 0xde9   :  { %v18030_v6 = vadd.f32 %v7908_v12, %v7740_v52  ;;  %v8037_v17 = vpop.f32.mrf.mxu3  ;;  %21909 = vst [vmem:[#allocation118_spill] sm:$0xff] %v18058_v36 }
 0xdea   :  { %v18033_v53 = vadd.f32 %v8037_v17, %v17724_v47  ;;  %v8183_v11 = vpop.f32.mrf.mxu1  ;;  %v21907_v17 = vld [vmem:[#allocation161_spill] sm:$0xff] }
 0xdeb   :  { %v18036_v15 = vadd.f32 %v8183_v11, %v17853_v61  ;;  %v18053_v61 = vsel %vm6119_vm3, %v21907_v17, %v17897_v48 }
 0xdec   :  { %21908 = vst [vmem:[#allocation11_spill] sm:$0xff] %v18053_v61 }
 0xded   :  { %21904 = vst [vmem:[#allocation156_spill] sm:$0xff] %v18036_v15  ;;  %v21919_v15 = vld [vmem:[#allocation22_spill] sm:$0xff] }
 0xdf0   :  { %v18041_v21 = vpop.f32.mrf.mxu2 }
 0xdf1   :  { %v8039_v8 = vpop.f32.mrf.mxu3 }
 0xdf2   :  { %v18045_v52 = vadd.f32 %v8039_v8, %v7871_v13  ;;  %v8186_v12 = vpop.f32.mrf.mxu1  ;;  %v21911_v13 = vld [vmem:[#allocation112_spill] sm:$0xff] }
 0xdf3   :  { %v18048_v47 = vadd.f32 %v8186_v12, %v17881_v9  ;;  %v7745_v9 = vadd.f32 %v17253_v57, %v21911_v13 }
 0xdf5   :  { %21906 = vst [vmem:[#allocation46_spill] sm:$0xff] %v18048_v47  ;;  %8225 = vmatmul.bf16.gmra.mxu1 %v18053_v61  ;;  %8299 = vmatmul.bf16.gmra.mxu2 %v21910_v45  ;;  %v13325_v45 = vld [vmem:[%s21049_s2 + $0x148] sm:$0xff] }
 0xdf6   :  { %8081 = vmatmul.bf16.gmra.mxu3 %v18058_v36  ;;  %v7707_v36 = vadd.f32 %v17253_v57, %v21913_v42 }
 0xdf7   :  { %8456 = vmatpush.bf16.msra.mxu3 %v13325_v45  ;;  %v21917_v45 = vld [vmem:[#allocation45_spill] sm:$0xff] }
 0xdf8   :  { %v7913_v11 = vpop.f32.mrf.mxu2  ;;  %v7876_v13 = vadd.f32 %v17778_v7, %v7707_v36  ;;  %v21920_v7 = vld [vmem:[#allocation174_spill] sm:$0xff] }
 0xdf9   :  { %v18065_v56 = vadd.f32 %v7913_v11, %v7745_v9  ;;  %v8042_v8 = vpop.f32.mrf.mxu3  ;;  %v18097_v36 = vsel %vm6119_vm3, %v21920_v7, %v21919_v15  ;;  %v21924_v7 = vld [vmem:[#allocation37_spill] sm:$0xff] }
 0xdfa   :  { %v18068_v48 = vadd.f32 %v8042_v8, %v17761_v32  ;;  %v8188_v12 = vpop.f32.mrf.mxu1  ;;  %21921 = vst [vmem:[#allocation20_spill] sm:$0xff] %v18097_v36 }
 0xdfb   :  { %v18071_v17 = vadd.f32 %v8188_v12, %v17899_v14  ;;  %v21915_v14 = vld [vmem:[#allocation166_spill] sm:$0xff] }
 0xdfc   :  { %v18089_v12 = vsel %vm6119_vm3, %v21915_v14, %v21882_v5  ;;  %v21922_v5 = vld [vmem:[#allocation181_spill] sm:$0xff] }
 0xdfd   :  { %21912 = vst [vmem:[#allocation161_spill] sm:$0xff] %v18071_v17  ;;  %v21918_v17 = vld [vmem:[#allocation58_spill] sm:$0xff] }
 0xdfe   :  { %21916 = vst [vmem:[#allocation112_spill] sm:$0xff] %v18089_v12  ;;  %v6490_v42 = vsel %vm6119_vm3, %v21918_v17, %v21917_v45 }
 0xe00   :  { %v18079_v9 = vpop.f32.mrf.mxu2 }
 0xe01   :  { %v8044_v11 = vpop.f32.mrf.mxu3 }
 0xe02   :  { %v18081_v47 = vadd.f32 %v8044_v11, %v7876_v13  ;;  %v8191_v32 = vpop.f32.mrf.mxu1  ;;  %v7750_v13 = vadd.f32 %v17253_v57, %v21922_v5 }
 0xe03   :  { %v18084_v8 = vadd.f32 %v8191_v32, %v17924_v23  ;;  %v13333_v23 = vld [vmem:[%s21049_s2 + $0x188] sm:$0xff] }
 0xe04   :  { %8625 = vmatpush.bf16.msrb.mxu1 %v13333_v23 }
 0xe05   :  { %21914 = vst [vmem:[#allocation51_spill] sm:$0xff] %v18084_v8  ;;  %8230 = vmatmul.bf16.gmra.mxu1 %v18089_v12  ;;  %8304 = vmatmul.bf16.gmra.mxu2 %v6490_v42 }
 0xe06   :  { %8086 = vmatmul.bf16.gmra.mxu3 %v18097_v36  ;;  %v7712_v36 = vadd.f32 %v17253_v57, %v21924_v7 }
 0xe08   :  { %v7918_v11 = vpop.f32.mrf.mxu2  ;;  %v7881_v8 = vadd.f32 %v17818_v18, %v7712_v36  ;;  %v21931_v18 = vld [vmem:[#allocation65_spill] sm:$0xff] }
 0xe09   :  { %v18106_v17 = vadd.f32 %v7918_v11, %v7750_v13  ;;  %v8047_v32 = vpop.f32.mrf.mxu3 }
 0xe0a   :  { %v18109_v14 = vadd.f32 %v8047_v32, %v17807_v35  ;;  %v8193_v45 = vpop.f32.mrf.mxu1  ;;  %v21926_v35 = vld [vmem:[#allocation170_spill] sm:$0xff]  ;;  %v21929_v32 = vld [vmem:[#allocation7_spill] sm:$0xff] }
 0xe0b   :  { %v18112_v42 = vadd.f32 %v8193_v45, %v17937_v38  ;;  %v18126_v11 = vsel %vm6119_vm3, %v21926_v35, %v6001_v43  ;;  %v21928_v38 = vld [vmem:[#allocation18_spill] sm:$0xff] }
 0xe0c   :  { %21927 = vst [vmem:[#allocation58_spill] sm:$0xff] %v18126_v11  ;;  %v18131_v45 = vsel %vm6119_vm3, %v21929_v32, %v21928_v38  ;;  %v21934_v38 = vld [vmem:[#allocation38_spill] sm:$0xff] }
 0xe0d   :  { %21923 = vst [vmem:[#allocation166_spill] sm:$0xff] %v18112_v42  ;;  %v7717_v32 = vadd.f32 %v17253_v57, %v21934_v38  ;;  %v21939_v38 = vld [vmem:[#allocation10_spill] sm:$0xff] }
 0xe0e   :  { %21930 = vst [vmem:[#allocation22_spill] sm:$0xff] %v18131_v45 }
 0xe10   :  { %v18117_v12 = vpop.f32.mrf.mxu2 }
 0xe11   :  { %v8049_v5 = vpop.f32.mrf.mxu3 }
 0xe12   :  { %v18119_v61 = vadd.f32 %v8049_v5, %v7881_v8  ;;  %v8196_v23 = vpop.f32.mrf.mxu1  ;;  %v21932_v8 = vld [vmem:[#allocation183_spill] sm:$0xff] }
 0xe13   :  { %v18122_v13 = vadd.f32 %v8196_v23, %v17967_v50  ;;  %v7755_v7 = vadd.f32 %v17253_v57, %v21932_v8 }
 0xe15   :  { %21925 = vst [vmem:[#allocation45_spill] sm:$0xff] %v18122_v13  ;;  %8235 = vmatmul.bf16.gmra.mxu1 %v18126_v11  ;;  %8309 = vmatmul.bf16.gmra.mxu2 %v21931_v18  ;;  %v21935_v18 = vld [vmem:[#allocation68_spill] sm:$0xff]  ;;  %v7886_v13 = vadd.f32 %v17851_v62, %v7717_v32  ;;  %v21941_v62 = vld [vmem:[#allocation67_spill] sm:$0xff]  ;;  %v18178_v32 = vpop.permute.xlu1 %6002 }
 0xe16   :  { %8091 = vmatmul.bf16.gmra.mxu3 %v18131_v45  ;;  %v7757_v45 = vadd.f32 %v17253_v57, %v21935_v18  ;;  %v18166_v57 = vsel %vm6119_vm3, %v21939_v38, %v17919_v51 }
 0xe17   :  { %21940 = vst [vmem:[#allocation18_spill] sm:$0xff] %v18166_v57 }
 0xe18   :  { %v7923_v50 = vpop.f32.mrf.mxu2 }
 0xe19   :  { %v18138_v36 = vadd.f32 %v7923_v50, %v7755_v7  ;;  %v8052_v5 = vpop.f32.mrf.mxu3 }
 0xe1a   :  { %v18141_v43 = vadd.f32 %v8052_v5, %v17840_v20  ;;  %v8198_v23 = vpop.f32.mrf.mxu1 }
 0xe1b   :  { %v18144_v35 = vadd.f32 %v8198_v23, %v17977_v26  ;;  %v21937_v26 = vld [vmem:[#allocation64_spill] sm:$0xff] }
 0xe1c   :  { %v18161_v23 = vsel %vm6119_vm3, %v21937_v26, %v17759_v25 }
 0xe1d   :  { %21933 = vst [vmem:[#allocation181_spill] sm:$0xff] %v18144_v35 }
 0xe1e   :  { %21938 = vst [vmem:[#allocation170_spill] sm:$0xff] %v18161_v23 }
 0xe20   :  { %v7925_v8 = vpop.f32.mrf.mxu2 }
 0xe21   :  { %v18151_v42 = vadd.f32 %v7925_v8, %v7757_v45  ;;  %v8054_v7 = vpop.f32.mrf.mxu3 }
 0xe22   :  { %v18153_v50 = vadd.f32 %v8054_v7, %v7886_v13  ;;  %v8201_v20 = vpop.f32.mrf.mxu1  ;;  %v21942_v13 = vld [vmem:[#allocation184_spill] sm:$0xff] }
 0xe23   :  { %v18156_v5 = vadd.f32 %v8201_v20, %v18000_v60  ;;  %v18174_v60 = vld [vmem:[%s21047_s6 + $0x1] ss:$0 sm:$0xff] }
 0xe24   :  { %v7760_v25 = vadd.f32 %v18174_v60, %v21942_v13 }
 0xe25   :  { %21936 = vst [vmem:[#allocation37_spill] sm:$0xff] %v18156_v5  ;;  %8240 = vmatmul.bf16.gmra.mxu1 %v18161_v23  ;;  %8314 = vmatmul.bf16.gmra.mxu2 %v21941_v62  ;;  %v21944_v62 = vld [vmem:[#allocation23_spill] sm:$0xff] }
 0xe26   :  { %8096 = vmatmul.bf16.gmra.mxu3 %v18166_v57  ;;  %v7722_v38 = vadd.f32 %v18174_v60, %v21944_v62  ;;  %v21945_v23 = vld [vmem:[#allocation135_spill] sm:$0xff] }
 0xe27   :  { %v7762_v57 = vadd.f32 %v18174_v60, %v21945_v23  ;;  %v21947_v23 = vld [vmem:[#allocation29_spill] sm:$0xff] }
 0xe28   :  { %v7928_v45 = vpop.f32.mrf.mxu2  ;;  %v7891_v13 = vadd.f32 %v17892_v46, %v7722_v38  ;;  %v18208_v46 = vsel %vm6119_vm3, %v21947_v23, %v18043_v31  ;;  %v21950_v38 = vld [vmem:[#allocation70_spill] sm:$0xff] }
 0xe29   :  { %v18180_v18 = vadd.f32 %v7928_v45, %v7760_v25  ;;  %v8057_v8 = vpop.f32.mrf.mxu3  ;;  %v18198_v45 = vpop.permute.xlu1 %5977  ;;  %21948 = vst [vmem:[#allocation38_spill] sm:$0xff] %v18208_v46  ;;  %v21953_v23 = vld [vmem:[#allocation66_spill] sm:$0xff] }
 0xe2a   :  { %v18183_v7 = vadd.f32 %v8057_v8, %v17875_v3  ;;  %v8203_v20 = vpop.f32.mrf.mxu1  ;;  %v13324_v3 = vld [vmem:[%s21049_s2 + $0x140] sm:$0xff] }
 0xe2b   :  { %v18186_v26 = vadd.f32 %v8203_v20, %v18010_v58  ;;  %8457 = vmatpush.bf16.msra.mxu3 %v13324_v3 }
 0xe2d   :  { %21943 = vst [vmem:[#allocation65_spill] sm:$0xff] %v18186_v26  ;;  %v6015_v26 = vpop.permute.xlu0 %6014 }
 0xe30   :  { %v7930_v5 = vpop.f32.mrf.mxu2 }
 0xe31   :  { %v18193_v35 = vadd.f32 %v7930_v5, %v7762_v57  ;;  %v8059_v25 = vpop.f32.mrf.mxu3  ;;  %v18213_v5 = vsel %vm6119_vm3, %v21880_v40, %v18198_v45  ;;  %v21951_v57 = vld [vmem:[#allocation56_spill] sm:$0xff]  ;;  %v7727_v40 = vadd.f32 %v18174_v60, %v21953_v23 }
 0xe32   :  { %v18200_v58 = vadd.f32 %v8059_v25, %v7891_v13  ;;  %v8206_v8 = vpop.f32.mrf.mxu1  ;;  %21949 = vst [vmem:[#allocation68_spill] sm:$0xff] %v18213_v5  ;;  %v21958_v23 = vld [vmem:[#allocation72_spill] sm:$0xff] }
 0xe33   :  { %v18203_v20 = vadd.f32 %v8206_v8, %v18033_v53  ;;  %v7765_v53 = vadd.f32 %v18174_v60, %v21951_v57 }
 0xe35   :  { %21946 = vst [vmem:[#allocation183_spill] sm:$0xff] %v18203_v20  ;;  %8245 = vmatmul.bf16.gmra.mxu1 %v18208_v46  ;;  %8319 = vmatmul.bf16.gmra.mxu2 %v21950_v38  ;;  %v21954_v38 = vld [vmem:[#allocation138_spill] sm:$0xff]  ;;  %v7896_v20 = vadd.f32 %v17935_v30, %v7727_v40  ;;  %v21959_v30 = vld [vmem:[#allocation120_spill] sm:$0xff] }
 0xe36   :  { %8101 = vmatmul.bf16.gmra.mxu3 %v18213_v5  ;;  %v7767_v5 = vadd.f32 %v18174_v60, %v21954_v38  ;;  %v6494_v38 = vsel %vm6119_vm3, %v21958_v23, %v6015_v26  ;;  %v21960_v40 = vld [vmem:[#allocation24_spill] sm:$0xff] }
 0xe38   :  { %v7933_v62 = vpop.f32.mrf.mxu2 }
 0xe39   :  { %v18220_v13 = vadd.f32 %v7933_v62, %v7765_v53  ;;  %v8062_v25 = vpop.f32.mrf.mxu3 }
 0xe3a   :  { %v18223_v31 = vadd.f32 %v8062_v25, %v17921_v33  ;;  %v8208_v3 = vpop.f32.mrf.mxu1 }
 0xe3b   :  { %v18226_v8 = vadd.f32 %v8208_v3, %v18045_v52  ;;  %v21956_v52 = vld [vmem:[#allocation8_spill] sm:$0xff] }
 0xe3c   :  { %v18243_v3 = vsel %vm6119_vm3, %v21956_v52, %v21919_v15 }
 0xe3d   :  { %21952 = vst [vmem:[#allocation64_spill] sm:$0xff] %v18226_v8  ;;  %v21977_v8 = vld [vmem:[#allocation146_spill] sm:$0xff] }
 0xe3e   :  { %21957 = vst [vmem:[#allocation184_spill] sm:$0xff] %v18243_v3 }
 0xe40   :  { %v7935_v57 = vpop.f32.mrf.mxu2 }
 0xe41   :  { %v18233_v53 = vadd.f32 %v7935_v57, %v7767_v5  ;;  %v8064_v62 = vpop.f32.mrf.mxu3  ;;  %v18250_v5 = vsel %vm6119_vm3, %v21960_v40, %v21959_v30  ;;  %v21965_v40 = vld [vmem:[#allocation142_spill] sm:$0xff] }
 0xe42   :  { %v18235_v46 = vadd.f32 %v8064_v62, %v7896_v20  ;;  %v8211_v33 = vpop.f32.mrf.mxu1  ;;  %21961 = vst [vmem:[#allocation23_spill] sm:$0xff] %v18250_v5  ;;  %v21962_v20 = vld [vmem:[#allocation94_spill] sm:$0xff] }
 0xe43   :  { %v18238_v25 = vadd.f32 %v8211_v33, %v18068_v48  ;;  %v13332_v48 = vld [vmem:[%s21049_s2 + $0x180] sm:$0xff]  ;;  %v7770_v15 = vadd.f32 %v18174_v60, %v21962_v20 }
 0xe44   :  { %8626 = vmatpush.bf16.msrb.mxu1 %v13332_v48 }
 0xe45   :  { %21955 = vst [vmem:[#allocation67_spill] sm:$0xff] %v18238_v25  ;;  %8250 = vmatmul.bf16.gmra.mxu1 %v18243_v3  ;;  %8324 = vmatmul.bf16.gmra.mxu2 %v6494_v38  ;;  %v21964_v38 = vld [vmem:[#allocation61_spill] sm:$0xff] }
 0xe46   :  { %8106 = vmatmul.bf16.gmra.mxu3 %v18250_v5  ;;  %v7732_v30 = vadd.f32 %v18174_v60, %v21964_v38  ;;  %v7772_v5 = vadd.f32 %v18174_v60, %v21965_v40  ;;  %v21969_v40 = vld [vmem:[#allocation80_spill] sm:$0xff] }
 0xe48   :  { %v7938_v57 = vpop.f32.mrf.mxu2  ;;  %v7901_v20 = vadd.f32 %v17975_v41, %v7732_v30  ;;  %v21970_v41 = vld [vmem:[#allocation69_spill] sm:$0xff] }
 0xe49   :  { %v18259_v26 = vadd.f32 %v7938_v57, %v7770_v15  ;;  %v8067_v62 = vpop.f32.mrf.mxu3 }
 0xe4a   :  { %v18262_v33 = vadd.f32 %v8067_v62, %v17964_v49  ;;  %v8213_v52 = vpop.f32.mrf.mxu1 }
 0xe4b   :  { %v18265_v23 = vadd.f32 %v8213_v52, %v18081_v47  ;;  %v21967_v47 = vld [vmem:[#allocation12_spill] sm:$0xff] }
 0xe4c   :  { %v18282_v52 = vsel %vm6119_vm3, %v21967_v47, %v18178_v32  ;;  %v21973_v32 = vld [vmem:[#allocation50_spill] sm:$0xff] }
 0xe4d   :  { %21963 = vst [vmem:[#allocation135_spill] sm:$0xff] %v18265_v23 }
 0xe4e   :  { %21968 = vst [vmem:[#allocation70_spill] sm:$0xff] %v18282_v52 }
 0xe50   :  { %v7940_v25 = vpop.f32.mrf.mxu2 }
 0xe51   :  { %v18272_v48 = vadd.f32 %v7940_v25, %v7772_v5  ;;  %v8069_v15 = vpop.f32.mrf.mxu3  ;;  %v21971_v5 = vld [vmem:[#allocation49_spill] sm:$0xff] }
 0xe52   :  { %v18274_v57 = vadd.f32 %v8069_v15, %v7901_v20  ;;  %v8216_v49 = vpop.f32.mrf.mxu1  ;;  %v7617_v38 = vadd.f32 %v18174_v60, %v21971_v5  ;;  %v21972_v20 = vld [vmem:[#allocation105_spill] sm:$0xff] }
 0xe53   :  { %v18277_v62 = vadd.f32 %v8216_v49, %v18109_v14 }
 0xe54   :  { %v7786_v47 = vadd.f32 %v21973_v32, %v7617_v38  ;;  %v21984_v32 = vld [vmem:[#allocation110_spill] sm:$0xff] }
 0xe55   :  { %21966 = vst [vmem:[#allocation29_spill] sm:$0xff] %v18277_v62  ;;  %8255 = vmatmul.bf16.gmra.mxu1 %v18282_v52  ;;  %8329 = vmatmul.bf16.gmra.mxu2 %v21969_v40  ;;  %v21975_v40 = vld [vmem:[#allocation73_spill] sm:$0xff] }
 0xe56   :  { %8458 = vmatmul.bf16.vlgmr.msra.gmra.mxu3 %v21970_v41  ;;  %v7955_v23 = vadd.f32 %v21975_v40, %v7786_v47  ;;  %v21976_v41 = vld [vmem:[#allocation27_spill] sm:$0xff] }
 0xe57   :  { %v7737_v52 = vadd.f32 %v18174_v60, %v21976_v41 }
 0xe58   :  { %v8290_v25 = vpop.f32.mrf.mxu2  ;;  %v8124_v5 = vadd.f32 %v21977_v8, %v7955_v23  ;;  %v21981_v8 = vld [vmem:[#allocation82_spill] sm:$0xff] }
 0xe59   :  { %v8072_v30 = vpop.f32.mrf.mxu3  ;;  %v18290_v15 = vadd.f32 %v8290_v25, %v21972_v20  ;;  %v7906_v3 = vadd.f32 %v18008_v37, %v7737_v52  ;;  %v21982_v37 = vld [vmem:[#allocation74_spill] sm:$0xff]  ;;  %v21983_v52 = vld [vmem:[#allocation53_spill] sm:$0xff] }
 0xe5a   :  { %v18293_v14 = vadd.f32 %v8072_v30, %v17997_v19  ;;  %v8218_v49 = vpop.f32.mrf.mxu1 }
 0xe5b   :  { %v18297_v62 = vadd.f32 %v8218_v49, %v18119_v61  ;;  %v21979_v61 = vld [vmem:[#allocation159_spill] sm:$0xff] }
 0xe5c   :  { %v18314_v40 = vsel %vm6119_vm3, %v21979_v61, %v17919_v51  ;;  %v21985_v51 = vld [vmem:[#allocation54_spill] sm:$0xff]  ;;  %v21987_v61 = vld [vmem:[#allocation107_spill] sm:$0xff] }
 0xe5d   :  { %21974 = vst [vmem:[#allocation56_spill] sm:$0xff] %v18297_v62 }
 0xe5e   :  { %21980 = vst [vmem:[#allocation138_spill] sm:$0xff] %v18314_v40 }
 0xe60   :  { %v8292_v25 = vpop.f32.mrf.mxu2 }
 0xe61   :  { %v8074_v20 = vpop.f32.mrf.mxu3  ;;  %v18304_v11 = vadd.f32 %v8292_v25, %v8124_v5 }
 0xe62   :  { %v18306_v19 = vadd.f32 %v8074_v20, %v7906_v3  ;;  %v8221_v30 = vpop.f32.mrf.mxu1  ;;  %v7622_v3 = vadd.f32 %v18174_v60, %v21983_v52  ;;  %v21986_v20 = vld [vmem:[#allocation131_spill] sm:$0xff] }
 0xe63   :  { %v18309_v38 = vadd.f32 %v8221_v30, %v18141_v43 }
 0xe64   :  { %v7791_v5 = vadd.f32 %v21985_v51, %v7622_v3 }
 0xe65   :  { %21978 = vst [vmem:[#allocation66_spill] sm:$0xff] %v18309_v38  ;;  %8260 = vmatmul.bf16.gmra.mxu1 %v18314_v40  ;;  %8334 = vmatmul.bf16.gmra.mxu2 %v21981_v8  ;;  %v7742_v40 = vadd.f32 %v18174_v60, %v21987_v61  ;;  %v21988_v8 = vld [vmem:[#allocation177_spill] sm:$0xff] }
 0xe66   :  { %8463 = vmatmul.bf16.gmra.mxu3 %v21982_v37  ;;  %v7960_v30 = vadd.f32 %v21986_v20, %v7791_v5  ;;  %v13355_v61 = vld [vmem:[%s21049_s2 + $0x238] sm:$0xff] }
 0xe67   :  { %v7911_v38 = vadd.f32 %v18041_v21, %v7742_v40  ;;  %v21991_v21 = vld [vmem:[#allocation75_spill] sm:$0xff]  ;;  %v6005_v40 = vpop.permute.xlu1 %6004  ;;  %8957 = vmatpush.bf16.msrb.mxu3 %v13355_v61  ;;  %v21997_v61 = vld [vmem:[#allocation40_spill] sm:$0xff] }
 0xe68   :  { %v8295_v23 = vpop.f32.mrf.mxu2  ;;  %v8129_v52 = vadd.f32 %v21988_v8, %v7960_v30 }
 0xe69   :  { %v8077_v49 = vpop.f32.mrf.mxu3  ;;  %v18322_v47 = vadd.f32 %v8295_v23, %v21984_v32 }
 0xe6a   :  { %v18325_v43 = vadd.f32 %v8077_v49, %v18030_v6  ;;  %v8223_v41 = vpop.f32.mrf.mxu1 }
 0xe6b   :  { %v18329_v25 = vadd.f32 %v8223_v41, %v18153_v50  ;;  %v21989_v50 = vld [vmem:[#allocation165_spill] sm:$0xff] }
 0xe6c   :  { %v18346_v41 = vsel %vm6119_vm3, %v21989_v50, %v18198_v45  ;;  %v13347_v45 = vld [vmem:[%s21049_s2 + $0x1f8] sm:$0xff] }
 0xe6d   :  { %21990 = vst [vmem:[#allocation8_spill] sm:$0xff] %v18346_v41  ;;  %8788 = vmatpush.bf16.msrb.mxu2 %v13347_v45 }
 0xe70   :  { %v8297_v23 = vpop.f32.mrf.mxu2 }
 0xe71   :  { %v8079_v32 = vpop.f32.mrf.mxu3  ;;  %v18336_v62 = vadd.f32 %v8297_v23, %v8129_v52  ;;  %v21993_v52 = vld [vmem:[#allocation115_spill] sm:$0xff] }
 0xe72   :  { %v18338_v6 = vadd.f32 %v8079_v32, %v7911_v38  ;;  %v8226_v49 = vpop.f32.mrf.mxu1  ;;  %v21992_v38 = vld [vmem:[#allocation114_spill] sm:$0xff]  ;;  %v7747_v23 = vadd.f32 %v18174_v60, %v21993_v52 }
 0xe73   :  { %v18341_v3 = vadd.f32 %v8226_v49, %v18183_v7  ;;  %v6017_v49 = vpop.permute.xlu1 %6016 }
 0xe75   :  { %8265 = vmatmul.bf16.gmra.mxu1 %v18346_v41  ;;  %8339 = vmatmul.bf16.gmra.mxu2 %v17677_v10 }
 0xe76   :  { %8468 = vmatmul.bf16.gmra.mxu3 %v21991_v21 }
 0xe78   :  { %v8300_v8 = vpop.f32.mrf.mxu2 }
 0xe79   :  { %v8082_v51 = vpop.f32.mrf.mxu3  ;;  %v18352_v5 = vadd.f32 %v8300_v8, %v21992_v38 }
 0xe7a   :  { %v18355_v7 = vadd.f32 %v8082_v51, %v18065_v56  ;;  %v8228_v20 = vpop.f32.mrf.mxu1  ;;  %v7916_v56 = vadd.f32 %v18079_v9, %v7747_v23  ;;  %v21998_v9 = vld [vmem:[#allocation76_spill] sm:$0xff] }
 0xe7b   :  { %v18358_v30 = vadd.f32 %v8228_v20, %v18200_v58  ;;  %v21995_v20 = vld [vmem:[#allocation87_spill] sm:$0xff] }
 0xe7c   :  { %v18379_v45 = vsel %vm6119_vm3, %v21995_v20, %v6017_v49 }
 0xe7d   :  { %21996 = vst [vmem:[#allocation120_spill] sm:$0xff] %v18379_v45 }
 0xe80   :  { %v8302_v32 = vpop.f32.mrf.mxu2 }
 0xe81   :  { %v8084_v50 = vpop.f32.mrf.mxu3  ;;  %v18370_v58 = vadd.f32 %v8302_v32, %v17662_v28  ;;  %v13363_v28 = vld [vmem:[%s21049_s2 + $0x278] sm:$0xff] }
 0xe82   :  { %v18372_v8 = vadd.f32 %v8084_v50, %v7916_v56  ;;  %v8231_v51 = vpop.f32.mrf.mxu1  ;;  %9126 = vmatpush.bf16.msra.mxu1 %v13363_v28  ;;  %v21999_v50 = vld [vmem:[#allocation125_spill] sm:$0xff] }
 0xe83   :  { %v18375_v38 = vadd.f32 %v8231_v51, %v18223_v31  ;;  %v7752_v51 = vadd.f32 %v18174_v60, %v21999_v50 }
 0xe85   :  { %21994 = vst [vmem:[#allocation72_spill] sm:$0xff] %v18375_v38  ;;  %8270 = vmatmul.bf16.gmra.mxu1 %v21997_v61  ;;  %8344 = vmatmul.bf16.gmra.mxu2 %v18379_v45  ;;  %v7921_v20 = vadd.f32 %v18117_v12, %v7752_v51  ;;  %v22002_v12 = vld [vmem:[#allocation86_spill] sm:$0xff] }
 0xe86   :  { %8473 = vmatmul.bf16.gmra.mxu3 %v21998_v9 }
 0xe88   :  { %v8305_v52 = vpop.f32.mrf.mxu2 }
 0xe89   :  { %v8087_v23 = vpop.f32.mrf.mxu3  ;;  %v18388_v31 = vadd.f32 %v8305_v52, %v17672_v22  ;;  %v22000_v52 = vld [vmem:[#allocation147_spill] sm:$0xff] }
 0xe8a   :  { %v18391_v56 = vadd.f32 %v8087_v23, %v18106_v17  ;;  %v8233_v32 = vpop.f32.mrf.mxu1 }
 0xe8b   :  { %v18394_v49 = vadd.f32 %v8233_v32, %v18235_v46  ;;  %v18409_v46 = vsel %vm6119_vm3, %v22000_v52, %v6005_v40 }
 0xe8c   :  { %22001 = vst [vmem:[#allocation94_spill] sm:$0xff] %v18409_v46 }
 0xe90   :  { %v8307_v45 = vpop.f32.mrf.mxu2 }
 0xe91   :  { %v8089_v10 = vpop.f32.mrf.mxu3  ;;  %v18400_v28 = vadd.f32 %v8307_v45, %v17695_v4 }
 0xe92   :  { %v18402_v38 = vadd.f32 %v8089_v10, %v7921_v20  ;;  %v8236_v22 = vpop.f32.mrf.mxu1 }
 0xe93   :  { %v18405_v17 = vadd.f32 %v8236_v22, %v18262_v33 }
 0xe95   :  { %8275 = vmatmul.bf16.gmra.mxu1 %v18409_v46  ;;  %8349 = vmatmul.bf16.gmra.mxu2 %v17747_v27 }
 0xe96   :  { %8478 = vmatmul.bf16.gmra.mxu3 %v22002_v12 }
 0xe98   :  { %v8310_v60 = vpop.f32.mrf.mxu2 }
 0xe99   :  { %v8092_v23 = vpop.f32.mrf.mxu3  ;;  %v18415_v4 = vadd.f32 %v8310_v60, %v17705_v24  ;;  %v22003_v24 = vld [vmem:[#allocation89_spill] sm:$0xff] }
 0xe9a   :  { %v18418_v10 = vadd.f32 %v8092_v23, %v18138_v36  ;;  %v8238_v33 = vpop.f32.mrf.mxu1 }
 0xe9b   :  { %v18421_v45 = vadd.f32 %v8238_v33, %v18274_v57 }
 0xea0   :  { %v8312_v40 = vpop.f32.mrf.mxu2 }
 0xea1   :  { %v8094_v32 = vpop.f32.mrf.mxu3  ;;  %v18424_v50 = vadd.f32 %v8312_v40, %v17730_v55 }
 0xea2   :  { %v18427_v51 = vadd.f32 %v8094_v32, %v18151_v42  ;;  %v8241_v20 = vpop.f32.mrf.mxu1  ;;  %v22005_v32 = vld [vmem:[#allocation98_spill] sm:$0xff] }
 0xea3   :  { %v18430_v22 = vadd.f32 %v8241_v20, %v18293_v14 }
 0xea5   :  { %8354 = vmatmul.bf16.gmra.mxu2 %v17788_v59  ;;  %8627 = vmatmul.bf16.vlgmr.msrb.gmra.mxu1 %v21982_v37 }
 0xea6   :  { %8483 = vmatmul.bf16.gmra.mxu3 %v22003_v24 }
 0xea8   :  { %v8315_v36 = vpop.f32.mrf.mxu2 }
 0xea9   :  { %v8097_v57 = vpop.f32.mrf.mxu3  ;;  %v18436_v52 = vadd.f32 %v8315_v36, %v17742_v1  ;;  %v22004_v1 = vld [vmem:[#allocation90_spill] sm:$0xff] }
 0xeaa   :  { %v18439_v55 = vadd.f32 %v8097_v57, %v18180_v18  ;;  %v8243_v42 = vpop.f32.mrf.mxu1 }
 0xeab   :  { %v18442_v12 = vadd.f32 %v8243_v42, %v18306_v19 }
 0xeb0   :  { %v8317_v14 = vpop.f32.mrf.mxu2 }
 0xeb1   :  { %v8099_v60 = vpop.f32.mrf.mxu3  ;;  %v18445_v23 = vadd.f32 %v8317_v14, %v17767_v39 }
 0xeb2   :  { %v18448_v37 = vadd.f32 %v8099_v60, %v18193_v35  ;;  %v8246_v33 = vpop.f32.mrf.mxu1 }
 0xeb3   :  { %v18451_v40 = vadd.f32 %v8246_v33, %v18325_v43  ;;  %v13346_v43 = vld [vmem:[%s21049_s2 + $0x1f0] sm:$0xff]  ;;  %v22006_v33 = vld [vmem:[#allocation55_spill] sm:$0xff] }
 0xeb4   :  { %8789 = vmatpush.bf16.msrb.mxu2 %v13346_v43 }
 0xeb5   :  { %8359 = vmatmul.bf16.gmra.mxu2 %v17828_v16  ;;  %8632 = vmatmul.bf16.gmra.mxu1 %v21991_v21  ;;  %v13354_v21 = vld [vmem:[%s21049_s2 + $0x230] sm:$0xff] }
 0xeb6   :  { %8488 = vmatmul.bf16.gmra.mxu3 %v22004_v1 }
 0xeb7   :  { %8958 = vmatpush.bf16.msrb.mxu3 %v13354_v21 }
 0xeb8   :  { %v8320_v18 = vpop.f32.mrf.mxu2 }
 0xeb9   :  { %v8102_v19 = vpop.f32.mrf.mxu3  ;;  %v18457_v20 = vadd.f32 %v8320_v18, %v22005_v32  ;;  %v22007_v18 = vld [vmem:[#allocation108_spill] sm:$0xff]  ;;  %v22009_v32 = vld [vmem:[#allocation93_spill] sm:$0xff] }
 0xeba   :  { %v18460_v39 = vadd.f32 %v8102_v19, %v18220_v13  ;;  %v8248_v35 = vpop.f32.mrf.mxu1  ;;  %v18483_v19 = vsel %vm6119_vm3, %v22007_v18, %v22006_v33 }
 0xebb   :  { %v18463_v36 = vadd.f32 %v8248_v35, %v18338_v6  ;;  %22008 = vst [vmem:[#allocation61_spill] sm:$0xff] %v18483_v19 }
 0xec0   :  { %v8322_v57 = vpop.f32.mrf.mxu2 }
 0xec1   :  { %v8104_v42 = vpop.f32.mrf.mxu3  ;;  %v18472_v14 = vadd.f32 %v8322_v57, %v17813_v0  ;;  %v13362_v0 = vld [vmem:[%s21049_s2 + $0x270] sm:$0xff] }
 0xec2   :  { %v18475_v13 = vadd.f32 %v8104_v42, %v18233_v53  ;;  %v8251_v6 = vpop.f32.mrf.mxu1  ;;  %9127 = vmatpush.bf16.msra.mxu1 %v13362_v0 }
 0xec3   :  { %v18478_v60 = vadd.f32 %v8251_v6, %v18355_v7 }
 0xec5   :  { %8364 = vmatmul.bf16.gmra.mxu2 %v18483_v19  ;;  %8637 = vmatmul.bf16.gmra.mxu1 %v21998_v9 }
 0xec6   :  { %8493 = vmatmul.bf16.gmra.mxu3 %v22009_v32 }
 0xec8   :  { %v8325_v53 = vpop.f32.mrf.mxu2 }
 0xec9   :  { %v8107_v35 = vpop.f32.mrf.mxu3  ;;  %v18492_v7 = vadd.f32 %v8325_v53, %v17823_v54  ;;  %v22010_v54 = vld [vmem:[#allocation81_spill] sm:$0xff] }
 0xeca   :  { %v18495_v43 = vadd.f32 %v8107_v35, %v18259_v26  ;;  %v8253_v21 = vpop.f32.mrf.mxu1  ;;  %v22011_v26 = vld [vmem:[#allocation106_spill] sm:$0xff] }
 0xecb   :  { %v18498_v57 = vadd.f32 %v8253_v21, %v18372_v8 }
 0xed0   :  { %v8327_v9 = vpop.f32.mrf.mxu2 }
 0xed1   :  { %v8109_v42 = vpop.f32.mrf.mxu3  ;;  %v18501_v6 = vadd.f32 %v8327_v9, %v17846_v63  ;;  %v22012_v9 = vld [vmem:[#allocation192_spill] sm:$0xff] }
 0xed2   :  { %v18504_v33 = vadd.f32 %v8109_v42, %v18272_v48  ;;  %v8256_v18 = vpop.f32.mrf.mxu1 }
 0xed3   :  { %v18507_v0 = vadd.f32 %v8256_v18, %v18391_v56 }
 0xed5   :  { %8369 = vmatmul.bf16.gmra.mxu2 %v17907_v29  ;;  %8642 = vmatmul.bf16.gmra.mxu1 %v22010_v54 }
 0xed6   :  { %8498 = vmatmul.bf16.gmra.mxu3 %v22011_v26 }
 0xed8   :  { %v8330_v8 = vpop.f32.mrf.mxu2 }
 0xed9   :  { %v18513_v53 = vadd.f32 %v8330_v8, %v17856_v44  ;;  %v8459_v35 = vpop.f32.mrf.mxu3  ;;  %v22013_v8 = vld [vmem:[#allocation123_spill] sm:$0xff] }
 0xeda   :  { %v18516_v63 = vadd.f32 %v8459_v35, %v18290_v15  ;;  %v8258_v48 = vpop.f32.mrf.mxu1  ;;  %v22014_v15 = vld [vmem:[#allocation109_spill] sm:$0xff]  ;;  %v22015_v35 = vld [vmem:[#allocation175_spill] sm:$0xff] }
 0xedb   :  { %v18519_v21 = vadd.f32 %v8258_v48, %v18402_v38 }
 0xee0   :  { %v8332_v56 = vpop.f32.mrf.mxu2 }
 0xee1   :  { %v18522_v42 = vadd.f32 %v8332_v56, %v22012_v9  ;;  %v8461_v18 = vpop.f32.mrf.mxu3 }
 0xee2   :  { %v18525_v54 = vadd.f32 %v8461_v18, %v18304_v11  ;;  %v8261_v26 = vpop.f32.mrf.mxu1 }
 0xee3   :  { %v18528_v44 = vadd.f32 %v8261_v26, %v18418_v10  ;;  %v22016_v26 = vld [vmem:[#allocation25_spill] sm:$0xff] }
 0xee5   :  { %8374 = vmatmul.bf16.gmra.mxu2 %v22013_v8  ;;  %8647 = vmatmul.bf16.gmra.mxu1 %v22003_v24 }
 0xee6   :  { %8503 = vmatmul.bf16.gmra.mxu3 %v22014_v15 }
 0xee8   :  { %v8335_v38 = vpop.f32.mrf.mxu2 }
 0xee9   :  { %v18534_v48 = vadd.f32 %v8335_v38, %v22015_v35  ;;  %v8464_v56 = vpop.f32.mrf.mxu3  ;;  %v22018_v35 = vld [vmem:[#allocation179_spill] sm:$0xff] }
 0xeea   :  { %v18537_v9 = vadd.f32 %v8464_v56, %v18322_v47  ;;  %v8263_v11 = vpop.f32.mrf.mxu1  ;;  %v22017_v47 = vld [vmem:[#allocation113_spill] sm:$0xff] }
 0xeeb   :  { %v18540_v18 = vadd.f32 %v8263_v11, %v18427_v51 }
 0xef0   :  { %v8337_v10 = vpop.f32.mrf.mxu2 }
 0xef1   :  { %v18543_v19 = vadd.f32 %v8337_v10, %v22016_v26  ;;  %v8466_v8 = vpop.f32.mrf.mxu3  ;;  %v6021_v26 = vpop.permute.xlu0 %6020 }
 0xef2   :  { %v18546_v24 = vadd.f32 %v8466_v8, %v18336_v62  ;;  %v8266_v29 = vpop.f32.mrf.mxu1 }
 0xef3   :  { %v18549_v38 = vadd.f32 %v8266_v29, %v18439_v55  ;;  %v13345_v29 = vld [vmem:[%s21049_s2 + $0x1e8] sm:$0xff] }
 0xef4   :  { %v13353_v55 = vld [vmem:[%s21049_s2 + $0x228] sm:$0xff]  ;;  %8790 = vmatpush.bf16.msrb.mxu2 %v13345_v29  ;;  %v22021_v29 = vld [vmem:[#allocation116_spill] sm:$0xff] }
 0xef5   :  { %8379 = vmatmul.bf16.gmra.mxu2 %v17985_v34  ;;  %8652 = vmatmul.bf16.gmra.mxu1 %v22004_v1 }
 0xef6   :  { %8508 = vmatmul.bf16.gmra.mxu3 %v22017_v47 }
 0xef7   :  { %8959 = vmatpush.bf16.msrb.mxu3 %v13353_v55  ;;  %v22022_v55 = vld [vmem:[#allocation60_spill] sm:$0xff] }
 0xef8   :  { %v8340_v51 = vpop.f32.mrf.mxu2 }
 0xef9   :  { %v18555_v56 = vadd.f32 %v8340_v51, %v22018_v35  ;;  %v8469_v11 = vpop.f32.mrf.mxu3 }
 0xefa   :  { %v18558_v10 = vadd.f32 %v8469_v11, %v18352_v5  ;;  %v8268_v62 = vpop.f32.mrf.mxu1 }
 0xefb   :  { %v18561_v8 = vadd.f32 %v8268_v62, %v18448_v37  ;;  %v22019_v62 = vld [vmem:[#allocation130_spill] sm:$0xff] }
 0xefc   :  { %v18580_v34 = vsel %vm6119_vm3, %v22019_v62, %v6021_v26  ;;  %v22024_v62 = vld [vmem:[#allocation97_spill] sm:$0xff] }
 0xefd   :  { %22020 = vst [vmem:[#allocation142_spill] sm:$0xff] %v18580_v34 }
 0xf00   :  { %v8342_v1 = vpop.f32.mrf.mxu2 }
 0xf01   :  { %v18570_v51 = vadd.f32 %v8342_v1, %v17970_v2  ;;  %v8471_v5 = vpop.f32.mrf.mxu3  ;;  %v13361_v2 = vld [vmem:[%s21049_s2 + $0x268] sm:$0xff] }
 0xf02   :  { %v18573_v35 = vadd.f32 %v8471_v5, %v18370_v58  ;;  %v8271_v37 = vpop.f32.mrf.mxu1  ;;  %9128 = vmatpush.bf16.msra.mxu1 %v13361_v2 }
 0xf03   :  { %v18576_v11 = vadd.f32 %v8271_v37, %v18460_v39 }
 0xf05   :  { %8384 = vmatmul.bf16.gmra.mxu2 %v18580_v34  ;;  %8657 = vmatmul.bf16.gmra.mxu1 %v22009_v32 }
 0xf06   :  { %8513 = vmatmul.bf16.gmra.mxu3 %v22021_v29 }
 0xf08   :  { %v8345_v58 = vpop.f32.mrf.mxu2 }
 0xf09   :  { %v18589_v1 = vadd.f32 %v8345_v58, %v22022_v55  ;;  %v8474_v39 = vpop.f32.mrf.mxu3  ;;  %v22026_v55 = vld [vmem:[#allocation11_spill] sm:$0xff] }
 0xf0a   :  { %v18592_v5 = vadd.f32 %v8474_v39, %v18388_v31  ;;  %v8273_v26 = vpop.f32.mrf.mxu1  ;;  %v22027_v31 = vld [vmem:[#allocation180_spill] sm:$0xff]  ;;  %v22028_v39 = vld [vmem:[#allocation126_spill] sm:$0xff] }
 0xf0b   :  { %v18595_v37 = vadd.f32 %v8273_v26, %v18475_v13  ;;  %v22029_v26 = vld [vmem:[#allocation44_spill] sm:$0xff] }
 0xf0d   :  { %22023 = vst [vmem:[#allocation12_spill] sm:$0xff] %v18595_v37 }
 0xf10   :  { %v8347_v32 = vpop.f32.mrf.mxu2 }
 0xf11   :  { %v18598_v34 = vadd.f32 %v8347_v32, %v22024_v62  ;;  %v8476_v16 = vpop.f32.mrf.mxu3 }
 0xf12   :  { %v18601_v59 = vadd.f32 %v8476_v16, %v18400_v28  ;;  %v8276_v2 = vpop.f32.mrf.mxu1 }
 0xf13   :  { %v18604_v58 = vadd.f32 %v8276_v2, %v18495_v43  ;;  %v22031_v2 = vld [vmem:[#allocation156_spill] sm:$0xff] }
 0xf15   :  { %22025 = vst [vmem:[#allocation69_spill] sm:$0xff] %v18604_v58  ;;  %8389 = vmatmul.bf16.gmra.mxu2 %v22026_v55  ;;  %8662 = vmatmul.bf16.gmra.mxu1 %v22027_v31 }
 0xf16   :  { %8518 = vmatmul.bf16.gmra.mxu3 %v22028_v39 }
 0xf18   :  { %v8350_v13 = vpop.f32.mrf.mxu2 }
 0xf19   :  { %v18610_v27 = vadd.f32 %v8350_v13, %v22029_v26  ;;  %v8479_v32 = vpop.f32.mrf.mxu3  ;;  %v22033_v26 = vld [vmem:[#allocation112_spill] sm:$0xff] }
 0xf1a   :  { %v18613_v62 = vadd.f32 %v8479_v32, %v18415_v4  ;;  %v8278_v16 = vpop.f32.mrf.mxu1  ;;  %v22034_v4 = vld [vmem:[#allocation133_spill] sm:$0xff]  ;;  %v22035_v32 = vld [vmem:[#allocation46_spill] sm:$0xff] }
 0xf1b   :  { %v18616_v28 = vadd.f32 %v8278_v16, %v18504_v33 }
 0xf1d   :  { %22030 = vst [vmem:[#allocation49_spill] sm:$0xff] %v18616_v28 }
 0xf20   :  { %v8352_v43 = vpop.f32.mrf.mxu2 }
 0xf21   :  { %v18619_v58 = vadd.f32 %v8352_v43, %v22031_v2  ;;  %v8481_v55 = vpop.f32.mrf.mxu3 }
 0xf22   :  { %v18622_v31 = vadd.f32 %v8481_v55, %v18424_v50  ;;  %v8628_v39 = vpop.f32.mrf.mxu1 }
 0xf23   :  { %v18625_v13 = vadd.f32 %v8628_v39, %v18516_v63  ;;  %v22037_v39 = vld [vmem:[#allocation161_spill] sm:$0xff] }
 0xf25   :  { %22032 = vst [vmem:[#allocation105_spill] sm:$0xff] %v18625_v13  ;;  %8394 = vmatmul.bf16.gmra.mxu2 %v22033_v26  ;;  %8667 = vmatmul.bf16.gmra.mxu1 %v22014_v15 }
 0xf26   :  { %8523 = vmatmul.bf16.gmra.mxu3 %v22034_v4 }
 0xf28   :  { %v8355_v33 = vpop.f32.mrf.mxu2 }
 0xf29   :  { %v18631_v16 = vadd.f32 %v8355_v33, %v22035_v32  ;;  %v8484_v43 = vpop.f32.mrf.mxu3  ;;  %v22039_v32 = vld [vmem:[#allocation58_spill] sm:$0xff] }
 0xf2a   :  { %v18634_v2 = vadd.f32 %v8484_v43, %v18436_v52  ;;  %v8630_v50 = vpop.f32.mrf.mxu1  ;;  %v22040_v52 = vld [vmem:[#allocation137_spill] sm:$0xff]  ;;  %v22041_v43 = vld [vmem:[#allocation51_spill] sm:$0xff] }
 0xf2b   :  { %v18637_v55 = vadd.f32 %v8630_v50, %v18525_v54 }
 0xf2d   :  { %22036 = vst [vmem:[#allocation50_spill] sm:$0xff] %v18637_v55 }
 0xf30   :  { %v8357_v63 = vpop.f32.mrf.mxu2 }
 0xf31   :  { %v18640_v13 = vadd.f32 %v8357_v63, %v22037_v39  ;;  %v8486_v26 = vpop.f32.mrf.mxu3 }
 0xf32   :  { %v18643_v15 = vadd.f32 %v8486_v26, %v18445_v23  ;;  %v8633_v28 = vpop.f32.mrf.mxu1 }
 0xf33   :  { %v18646_v33 = vadd.f32 %v8633_v28, %v18537_v9  ;;  %v13344_v9 = vld [vmem:[%s21049_s2 + $0x1e0] sm:$0xff] }
 0xf34   :  { %v13352_v28 = vld [vmem:[%s21049_s2 + $0x220] sm:$0xff]  ;;  %8791 = vmatpush.bf16.msrb.mxu2 %v13344_v9  ;;  %v22047_v9 = vld [vmem:[#allocation139_spill] sm:$0xff] }
 0xf35   :  { %22038 = vst [vmem:[#allocation73_spill] sm:$0xff] %v18646_v33  ;;  %8399 = vmatmul.bf16.gmra.mxu2 %v22039_v32  ;;  %8672 = vmatmul.bf16.gmra.mxu1 %v22017_v47  ;;  %v22043_v47 = vld [vmem:[#allocation166_spill] sm:$0xff] }
 0xf36   :  { %8528 = vmatmul.bf16.gmra.mxu3 %v22040_v52 }
 0xf37   :  { %8960 = vmatpush.bf16.msrb.mxu3 %v13352_v28  ;;  %v22048_v28 = vld [vmem:[#allocation45_spill] sm:$0xff] }
 0xf38   :  { %v8360_v54 = vpop.f32.mrf.mxu2 }
 0xf39   :  { %v18652_v50 = vadd.f32 %v8360_v54, %v22041_v43  ;;  %v8489_v63 = vpop.f32.mrf.mxu3  ;;  %v6023_v43 = vpop.permute.xlu1 %6022 }
 0xf3a   :  { %v18655_v39 = vadd.f32 %v8489_v63, %v18457_v20  ;;  %v8635_v23 = vpop.f32.mrf.mxu1 }
 0xf3b   :  { %v18658_v26 = vadd.f32 %v8635_v23, %v18546_v24 }
 0xf3d   :  { %22042 = vst [vmem:[#allocation27_spill] sm:$0xff] %v18658_v26  ;;  %v22045_v26 = vld [vmem:[#allocation145_spill] sm:$0xff] }
 0xf3e   :  { %v18677_v33 = vsel %vm6119_vm3, %v22045_v26, %v6023_v43 }
 0xf3f   :  { %22046 = vst [vmem:[#allocation159_spill] sm:$0xff] %v18677_v33 }
 0xf40   :  { %v8362_v54 = vpop.f32.mrf.mxu2 }
 0xf41   :  { %v18667_v32 = vadd.f32 %v8362_v54, %v22043_v47  ;;  %v8491_v20 = vpop.f32.mrf.mxu3  ;;  %v13360_v47 = vld [vmem:[%s21049_s2 + $0x260] sm:$0xff] }
 0xf42   :  { %v18670_v63 = vadd.f32 %v8491_v20, %v18472_v14  ;;  %v8638_v24 = vpop.f32.mrf.mxu1  ;;  %9129 = vmatpush.bf16.msra.mxu1 %v13360_v47 }
 0xf43   :  { %v18673_v23 = vadd.f32 %v8638_v24, %v18558_v10 }
 0xf45   :  { %22044 = vst [vmem:[#allocation146_spill] sm:$0xff] %v18673_v23  ;;  %8404 = vmatmul.bf16.gmra.mxu2 %v18677_v33  ;;  %8677 = vmatmul.bf16.gmra.mxu1 %v22021_v29  ;;  %v22050_v29 = vld [vmem:[#allocation181_spill] sm:$0xff] }
 0xf46   :  { %8533 = vmatmul.bf16.gmra.mxu3 %v22047_v9 }
 0xf48   :  { %v8365_v14 = vpop.f32.mrf.mxu2 }
 0xf49   :  { %v18686_v54 = vadd.f32 %v8365_v14, %v22048_v28  ;;  %v8494_v10 = vpop.f32.mrf.mxu3  ;;  %v22052_v28 = vld [vmem:[#allocation38_spill] sm:$0xff] }
 0xf4a   :  { %v18689_v20 = vadd.f32 %v8494_v10, %v18492_v7  ;;  %v8640_v26 = vpop.f32.mrf.mxu1  ;;  %v22053_v7 = vld [vmem:[#allocation186_spill] sm:$0xff]  ;;  %v22054_v10 = vld [vmem:[#allocation144_spill] sm:$0xff] }
 0xf4b   :  { %v18692_v43 = vadd.f32 %v8640_v26, %v18573_v35  ;;  %v22055_v26 = vld [vmem:[#allocation37_spill] sm:$0xff] }
 0xf4d   :  { %22049 = vst [vmem:[#allocation74_spill] sm:$0xff] %v18692_v43 }
 0xf50   :  { %v8367_v24 = vpop.f32.mrf.mxu2 }
 0xf51   :  { %v18695_v33 = vadd.f32 %v8367_v24, %v22050_v29  ;;  %v8496_v23 = vpop.f32.mrf.mxu3 }
 0xf52   :  { %v18698_v55 = vadd.f32 %v8496_v23, %v18501_v6  ;;  %v8643_v47 = vpop.f32.mrf.mxu1 }
 0xf53   :  { %v18701_v14 = vadd.f32 %v8643_v47, %v18592_v5  ;;  %v22057_v47 = vld [vmem:[#allocation65_spill] sm:$0xff] }
 0xf55   :  { %22051 = vst [vmem:[#allocation53_spill] sm:$0xff] %v18701_v14  ;;  %8409 = vmatmul.bf16.gmra.mxu2 %v22052_v28  ;;  %8682 = vmatmul.bf16.gmra.mxu1 %v22053_v7 }
 0xf56   :  { %8538 = vmatmul.bf16.gmra.mxu3 %v22054_v10 }
 0xf58   :  { %v8370_v35 = vpop.f32.mrf.mxu2 }
 0xf59   :  { %v18707_v43 = vadd.f32 %v8370_v35, %v22055_v26  ;;  %v8499_v29 = vpop.f32.mrf.mxu3  ;;  %v22059_v26 = vld [vmem:[#allocation184_spill] sm:$0xff] }
 0xf5a   :  { %v18710_v24 = vadd.f32 %v8499_v29, %v18513_v53  ;;  %v8645_v6 = vpop.f32.mrf.mxu1  ;;  %v22060_v53 = vld [vmem:[#allocation176_spill] sm:$0xff]  ;;  %v22061_v29 = vld [vmem:[#allocation183_spill] sm:$0xff] }
 0xf5b   :  { %v18713_v23 = vadd.f32 %v8645_v6, %v18601_v59 }
 0xf5d   :  { %22056 = vst [vmem:[#allocation110_spill] sm:$0xff] %v18713_v23 }
 0xf60   :  { %v8372_v5 = vpop.f32.mrf.mxu2 }
 0xf61   :  { %v18716_v14 = vadd.f32 %v8372_v5, %v22057_v47  ;;  %v8501_v28 = vpop.f32.mrf.mxu3 }
 0xf62   :  { %v18719_v7 = vadd.f32 %v8501_v28, %v18522_v42  ;;  %v8648_v10 = vpop.f32.mrf.mxu1 }
 0xf63   :  { %v18722_v35 = vadd.f32 %v8648_v10, %v18613_v62  ;;  %v22063_v10 = vld [vmem:[#allocation64_spill] sm:$0xff] }
 0xf65   :  { %22058 = vst [vmem:[#allocation54_spill] sm:$0xff] %v18722_v35  ;;  %8414 = vmatmul.bf16.gmra.mxu2 %v22059_v26  ;;  %8687 = vmatmul.bf16.gmra.mxu1 %v22034_v4 }
 0xf66   :  { %8543 = vmatmul.bf16.gmra.mxu3 %v22060_v53 }
 0xf68   :  { %v8375_v59 = vpop.f32.mrf.mxu2 }
 0xf69   :  { %v18728_v6 = vadd.f32 %v8375_v59, %v22061_v29  ;;  %v8504_v5 = vpop.f32.mrf.mxu3  ;;  %v22065_v29 = vld [vmem:[#allocation70_spill] sm:$0xff] }
 0xf6a   :  { %v18731_v47 = vadd.f32 %v8504_v5, %v18534_v48  ;;  %v8650_v42 = vpop.f32.mrf.mxu1  ;;  %v22066_v48 = vld [vmem:[#allocation178_spill] sm:$0xff] }
 0xf6b   :  { %v18734_v28 = vadd.f32 %v8650_v42, %v18622_v31  ;;  %v18748_v31 = vpop.permute.xlu0 %6056  ;;  %v22067_v42 = vld [vmem:[#allocation67_spill] sm:$0xff] }
 0xf6d   :  { %22062 = vst [vmem:[#allocation131_spill] sm:$0xff] %v18734_v28 }
 0xf70   :  { %v8377_v62 = vpop.f32.mrf.mxu2 }
 0xf71   :  { %v18737_v35 = vadd.f32 %v8377_v62, %v22063_v10  ;;  %v8506_v26 = vpop.f32.mrf.mxu3 }
 0xf72   :  { %v18740_v4 = vadd.f32 %v8506_v26, %v18543_v19  ;;  %v8653_v23 = vpop.f32.mrf.mxu1 }
 0xf73   :  { %v18743_v59 = vadd.f32 %v8653_v23, %v18634_v2  ;;  %v13343_v23 = vld [vmem:[%s21049_s2 + $0x1d8] sm:$0xff] }
 0xf74   :  { %8792 = vmatpush.bf16.msrb.mxu2 %v13343_v23  ;;  %v22074_v23 = vld [vmem:[#allocation29_spill] sm:$0xff] }
 0xf75   :  { %22064 = vst [vmem:[#allocation107_spill] sm:$0xff] %v18743_v59  ;;  %8419 = vmatmul.bf16.gmra.mxu2 %v22065_v29  ;;  %8692 = vmatmul.bf16.gmra.mxu1 %v22040_v52  ;;  %v13351_v52 = vld [vmem:[%s21049_s2 + $0x218] sm:$0xff]  ;;  %v22069_v29 = vld [vmem:[#allocation135_spill] sm:$0xff] }
 0xf76   :  { %8548 = vmatmul.bf16.gmra.mxu3 %v22066_v48 }
 0xf77   :  { %8961 = vmatpush.bf16.msrb.mxu3 %v13351_v52  ;;  %v22073_v52 = vld [vmem:[#allocation4_spill] sm:$0xff] }
 0xf78   :  { %v8380_v5 = vpop.f32.mrf.mxu2 }
 0xf79   :  { %v18751_v62 = vadd.f32 %v8380_v5, %v22067_v42  ;;  %v8509_v10 = vpop.f32.mrf.mxu3  ;;  %v6025_v42 = vpop.permute.xlu0 %6024 }
 0xf7a   :  { %v18754_v19 = vadd.f32 %v8509_v10, %v18555_v56  ;;  %v8655_v26 = vpop.f32.mrf.mxu1 }
 0xf7b   :  { %v18757_v2 = vadd.f32 %v8655_v26, %v18643_v15 }
 0xf7d   :  { %22068 = vst [vmem:[#allocation177_spill] sm:$0xff] %v18757_v2  ;;  %v22071_v2 = vld [vmem:[#allocation43_spill] sm:$0xff] }
 0xf7e   :  { %v18776_v28 = vsel %vm6119_vm3, %v22071_v2, %v6025_v42 }
 0xf7f   :  { %22072 = vst [vmem:[#allocation75_spill] sm:$0xff] %v18776_v28 }
 0xf80   :  { %v8382_v5 = vpop.f32.mrf.mxu2 }
 0xf81   :  { %v18766_v59 = vadd.f32 %v8382_v5, %v22069_v29  ;;  %v8511_v56 = vpop.f32.mrf.mxu3  ;;  %v13359_v29 = vld [vmem:[%s21049_s2 + $0x258] sm:$0xff] }
 0xf82   :  { %v18769_v10 = vadd.f32 %v8511_v56, %v18570_v51  ;;  %v8658_v15 = vpop.f32.mrf.mxu1  ;;  %9130 = vmatpush.bf16.msra.mxu1 %v13359_v29 }
 0xf83   :  { %v18772_v26 = vadd.f32 %v8658_v15, %v18655_v39 }
 0xf85   :  { %22070 = vst [vmem:[#allocation165_spill] sm:$0xff] %v18772_v26  ;;  %8424 = vmatmul.bf16.gmra.mxu2 %v18776_v28  ;;  %8697 = vmatmul.bf16.gmra.mxu1 %v22047_v9  ;;  %v22075_v9 = vld [vmem:[#allocation56_spill] sm:$0xff] }
 0xf86   :  { %8553 = vmatmul.bf16.gmra.mxu3 %v22073_v52 }
 0xf88   :  { %v8385_v51 = vpop.f32.mrf.mxu2 }
 0xf89   :  { %v18785_v5 = vadd.f32 %v8385_v51, %v22074_v23  ;;  %v8514_v39 = vpop.f32.mrf.mxu3  ;;  %v22077_v23 = vld [vmem:[#allocation42_spill] sm:$0xff] }
 0xf8a   :  { %v18788_v56 = vadd.f32 %v8514_v39, %v18589_v1  ;;  %v8660_v2 = vpop.f32.mrf.mxu1  ;;  %v22076_v1 = vld [vmem:[#allocation190_spill] sm:$0xff] }
 0xf8b   :  { %v18791_v42 = vadd.f32 %v8660_v2, %v18670_v63  ;;  %v22078_v39 = vld [vmem:[#allocation66_spill] sm:$0xff] }
 0xf90   :  { %v8387_v15 = vpop.f32.mrf.mxu2 }
 0xf91   :  { %v18794_v28 = vadd.f32 %v8387_v15, %v22075_v9  ;;  %v8516_v26 = vpop.f32.mrf.mxu3 }
 0xf92   :  { %v18797_v37 = vadd.f32 %v8516_v26, %v18598_v34  ;;  %v8663_v29 = vpop.f32.mrf.mxu1 }
 0xf93   :  { %v18800_v51 = vadd.f32 %v8663_v29, %v18689_v20 }
 0xf95   :  { %8429 = vmatmul.bf16.gmra.mxu2 %v18346_v41  ;;  %8702 = vmatmul.bf16.gmra.mxu1 %v22076_v1 }
 0xf96   :  { %8558 = vmatmul.bf16.gmra.mxu3 %v22077_v23 }
 0xf98   :  { %v8390_v63 = vpop.f32.mrf.mxu2 }
 0xf99   :  { %v18806_v2 = vadd.f32 %v8390_v63, %v22078_v39  ;;  %v8519_v9 = vpop.f32.mrf.mxu3 }
 0xf9a   :  { %v18809_v15 = vadd.f32 %v8519_v9, %v18610_v27  ;;  %v8665_v34 = vpop.f32.mrf.mxu1  ;;  %v22079_v27 = vld [vmem:[#allocation34_spill] sm:$0xff]  ;;  %v13341_v9 = vld [vmem:[%s21049_s2 + $0x1c8] sm:$0xff] }
 0xf9b   :  { %v18812_v26 = vadd.f32 %v8665_v34, %v18698_v55 }
 0xfa0   :  { %v8392_v20 = vpop.f32.mrf.mxu2 }
 0xfa1   :  { %v18815_v29 = vadd.f32 %v8392_v20, %v18329_v25  ;;  %v8521_v41 = vpop.f32.mrf.mxu3 }
 0xfa2   :  { %v18818_v1 = vadd.f32 %v8521_v41, %v18619_v58  ;;  %v8668_v23 = vpop.f32.mrf.mxu1  ;;  %v13342_v41 = vld [vmem:[%s21049_s2 + $0x1d0] sm:$0xff] }
 0xfa3   :  { %v18821_v63 = vadd.f32 %v8668_v23, %v18710_v24  ;;  %8793 = vmatpush.bf16.msrb.mxu2 %v13342_v41  ;;  %v22080_v41 = vld [vmem:[#allocation71_spill] sm:$0xff] }
 0xfa5   :  { %8434 = vmatmul.bf16.gmra.mxu2 %v21997_v61  ;;  %8707 = vmatmul.bf16.gmra.mxu1 %v22060_v53 }
 0xfa6   :  { %8563 = vmatmul.bf16.gmra.mxu3 %v22079_v27 }
 0xfa7   :  { %8794 = vmatpush.bf16.msrb.mxu2 %v13341_v9  ;;  %v22081_v9 = vld [vmem:[#allocation72_spill] sm:$0xff] }
 0xfa8   :  { %v8395_v55 = vpop.f32.mrf.mxu2 }
 0xfa9   :  { %v18827_v39 = vadd.f32 %v8395_v55, %v18341_v3  ;;  %v8524_v25 = vpop.f32.mrf.mxu3 }
 0xfaa   :  { %v18833_v58 = vadd.f32 %v8524_v25, %v18631_v16  ;;  %v8670_v24 = vpop.f32.mrf.mxu1  ;;  %v13340_v16 = vld [vmem:[%s21049_s2 + $0x1c0] sm:$0xff] }
 0xfab   :  { %v18836_v23 = vadd.f32 %v8670_v24, %v18719_v7  ;;  %8795 = vmatpush.bf16.msrb.mxu2 %v13340_v16  ;;  %v13350_v16 = vld [vmem:[%s21049_s2 + $0x210] sm:$0xff] }
 0xfac   :  { %8962 = vmatpush.bf16.msrb.mxu3 %v13350_v16  ;;  %v22085_v16 = vld [vmem:[#allocation28_spill] sm:$0xff] }
 0xfb0   :  { %v8397_v3 = vpop.f32.mrf.mxu2 }
 0xfb1   :  { %v18842_v34 = vadd.f32 %v8397_v3, %v18358_v30  ;;  %v8526_v20 = vpop.f32.mrf.mxu3  ;;  %v18856_v30 = vpop.permute.xlu0 %6064 }
 0xfb2   :  { %v18848_v55 = vadd.f32 %v8526_v20, %v18640_v13  ;;  %v8673_v7 = vpop.f32.mrf.mxu1 }
 0xfb3   :  { %v18851_v25 = vadd.f32 %v8673_v7, %v18731_v47 }
 0xfb5   :  { %8439 = vmatmul.bf16.gmra.mxu2 %v18409_v46  ;;  %8712 = vmatmul.bf16.gmra.mxu1 %v22066_v48 }
 0xfb6   :  { %8568 = vmatmul.bf16.gmra.mxu3 %v22080_v41 }
 0xfb8   :  { %v8400_v24 = vpop.f32.mrf.mxu2 }
 0xfb9   :  { %v18859_v3 = vadd.f32 %v8400_v24, %v22081_v9  ;;  %v8529_v53 = vpop.f32.mrf.mxu3  ;;  %v6027_v48 = vpop.permute.xlu0 %6026 }
 0xfba   :  { %v18862_v13 = vadd.f32 %v8529_v53, %v18652_v50  ;;  %v8675_v20 = vpop.f32.mrf.mxu1 }
 0xfbb   :  { %v18865_v47 = vadd.f32 %v8675_v20, %v18740_v4  ;;  %v22083_v4 = vld [vmem:[#allocation151_spill] sm:$0xff] }
 0xfbc   :  { %v18881_v20 = vsel %vm6119_vm3, %v22083_v4, %v6027_v48 }
 0xfbd   :  { %22084 = vst [vmem:[#allocation115_spill] sm:$0xff] %v18881_v20 }
 0xfc0   :  { %v8402_v7 = vpop.f32.mrf.mxu2 }
 0xfc1   :  { %v18871_v46 = vadd.f32 %v8402_v7, %v18394_v49  ;;  %v8531_v24 = vpop.f32.mrf.mxu3  ;;  %v13358_v49 = vld [vmem:[%s21049_s2 + $0x250] sm:$0xff] }
 0xfc2   :  { %v18874_v9 = vadd.f32 %v8531_v24, %v18667_v32  ;;  %v8678_v50 = vpop.f32.mrf.mxu1  ;;  %9131 = vmatpush.bf16.msra.mxu1 %v13358_v49 }
 0xfc3   :  { %v18877_v53 = vadd.f32 %v8678_v50, %v18754_v19 }
 0xfc5   :  { %22082 = vst [vmem:[#allocation114_spill] sm:$0xff] %v18877_v53  ;;  %8444 = vmatmul.bf16.gmra.mxu2 %v18881_v20  ;;  %8717 = vmatmul.bf16.gmra.mxu1 %v22073_v52  ;;  %v22087_v53 = vld [vmem:[#allocation157_spill] sm:$0xff] }
 0xfc6   :  { %8573 = vmatmul.bf16.gmra.mxu3 %v22085_v16 }
 0xfc8   :  { %v8405_v32 = vpop.f32.mrf.mxu2 }
 0xfc9   :  { %v18890_v7 = vadd.f32 %v8405_v32, %v18405_v17  ;;  %v8534_v19 = vpop.f32.mrf.mxu3  ;;  %v22086_v32 = vld [vmem:[#allocation59_spill] sm:$0xff] }
 0xfca   :  { %v18893_v24 = vadd.f32 %v8534_v19, %v18686_v54  ;;  %v8680_v48 = vpop.f32.mrf.mxu1  ;;  %v18910_v54 = vsel %vm6119_vm3, %v22087_v53, %v22086_v32  ;;  %v22089_v19 = vld [vmem:[#allocation100_spill] sm:$0xff] }
 0xfcb   :  { %v18896_v50 = vadd.f32 %v8680_v48, %v18769_v10  ;;  %22088 = vst [vmem:[#allocation87_spill] sm:$0xff] %v18910_v54  ;;  %v22090_v10 = vld [vmem:[#allocation182_spill] sm:$0xff] }
 0xfd0   :  { %v8407_v4 = vpop.f32.mrf.mxu2 }
 0xfd1   :  { %v18899_v52 = vadd.f32 %v8407_v4, %v18421_v45  ;;  %v8536_v20 = vpop.f32.mrf.mxu3 }
 0xfd2   :  { %v18902_v61 = vadd.f32 %v8536_v20, %v18695_v33  ;;  %v8683_v49 = vpop.f32.mrf.mxu1 }
 0xfd3   :  { %v18905_v17 = vadd.f32 %v8683_v49, %v18788_v56 }
 0xfd5   :  { %8722 = vmatmul.bf16.gmra.mxu1 %v22089_v19  ;;  %8796 = vmatmul.bf16.vlgmr.msrb.gmra.mxu2 %v22090_v10 }
 0xfd6   :  { %8578 = vmatmul.bf16.gmra.mxu3 %v18910_v54 }
 0xfd8   :  { %v8410_v45 = vpop.f32.mrf.mxu2 }
 0xfd9   :  { %v18916_v48 = vadd.f32 %v8410_v45, %v18430_v22  ;;  %v8539_v33 = vpop.f32.mrf.mxu3  ;;  %v22091_v45 = vld [vmem:[#allocation162_spill] sm:$0xff] }
 0xfda   :  { %v18919_v20 = vadd.f32 %v8539_v33, %v18707_v43  ;;  %v8685_v56 = vpop.f32.mrf.mxu1  ;;  %v18936_v43 = vsel %vm6119_vm3, %v22091_v45, %v18748_v31  ;;  %v6059_v45 = vpop.permute.xlu1 %6058 }
 0xfdb   :  { %v18922_v4 = vadd.f32 %v8685_v56, %v18797_v37  ;;  %22092 = vst [vmem:[#allocation76_spill] sm:$0xff] %v18936_v43  ;;  %v22093_v37 = vld [vmem:[#allocation63_spill] sm:$0xff] }
 0xfe0   :  { %v8412_v53 = vpop.f32.mrf.mxu2 }
 0xfe1   :  { %v18925_v49 = vadd.f32 %v8412_v53, %v18442_v12  ;;  %v8541_v32 = vpop.f32.mrf.mxu3 }
 0xfe2   :  { %v18928_v10 = vadd.f32 %v8541_v32, %v18716_v14  ;;  %v8688_v19 = vpop.f32.mrf.mxu1 }
 0xfe3   :  { %v18931_v22 = vadd.f32 %v8688_v19, %v18809_v15 }
 0xfe5   :  { %8727 = vmatmul.bf16.gmra.mxu1 %v22079_v27  ;;  %8801 = vmatmul.bf16.gmra.mxu2 %v22093_v37 }
 0xfe6   :  { %8583 = vmatmul.bf16.gmra.mxu3 %v18936_v43 }
 0xfe8   :  { %v8415_v12 = vpop.f32.mrf.mxu2 }
 0xfe9   :  { %v18942_v33 = vadd.f32 %v8415_v12, %v18451_v40  ;;  %v8544_v14 = vpop.f32.mrf.mxu3  ;;  %v22094_v12 = vld [vmem:[#allocation167_spill] sm:$0xff] }
 0xfea   :  { %v18945_v56 = vadd.f32 %v8544_v14, %v18728_v6  ;;  %v8690_v15 = vpop.f32.mrf.mxu1  ;;  %v18961_v6 = vsel %vm6119_vm3, %v22094_v12, %v6059_v45 }
 0xfeb   :  { %v18948_v19 = vadd.f32 %v8690_v15, %v18818_v1  ;;  %22095 = vst [vmem:[#allocation125_spill] sm:$0xff] %v18961_v6  ;;  %v22096_v1 = vld [vmem:[#allocation185_spill] sm:$0xff] }
 0xff0   :  { %v8417_v31 = vpop.f32.mrf.mxu2 }
 0xff1   :  { %v18951_v53 = vadd.f32 %v8417_v31, %v18463_v36  ;;  %v8546_v32 = vpop.f32.mrf.mxu3  ;;  %v13349_v31 = vld [vmem:[%s21049_s2 + $0x208] sm:$0xff] }
 0xff2   :  { %v18954_v37 = vadd.f32 %v8546_v32, %v18737_v35  ;;  %v8693_v54 = vpop.f32.mrf.mxu1  ;;  %8963 = vmatpush.bf16.msrb.mxu3 %v13349_v31  ;;  %v22100_v31 = vld [vmem:[#allocation187_spill] sm:$0xff] }
 0xff3   :  { %v18957_v40 = vadd.f32 %v8693_v54, %v18833_v58 }
 0xff5   :  { %8732 = vmatmul.bf16.gmra.mxu1 %v22080_v41  ;;  %8806 = vmatmul.bf16.gmra.mxu2 %v22096_v1 }
 0xff6   :  { %8588 = vmatmul.bf16.gmra.mxu3 %v18961_v6 }
 0xff8   :  { %v8420_v36 = vpop.f32.mrf.mxu2 }
 0xff9   :  { %v18967_v14 = vadd.f32 %v8420_v36, %v18478_v60  ;;  %v8549_v35 = vpop.f32.mrf.mxu3 }
 0xffa   :  { %v18970_v15 = vadd.f32 %v8549_v35, %v18751_v62  ;;  %v8695_v58 = vpop.f32.mrf.mxu1  ;;  %v22097_v35 = vld [vmem:[#allocation57_spill] sm:$0xff] }
 0xffb   :  { %v18973_v54 = vadd.f32 %v8695_v58, %v18848_v55  ;;  %v22098_v55 = vld [vmem:[#allocation143_spill] sm:$0xff] }
 0xffc   :  { %v18990_v58 = vsel %vm6119_vm3, %v22098_v55, %v22097_v35  ;;  %v22102_v55 = vld [vmem:[#allocation3_spill] sm:$0xff] }
 0xffd   :  { %22099 = vst [vmem:[#allocation147_spill] sm:$0xff] %v18990_v58 }
0x1000   :  { %v8422_v32 = vpop.f32.mrf.mxu2 }
0x1001   :  { %v18979_v45 = vadd.f32 %v8422_v32, %v18498_v57  ;;  %v8551_v1 = vpop.f32.mrf.mxu3  ;;  %v13357_v57 = vld [vmem:[%s21049_s2 + $0x248] sm:$0xff] }
0x1002   :  { %v18982_v60 = vadd.f32 %v8551_v1, %v18766_v59  ;;  %v8698_v36 = vpop.f32.mrf.mxu1  ;;  %9132 = vmatpush.bf16.msra.mxu1 %v13357_v57 }
0x1003   :  { %v18985_v62 = vadd.f32 %v8698_v36, %v18862_v13 }
0x1005   :  { %8737 = vmatmul.bf16.gmra.mxu1 %v22085_v16  ;;  %8811 = vmatmul.bf16.gmra.mxu2 %v22100_v31 }
0x1006   :  { %8593 = vmatmul.bf16.gmra.mxu3 %v18990_v58 }
0x1008   :  { %v8425_v59 = vpop.f32.mrf.mxu2 }
0x1009   :  { %v18999_v13 = vadd.f32 %v8425_v59, %v18507_v0  ;;  %v8554_v32 = vpop.f32.mrf.mxu3  ;;  %v22101_v59 = vld [vmem:[#allocation85_spill] sm:$0xff] }
0x100a   :  { %v19002_v1 = vadd.f32 %v8554_v32, %v18785_v5  ;;  %v8700_v36 = vpop.f32.mrf.mxu1  ;;  %v19019_v5 = vsel %vm6119_vm3, %v22102_v55, %v22101_v59  ;;  %v22104_v32 = vld [vmem:[#allocation194_spill] sm:$0xff] }
0x100b   :  { %v19005_v35 = vadd.f32 %v8700_v36, %v18874_v9  ;;  %22103 = vst [vmem:[#allocation86_spill] sm:$0xff] %v19019_v5  ;;  %v22105_v9 = vld [vmem:[#allocation188_spill] sm:$0xff] }
0x1010   :  { %v8427_v31 = vpop.f32.mrf.mxu2 }
0x1011   :  { %v19008_v16 = vadd.f32 %v8427_v31, %v18519_v21  ;;  %v8556_v41 = vpop.f32.mrf.mxu3 }
0x1012   :  { %v19011_v27 = vadd.f32 %v8556_v41, %v18794_v28  ;;  %v8703_v57 = vpop.f32.mrf.mxu1 }
0x1013   :  { %v19014_v0 = vadd.f32 %v8703_v57, %v18893_v24 }
0x1015   :  { %8742 = vmatmul.bf16.gmra.mxu1 %v22104_v32  ;;  %8816 = vmatmul.bf16.gmra.mxu2 %v22105_v9 }
0x1016   :  { %8598 = vmatmul.bf16.gmra.mxu3 %v19019_v5 }
0x1018   :  { %v8430_v21 = vpop.f32.mrf.mxu2 }
0x1019   :  { %v19025_v36 = vadd.f32 %v8430_v21, %v18528_v44  ;;  %v8559_v28 = vpop.f32.mrf.mxu3  ;;  %v22106_v21 = vld [vmem:[#allocation6_spill] sm:$0xff] }
0x101a   :  { %v19028_v41 = vadd.f32 %v8559_v28, %v18806_v2  ;;  %v8705_v24 = vpop.f32.mrf.mxu1  ;;  %v19045_v2 = vsel %vm6119_vm3, %v22106_v21, %v18856_v30 }
0x101b   :  { %v19031_v31 = vadd.f32 %v8705_v24, %v18902_v61  ;;  %22107 = vst [vmem:[#allocation89_spill] sm:$0xff] %v19045_v2  ;;  %v22108_v61 = vld [vmem:[#allocation83_spill] sm:$0xff] }
0x1020   :  { %v8432_v55 = vpop.f32.mrf.mxu2 }
0x1021   :  { %v19034_v57 = vadd.f32 %v8432_v55, %v18540_v18  ;;  %v8561_v59 = vpop.f32.mrf.mxu3  ;;  %v6077_v18 = vpop.permute.xlu1 %6076 }
0x1022   :  { %v19037_v9 = vadd.f32 %v8561_v59, %v18815_v29  ;;  %v8708_v32 = vpop.f32.mrf.mxu1 }
0x1023   :  { %v19040_v44 = vadd.f32 %v8708_v32, %v18919_v20 }
0x1025   :  { %8747 = vmatmul.bf16.gmra.mxu1 %v18936_v43  ;;  %8821 = vmatmul.bf16.gmra.mxu2 %v22108_v61  ;;  %v13348_v61 = vld [vmem:[%s21049_s2 + $0x200] sm:$0xff] }
0x1026   :  { %8603 = vmatmul.bf16.gmra.mxu3 %v19045_v2 }
0x1027   :  { %8964 = vmatpush.bf16.msrb.mxu3 %v13348_v61 }
0x1028   :  { %v8435_v28 = vpop.f32.mrf.mxu2 }
0x1029   :  { %v19051_v29 = vadd.f32 %v8435_v28, %v18549_v38  ;;  %v8564_v24 = vpop.f32.mrf.mxu3  ;;  %v6067_v5 = vpop.permute.xlu1 %6066 }
0x102a   :  { %v19054_v20 = vadd.f32 %v8564_v24, %v18827_v39  ;;  %v8710_v32 = vpop.f32.mrf.mxu1 }
0x102b   :  { %v19057_v55 = vadd.f32 %v8710_v32, %v18928_v10  ;;  %v22110_v10 = vld [vmem:[#allocation32_spill] sm:$0xff] }
0x102c   :  { %v19073_v24 = vsel %vm6119_vm3, %v22110_v10, %v6067_v5 }
0x102d   :  { %22111 = vst [vmem:[#allocation98_spill] sm:$0xff] %v19073_v24 }
0x1030   :  { %v8437_v30 = vpop.f32.mrf.mxu2 }
0x1031   :  { %v19060_v59 = vadd.f32 %v8437_v30, %v18561_v8  ;;  %v8566_v21 = vpop.f32.mrf.mxu3  ;;  %v22112_v8 = vld [vmem:[#allocation189_spill] sm:$0xff] }
0x1032   :  { %v19066_v38 = vadd.f32 %v8566_v21, %v18842_v34  ;;  %v8713_v28 = vpop.f32.mrf.mxu1 }
0x1033   :  { %v19069_v39 = vadd.f32 %v8713_v28, %v18945_v56  ;;  %v22113_v28 = vld [vmem:[#allocation12_spill] sm:$0xff] }
0x1035   :  { %22109 = vst [vmem:[#allocation90_spill] sm:$0xff] %v19069_v39  ;;  %8752 = vmatmul.bf16.gmra.mxu1 %v18961_v6  ;;  %8826 = vmatmul.bf16.gmra.mxu2 %v22112_v8  ;;  %v22116_v39 = vld [vmem:[#allocation62_spill] sm:$0xff] }
0x1036   :  { %8608 = vmatmul.bf16.gmra.mxu3 %v19073_v24 }
0x1038   :  { %v8440_v32 = vpop.f32.mrf.mxu2 }
0x1039   :  { %v19079_v30 = vadd.f32 %v8440_v32, %v18576_v11  ;;  %v8569_v34 = vpop.f32.mrf.mxu3  ;;  %v22115_v32 = vld [vmem:[#allocation48_spill] sm:$0xff] }
0x103a   :  { %v19082_v21 = vadd.f32 %v8569_v34, %v18859_v3  ;;  %v8715_v56 = vpop.f32.mrf.mxu1  ;;  %v19099_v3 = vsel %vm6119_vm3, %v22116_v39, %v22115_v32  ;;  %v22119_v34 = vld [vmem:[#allocation69_spill] sm:$0xff] }
0x103b   :  { %v19085_v61 = vadd.f32 %v8715_v56, %v18954_v37  ;;  %22117 = vst [vmem:[#allocation108_spill] sm:$0xff] %v19099_v3  ;;  %v22118_v37 = vld [vmem:[#allocation91_spill] sm:$0xff] }
0x1040   :  { %v8442_v5 = vpop.f32.mrf.mxu2 }
0x1041   :  { %v19088_v43 = vadd.f32 %v8442_v5, %v22113_v28  ;;  %v8571_v6 = vpop.f32.mrf.mxu3 }
0x1042   :  { %v19091_v8 = vadd.f32 %v8571_v6, %v18871_v46  ;;  %v8718_v10 = vpop.f32.mrf.mxu1  ;;  %v13356_v46 = vld [vmem:[%s21049_s2 + $0x240] sm:$0xff] }
0x1043   :  { %v19094_v11 = vadd.f32 %v8718_v10, %v18970_v15  ;;  %9133 = vmatpush.bf16.msra.mxu1 %v13356_v46 }
0x1045   :  { %22114 = vst [vmem:[#allocation55_spill] sm:$0xff] %v19094_v11  ;;  %8757 = vmatmul.bf16.gmra.mxu1 %v18990_v58  ;;  %8831 = vmatmul.bf16.gmra.mxu2 %v22118_v37  ;;  %v22121_v37 = vld [vmem:[#allocation49_spill] sm:$0xff] }
0x1046   :  { %8613 = vmatmul.bf16.gmra.mxu3 %v19099_v3 }
0x1048   :  { %v8445_v6 = vpop.f32.mrf.mxu2 }
0x1049   :  { %v19108_v15 = vadd.f32 %v8445_v6, %v22119_v34  ;;  %v8574_v10 = vpop.f32.mrf.mxu3  ;;  %v22123_v34 = vld [vmem:[#allocation148_spill] sm:$0xff] }
0x104a   :  { %v19111_v56 = vadd.f32 %v8574_v10, %v18890_v7  ;;  %v8720_v5 = vpop.f32.mrf.mxu1  ;;  %v19127_v7 = vsel %vm6119_vm3, %v22123_v34, %v6077_v18  ;;  %v22126_v10 = vld [vmem:[#allocation78_spill] sm:$0xff] }
0x104b   :  { %v19114_v28 = vadd.f32 %v8720_v5, %v18982_v60  ;;  %22124 = vst [vmem:[#allocation192_spill] sm:$0xff] %v19127_v7  ;;  %v22125_v60 = vld [vmem:[#allocation117_spill] sm:$0xff] }
0x104d   :  { %22120 = vst [vmem:[#allocation93_spill] sm:$0xff] %v19114_v28 }
0x1050   :  { %v8447_v32 = vpop.f32.mrf.mxu2 }
0x1051   :  { %v19117_v58 = vadd.f32 %v8447_v32, %v22121_v37  ;;  %v8576_v39 = vpop.f32.mrf.mxu3  ;;  %v22127_v37 = vld [vmem:[#allocation105_spill] sm:$0xff] }
0x1052   :  { %v19120_v11 = vadd.f32 %v8576_v39, %v18899_v52  ;;  %v8723_v46 = vpop.f32.mrf.mxu1 }
0x1053   :  { %v19123_v6 = vadd.f32 %v8723_v46, %v19002_v1 }
0x1055   :  { %22122 = vst [vmem:[#allocation81_spill] sm:$0xff] %v19123_v6  ;;  %8762 = vmatmul.bf16.gmra.mxu1 %v19127_v7  ;;  %8836 = vmatmul.bf16.gmra.mxu2 %v22125_v60  ;;  %v22129_v6 = vld [vmem:[#allocation50_spill] sm:$0xff] }
0x1056   :  { %8965 = vmatmul.bf16.vlgmr.msrb.gmra.mxu3 %v22126_v10 }
0x1058   :  { %v8797_v5 = vpop.f32.mrf.mxu2 }
0x1059   :  { %v8579_v32 = vpop.f32.mrf.mxu3  ;;  %v19133_v28 = vadd.f32 %v8797_v5, %v22127_v37  ;;  %v22132_v5 = vld [vmem:[#allocation80_spill] sm:$0xff]  ;;  %v22133_v37 = vld [vmem:[#allocation73_spill] sm:$0xff] }
0x105a   :  { %v19136_v52 = vadd.f32 %v8579_v32, %v18916_v48  ;;  %v8725_v1 = vpop.f32.mrf.mxu1  ;;  %v22131_v48 = vld [vmem:[#allocation127_spill] sm:$0xff] }
0x105b   :  { %v19139_v39 = vadd.f32 %v8725_v1, %v19011_v27 }
0x105d   :  { %22128 = vst [vmem:[#allocation175_spill] sm:$0xff] %v19139_v39 }
0x1060   :  { %v8799_v18 = vpop.f32.mrf.mxu2 }
0x1061   :  { %v8581_v46 = vpop.f32.mrf.mxu3  ;;  %v19142_v7 = vadd.f32 %v8799_v18, %v22129_v6 }
0x1062   :  { %v19145_v60 = vadd.f32 %v8581_v46, %v18925_v49  ;;  %v8728_v10 = vpop.f32.mrf.mxu1 }
0x1063   :  { %v19148_v34 = vadd.f32 %v8728_v10, %v19028_v41  ;;  %v22135_v10 = vld [vmem:[#allocation27_spill] sm:$0xff] }
0x1065   :  { %22130 = vst [vmem:[#allocation25_spill] sm:$0xff] %v19148_v34  ;;  %8767 = vmatmul.bf16.gmra.mxu1 %v19045_v2  ;;  %8841 = vmatmul.bf16.gmra.mxu2 %v22131_v48 }
0x1066   :  { %8970 = vmatmul.bf16.gmra.mxu3 %v22132_v5 }
0x1068   :  { %v8802_v27 = vpop.f32.mrf.mxu2 }
0x1069   :  { %v8584_v32 = vpop.f32.mrf.mxu3  ;;  %v19154_v1 = vadd.f32 %v8802_v27, %v22133_v37  ;;  %v22138_v27 = vld [vmem:[#allocation82_spill] sm:$0xff] }
0x106a   :  { %v19157_v6 = vadd.f32 %v8584_v32, %v18942_v33  ;;  %v8730_v49 = vpop.f32.mrf.mxu1  ;;  %v22137_v33 = vld [vmem:[#allocation134_spill] sm:$0xff] }
0x106b   :  { %v19160_v18 = vadd.f32 %v8730_v49, %v19037_v9  ;;  %v22139_v37 = vld [vmem:[#allocation146_spill] sm:$0xff] }
0x106d   :  { %22134 = vst [vmem:[#allocation179_spill] sm:$0xff] %v19160_v18 }
0x1070   :  { %v8804_v41 = vpop.f32.mrf.mxu2 }
0x1071   :  { %v8586_v46 = vpop.f32.mrf.mxu3  ;;  %v19163_v2 = vadd.f32 %v8804_v41, %v22135_v10 }
0x1072   :  { %v19166_v48 = vadd.f32 %v8586_v46, %v18951_v53  ;;  %v8733_v34 = vpop.f32.mrf.mxu1 }
0x1073   :  { %v19169_v39 = vadd.f32 %v8733_v34, %v19054_v20  ;;  %v13371_v20 = vld [vmem:[%s21049_s2 + $0x2b8] sm:$0xff] }
0x1074   :  { %v13379_v34 = vld [vmem:[%s21049_s2 + $0x2f8] sm:$0xff]  ;;  %9295 = vmatpush.bf16.msra.mxu2 %v13371_v20 }
0x1075   :  { %22136 = vst [vmem:[#allocation130_spill] sm:$0xff] %v19169_v39  ;;  %8772 = vmatmul.bf16.gmra.mxu1 %v19073_v24  ;;  %8846 = vmatmul.bf16.gmra.mxu2 %v22137_v33  ;;  %v22144_v24 = vld [vmem:[#allocation2_spill] sm:$0xff]  ;;  %v13383_v20 = vld [vmem:[%s21049_s2 + $0x318] sm:$0xff] }
0x1076   :  { %8975 = vmatmul.bf16.gmra.mxu3 %v22138_v27  ;;  %9637 = vmatpush.bf16.msrb.mxu1 %v13383_v20 }
0x1077   :  { %9464 = vmatpush.bf16.msra.mxu3 %v13379_v34 }
0x1078   :  { %v8807_v9 = vpop.f32.mrf.mxu2 }
0x1079   :  { %v8589_v32 = vpop.f32.mrf.mxu3  ;;  %v19175_v49 = vadd.f32 %v8807_v9, %v22139_v37  ;;  %v22141_v9 = vld [vmem:[#allocation74_spill] sm:$0xff] }
0x107a   :  { %v19178_v41 = vadd.f32 %v8589_v32, %v18967_v14  ;;  %v8735_v53 = vpop.f32.mrf.mxu1 }
0x107b   :  { %v19181_v46 = vadd.f32 %v8735_v53, %v19066_v38  ;;  %v22143_v53 = vld [vmem:[#allocation191_spill] sm:$0xff] }
0x107d   :  { %22140 = vst [vmem:[#allocation60_spill] sm:$0xff] %v19181_v46  ;;  %v22147_v46 = vld [vmem:[#allocation110_spill] sm:$0xff] }
0x1080   :  { %v8809_v10 = vpop.f32.mrf.mxu2 }
0x1081   :  { %v8591_v33 = vpop.f32.mrf.mxu3  ;;  %v19190_v37 = vadd.f32 %v8809_v10, %v22141_v9  ;;  %v22145_v9 = vld [vmem:[#allocation53_spill] sm:$0xff] }
0x1082   :  { %v19193_v14 = vadd.f32 %v8591_v33, %v18979_v45  ;;  %v8738_v38 = vpop.f32.mrf.mxu1 }
0x1083   :  { %v19196_v32 = vadd.f32 %v8738_v38, %v19082_v21 }
0x1085   :  { %22142 = vst [vmem:[#allocation97_spill] sm:$0xff] %v19196_v32  ;;  %8777 = vmatmul.bf16.gmra.mxu1 %v19099_v3  ;;  %8851 = vmatmul.bf16.gmra.mxu2 %v22143_v53  ;;  %v6079_v3 = vpop.permute.xlu1 %6078 }
0x1086   :  { %8980 = vmatmul.bf16.gmra.mxu3 %v22144_v24 }
0x1088   :  { %v8812_v34 = vpop.f32.mrf.mxu2 }
0x1089   :  { %v8594_v10 = vpop.f32.mrf.mxu3  ;;  %v19205_v45 = vadd.f32 %v8812_v34, %v22145_v9  ;;  %v22149_v9 = vld [vmem:[#allocation15_spill] sm:$0xff] }
0x108a   :  { %v19208_v33 = vadd.f32 %v8594_v10, %v18999_v13  ;;  %v8740_v21 = vpop.f32.mrf.mxu1  ;;  %v19224_v13 = vsel %vm6119_vm3, %v22149_v9, %v6079_v3  ;;  %v22152_v10 = vld [vmem:[#allocation84_spill] sm:$0xff] }
0x108b   :  { %v19211_v38 = vadd.f32 %v8740_v21, %v19091_v8  ;;  %22150 = vst [vmem:[#allocation156_spill] sm:$0xff] %v19224_v13  ;;  %v22151_v8 = vld [vmem:[#allocation102_spill] sm:$0xff] }
0x108d   :  { %22146 = vst [vmem:[#allocation180_spill] sm:$0xff] %v19211_v38 }
0x1090   :  { %v8814_v53 = vpop.f32.mrf.mxu2 }
0x1091   :  { %v8596_v32 = vpop.f32.mrf.mxu3  ;;  %v19214_v39 = vadd.f32 %v8814_v53, %v22147_v46  ;;  %v22153_v53 = vld [vmem:[#allocation54_spill] sm:$0xff] }
0x1092   :  { %v19217_v18 = vadd.f32 %v8596_v32, %v19008_v16  ;;  %v8743_v20 = vpop.f32.mrf.mxu1 }
0x1093   :  { %v19220_v34 = vadd.f32 %v8743_v20, %v19111_v56 }
0x1095   :  { %22148 = vst [vmem:[#allocation44_spill] sm:$0xff] %v19220_v34  ;;  %8782 = vmatmul.bf16.gmra.mxu1 %v19224_v13  ;;  %8856 = vmatmul.bf16.gmra.mxu2 %v22151_v8  ;;  %v22155_v34 = vld [vmem:[#allocation131_spill] sm:$0xff] }
0x1096   :  { %8985 = vmatmul.bf16.gmra.mxu3 %v22152_v10 }
0x1098   :  { %v8817_v21 = vpop.f32.mrf.mxu2 }
0x1099   :  { %v8599_v46 = vpop.f32.mrf.mxu3  ;;  %v19230_v38 = vadd.f32 %v8817_v21, %v22153_v53  ;;  %v22157_v21 = vld [vmem:[#allocation119_spill] sm:$0xff] }
0x109a   :  { %v19233_v16 = vadd.f32 %v8599_v46, %v19025_v36  ;;  %v8745_v56 = vpop.f32.mrf.mxu1  ;;  %v22158_v36 = vld [vmem:[#allocation96_spill] sm:$0xff]  ;;  %v22159_v53 = vld [vmem:[#allocation107_spill] sm:$0xff] }
0x109b   :  { %v19236_v32 = vadd.f32 %v8745_v56, %v19120_v11 }
0x109d   :  { %22154 = vst [vmem:[#allocation46_spill] sm:$0xff] %v19236_v32 }
0x10a0   :  { %v8819_v3 = vpop.f32.mrf.mxu2 }
0x10a1   :  { %v8601_v20 = vpop.f32.mrf.mxu3  ;;  %v19239_v13 = vadd.f32 %v8819_v3, %v22155_v34 }
0x10a2   :  { %v19242_v8 = vadd.f32 %v8601_v20, %v19034_v57  ;;  %v8748_v10 = vpop.f32.mrf.mxu1 }
0x10a3   :  { %v19245_v9 = vadd.f32 %v8748_v10, %v19136_v52  ;;  %v22160_v10 = vld [vmem:[#allocation177_spill] sm:$0xff] }
0x10a5   :  { %22156 = vst [vmem:[#allocation161_spill] sm:$0xff] %v19245_v9  ;;  %8861 = vmatmul.bf16.gmra.mxu2 %v22157_v21  ;;  %9134 = vmatmul.bf16.vlgmr.msra.gmra.mxu1 %v22132_v5 }
0x10a6   :  { %8990 = vmatmul.bf16.gmra.mxu3 %v22158_v36 }
0x10a8   :  { %v8822_v11 = vpop.f32.mrf.mxu2 }
0x10a9   :  { %v8604_v46 = vpop.f32.mrf.mxu3  ;;  %v19251_v56 = vadd.f32 %v8822_v11, %v22159_v53  ;;  %v22161_v11 = vld [vmem:[#allocation193_spill] sm:$0xff] }
0x10aa   :  { %v19254_v34 = vadd.f32 %v8604_v46, %v19051_v29  ;;  %v8750_v57 = vpop.f32.mrf.mxu1  ;;  %v22162_v29 = vld [vmem:[#allocation136_spill] sm:$0xff]  ;;  %v22163_v53 = vld [vmem:[#allocation165_spill] sm:$0xff] }
0x10ab   :  { %v19257_v3 = vadd.f32 %v8750_v57, %v19145_v60 }
0x10b0   :  { %v8824_v52 = vpop.f32.mrf.mxu2 }
0x10b1   :  { %v8606_v20 = vpop.f32.mrf.mxu3  ;;  %v19260_v21 = vadd.f32 %v8824_v52, %v22160_v10 }
0x10b2   :  { %v19263_v5 = vadd.f32 %v8606_v20, %v19060_v59  ;;  %v8753_v9 = vpop.f32.mrf.mxu1 }
0x10b3   :  { %v19266_v32 = vadd.f32 %v8753_v9, %v19157_v6  ;;  %v13370_v6 = vld [vmem:[%s21049_s2 + $0x2b0] sm:$0xff] }
0x10b4   :  { %9296 = vmatpush.bf16.msra.mxu2 %v13370_v6 }
0x10b5   :  { %8866 = vmatmul.bf16.gmra.mxu2 %v22161_v11  ;;  %9139 = vmatmul.bf16.gmra.mxu1 %v22138_v27  ;;  %v13378_v27 = vld [vmem:[%s21049_s2 + $0x2f0] sm:$0xff] }
0x10b6   :  { %8995 = vmatmul.bf16.gmra.mxu3 %v22162_v29 }
0x10b7   :  { %9465 = vmatpush.bf16.msra.mxu3 %v13378_v27 }
0x10b8   :  { %v8827_v60 = vpop.f32.mrf.mxu2 }
0x10b9   :  { %v8609_v46 = vpop.f32.mrf.mxu3  ;;  %v19272_v57 = vadd.f32 %v8827_v60, %v22163_v53  ;;  %v22166_v53 = vld [vmem:[#allocation140_spill] sm:$0xff] }
0x10ba   :  { %v19275_v52 = vadd.f32 %v8609_v46, %v19079_v30  ;;  %v8755_v59 = vpop.f32.mrf.mxu1  ;;  %v22165_v46 = vld [vmem:[#allocation21_spill] sm:$0xff] }
0x10bb   :  { %v19278_v20 = vadd.f32 %v8755_v59, %v19166_v48 }
0x10c0   :  { %v8829_v9 = vpop.f32.mrf.mxu2 }
0x10c1   :  { %v8611_v10 = vpop.f32.mrf.mxu3  ;;  %v19287_v11 = vadd.f32 %v8829_v9, %v18791_v42 }
0x10c2   :  { %v19290_v30 = vadd.f32 %v8611_v10, %v19088_v43  ;;  %v8758_v48 = vpop.f32.mrf.mxu1 }
0x10c3   :  { %v19293_v60 = vadd.f32 %v8758_v48, %v19178_v41 }
0x10c5   :  { %22164 = vst [vmem:[#allocation51_spill] sm:$0xff] %v19293_v60  ;;  %8871 = vmatmul.bf16.gmra.mxu2 %v22165_v46  ;;  %9144 = vmatmul.bf16.gmra.mxu1 %v22144_v24 }
0x10c6   :  { %9000 = vmatmul.bf16.gmra.mxu3 %v22166_v53 }
0x10c8   :  { %v8832_v59 = vpop.f32.mrf.mxu2 }
0x10c9   :  { %v8614_v6 = vpop.f32.mrf.mxu3  ;;  %v19299_v27 = vadd.f32 %v8832_v59, %v18800_v51  ;;  %v22167_v51 = vld [vmem:[#allocation128_spill] sm:$0xff]  ;;  %v22169_v59 = vld [vmem:[#allocation173_spill] sm:$0xff] }
0x10ca   :  { %v19302_v42 = vadd.f32 %v8614_v6, %v19108_v15  ;;  %v8760_v43 = vpop.f32.mrf.mxu1  ;;  %v22168_v15 = vld [vmem:[#allocation120_spill] sm:$0xff] }
0x10cb   :  { %v19305_v9 = vadd.f32 %v8760_v43, %v19193_v14 }
0x10d0   :  { %v8834_v41 = vpop.f32.mrf.mxu2 }
0x10d1   :  { %v8616_v10 = vpop.f32.mrf.mxu3  ;;  %v19308_v48 = vadd.f32 %v8834_v41, %v18812_v26 }
0x10d2   :  { %v19311_v24 = vadd.f32 %v8616_v10, %v19117_v58  ;;  %v8763_v46 = vpop.f32.mrf.mxu1 }
0x10d3   :  { %v19314_v60 = vadd.f32 %v8763_v46, %v19208_v33 }
0x10d5   :  { %8876 = vmatmul.bf16.gmra.mxu2 %v22167_v51  ;;  %9149 = vmatmul.bf16.gmra.mxu1 %v22168_v15 }
0x10d6   :  { %9005 = vmatmul.bf16.gmra.mxu3 %v22169_v59  ;;  %v22170_v59 = vld [vmem:[#allocation17_spill] sm:$0xff] }
0x10d8   :  { %v8837_v14 = vpop.f32.mrf.mxu2 }
0x10d9   :  { %v19320_v6 = vadd.f32 %v8837_v14, %v18821_v63  ;;  %v8966_v43 = vpop.f32.mrf.mxu3 }
0x10da   :  { %v19323_v26 = vadd.f32 %v8966_v43, %v19133_v28  ;;  %v8765_v58 = vpop.f32.mrf.mxu1  ;;  %v22171_v28 = vld [vmem:[#allocation121_spill] sm:$0xff] }
0x10db   :  { %v19326_v41 = vadd.f32 %v8765_v58, %v19217_v18 }
0x10e0   :  { %v8839_v33 = vpop.f32.mrf.mxu2 }
0x10e1   :  { %v19329_v10 = vadd.f32 %v8839_v33, %v18836_v23  ;;  %v8968_v46 = vpop.f32.mrf.mxu3 }
0x10e2   :  { %v19332_v51 = vadd.f32 %v8968_v46, %v19142_v7  ;;  %v8768_v15 = vpop.f32.mrf.mxu1 }
0x10e3   :  { %v19335_v63 = vadd.f32 %v8768_v15, %v19233_v16 }
0x10e5   :  { %8881 = vmatmul.bf16.gmra.mxu2 %v22170_v59  ;;  %9154 = vmatmul.bf16.gmra.mxu1 %v22158_v36  ;;  %v22172_v59 = vld [vmem:[#allocation118_spill] sm:$0xff] }
0x10e6   :  { %9010 = vmatmul.bf16.gmra.mxu3 %v22171_v28 }
0x10e8   :  { %v8842_v18 = vpop.f32.mrf.mxu2 }
0x10e9   :  { %v19341_v14 = vadd.f32 %v8842_v18, %v18851_v25  ;;  %v8971_v23 = vpop.f32.mrf.mxu3  ;;  %v22174_v18 = vld [vmem:[#allocation114_spill] sm:$0xff] }
0x10ea   :  { %v19344_v43 = vadd.f32 %v8971_v23, %v19154_v1  ;;  %v8770_v7 = vpop.f32.mrf.mxu1  ;;  %v22173_v1 = vld [vmem:[#allocation123_spill] sm:$0xff] }
0x10eb   :  { %v19347_v58 = vadd.f32 %v8770_v7, %v19242_v8 }
0x10f0   :  { %v8844_v16 = vpop.f32.mrf.mxu2 }
0x10f1   :  { %v19350_v33 = vadd.f32 %v8844_v16, %v18865_v47  ;;  %v8973_v46 = vpop.f32.mrf.mxu3 }
0x10f2   :  { %v19353_v36 = vadd.f32 %v8973_v46, %v19163_v2  ;;  %v8773_v15 = vpop.f32.mrf.mxu1 }
0x10f3   :  { %v19356_v25 = vadd.f32 %v8773_v15, %v19254_v34  ;;  %v13369_v34 = vld [vmem:[%s21049_s2 + $0x2a8] sm:$0xff] }
0x10f4   :  { %9297 = vmatpush.bf16.msra.mxu2 %v13369_v34 }
0x10f5   :  { %8886 = vmatmul.bf16.gmra.mxu2 %v22172_v59  ;;  %9159 = vmatmul.bf16.gmra.mxu1 %v22162_v29  ;;  %v13377_v29 = vld [vmem:[%s21049_s2 + $0x2e8] sm:$0xff] }
0x10f6   :  { %9015 = vmatmul.bf16.gmra.mxu3 %v22173_v1 }
0x10f7   :  { %9466 = vmatpush.bf16.msra.mxu3 %v13377_v29 }
0x10f8   :  { %v8847_v8 = vpop.f32.mrf.mxu2 }
0x10f9   :  { %v19362_v23 = vadd.f32 %v8847_v8, %v22174_v18  ;;  %v8976_v47 = vpop.f32.mrf.mxu3  ;;  %v22175_v18 = vld [vmem:[#allocation20_spill] sm:$0xff] }
0x10fa   :  { %v19365_v7 = vadd.f32 %v8976_v47, %v19175_v49  ;;  %v8775_v2 = vpop.f32.mrf.mxu1  ;;  %v22176_v47 = vld [vmem:[#allocation5_spill] sm:$0xff] }
0x10fb   :  { %v19368_v16 = vadd.f32 %v8775_v2, %v19263_v5  ;;  %v13382_v2 = vld [vmem:[%s21049_s2 + $0x310] sm:$0xff] }
0x10fc   :  { %9638 = vmatpush.bf16.msrb.mxu1 %v13382_v2 }
0x1100   :  { %v8849_v46 = vpop.f32.mrf.mxu2 }
0x1101   :  { %v19377_v15 = vadd.f32 %v8849_v46, %v18896_v50  ;;  %v8978_v49 = vpop.f32.mrf.mxu3 }
0x1102   :  { %v19380_v59 = vadd.f32 %v8978_v49, %v19190_v37  ;;  %v8778_v5 = vpop.f32.mrf.mxu1 }
0x1103   :  { %v19383_v8 = vadd.f32 %v8778_v5, %v19275_v52 }
0x1105   :  { %8891 = vmatmul.bf16.gmra.mxu2 %v22175_v18  ;;  %9164 = vmatmul.bf16.gmra.mxu1 %v22166_v53 }
0x1106   :  { %9020 = vmatmul.bf16.gmra.mxu3 %v22176_v47 }
0x1108   :  { %v8852_v50 = vpop.f32.mrf.mxu2 }
0x1109   :  { %v19392_v34 = vadd.f32 %v8852_v50, %v18905_v17  ;;  %v8981_v37 = vpop.f32.mrf.mxu3  ;;  %v22177_v50 = vld [vmem:[#allocation22_spill] sm:$0xff] }
0x110a   :  { %v19395_v29 = vadd.f32 %v8981_v37, %v19205_v45  ;;  %v8780_v52 = vpop.f32.mrf.mxu1  ;;  %v22178_v45 = vld [vmem:[#allocation61_spill] sm:$0xff]  ;;  %v22179_v37 = vld [vmem:[#allocation52_spill] sm:$0xff] }
0x110b   :  { %v19398_v46 = vadd.f32 %v8780_v52, %v19290_v30 }
0x1110   :  { %v8854_v53 = vpop.f32.mrf.mxu2 }
0x1111   :  { %v19401_v49 = vadd.f32 %v8854_v53, %v18922_v4  ;;  %v8983_v5 = vpop.f32.mrf.mxu3 }
0x1112   :  { %v19404_v18 = vadd.f32 %v8983_v5, %v19214_v39  ;;  %v8783_v2 = vpop.f32.mrf.mxu1 }
0x1113   :  { %v19407_v17 = vadd.f32 %v8783_v2, %v19302_v42 }
0x1115   :  { %8896 = vmatmul.bf16.gmra.mxu2 %v22177_v50  ;;  %9169 = vmatmul.bf16.gmra.mxu1 %v22178_v45 }
0x1116   :  { %9025 = vmatmul.bf16.gmra.mxu3 %v22179_v37 }
0x1118   :  { %v8857_v30 = vpop.f32.mrf.mxu2 }
0x1119   :  { %v19413_v52 = vadd.f32 %v8857_v30, %v18931_v22  ;;  %v8986_v4 = vpop.f32.mrf.mxu3  ;;  %v22180_v30 = vld [vmem:[#allocation18_spill] sm:$0xff] }
0x111a   :  { %v19416_v53 = vadd.f32 %v8986_v4, %v19230_v38  ;;  %v8785_v39 = vpop.f32.mrf.mxu1  ;;  %v22181_v38 = vld [vmem:[#allocation11_spill] sm:$0xff] }
0x111b   :  { %v19419_v5 = vadd.f32 %v8785_v39, %v19311_v24 }
0x1120   :  { %v8859_v42 = vpop.f32.mrf.mxu2 }
0x1121   :  { %v19422_v2 = vadd.f32 %v8859_v42, %v18948_v19  ;;  %v8988_v50 = vpop.f32.mrf.mxu3 }
0x1122   :  { %v19425_v45 = vadd.f32 %v8988_v50, %v19239_v13  ;;  %v9135_v37 = vpop.f32.mrf.mxu1 }
0x1123   :  { %v19428_v22 = vadd.f32 %v9135_v37, %v19323_v26 }
0x1125   :  { %8901 = vmatmul.bf16.gmra.mxu2 %v22180_v30  ;;  %9174 = vmatmul.bf16.gmra.mxu1 %v22171_v28 }
0x1126   :  { %9030 = vmatmul.bf16.gmra.mxu3 %v22181_v38 }
0x1128   :  { %v8862_v24 = vpop.f32.mrf.mxu2 }
0x1129   :  { %v19434_v4 = vadd.f32 %v8862_v24, %v18957_v40  ;;  %v8991_v19 = vpop.f32.mrf.mxu3  ;;  %v22182_v24 = vld [vmem:[#allocation68_spill] sm:$0xff] }
0x112a   :  { %v19437_v39 = vadd.f32 %v8991_v19, %v19251_v56  ;;  %v9137_v13 = vpop.f32.mrf.mxu1  ;;  %v22183_v56 = vld [vmem:[#allocation112_spill] sm:$0xff] }
0x112b   :  { %v19440_v42 = vadd.f32 %v9137_v13, %v19332_v51 }
0x1130   :  { %v8864_v26 = vpop.f32.mrf.mxu2 }
0x1131   :  { %v19443_v50 = vadd.f32 %v8864_v26, %v18973_v54  ;;  %v8993_v37 = vpop.f32.mrf.mxu3 }
0x1132   :  { %v19446_v28 = vadd.f32 %v8993_v37, %v19260_v21  ;;  %v9140_v30 = vpop.f32.mrf.mxu1 }
0x1133   :  { %v19449_v40 = vadd.f32 %v9140_v30, %v19344_v43  ;;  %v13368_v43 = vld [vmem:[%s21049_s2 + $0x2a0] sm:$0xff] }
0x1134   :  { %9298 = vmatpush.bf16.msra.mxu2 %v13368_v43 }
0x1135   :  { %8906 = vmatmul.bf16.gmra.mxu2 %v22182_v24  ;;  %9179 = vmatmul.bf16.gmra.mxu1 %v22173_v1  ;;  %v13376_v1 = vld [vmem:[%s21049_s2 + $0x2e0] sm:$0xff] }
0x1136   :  { %9035 = vmatmul.bf16.gmra.mxu3 %v22183_v56 }
0x1137   :  { %9467 = vmatpush.bf16.msra.mxu3 %v13376_v1 }
0x1138   :  { %v8867_v51 = vpop.f32.mrf.mxu2 }
0x1139   :  { %v19455_v19 = vadd.f32 %v8867_v51, %v18985_v62  ;;  %v8996_v54 = vpop.f32.mrf.mxu3  ;;  %v22186_v51 = vld [vmem:[#allocation23_spill] sm:$0xff] }
0x113a   :  { %v19458_v13 = vadd.f32 %v8996_v54, %v19272_v57  ;;  %v9142_v21 = vpop.f32.mrf.mxu1  ;;  %v22187_v54 = vld [vmem:[#allocation58_spill] sm:$0xff] }
0x113b   :  { %v19461_v26 = vadd.f32 %v9142_v21, %v19353_v36 }
0x113d   :  { %22184 = vst [vmem:[#allocation166_spill] sm:$0xff] %v19461_v26 }
0x1140   :  { %v8869_v62 = vpop.f32.mrf.mxu2 }
0x1141   :  { %v19470_v37 = vadd.f32 %v8869_v62, %v19005_v35  ;;  %v8998_v57 = vpop.f32.mrf.mxu3 }
0x1142   :  { %v19473_v30 = vadd.f32 %v8998_v57, %v19287_v11  ;;  %v9145_v36 = vpop.f32.mrf.mxu1 }
0x1143   :  { %v19476_v24 = vadd.f32 %v9145_v36, %v19365_v7 }
0x1145   :  { %22185 = vst [vmem:[#allocation145_spill] sm:$0xff] %v19476_v24  ;;  %8911 = vmatmul.bf16.gmra.mxu2 %v22186_v51  ;;  %9184 = vmatmul.bf16.gmra.mxu1 %v22176_v47 }
0x1146   :  { %9040 = vmatmul.bf16.gmra.mxu3 %v22187_v54 }
0x1148   :  { %v8872_v21 = vpop.f32.mrf.mxu2 }
0x1149   :  { %v19482_v43 = vadd.f32 %v8872_v21, %v19014_v0  ;;  %v9001_v35 = vpop.f32.mrf.mxu3  ;;  %v22190_v21 = vld [vmem:[#allocation88_spill] sm:$0xff] }
0x114a   :  { %v19485_v1 = vadd.f32 %v9001_v35, %v19299_v27  ;;  %v9147_v11 = vpop.f32.mrf.mxu1  ;;  %v6561_v27 = vsel %vm6119_vm3, %v22094_v12, %v22190_v21  ;;  %v22191_v35 = vld [vmem:[#allocation142_spill] sm:$0xff]  ;;  %v19538_v12 = vpop.permute.xlu1 %6107 }
0x114b   :  { %v19488_v62 = vadd.f32 %v9147_v11, %v19380_v59  ;;  %v22192_v59 = vld [vmem:[#allocation170_spill] sm:$0xff] }
0x114d   :  { %22188 = vst [vmem:[#allocation45_spill] sm:$0xff] %v19488_v62 }
0x1150   :  { %v8874_v7 = vpop.f32.mrf.mxu2 }
0x1151   :  { %v19491_v57 = vadd.f32 %v8874_v7, %v19031_v31  ;;  %v9003_v36 = vpop.f32.mrf.mxu3 }
0x1152   :  { %v19494_v47 = vadd.f32 %v9003_v36, %v19308_v48  ;;  %v9150_v51 = vpop.f32.mrf.mxu1 }
0x1153   :  { %v19497_v0 = vadd.f32 %v9150_v51, %v19395_v29 }
0x1155   :  { %22189 = vst [vmem:[#allocation181_spill] sm:$0xff] %v19497_v0  ;;  %8916 = vmatmul.bf16.gmra.mxu2 %v6561_v27  ;;  %9189 = vmatmul.bf16.gmra.mxu1 %v22191_v35  ;;  %v19513_v0 = vpop.permute.xlu0 %6105 }
0x1156   :  { %9045 = vmatmul.bf16.gmra.mxu3 %v22192_v59 }
0x1158   :  { %v8877_v11 = vpop.f32.mrf.mxu2 }
0x1159   :  { %v19505_v31 = vadd.f32 %v8877_v11, %v19040_v44  ;;  %v9006_v7 = vpop.f32.mrf.mxu3 }
0x115a   :  { %v19508_v48 = vadd.f32 %v9006_v7, %v19320_v6  ;;  %v9152_v36 = vpop.f32.mrf.mxu1  ;;  %v22195_v6 = vld [vmem:[#allocation143_spill] sm:$0xff] }
0x115b   :  { %v19511_v29 = vadd.f32 %v9152_v36, %v19404_v18  ;;  %v6564_v11 = vsel %vm6119_vm3, %v22195_v6, %v19513_v0  ;;  %v22196_v18 = vld [vmem:[#allocation38_spill] sm:$0xff] }
0x115d   :  { %22193 = vst [vmem:[#allocation37_spill] sm:$0xff] %v19511_v29  ;;  %v22214_v29 = vld [vmem:[#allocation32_spill] sm:$0xff] }
0x1160   :  { %v8879_v51 = vpop.f32.mrf.mxu2 }
0x1161   :  { %v19516_v21 = vadd.f32 %v8879_v51, %v19057_v55  ;;  %v9008_v27 = vpop.f32.mrf.mxu3  ;;  %v22197_v55 = vld [vmem:[#allocation90_spill] sm:$0xff] }
0x1162   :  { %v19519_v35 = vadd.f32 %v9008_v27, %v19329_v10  ;;  %v9155_v44 = vpop.f32.mrf.mxu1 }
0x1163   :  { %v19522_v59 = vadd.f32 %v9155_v44, %v19416_v53 }
0x1165   :  { %22194 = vst [vmem:[#allocation65_spill] sm:$0xff] %v19522_v59  ;;  %8921 = vmatmul.bf16.gmra.mxu2 %v6564_v11  ;;  %9194 = vmatmul.bf16.gmra.mxu1 %v22181_v38 }
0x1166   :  { %9050 = vmatmul.bf16.gmra.mxu3 %v22196_v18 }
0x1168   :  { %v8882_v7 = vpop.f32.mrf.mxu2 }
0x1169   :  { %v19530_v36 = vadd.f32 %v8882_v7, %v22197_v55  ;;  %v9011_v51 = vpop.f32.mrf.mxu3 }
0x116a   :  { %v19533_v10 = vadd.f32 %v9011_v51, %v19341_v14  ;;  %v9157_v27 = vpop.f32.mrf.mxu1  ;;  %v22200_v14 = vld [vmem:[#allocation148_spill] sm:$0xff] }
0x116b   :  { %v19536_v53 = vadd.f32 %v9157_v27, %v19425_v45  ;;  %v6567_v51 = vsel %vm6119_vm3, %v22200_v14, %v19538_v12  ;;  %v22201_v45 = vld [vmem:[#allocation184_spill] sm:$0xff] }
0x116c   :  { %v22206_v14 = vld [vmem:[#allocation92_spill] sm:$0xff] }
0x116d   :  { %22198 = vst [vmem:[#allocation183_spill] sm:$0xff] %v19536_v53 }
0x1170   :  { %v8884_v44 = vpop.f32.mrf.mxu2 }
0x1171   :  { %v19541_v11 = vadd.f32 %v8884_v44, %v19085_v61  ;;  %v9013_v38 = vpop.f32.mrf.mxu3  ;;  %v22202_v61 = vld [vmem:[#allocation55_spill] sm:$0xff] }
0x1172   :  { %v19544_v6 = vadd.f32 %v9013_v38, %v19350_v33  ;;  %v9160_v7 = vpop.f32.mrf.mxu1 }
0x1173   :  { %v19547_v55 = vadd.f32 %v9160_v7, %v19437_v39  ;;  %v13367_v7 = vld [vmem:[%s21049_s2 + $0x298] sm:$0xff] }
0x1174   :  { %9299 = vmatpush.bf16.msra.mxu2 %v13367_v7  ;;  %v22208_v7 = vld [vmem:[#allocation70_spill] sm:$0xff] }
0x1175   :  { %22199 = vst [vmem:[#allocation64_spill] sm:$0xff] %v19547_v55  ;;  %8926 = vmatmul.bf16.gmra.mxu2 %v6567_v51  ;;  %9199 = vmatmul.bf16.gmra.mxu1 %v22183_v56  ;;  %v13375_v56 = vld [vmem:[%s21049_s2 + $0x2d8] sm:$0xff] }
0x1176   :  { %9055 = vmatmul.bf16.gmra.mxu3 %v22201_v45 }
0x1177   :  { %9468 = vmatpush.bf16.msra.mxu3 %v13375_v56  ;;  %v13381_v56 = vld [vmem:[%s21049_s2 + $0x308] sm:$0xff] }
0x1178   :  { %v8887_v27 = vpop.f32.mrf.mxu2  ;;  %9639 = vmatpush.bf16.msrb.mxu1 %v13381_v56 }
0x1179   :  { %v19555_v44 = vadd.f32 %v8887_v27, %v22202_v61  ;;  %v9016_v53 = vpop.f32.mrf.mxu3  ;;  %v22204_v27 = vld [vmem:[#allocation93_spill] sm:$0xff] }
0x117a   :  { %v19558_v33 = vadd.f32 %v9016_v53, %v19362_v23  ;;  %v9162_v38 = vpop.f32.mrf.mxu1 }
0x117b   :  { %v19561_v39 = vadd.f32 %v9162_v38, %v19446_v28 }
0x117d   :  { %22203 = vst [vmem:[#allocation67_spill] sm:$0xff] %v19561_v39  ;;  %v22207_v39 = vld [vmem:[#allocation153_spill] sm:$0xff] }
0x117e   :  { %v6571_v55 = vsel %vm6119_vm3, %v22207_v39, %v22206_v14  ;;  %v22211_v14 = vld [vmem:[#allocation175_spill] sm:$0xff] }
0x1180   :  { %v8889_v51 = vpop.f32.mrf.mxu2 }
0x1181   :  { %v19570_v61 = vadd.f32 %v8889_v51, %v22204_v27  ;;  %v9018_v23 = vpop.f32.mrf.mxu3 }
0x1182   :  { %v19573_v53 = vadd.f32 %v9018_v23, %v19377_v15  ;;  %v9165_v28 = vpop.f32.mrf.mxu1  ;;  %v22209_v15 = vld [vmem:[#allocation81_spill] sm:$0xff] }
0x1183   :  { %v19576_v38 = vadd.f32 %v9165_v28, %v19458_v13 }
0x1185   :  { %22205 = vst [vmem:[#allocation135_spill] sm:$0xff] %v19576_v38  ;;  %8931 = vmatmul.bf16.gmra.mxu2 %v6571_v55  ;;  %9204 = vmatmul.bf16.gmra.mxu1 %v22187_v54 }
0x1186   :  { %9060 = vmatmul.bf16.gmra.mxu3 %v22208_v7 }
0x1188   :  { %v8892_v51 = vpop.f32.mrf.mxu2 }
0x1189   :  { %v19587_v27 = vadd.f32 %v8892_v51, %v22209_v15  ;;  %v9021_v13 = vpop.f32.mrf.mxu3  ;;  %v22213_v15 = vld [vmem:[#allocation41_spill] sm:$0xff] }
0x118a   :  { %v19590_v23 = vadd.f32 %v9021_v13, %v19392_v34  ;;  %v9167_v28 = vpop.f32.mrf.mxu1  ;;  %v6574_v34 = vsel %vm6119_vm3, %v22214_v29, %v22213_v15  ;;  %v22215_v13 = vld [vmem:[#allocation159_spill] sm:$0xff] }
0x118b   :  { %v19593_v55 = vadd.f32 %v9167_v28, %v19473_v30  ;;  %v22216_v30 = vld [vmem:[#allocation138_spill] sm:$0xff]  ;;  %v19609_v28 = vpop.permute.xlu0 %6595 }
0x118d   :  { %22210 = vst [vmem:[#allocation43_spill] sm:$0xff] %v19593_v55 }
0x1190   :  { %v8894_v54 = vpop.f32.mrf.mxu2 }
0x1191   :  { %v19596_v39 = vadd.f32 %v8894_v54, %v22211_v14  ;;  %v9023_v38 = vpop.f32.mrf.mxu3  ;;  %v22217_v14 = vld [vmem:[#allocation25_spill] sm:$0xff] }
0x1192   :  { %v19599_v59 = vadd.f32 %v9023_v38, %v19401_v49  ;;  %v9170_v56 = vpop.f32.mrf.mxu1 }
0x1193   :  { %v19602_v51 = vadd.f32 %v9170_v56, %v19485_v1 }
0x1195   :  { %22212 = vst [vmem:[#allocation29_spill] sm:$0xff] %v19602_v51  ;;  %8936 = vmatmul.bf16.gmra.mxu2 %v6574_v34  ;;  %9209 = vmatmul.bf16.gmra.mxu1 %v22215_v13  ;;  %v19620_v34 = vpop.permute.xlu0 %6113  ;;  %v22219_v13 = vld [vmem:[#allocation179_spill] sm:$0xff] }
0x1196   :  { %9065 = vmatmul.bf16.gmra.mxu3 %v22216_v30 }
0x1198   :  { %v8897_v54 = vpop.f32.mrf.mxu2 }
0x1199   :  { %v19612_v55 = vadd.f32 %v8897_v54, %v22217_v14  ;;  %v9026_v49 = vpop.f32.mrf.mxu3 }
0x119a   :  { %v19615_v38 = vadd.f32 %v9026_v49, %v19413_v52  ;;  %v9172_v1 = vpop.f32.mrf.mxu1  ;;  %v22221_v52 = vld [vmem:[#allocation62_spill] sm:$0xff] }
0x119b   :  { %v19618_v56 = vadd.f32 %v9172_v1, %v19494_v47  ;;  %v6577_v49 = vsel %vm6119_vm3, %v22221_v52, %v19620_v34  ;;  %v22222_v47 = vld [vmem:[#allocation8_spill] sm:$0xff]  ;;  %v19636_v1 = vpop.permute.xlu1 %6605 }
0x119c   :  { %v22225_v52 = vld [vmem:[#allocation60_spill] sm:$0xff] }
0x119d   :  { %22218 = vst [vmem:[#allocation56_spill] sm:$0xff] %v19618_v56 }
0x11a0   :  { %v8899_v15 = vpop.f32.mrf.mxu2 }
0x11a1   :  { %v19623_v29 = vadd.f32 %v8899_v15, %v22219_v13  ;;  %v9028_v30 = vpop.f32.mrf.mxu3  ;;  %v22223_v13 = vld [vmem:[#allocation130_spill] sm:$0xff] }
0x11a2   :  { %v19626_v51 = vadd.f32 %v9028_v30, %v19422_v2  ;;  %v9175_v54 = vpop.f32.mrf.mxu1 }
0x11a3   :  { %v19629_v14 = vadd.f32 %v9175_v54, %v19508_v48  ;;  %v13366_v48 = vld [vmem:[%s21049_s2 + $0x290] sm:$0xff] }
0x11a4   :  { %9300 = vmatpush.bf16.msra.mxu2 %v13366_v48 }
0x11a5   :  { %22220 = vst [vmem:[#allocation66_spill] sm:$0xff] %v19629_v14  ;;  %8941 = vmatmul.bf16.gmra.mxu2 %v6577_v49  ;;  %9214 = vmatmul.bf16.gmra.mxu1 %v22196_v18  ;;  %v13365_v18 = vld [vmem:[%s21049_s2 + $0x288] sm:$0xff] }
0x11a6   :  { %9070 = vmatmul.bf16.gmra.mxu3 %v22222_v47 }
0x11a8   :  { %v8902_v15 = vpop.f32.mrf.mxu2  ;;  %9301 = vmatpush.bf16.msra.mxu2 %v13365_v18 }
0x11a9   :  { %v19639_v56 = vadd.f32 %v8902_v15, %v22223_v13  ;;  %v9031_v2 = vpop.f32.mrf.mxu3  ;;  %v19653_v13 = vpop.permute.xlu1 %6115 }
0x11aa   :  { %v19645_v30 = vadd.f32 %v9031_v2, %v19434_v4  ;;  %v9177_v54 = vpop.f32.mrf.mxu1  ;;  %v13364_v4 = vld [vmem:[%s21049_s2 + $0x280] sm:$0xff] }
0x11ab   :  { %v19648_v49 = vadd.f32 %v9177_v54, %v19519_v35  ;;  %v22227_v54 = vld [vmem:[#allocation15_spill] sm:$0xff] }
0x11ac   :  { %9302 = vmatpush.bf16.msra.mxu2 %v13364_v4  ;;  %v6580_v18 = vsel %vm6119_vm3, %v22227_v54, %v19653_v13 }
0x11ad   :  { %22224 = vst [vmem:[#allocation72_spill] sm:$0xff] %v19648_v49  ;;  %v22229_v49 = vld [vmem:[#allocation97_spill] sm:$0xff] }
0x11b0   :  { %v8904_v15 = vpop.f32.mrf.mxu2 }
0x11b1   :  { %v19656_v14 = vadd.f32 %v8904_v15, %v22225_v52  ;;  %v9033_v62 = vpop.f32.mrf.mxu3  ;;  %v22228_v52 = vld [vmem:[#allocation40_spill] sm:$0xff] }
0x11b2   :  { %v19662_v35 = vadd.f32 %v9033_v62, %v19443_v50  ;;  %v9180_v2 = vpop.f32.mrf.mxu1 }
0x11b3   :  { %v19665_v48 = vadd.f32 %v9180_v2, %v19533_v10  ;;  %v13374_v2 = vld [vmem:[%s21049_s2 + $0x2d0] sm:$0xff] }
0x11b4   :  { %9469 = vmatpush.bf16.msra.mxu3 %v13374_v2  ;;  %v22235_v2 = vld [vmem:[#allocation94_spill] sm:$0xff] }
0x11b5   :  { %22226 = vst [vmem:[#allocation151_spill] sm:$0xff] %v19665_v48  ;;  %8946 = vmatmul.bf16.gmra.mxu2 %v6580_v18  ;;  %9219 = vmatmul.bf16.gmra.mxu1 %v22201_v45  ;;  %v22231_v18 = vld [vmem:[#allocation180_spill] sm:$0xff] }
0x11b6   :  { %9075 = vmatmul.bf16.gmra.mxu3 %v22228_v52 }
0x11b8   :  { %v8907_v15 = vpop.f32.mrf.mxu2 }
0x11b9   :  { %v19673_v24 = vadd.f32 %v8907_v15, %v22229_v49  ;;  %v9036_v50 = vpop.f32.mrf.mxu3 }
0x11ba   :  { %v19676_v62 = vadd.f32 %v9036_v50, %v19455_v19  ;;  %v9182_v10 = vpop.f32.mrf.mxu1  ;;  %v22233_v50 = vld [vmem:[#allocation47_spill] sm:$0xff] }
0x11bb   :  { %v19679_v4 = vadd.f32 %v9182_v10, %v19544_v6  ;;  %v22234_v6 = vld [vmem:[#allocation16_spill] sm:$0xff] }
0x11bc   :  { %v6584_v10 = vsel %vm6119_vm3, %v22234_v6, %v22233_v50 }
0x11bd   :  { %22230 = vst [vmem:[#allocation59_spill] sm:$0xff] %v19679_v4 }
0x11c0   :  { %v8909_v45 = vpop.f32.mrf.mxu2 }
0x11c1   :  { %v19685_v54 = vadd.f32 %v8909_v45, %v22231_v18  ;;  %v9038_v48 = vpop.f32.mrf.mxu3  ;;  %v22236_v45 = vld [vmem:[#allocation44_spill] sm:$0xff] }
0x11c2   :  { %v19688_v49 = vadd.f32 %v9038_v48, %v19470_v37  ;;  %v9185_v15 = vpop.f32.mrf.mxu1 }
0x11c3   :  { %v19691_v19 = vadd.f32 %v9185_v15, %v19558_v33 }
0x11c5   :  { %22232 = vst [vmem:[#allocation157_spill] sm:$0xff] %v19691_v19  ;;  %8951 = vmatmul.bf16.gmra.mxu2 %v6584_v10  ;;  %9224 = vmatmul.bf16.gmra.mxu1 %v22208_v7  ;;  %v22238_v19 = vld [vmem:[#allocation46_spill] sm:$0xff] }
0x11c6   :  { %9080 = vmatmul.bf16.gmra.mxu3 %v22235_v2 }
0x11c8   :  { %v8912_v4 = vpop.f32.mrf.mxu2 }
0x11c9   :  { %v19699_v18 = vadd.f32 %v8912_v4, %v22236_v45  ;;  %v9041_v26 = vpop.f32.mrf.mxu3  ;;  %v22239_v45 = vld [vmem:[#allocation30_spill] sm:$0xff] }
0x11ca   :  { %v19702_v37 = vadd.f32 %v9041_v26, %v19482_v43  ;;  %v9187_v48 = vpop.f32.mrf.mxu1  ;;  %v6665_v26 = vsel %vm6119_vm3, %v22239_v45, %v19513_v0  ;;  %v22240_v43 = vld [vmem:[#allocation75_spill] sm:$0xff] }
0x11cb   :  { %v19705_v33 = vadd.f32 %v9187_v48, %v19573_v53  ;;  %v22241_v53 = vld [vmem:[#allocation106_spill] sm:$0xff] }
0x11cd   :  { %22237 = vst [vmem:[#allocation182_spill] sm:$0xff] %v19705_v33 }
0x11d0   :  { %v8914_v15 = vpop.f32.mrf.mxu2 }
0x11d1   :  { %v19708_v50 = vadd.f32 %v8914_v15, %v22238_v19  ;;  %v9043_v10 = vpop.f32.mrf.mxu3  ;;  %v22242_v19 = vld [vmem:[#allocation161_spill] sm:$0xff] }
0x11d2   :  { %v19711_v7 = vadd.f32 %v9043_v10, %v19491_v57  ;;  %v9190_v6 = vpop.f32.mrf.mxu1 }
0x11d3   :  { %v19714_v4 = vadd.f32 %v9190_v6, %v19590_v23 }
0x11d5   :  { %9229 = vmatmul.bf16.gmra.mxu1 %v22240_v43  ;;  %9303 = vmatmul.bf16.vlgmr.msra.gmra.mxu2 %v22241_v53 }
0x11d6   :  { %9085 = vmatmul.bf16.gmra.mxu3 %v6665_v26 }
0x11d8   :  { %v8917_v48 = vpop.f32.mrf.mxu2 }
0x11d9   :  { %v19722_v15 = vadd.f32 %v8917_v48, %v22242_v19  ;;  %v9046_v33 = vpop.f32.mrf.mxu3  ;;  %v22243_v48 = vld [vmem:[#allocation31_spill] sm:$0xff] }
0x11da   :  { %v19725_v57 = vadd.f32 %v9046_v33, %v19505_v31  ;;  %v9192_v10 = vpop.f32.mrf.mxu1  ;;  %v19742_v31 = vsel %vm6119_vm3, %v22243_v48, %v19538_v12  ;;  %v22246_v48 = vld [vmem:[#allocation103_spill] sm:$0xff] }
0x11db   :  { %v19728_v23 = vadd.f32 %v9192_v10, %v19599_v59  ;;  %v22244_v59 = vld [vmem:[#allocation109_spill] sm:$0xff] }
0x11e0   :  { %v8919_v6 = vpop.f32.mrf.mxu2 }
0x11e1   :  { %v19731_v0 = vadd.f32 %v8919_v6, %v19257_v3  ;;  %v9048_v45 = vpop.f32.mrf.mxu3 }
0x11e2   :  { %v19734_v43 = vadd.f32 %v9048_v45, %v19516_v21  ;;  %v9195_v26 = vpop.f32.mrf.mxu1 }
0x11e3   :  { %v19737_v53 = vadd.f32 %v9195_v26, %v19615_v38 }
0x11e5   :  { %9234 = vmatmul.bf16.gmra.mxu1 %v22222_v47  ;;  %9308 = vmatmul.bf16.gmra.mxu2 %v22244_v59 }
0x11e6   :  { %9090 = vmatmul.bf16.gmra.mxu3 %v19742_v31 }
0x11e8   :  { %v8922_v3 = vpop.f32.mrf.mxu2 }
0x11e9   :  { %v19748_v33 = vadd.f32 %v8922_v3, %v19266_v32  ;;  %v9051_v21 = vpop.f32.mrf.mxu3  ;;  %v22247_v3 = vld [vmem:[#allocation51_spill] sm:$0xff] }
0x11ea   :  { %v19751_v19 = vadd.f32 %v9051_v21, %v19530_v36  ;;  %v9197_v38 = vpop.f32.mrf.mxu1  ;;  %v22245_v36 = vld [vmem:[#allocation113_spill] sm:$0xff] }
0x11eb   :  { %v19754_v10 = vadd.f32 %v9197_v38, %v19626_v51 }
0x11f0   :  { %v8924_v12 = vpop.f32.mrf.mxu2 }
0x11f1   :  { %v19757_v6 = vadd.f32 %v8924_v12, %v19278_v20  ;;  %v9053_v47 = vpop.f32.mrf.mxu3 }
0x11f2   :  { %v19760_v45 = vadd.f32 %v9053_v47, %v19541_v11  ;;  %v9200_v26 = vpop.f32.mrf.mxu1 }
0x11f3   :  { %v19763_v32 = vadd.f32 %v9200_v26, %v19645_v30  ;;  %v13373_v30 = vld [vmem:[%s21049_s2 + $0x2c8] sm:$0xff] }
0x11f4   :  { %9470 = vmatpush.bf16.msra.mxu3 %v13373_v30 }
0x11f5   :  { %9239 = vmatmul.bf16.gmra.mxu1 %v22228_v52  ;;  %9313 = vmatmul.bf16.gmra.mxu2 %v22245_v36 }
0x11f6   :  { %9095 = vmatmul.bf16.gmra.mxu3 %v22246_v48 }
0x11f8   :  { %v8927_v51 = vpop.f32.mrf.mxu2 }
0x11f9   :  { %v19769_v21 = vadd.f32 %v8927_v51, %v22247_v3  ;;  %v9056_v20 = vpop.f32.mrf.mxu3 }
0x11fa   :  { %v19772_v38 = vadd.f32 %v9056_v20, %v19555_v44  ;;  %v9202_v11 = vpop.f32.mrf.mxu1 }
0x11fb   :  { %v19775_v12 = vadd.f32 %v9202_v11, %v19662_v35  ;;  %v22249_v35 = vld [vmem:[#allocation77_spill] sm:$0xff]  ;;  %v22250_v11 = vld [vmem:[#allocation116_spill] sm:$0xff] }
0x11fc   :  { %v19792_v20 = vsel %vm6119_vm3, %v22249_v35, %v19609_v28 }
0x1200   :  { %v8929_v52 = vpop.f32.mrf.mxu2 }
0x1201   :  { %v19781_v47 = vadd.f32 %v8929_v52, %v19305_v9  ;;  %v9058_v26 = vpop.f32.mrf.mxu3  ;;  %v13380_v9 = vld [vmem:[%s21049_s2 + $0x300] sm:$0xff] }
0x1202   :  { %v19784_v51 = vadd.f32 %v9058_v26, %v19570_v61  ;;  %v9205_v3 = vpop.f32.mrf.mxu1  ;;  %9640 = vmatpush.bf16.msrb.mxu1 %v13380_v9 }
0x1203   :  { %v19787_v44 = vadd.f32 %v9205_v3, %v19676_v62 }
0x1205   :  { %22248 = vst [vmem:[#allocation162_spill] sm:$0xff] %v19787_v44  ;;  %9244 = vmatmul.bf16.gmra.mxu1 %v22235_v2  ;;  %9318 = vmatmul.bf16.gmra.mxu2 %v22250_v11 }
0x1206   :  { %9100 = vmatmul.bf16.gmra.mxu3 %v19792_v20 }
0x1208   :  { %v8932_v61 = vpop.f32.mrf.mxu2 }
0x1209   :  { %v19801_v62 = vadd.f32 %v8932_v61, %v19314_v60  ;;  %v9061_v30 = vpop.f32.mrf.mxu3  ;;  %v22251_v61 = vld [vmem:[#allocation141_spill] sm:$0xff] }
0x120a   :  { %v19804_v52 = vadd.f32 %v9061_v30, %v19587_v27  ;;  %v9207_v28 = vpop.f32.mrf.mxu1  ;;  %v6678_v27 = vsel %vm6119_vm3, %v22251_v61, %v19620_v34  ;;  %v22252_v30 = vld [vmem:[#allocation115_spill] sm:$0xff] }
0x120b   :  { %v19807_v2 = vadd.f32 %v9207_v28, %v19688_v49  ;;  %v22253_v49 = vld [vmem:[#allocation126_spill] sm:$0xff] }
0x1210   :  { %v8934_v26 = vpop.f32.mrf.mxu2 }
0x1211   :  { %v19810_v3 = vadd.f32 %v8934_v26, %v19326_v41  ;;  %v9063_v35 = vpop.f32.mrf.mxu3 }
0x1212   :  { %v19813_v44 = vadd.f32 %v9063_v35, %v19596_v39  ;;  %v9210_v9 = vpop.f32.mrf.mxu1 }
0x1213   :  { %v19816_v60 = vadd.f32 %v9210_v9, %v19702_v37 }
0x1215   :  { %9249 = vmatmul.bf16.gmra.mxu1 %v22252_v30  ;;  %9323 = vmatmul.bf16.gmra.mxu2 %v22253_v49  ;;  %v22254_v49 = vld [vmem:[#allocation149_spill] sm:$0xff] }
0x1216   :  { %9105 = vmatmul.bf16.gmra.mxu3 %v6678_v27 }
0x1218   :  { %v8937_v28 = vpop.f32.mrf.mxu2 }
0x1219   :  { %v19824_v41 = vadd.f32 %v8937_v28, %v19335_v63  ;;  %v9066_v26 = vpop.f32.mrf.mxu3 }
0x121a   :  { %v19827_v39 = vadd.f32 %v9066_v26, %v19612_v55  ;;  %v9212_v35 = vpop.f32.mrf.mxu1  ;;  %v19844_v55 = vsel %vm6119_vm3, %v22254_v49, %v19653_v13  ;;  %v22258_v49 = vld [vmem:[#allocation152_spill] sm:$0xff] }
0x121b   :  { %v19830_v37 = vadd.f32 %v9212_v35, %v19711_v7  ;;  %v22255_v7 = vld [vmem:[#allocation133_spill] sm:$0xff] }
0x1220   :  { %v8939_v9 = vpop.f32.mrf.mxu2 }
0x1221   :  { %v19833_v34 = vadd.f32 %v8939_v9, %v19347_v58  ;;  %v9068_v61 = vpop.f32.mrf.mxu3 }
0x1222   :  { %v19836_v30 = vadd.f32 %v9068_v61, %v19623_v29  ;;  %v9215_v27 = vpop.f32.mrf.mxu1  ;;  %v13372_v61 = vld [vmem:[%s21049_s2 + $0x2c0] sm:$0xff] }
0x1223   :  { %v19839_v63 = vadd.f32 %v9215_v27, %v19725_v57  ;;  %9471 = vmatpush.bf16.msra.mxu3 %v13372_v61  ;;  %v6598_v61 = vpop.permute.xlu0 %6597 }
0x1225   :  { %9254 = vmatmul.bf16.gmra.mxu1 %v19742_v31  ;;  %9328 = vmatmul.bf16.gmra.mxu2 %v22255_v7 }
0x1226   :  { %9110 = vmatmul.bf16.gmra.mxu3 %v19844_v55 }
0x1228   :  { %v8942_v58 = vpop.f32.mrf.mxu2 }
0x1229   :  { %v19850_v28 = vadd.f32 %v8942_v58, %v19356_v25  ;;  %v9071_v29 = vpop.f32.mrf.mxu3 }
0x122a   :  { %v19853_v26 = vadd.f32 %v9071_v29, %v19639_v56  ;;  %v9217_v57 = vpop.f32.mrf.mxu1 }
0x122b   :  { %v19856_v35 = vadd.f32 %v9217_v57, %v19734_v43  ;;  %v22257_v43 = vld [vmem:[#allocation137_spill] sm:$0xff] }
0x1230   :  { %v8944_v13 = vpop.f32.mrf.mxu2 }
0x1231   :  { %v19859_v9 = vadd.f32 %v8944_v13, %v19368_v16  ;;  %v9073_v31 = vpop.f32.mrf.mxu3 }
0x1232   :  { %v19865_v25 = vadd.f32 %v9073_v31, %v19656_v14  ;;  %v9220_v27 = vpop.f32.mrf.mxu1 }
0x1233   :  { %v19868_v56 = vadd.f32 %v9220_v27, %v19751_v19 }
0x1235   :  { %22256 = vst [vmem:[#allocation63_spill] sm:$0xff] %v19868_v56  ;;  %9259 = vmatmul.bf16.gmra.mxu1 %v22246_v48  ;;  %9333 = vmatmul.bf16.gmra.mxu2 %v22257_v43 }
0x1236   :  { %9115 = vmatmul.bf16.gmra.mxu3 %v22258_v49 }
0x1238   :  { %v8947_v16 = vpop.f32.mrf.mxu2 }
0x1239   :  { %v19874_v58 = vadd.f32 %v8947_v16, %v19383_v8  ;;  %v9076_v29 = vpop.f32.mrf.mxu3  ;;  %v22259_v16 = vld [vmem:[#allocation155_spill] sm:$0xff] }
0x123a   :  { %v19877_v57 = vadd.f32 %v9076_v29, %v19673_v24  ;;  %v9222_v14 = vpop.f32.mrf.mxu1  ;;  %v6688_v24 = vsel %vm6119_vm3, %v22259_v16, %v6598_v61 }
0x123b   :  { %v19880_v13 = vadd.f32 %v9222_v14, %v19760_v45  ;;  %v22260_v45 = vld [vmem:[#allocation139_spill] sm:$0xff] }
0x1240   :  { %v8949_v19 = vpop.f32.mrf.mxu2 }
0x1241   :  { %v19883_v31 = vadd.f32 %v8949_v19, %v19398_v46  ;;  %v9078_v48 = vpop.f32.mrf.mxu3 }
0x1242   :  { %v19886_v27 = vadd.f32 %v9078_v48, %v19685_v54  ;;  %v9225_v56 = vpop.f32.mrf.mxu1 }
0x1243   :  { %v19889_v8 = vadd.f32 %v9225_v56, %v19772_v38 }
0x1245   :  { %9264 = vmatmul.bf16.gmra.mxu1 %v19792_v20  ;;  %9338 = vmatmul.bf16.gmra.mxu2 %v22260_v45 }
0x1246   :  { %9120 = vmatmul.bf16.gmra.mxu3 %v6688_v24 }
0x1248   :  { %v8952_v29 = vpop.f32.mrf.mxu2 }
0x1249   :  { %v19896_v46 = vadd.f32 %v8952_v29, %v19407_v17  ;;  %v9081_v14 = vpop.f32.mrf.mxu3  ;;  %v22261_v29 = vld [vmem:[#allocation35_spill] sm:$0xff] }
0x124a   :  { %v19899_v54 = vadd.f32 %v9081_v14, %v19699_v18  ;;  %v9227_v19 = vpop.f32.mrf.mxu1  ;;  %v6692_v18 = vsel %vm6119_vm3, %v22261_v29, %v19636_v1  ;;  %v22262_v14 = vld [vmem:[#allocation144_spill] sm:$0xff] }
0x124b   :  { %v19902_v38 = vadd.f32 %v9227_v19, %v19784_v51 }
0x1250   :  { %v8954_v56 = vpop.f32.mrf.mxu2 }
0x1251   :  { %v19905_v48 = vadd.f32 %v8954_v56, %v19419_v5  ;;  %v9083_v20 = vpop.f32.mrf.mxu3 }
0x1252   :  { %v19908_v61 = vadd.f32 %v9083_v20, %v19708_v50  ;;  %v9230_v16 = vpop.f32.mrf.mxu1 }
0x1253   :  { %v19911_v17 = vadd.f32 %v9230_v16, %v19804_v52 }
0x1255   :  { %9269 = vmatmul.bf16.gmra.mxu1 %v6692_v18  ;;  %9343 = vmatmul.bf16.gmra.mxu2 %v22262_v14 }
0x1256   :  { %9472 = vmatmul.bf16.vlgmr.msra.gmra.mxu3 %v22244_v59 }
0x1258   :  { %v9304_v51 = vpop.f32.mrf.mxu2 }
0x1259   :  { %v9086_v5 = vpop.f32.mrf.mxu3  ;;  %v19919_v19 = vadd.f32 %v9304_v51, %v19428_v22  ;;  %v22263_v22 = vld [vmem:[#allocation176_spill] sm:$0xff] }
0x125a   :  { %v19922_v50 = vadd.f32 %v9086_v5, %v19722_v15  ;;  %v9232_v56 = vpop.f32.mrf.mxu1 }
0x125b   :  { %v19925_v52 = vadd.f32 %v9232_v56, %v19813_v44  ;;  %v22265_v56 = vld [vmem:[#allocation166_spill] sm:$0xff] }
0x1260   :  { %v9306_v20 = vpop.f32.mrf.mxu2 }
0x1261   :  { %v9088_v16 = vpop.f32.mrf.mxu3  ;;  %v19928_v1 = vadd.f32 %v9306_v20, %v19440_v42 }
0x1262   :  { %v19931_v29 = vadd.f32 %v9088_v16, %v19731_v0  ;;  %v9235_v59 = vpop.f32.mrf.mxu1 }
0x1263   :  { %v19934_v18 = vadd.f32 %v9235_v59, %v19827_v39  ;;  %v22267_v59 = vld [vmem:[#allocation145_spill] sm:$0xff] }
0x1265   :  { %9274 = vmatmul.bf16.gmra.mxu1 %v19844_v55  ;;  %9348 = vmatmul.bf16.gmra.mxu2 %v22263_v22 }
0x1266   :  { %9477 = vmatmul.bf16.gmra.mxu3 %v22245_v36 }
0x1268   :  { %v9309_v15 = vpop.f32.mrf.mxu2 }
0x1269   :  { %v9091_v44 = vpop.f32.mrf.mxu3  ;;  %v19940_v14 = vadd.f32 %v9309_v15, %v19449_v40  ;;  %v22266_v40 = vld [vmem:[#allocation178_spill] sm:$0xff] }
0x126a   :  { %v19943_v42 = vadd.f32 %v9091_v44, %v19748_v33  ;;  %v9237_v0 = vpop.f32.mrf.mxu1 }
0x126b   :  { %v19946_v51 = vadd.f32 %v9237_v0, %v19836_v30 }
0x126d   :  { %22264 = vst [vmem:[#allocation185_spill] sm:$0xff] %v19946_v51 }
0x1270   :  { %v9311_v39 = vpop.f32.mrf.mxu2 }
0x1271   :  { %v9093_v5 = vpop.f32.mrf.mxu3  ;;  %v19949_v55 = vadd.f32 %v9311_v39, %v22265_v56 }
0x1272   :  { %v19952_v20 = vadd.f32 %v9093_v5, %v19757_v6  ;;  %v9240_v36 = vpop.f32.mrf.mxu1  ;;  %v22269_v5 = vld [vmem:[#allocation45_spill] sm:$0xff] }
0x1273   :  { %v19955_v16 = vadd.f32 %v9240_v36, %v19853_v26 }
0x1275   :  { %9279 = vmatmul.bf16.gmra.mxu1 %v22258_v49  ;;  %9353 = vmatmul.bf16.gmra.mxu2 %v22266_v40 }
0x1276   :  { %9482 = vmatmul.bf16.gmra.mxu3 %v22250_v11 }
0x1278   :  { %v9314_v33 = vpop.f32.mrf.mxu2 }
0x1279   :  { %v9096_v30 = vpop.f32.mrf.mxu3  ;;  %v19961_v15 = vadd.f32 %v9314_v33, %v22267_v59  ;;  %v22270_v33 = vld [vmem:[#allocation4_spill] sm:$0xff]  ;;  %v22272_v59 = vld [vmem:[#allocation181_spill] sm:$0xff] }
0x127a   :  { %v19964_v44 = vadd.f32 %v9096_v30, %v19769_v21  ;;  %v9242_v6 = vpop.f32.mrf.mxu1  ;;  %v22271_v21 = vld [vmem:[#allocation186_spill] sm:$0xff] }
0x127b   :  { %v19967_v0 = vadd.f32 %v9242_v6, %v19865_v25 }
0x127d   :  { %22268 = vst [vmem:[#allocation57_spill] sm:$0xff] %v19967_v0 }
0x1280   :  { %v9316_v26 = vpop.f32.mrf.mxu2 }
0x1281   :  { %v9098_v39 = vpop.f32.mrf.mxu3  ;;  %v19970_v49 = vadd.f32 %v9316_v26, %v22269_v5 }
0x1282   :  { %v19973_v56 = vadd.f32 %v9098_v39, %v19781_v47  ;;  %v9245_v11 = vpop.f32.mrf.mxu1 }
0x1283   :  { %v19976_v36 = vadd.f32 %v9245_v11, %v19877_v57  ;;  %v6608_v57 = vpop.permute.xlu1 %6607 }
0x1285   :  { %9284 = vmatmul.bf16.gmra.mxu1 %v6688_v24  ;;  %9358 = vmatmul.bf16.gmra.mxu2 %v22270_v33  ;;  %v22274_v24 = vld [vmem:[#allocation37_spill] sm:$0xff] }
0x1286   :  { %9487 = vmatmul.bf16.gmra.mxu3 %v22271_v21 }
0x1288   :  { %v9319_v30 = vpop.f32.mrf.mxu2 }
0x1289   :  { %v9101_v25 = vpop.f32.mrf.mxu3  ;;  %v19981_v6 = vadd.f32 %v9319_v30, %v22272_v59  ;;  %v22276_v59 = vld [vmem:[#allocation160_spill] sm:$0xff] }
0x128a   :  { %v19984_v26 = vadd.f32 %v9101_v25, %v19801_v62  ;;  %v9247_v5 = vpop.f32.mrf.mxu1  ;;  %v6696_v62 = vsel %vm6119_vm3, %v22276_v59, %v6608_v57  ;;  %v22277_v25 = vld [vmem:[#allocation42_spill] sm:$0xff]  ;;  %v22280_v57 = vld [vmem:[#allocation183_spill] sm:$0xff] }
0x128b   :  { %v19987_v47 = vadd.f32 %v9247_v5, %v19886_v27 }
0x128d   :  { %22273 = vst [vmem:[#allocation187_spill] sm:$0xff] %v19987_v47  ;;  %v22278_v47 = vld [vmem:[#allocation65_spill] sm:$0xff] }
0x1290   :  { %v9321_v39 = vpop.f32.mrf.mxu2 }
0x1291   :  { %v9103_v11 = vpop.f32.mrf.mxu3  ;;  %v19990_v0 = vadd.f32 %v9321_v39, %v22274_v24 }
0x1292   :  { %v19993_v21 = vadd.f32 %v9103_v11, %v19810_v3  ;;  %v9250_v51 = vpop.f32.mrf.mxu1 }
0x1293   :  { %v19996_v30 = vadd.f32 %v9250_v51, %v19899_v54 }
0x1295   :  { %22275 = vst [vmem:[#allocation85_spill] sm:$0xff] %v19996_v30  ;;  %9289 = vmatmul.bf16.gmra.mxu1 %v6696_v62  ;;  %9363 = vmatmul.bf16.gmra.mxu2 %v22277_v25 }
0x1296   :  { %9492 = vmatmul.bf16.gmra.mxu3 %v22255_v7 }
0x1298   :  { %v9324_v27 = vpop.f32.mrf.mxu2 }
0x1299   :  { %v9106_v5 = vpop.f32.mrf.mxu3  ;;  %v20003_v39 = vadd.f32 %v9324_v27, %v22278_v47  ;;  %v22282_v47 = vld [vmem:[#allocation34_spill] sm:$0xff] }
0x129a   :  { %v20006_v3 = vadd.f32 %v9106_v5, %v19824_v41  ;;  %v9252_v11 = vpop.f32.mrf.mxu1  ;;  %v22283_v41 = vld [vmem:[#allocation99_spill] sm:$0xff]  ;;  %v22284_v5 = vld [vmem:[#allocation64_spill] sm:$0xff] }
0x129b   :  { %v20009_v54 = vadd.f32 %v9252_v11, %v19908_v61 }
0x129d   :  { %22279 = vst [vmem:[#allocation3_spill] sm:$0xff] %v20009_v54 }
0x12a0   :  { %v9326_v51 = vpop.f32.mrf.mxu2 }
0x12a1   :  { %v9108_v24 = vpop.f32.mrf.mxu3  ;;  %v20012_v59 = vadd.f32 %v9326_v51, %v22280_v57 }
0x12a2   :  { %v20015_v62 = vadd.f32 %v9108_v24, %v19833_v34  ;;  %v9255_v7 = vpop.f32.mrf.mxu1 }
0x12a3   :  { %v20018_v25 = vadd.f32 %v9255_v7, %v19922_v50  ;;  %v22286_v7 = vld [vmem:[#allocation67_spill] sm:$0xff] }
0x12a5   :  { %22281 = vst [vmem:[#allocation188_spill] sm:$0xff] %v20018_v25  ;;  %9368 = vmatmul.bf16.gmra.mxu2 %v22282_v47  ;;  %12642 = vmatmul.msk.bf16.vlgmr.msrb.gmra.mxu1 %vm6119_vm3, %v22283_v41 }
0x12a6   :  { %9497 = vmatmul.bf16.gmra.mxu3 %v22257_v43 }
0x12a8   :  { %v9329_v61 = vpop.f32.mrf.mxu2 }
0x12a9   :  { %v9111_v27 = vpop.f32.mrf.mxu3  ;;  %v20025_v11 = vadd.f32 %v9329_v61, %v22284_v5  ;;  %v22288_v61 = vld [vmem:[#allocation71_spill] sm:$0xff] }
0x12aa   :  { %v20028_v51 = vadd.f32 %v9111_v27, %v19850_v28  ;;  %v9257_v34 = vpop.f32.mrf.mxu1  ;;  %v22289_v28 = vld [vmem:[#allocation101_spill] sm:$0xff]  ;;  %v22290_v5 = vld [vmem:[#allocation135_spill] sm:$0xff] }
0x12ab   :  { %v20031_v24 = vadd.f32 %v9257_v34, %v19931_v29 }
0x12ad   :  { %22285 = vst [vmem:[#allocation6_spill] sm:$0xff] %v20031_v24 }
0x12b0   :  { %v9331_v50 = vpop.f32.mrf.mxu2 }
0x12b1   :  { %v9113_v57 = vpop.f32.mrf.mxu3  ;;  %v20034_v54 = vadd.f32 %v9331_v50, %v22286_v7 }
0x12b2   :  { %v20037_v41 = vadd.f32 %v9113_v57, %v19859_v9  ;;  %v9260_v43 = vpop.f32.mrf.mxu1 }
0x12b3   :  { %v20040_v25 = vadd.f32 %v9260_v43, %v19943_v42  ;;  %v22292_v43 = vld [vmem:[#allocation43_spill] sm:$0xff] }
0x12b5   :  { %22287 = vst [vmem:[#allocation83_spill] sm:$0xff] %v20040_v25  ;;  %9373 = vmatmul.bf16.gmra.mxu2 %v22288_v61  ;;  %12643 = vmatmul.msk.bf16.gmra.mxu1 %vm6119_vm3, %v22289_v28 }
0x12b6   :  { %9502 = vmatmul.bf16.gmra.mxu3 %v22260_v45 }
0x12b8   :  { %v9334_v29 = vpop.f32.mrf.mxu2 }
0x12b9   :  { %v9116_v27 = vpop.f32.mrf.mxu3  ;;  %v20047_v34 = vadd.f32 %v9334_v29, %v22290_v5  ;;  %v22294_v29 = vld [vmem:[#allocation28_spill] sm:$0xff] }
0x12ba   :  { %v20050_v50 = vadd.f32 %v9116_v27, %v19874_v58  ;;  %v9262_v9 = vpop.f32.mrf.mxu1  ;;  %v22295_v58 = vld [vmem:[#allocation104_spill] sm:$0xff]  ;;  %v22296_v27 = vld [vmem:[#allocation190_spill] sm:$0xff] }
0x12bb   :  { %v20053_v57 = vadd.f32 %v9262_v9, %v19952_v20  ;;  %v22297_v9 = vld [vmem:[#allocation29_spill] sm:$0xff] }
0x12bd   :  { %22291 = vst [vmem:[#allocation189_spill] sm:$0xff] %v20053_v57 }
0x12c0   :  { %v9336_v42 = vpop.f32.mrf.mxu2 }
0x12c1   :  { %v9118_v7 = vpop.f32.mrf.mxu3  ;;  %v20056_v24 = vadd.f32 %v9336_v42, %v22292_v43 }
0x12c2   :  { %v20059_v28 = vadd.f32 %v9118_v7, %v19883_v31  ;;  %v9265_v45 = vpop.f32.mrf.mxu1 }
0x12c3   :  { %v20062_v25 = vadd.f32 %v9265_v45, %v19964_v44  ;;  %v22298_v45 = vld [vmem:[#allocation56_spill] sm:$0xff] }
0x12c5   :  { %22293 = vst [vmem:[#allocation12_spill] sm:$0xff] %v20062_v25  ;;  %9378 = vmatmul.bf16.gmra.mxu2 %v22294_v29  ;;  %12644 = vmatmul.msk.bf16.gmra.mxu1 %vm6119_vm3, %v22295_v58 }
0x12c6   :  { %9507 = vmatmul.bf16.gmra.mxu3 %v22296_v27 }
0x12c8   :  { %v9339_v20 = vpop.f32.mrf.mxu2 }
0x12c9   :  { %v9121_v5 = vpop.f32.mrf.mxu3  ;;  %v20069_v57 = vadd.f32 %v9339_v20, %v22297_v9  ;;  %v22299_v20 = vld [vmem:[#allocation87_spill] sm:$0xff] }
0x12ca   :  { %v20072_v42 = vadd.f32 %v9121_v5, %v19896_v46  ;;  %v9267_v31 = vpop.f32.mrf.mxu1  ;;  %v22300_v46 = vld [vmem:[#allocation111_spill] sm:$0xff]  ;;  %v22301_v5 = vld [vmem:[#allocation66_spill] sm:$0xff] }
0x12cb   :  { %v20075_v7 = vadd.f32 %v9267_v31, %v19973_v56 }
0x12d0   :  { %v9341_v44 = vpop.f32.mrf.mxu2 }
0x12d1   :  { %v9123_v43 = vpop.f32.mrf.mxu3  ;;  %v20078_v25 = vadd.f32 %v9341_v44, %v22298_v45  ;;  %v22303_v45 = vld [vmem:[#allocation72_spill] sm:$0xff] }
0x12d2   :  { %v20081_v58 = vadd.f32 %v9123_v43, %v19905_v48  ;;  %v9270_v27 = vpop.f32.mrf.mxu1 }
0x12d3   :  { %v20084_v30 = vadd.f32 %v9270_v27, %v19984_v26 }
0x12d5   :  { %9383 = vmatmul.bf16.gmra.mxu2 %v22299_v20  ;;  %12645 = vmatmul.msk.bf16.gmra.mxu1 %vm6119_vm3, %v22300_v46 }
0x12d6   :  { %9512 = vmatmul.bf16.gmra.mxu3 %v22263_v22 }
0x12d8   :  { %v9344_v56 = vpop.f32.mrf.mxu2 }
0x12d9   :  { %v20091_v9 = vadd.f32 %v9344_v56, %v22301_v5  ;;  %v9473_v31 = vpop.f32.mrf.mxu3  ;;  %v22305_v5 = vld [vmem:[#allocation76_spill] sm:$0xff] }
0x12da   :  { %v20094_v44 = vadd.f32 %v9473_v31, %v19919_v19  ;;  %v9272_v48 = vpop.f32.mrf.mxu1  ;;  %v22306_v19 = vld [vmem:[#allocation122_spill] sm:$0xff]  ;;  %v22307_v31 = vld [vmem:[#allocation151_spill] sm:$0xff] }
0x12db   :  { %v20097_v43 = vadd.f32 %v9272_v48, %v19993_v21 }
0x12dd   :  { %22302 = vst [vmem:[#allocation48_spill] sm:$0xff] %v20097_v43 }
0x12e0   :  { %v9346_v26 = vpop.f32.mrf.mxu2 }
0x12e1   :  { %v20100_v27 = vadd.f32 %v9346_v26, %v22303_v45  ;;  %v9475_v20 = vpop.f32.mrf.mxu3 }
0x12e2   :  { %v20103_v46 = vadd.f32 %v9475_v20, %v19928_v1  ;;  %v9275_v22 = vpop.f32.mrf.mxu1 }
0x12e3   :  { %v20106_v56 = vadd.f32 %v9275_v22, %v20006_v3  ;;  %v22309_v22 = vld [vmem:[#allocation59_spill] sm:$0xff] }
0x12e5   :  { %22304 = vst [vmem:[#allocation91_spill] sm:$0xff] %v20106_v56  ;;  %9388 = vmatmul.bf16.gmra.mxu2 %v22305_v5  ;;  %12646 = vmatmul.msk.bf16.gmra.mxu1 %vm6119_vm3, %v22306_v19 }
0x12e6   :  { %9517 = vmatmul.bf16.gmra.mxu3 %v22266_v40 }
0x12e8   :  { %v9349_v21 = vpop.f32.mrf.mxu2 }
0x12e9   :  { %v20113_v48 = vadd.f32 %v9349_v21, %v22307_v31  ;;  %v9478_v26 = vpop.f32.mrf.mxu3  ;;  %v22311_v31 = vld [vmem:[#allocation125_spill] sm:$0xff] }
0x12ea   :  { %v20116_v45 = vadd.f32 %v9478_v26, %v19940_v14  ;;  %v9277_v1 = vpop.f32.mrf.mxu1  ;;  %v22312_v14 = vld [vmem:[#allocation124_spill] sm:$0xff]  ;;  %v22313_v26 = vld [vmem:[#allocation157_spill] sm:$0xff] }
0x12eb   :  { %v20119_v20 = vadd.f32 %v9277_v1, %v20015_v62 }
0x12ed   :  { %22308 = vst [vmem:[#allocation69_spill] sm:$0xff] %v20119_v20 }
0x12f0   :  { %v9351_v3 = vpop.f32.mrf.mxu2 }
0x12f1   :  { %v20122_v56 = vadd.f32 %v9351_v3, %v22309_v22  ;;  %v9480_v43 = vpop.f32.mrf.mxu3 }
0x12f2   :  { %v20125_v19 = vadd.f32 %v9480_v43, %v19949_v55  ;;  %v9280_v40 = vpop.f32.mrf.mxu1 }
0x12f3   :  { %v20128_v21 = vadd.f32 %v9280_v40, %v20028_v51  ;;  %v22315_v40 = vld [vmem:[#allocation182_spill] sm:$0xff] }
0x12f5   :  { %22310 = vst [vmem:[#allocation49_spill] sm:$0xff] %v20128_v21  ;;  %9393 = vmatmul.bf16.gmra.mxu2 %v22311_v31  ;;  %12647 = vmatmul.msk.bf16.gmra.mxu1 %vm6119_vm3, %v22312_v14 }
0x12f6   :  { %9522 = vmatmul.bf16.gmra.mxu3 %v22270_v33 }
0x12f8   :  { %v9354_v62 = vpop.f32.mrf.mxu2 }
0x12f9   :  { %v20135_v1 = vadd.f32 %v9354_v62, %v22313_v26  ;;  %v9483_v3 = vpop.f32.mrf.mxu3  ;;  %v22317_v26 = vld [vmem:[#allocation147_spill] sm:$0xff] }
0x12fa   :  { %v20138_v22 = vadd.f32 %v9483_v3, %v19961_v15  ;;  %v9282_v55 = vpop.f32.mrf.mxu1  ;;  %v22318_v15 = vld [vmem:[#allocation129_spill] sm:$0xff]  ;;  %v22319_v3 = vld [vmem:[#allocation100_spill] sm:$0xff] }
0x12fb   :  { %v20141_v43 = vadd.f32 %v9282_v55, %v20037_v41 }
0x12fd   :  { %22314 = vst [vmem:[#allocation117_spill] sm:$0xff] %v20141_v43 }
0x1300   :  { %v9356_v51 = vpop.f32.mrf.mxu2 }
0x1301   :  { %v20144_v21 = vadd.f32 %v9356_v51, %v22315_v40  ;;  %v9485_v20 = vpop.f32.mrf.mxu3 }
0x1302   :  { %v20147_v14 = vadd.f32 %v9485_v20, %v19970_v49  ;;  %v9285_v33 = vpop.f32.mrf.mxu1 }
0x1303   :  { %v20150_v62 = vadd.f32 %v9285_v33, %v20050_v50 }
0x1305   :  { %22316 = vst [vmem:[#allocation78_spill] sm:$0xff] %v20150_v62  ;;  %9398 = vmatmul.bf16.gmra.mxu2 %v22317_v26  ;;  %12648 = vmatmul.msk.bf16.gmra.mxu1 %vm6119_vm3, %v22318_v15 }
0x1306   :  { %9527 = vmatmul.bf16.gmra.mxu3 %v22319_v3 }
0x1308   :  { %v9359_v41 = vpop.f32.mrf.mxu2 }
0x1309   :  { %v20157_v55 = vadd.f32 %v9359_v41, %v19714_v4  ;;  %v9488_v51 = vpop.f32.mrf.mxu3  ;;  %v22322_v41 = vld [vmem:[#allocation86_spill] sm:$0xff] }
0x130a   :  { %v20160_v40 = vadd.f32 %v9488_v51, %v19981_v6  ;;  %v9287_v49 = vpop.f32.mrf.mxu1  ;;  %v22323_v6 = vld [vmem:[#allocation132_spill] sm:$0xff] }
0x130b   :  { %v20163_v20 = vadd.f32 %v9287_v49, %v20059_v28 }
0x130d   :  { %22320 = vst [vmem:[#allocation105_spill] sm:$0xff] %v20163_v20 }
0x1310   :  { %v9361_v50 = vpop.f32.mrf.mxu2 }
0x1311   :  { %v20166_v33 = vadd.f32 %v9361_v50, %v19728_v23  ;;  %v9490_v62 = vpop.f32.mrf.mxu3 }
0x1312   :  { %v20169_v15 = vadd.f32 %v9490_v62, %v19990_v0  ;;  %v9290_v3 = vpop.f32.mrf.mxu1 }
0x1313   :  { %v20172_v4 = vadd.f32 %v9290_v3, %v20072_v42 }
0x1315   :  { %22321 = vst [vmem:[#allocation50_spill] sm:$0xff] %v20172_v4  ;;  %9403 = vmatmul.bf16.gmra.mxu2 %v22322_v41  ;;  %12649 = vmatmul.msk.bf16.gmra.mxu1 %vm6119_vm3, %v22323_v6  ;;  %v22325_v6 = vld [vmem:[#allocation89_spill] sm:$0xff] }
0x1316   :  { %9532 = vmatmul.bf16.gmra.mxu3 %v22282_v47 }
0x1318   :  { %v9364_v28 = vpop.f32.mrf.mxu2 }
0x1319   :  { %v20179_v51 = vadd.f32 %v9364_v28, %v19737_v53  ;;  %v9493_v23 = vpop.f32.mrf.mxu3 }
0x131a   :  { %v20182_v49 = vadd.f32 %v9493_v23, %v20003_v39  ;;  %v9292_v0 = vpop.f32.mrf.mxu1  ;;  %v22326_v39 = vld [vmem:[#allocation164_spill] sm:$0xff] }
0x131b   :  { %v20185_v62 = vadd.f32 %v9292_v0, %v20081_v58 }
0x131d   :  { %22324 = vst [vmem:[#allocation127_spill] sm:$0xff] %v20185_v62 }
0x1320   :  { %v9366_v42 = vpop.f32.mrf.mxu2 }
0x1321   :  { %v20188_v50 = vadd.f32 %v9366_v42, %v19754_v10  ;;  %v9495_v3 = vpop.f32.mrf.mxu3 }
0x1322   :  { %v20191_v41 = vadd.f32 %v9495_v3, %v20012_v59  ;;  %v9642_v47 = vpop.f32.mrf.mxu1 }
0x1323   :  { %v20194_v53 = vadd.f32 %v9642_v47, %v20094_v44 }
0x1325   :  { %9408 = vmatmul.bf16.gmra.mxu2 %v22325_v6  ;;  %12650 = vmatmul.msk.bf16.gmra.mxu1 %vm6119_vm3, %v22326_v39  ;;  %v22327_v39 = vld [vmem:[#allocation98_spill] sm:$0xff] }
0x1326   :  { %9537 = vmatmul.bf16.gmra.mxu3 %v22288_v61 }
0x1328   :  { %v9369_v58 = vpop.f32.mrf.mxu2 }
0x1329   :  { %v20201_v28 = vadd.f32 %v9369_v58, %v19763_v32  ;;  %v9498_v10 = vpop.f32.mrf.mxu3  ;;  %v22329_v58 = vld [vmem:[#allocation162_spill] sm:$0xff] }
0x132a   :  { %v20204_v23 = vadd.f32 %v9498_v10, %v20025_v11  ;;  %v9644_v59 = vpop.f32.mrf.mxu1  ;;  %v22328_v11 = vld [vmem:[#allocation169_spill] sm:$0xff] }
0x132b   :  { %v20207_v0 = vadd.f32 %v9644_v59, %v20103_v46 }
0x1330   :  { %v9371_v44 = vpop.f32.mrf.mxu2 }
0x1331   :  { %v20210_v42 = vadd.f32 %v9371_v44, %v19775_v12  ;;  %v9500_v3 = vpop.f32.mrf.mxu3 }
0x1332   :  { %v20213_v47 = vadd.f32 %v9500_v3, %v20034_v54  ;;  %v9647_v61 = vpop.f32.mrf.mxu1 }
0x1333   :  { %v20216_v32 = vadd.f32 %v9647_v61, %v20116_v45 }
0x1335   :  { %9413 = vmatmul.bf16.gmra.mxu2 %v22327_v39  ;;  %12651 = vmatmul.msk.bf16.gmra.mxu1 %vm6119_vm3, %v22328_v11 }
0x1336   :  { %9542 = vmatmul.bf16.gmra.mxu3 %v22294_v29 }
0x1338   :  { %v9374_v46 = vpop.f32.mrf.mxu2 }
0x1339   :  { %v20223_v10 = vadd.f32 %v9374_v46, %v22329_v58  ;;  %v9503_v12 = vpop.f32.mrf.mxu3  ;;  %v22330_v58 = vld [vmem:[#allocation108_spill] sm:$0xff] }
0x133a   :  { %v20226_v59 = vadd.f32 %v9503_v12, %v20047_v34  ;;  %v9649_v54 = vpop.f32.mrf.mxu1  ;;  %v22331_v34 = vld [vmem:[#allocation172_spill] sm:$0xff]  ;;  %v22332_v12 = vld [vmem:[#allocation194_spill] sm:$0xff] }
0x133b   :  { %v20229_v44 = vadd.f32 %v9649_v54, %v20125_v19 }
0x1340   :  { %v9376_v45 = vpop.f32.mrf.mxu2 }
0x1341   :  { %v20232_v3 = vadd.f32 %v9376_v45, %v19807_v2  ;;  %v9505_v61 = vpop.f32.mrf.mxu3 }
0x1342   :  { %v20235_v11 = vadd.f32 %v9505_v61, %v20056_v24  ;;  %v9652_v29 = vpop.f32.mrf.mxu1 }
0x1343   :  { %v20238_v46 = vadd.f32 %v9652_v29, %v20138_v22  ;;  %v6636_v29 = vpop.permute.xlu2 %6635 }
0x1345   :  { %9418 = vmatmul.bf16.gmra.mxu2 %v22330_v58  ;;  %12652 = vmatmul.msk.bf16.gmra.mxu1 %vm6119_vm3, %v22331_v34 }
0x1346   :  { %9547 = vmatmul.bf16.gmra.mxu3 %v22332_v12  ;;  %v13391_v12 = vld [vmem:[%s21050_s3 + $0x38] sm:$0xff] }
0x1347   :  { %10515 = vmatpush.bf16.msrb.mxu2 %v13391_v12 }
0x1348   :  { %v9379_v19 = vpop.f32.mrf.mxu2 }
0x1349   :  { %v20245_v54 = vadd.f32 %v9379_v19, %v19816_v60  ;;  %v9508_v2 = vpop.f32.mrf.mxu3  ;;  %v13399_v60 = vld [vmem:[%s21050_s3 + $0x78] sm:$0xff] }
0x134a   :  { %v20248_v45 = vadd.f32 %v9508_v2, %v20069_v57  ;;  %v9654_v24 = vpop.f32.mrf.mxu1  ;;  %10528 = vmatpush.bf16.msrb.mxu3 %v13399_v60 }
0x134b   :  { %v20251_v61 = vadd.f32 %v9654_v24, %v20147_v14  ;;  %v22334_v24 = vld [vmem:[#allocation174_spill] sm:$0xff] }
0x1350   :  { %v9381_v22 = vpop.f32.mrf.mxu2 }
0x1351   :  { %v20254_v62 = vadd.f32 %v9381_v22, %v19830_v37  ;;  %v9510_v34 = vpop.f32.mrf.mxu3  ;;  %v22333_v37 = vld [vmem:[#allocation168_spill] sm:$0xff] }
0x1352   :  { %v20263_v57 = vadd.f32 %v9510_v34, %v20078_v25  ;;  %v9657_v19 = vpop.f32.mrf.mxu1  ;;  %v6700_v2 = vsel %vm6119_vm3, %v22333_v37, %v6636_v29  ;;  %v6638_v29 = vpop.permute.xlu0 %6637 }
0x1353   :  { %v20266_v14 = vadd.f32 %v9657_v19, %v20160_v40 }
0x1355   :  { %9423 = vmatmul.bf16.gmra.mxu2 %v6700_v2  ;;  %12653 = vmatmul.msk.bf16.gmra.mxu1 %vm6119_vm3, %v22334_v24  ;;  %v22335_v24 = vld [vmem:[#allocation171_spill] sm:$0xff] }
0x1356   :  { %9552 = vmatmul.bf16.gmra.mxu3 %v22305_v5 }
0x1358   :  { %v9384_v22 = vpop.f32.mrf.mxu2 }
0x1359   :  { %v20274_v4 = vadd.f32 %v9384_v22, %v19839_v63  ;;  %v9513_v25 = vpop.f32.mrf.mxu3  ;;  %v9802_v22 = vmax.f32 %v20194_v53, 0.0 }
0x135a   :  { %v20277_v34 = vadd.f32 %v9513_v25, %v20091_v9  ;;  %v9659_v40 = vpop.f32.mrf.mxu1  ;;  %v20291_v9 = vsel %vm6119_vm3, %v22335_v24, %v6638_v29  ;;  %v22336_v25 = vld [vmem:[#allocation7_spill] sm:$0xff] }
0x135b   :  { %v20280_v12 = vadd.f32 %v9659_v40, %v20169_v15  ;;  %v22337_v40 = vld [vmem:[#allocation63_spill] sm:$0xff] }
0x1360   :  { %v9386_v60 = vpop.f32.mrf.mxu2 }
0x1361   :  { %v20283_v19 = vadd.f32 %v9386_v60, %v19856_v35  ;;  %v9515_v37 = vpop.f32.mrf.mxu3 }
0x1362   :  { %v20286_v5 = vadd.f32 %v9515_v37, %v20100_v27  ;;  %v9662_v2 = vpop.f32.mrf.mxu1 }
0x1363   :  { %v9663_v63 = vadd.f32 %v9662_v2, %v20182_v49  ;;  %v9803_v2 = vmax.f32 %v20207_v0, 0.0  ;;  %v9804_v0 = vmax.f32 %v20216_v32, 0.0 }
0x1365   :  { %v9810_v15 = vmax.f32 %v9663_v63, 0.0  ;;  %9428 = vmatmul.bf16.gmra.mxu2 %v20291_v9  ;;  %12654 = vmatmul.msk.bf16.gmra.mxu1 %vm6119_vm3, %v22336_v25  ;;  %v6640_v25 = vpop.permute.xlu1 %6639 }
0x1366   :  { %9557 = vmatmul.bf16.gmra.mxu3 %v22311_v31 }
0x1367   :  { %v9866_v35 = vmax.f32 %v9802_v22, %v9810_v15 }
0x1368   :  { %v9389_v27 = vpop.f32.mrf.mxu2 }
0x1369   :  { %v20299_v60 = vadd.f32 %v9389_v27, %v22337_v40  ;;  %v9518_v49 = vpop.f32.mrf.mxu3  ;;  %v22338_v40 = vld [vmem:[#allocation150_spill] sm:$0xff] }
0x136a   :  { %v20302_v37 = vadd.f32 %v9518_v49, %v20113_v48  ;;  %v9664_v29 = vpop.f32.mrf.mxu1 }
0x136b   :  { %v9665_v53 = vadd.f32 %v9664_v29, %v20191_v41  ;;  %v20317_v41 = vsel %vm6119_vm3, %v22338_v40, %v6640_v25 }
0x136d   :  { %v9811_v63 = vmax.f32 %v9665_v53, 0.0 }
0x136f   :  { %v9867_v24 = vmax.f32 %v9803_v2, %v9811_v63  ;;  %v9805_v2 = vmax.f32 %v20229_v44, 0.0  ;;  %v9806_v44 = vmax.f32 %v20238_v46, 0.0 }
0x1370   :  { %v9391_v20 = vpop.f32.mrf.mxu2 }
0x1371   :  { %v20306_v43 = vmax.f32 %v9866_v35, %v9867_v24  ;;  %v20309_v31 = vadd.f32 %v9391_v20, %v19880_v13  ;;  %v9520_v22 = vpop.f32.mrf.mxu3  ;;  %v22339_v35 = vld [vmem:[#allocation10_spill] sm:$0xff] }
0x1372   :  { %v20312_v15 = vadd.f32 %v9520_v22, %v20122_v56  ;;  %v9667_v48 = vpop.f32.mrf.mxu1  ;;  %v6642_v22 = vpop.permute.xlu2 %6641 }
0x1373   :  { %v9668_v27 = vadd.f32 %v9667_v48, %v20204_v23 }
0x1375   :  { %v9812_v49 = vmax.f32 %v9668_v27, 0.0  ;;  %9433 = vmatmul.bf16.gmra.mxu2 %v20317_v41  ;;  %12655 = vmatmul.msk.bf16.gmra.mxu1 %vm6119_vm3, %v22339_v35  ;;  %v22340_v35 = vld [vmem:[#allocation154_spill] sm:$0xff] }
0x1376   :  { %9562 = vmatmul.bf16.gmra.mxu3 %v22317_v26 }
0x1377   :  { %v9868_v13 = vmax.f32 %v9804_v0, %v9812_v49 }
0x1378   :  { %v9394_v56 = vpop.f32.mrf.mxu2 }
0x1379   :  { %v20325_v20 = vadd.f32 %v9394_v56, %v19889_v8  ;;  %v9523_v23 = vpop.f32.mrf.mxu3 }
0x137a   :  { %v20328_v29 = vadd.f32 %v9523_v23, %v20135_v1  ;;  %v9669_v53 = vpop.f32.mrf.mxu1  ;;  %v22342_v23 = vld [vmem:[#allocation192_spill] sm:$0xff] }
0x137b   :  { %v9670_v32 = vadd.f32 %v9669_v53, %v20213_v47  ;;  %v20341_v47 = vsel %vm6119_vm3, %v22340_v35, %v6642_v22 }
0x137d   :  { %v9813_v63 = vmax.f32 %v9670_v32, 0.0 }
0x137f   :  { %v9869_v24 = vmax.f32 %v9805_v2, %v9813_v63 }
0x1380   :  { %v9396_v25 = vpop.f32.mrf.mxu2 }
0x1381   :  { %v20333_v26 = vadd.f32 %v9396_v25, %v19902_v38  ;;  %v9525_v48 = vpop.f32.mrf.mxu3  ;;  %v9899_v27 = vmax.f32 %v9868_v13, %v9869_v24  ;;  %v22341_v38 = vld [vmem:[#allocation14_spill] sm:$0xff]  ;;  %v9807_v25 = vmax.f32 %v20251_v61, 0.0 }
0x1382   :  { %v20336_v8 = vadd.f32 %v9525_v48, %v20144_v21  ;;  %v9672_v0 = vpop.f32.mrf.mxu1  ;;  %v13390_v48 = vld [vmem:[%s21050_s3 + $0x30] sm:$0xff] }
0x1383   :  { %v9673_v1 = vadd.f32 %v9672_v0, %v20226_v59  ;;  %v9915_v49 = vpack.c.bf16 %v9899_v27, %v9899_v27  ;;  %10516 = vmatpush.bf16.msrb.mxu2 %v13390_v48 }
0x1385   :  { %v9814_v56 = vmax.f32 %v9673_v1, 0.0  ;;  %9438 = vmatmul.bf16.gmra.mxu2 %v20341_v47  ;;  %12656 = vmatmul.msk.bf16.gmra.mxu1 %vm6119_vm3, %v22341_v38  ;;  %v9931_v13 = vunpack.c.l.b16 %v9915_v49  ;;  %v22343_v38 = vld [vmem:[#allocation39_spill] sm:$0xff] }
0x1386   :  { %9567 = vmatmul.bf16.gmra.mxu3 %v22342_v23 }
0x1387   :  { %v9870_v21 = vmax.f32 %v9806_v44, %v9814_v56  ;;  %v9932_v53 = vpack.c.b16 %v9931_v13, %v9931_v13  ;;  %v22344_v13 = vld [vmem:[#allocation9_spill] sm:$0xff] }
0x1388   :  { %v9399_v32 = vpop.f32.mrf.mxu2  ;;  %v22345_v23 = vpack.c.b16 %v22343_v38, %v22344_v13  ;;  %v22348_v38 = vld [vmem:[#allocation33_spill] sm:$0xff]  ;;  %v22350_v13 = vld [vmem:[#allocation167_spill] sm:$0xff] }
0x1389   :  { %v20349_v59 = vadd.f32 %v9399_v32, %v19911_v17  ;;  %v9528_v2 = vpop.f32.mrf.mxu3  ;;  %9933 = vrot.lane.b32.xlu0 %v9932_v53, %s13490_s1  ;;  %v13398_v17 = vld [vmem:[%s21050_s3 + $0x70] sm:$0xff]  ;;  %v9808_v32 = vmax.f32 %v20266_v14, 0.0  ;;  %v9809_v14 = vmax.f32 %v20280_v12, 0.0 }
0x138a   :  { %v20353_v46 = vadd.f32 %v9528_v2, %v20157_v55  ;;  %v9674_v63 = vpop.f32.mrf.mxu1  ;;  %10529 = vmatpush.bf16.msrb.mxu3 %v13398_v17  ;;  %v6644_v55 = vpop.permute.xlu1 %6643 }
0x138b   :  { %v9675_v24 = vadd.f32 %v9674_v63, %v20235_v11  ;;  %v6716_v53 = vsel %vm6119_vm3, %v22345_v23, %v6644_v55 }
0x138d   :  { %v9815_v22 = vmax.f32 %v9675_v24, 0.0 }
0x138f   :  { %v9871_v27 = vmax.f32 %v9807_v25, %v9815_v22 }
0x1390   :  { %v9401_v0 = vpop.f32.mrf.mxu2 }
0x1391   :  { %v20363_v1 = vmax.f32 %v9870_v21, %v9871_v27  ;;  %v20366_v11 = vadd.f32 %v9401_v0, %v19925_v52  ;;  %v9530_v61 = vpop.f32.mrf.mxu3  ;;  %v22346_v21 = vld [vmem:[#allocation24_spill] sm:$0xff]  ;;  %v6646_v0 = vpop.permute.xlu2 %6645 }
0x1392   :  { %v20369_v49 = vadd.f32 %v9530_v61, %v20166_v33  ;;  %v9677_v44 = vpop.f32.mrf.mxu1 }
0x1393   :  { %v9678_v56 = vadd.f32 %v9677_v44, %v20248_v45 }
0x1395   :  { %v9816_v2 = vmax.f32 %v9678_v56, 0.0  ;;  %9443 = vmatmul.bf16.gmra.mxu2 %v6716_v53  ;;  %12657 = vmatmul.msk.bf16.gmra.mxu1 %vm6119_vm3, %v22346_v21  ;;  %v22347_v56 = vld [vmem:[#allocation13_spill] sm:$0xff] }
0x1396   :  { %9572 = vmatmul.bf16.gmra.mxu3 %v22325_v6 }
0x1397   :  { %v9872_v52 = vmax.f32 %v9808_v32, %v9816_v2 }
0x1398   :  { %v9404_v33 = vpop.f32.mrf.mxu2 }
0x1399   :  { %v20381_v63 = vadd.f32 %v9404_v33, %v19934_v18  ;;  %v9533_v45 = vpop.f32.mrf.mxu3 }
0x139a   :  { %v20384_v24 = vadd.f32 %v9533_v45, %v20179_v51  ;;  %v9679_v25 = vpop.f32.mrf.mxu1 }
0x139b   :  { %v9680_v22 = vadd.f32 %v9679_v25, %v20263_v57  ;;  %v22349_v57 = vpack.c.b16 %v22347_v56, %v22348_v38 }
0x139d   :  { %v9817_v48 = vmax.f32 %v9680_v22, 0.0  ;;  %v20400_v12 = vsel %vm6119_vm3, %v22349_v57, %v6646_v0 }
0x139f   :  { %v9873_v17 = vmax.f32 %v9809_v14, %v9817_v48  ;;  %v22351_v48 = vld [vmem:[#allocation26_spill] sm:$0xff] }
0x13a0   :  { %v20388_v27 = vpop.f32.mrf.mxu2 }
0x13a1   :  { %v9535_v6 = vpop.f32.mrf.mxu3  ;;  %v9901_v55 = vmax.f32 %v9872_v52, %v9873_v17 }
0x13a2   :  { %v20391_v61 = vadd.f32 %v9535_v6, %v20188_v50  ;;  %v9682_v18 = vpop.f32.mrf.mxu1  ;;  %v20406_v50 = vpop.permute.xlu0 %6657 }
0x13a3   :  { %v20394_v44 = vadd.f32 %v9682_v18, %v20277_v34  ;;  %v9917_v51 = vpack.c.bf16 %v9901_v55, %v9901_v55 }
0x13a5   :  { %9448 = vmatmul.bf16.gmra.mxu2 %v20400_v12  ;;  %12658 = vmatmul.msk.bf16.gmra.mxu1 %vm6119_vm3, %v22350_v13  ;;  %v9936_v23 = vunpack.c.l.b16 %v9917_v51  ;;  %v6650_v51 = vpop.permute.xlu1 %6649 }
0x13a6   :  { %9577 = vmatmul.bf16.gmra.mxu3 %v22327_v39 }
0x13a7   :  { %v9937_v53 = vpack.c.b16 %v9936_v23, %v9936_v23  ;;  %v22355_v23 = vld [vmem:[#allocation156_spill] sm:$0xff] }
0x13a8   :  { %v9409_v34 = vpop.f32.mrf.mxu2 }
0x13a9   :  { %v20409_v32 = vadd.f32 %v9409_v34, %v19955_v16  ;;  %v9538_v2 = vpop.f32.mrf.mxu3  ;;  %9938 = vrot.lane.b32.xlu1 %v9937_v53, %s13490_s1  ;;  %v22356_v53 = vld [vmem:[#allocation85_spill] sm:$0xff] }
0x13aa   :  { %v20413_v21 = vadd.f32 %v9538_v2, %v20201_v28  ;;  %v9684_v52 = vpop.f32.mrf.mxu1  ;;  %v6648_v39 = vpop.permute.xlu0 %6647  ;;  %v22352_v28 = vld [vmem:[#allocation143_spill] sm:$0xff]  ;;  %v13388_v2 = vld [vmem:[%s21050_s3 + $0x20] sm:$0xff] }
0x13ab   :  { %v20416_v33 = vadd.f32 %v9684_v52, %v20286_v5  ;;  %v20428_v17 = vsel %vm6119_vm3, %v22351_v48, %v6648_v39 }
0x13b0   :  { %v20418_v45 = vpop.f32.mrf.mxu2 }
0x13b1   :  { %v9540_v25 = vpop.f32.mrf.mxu3 }
0x13b2   :  { %v20421_v22 = vadd.f32 %v9540_v25, %v20210_v42  ;;  %v9687_v14 = vpop.f32.mrf.mxu1 }
0x13b3   :  { %v20424_v16 = vadd.f32 %v9687_v14, %v20302_v37  ;;  %v13387_v14 = vld [vmem:[%s21050_s3 + $0x18] sm:$0xff] }
0x13b5   :  { %9453 = vmatmul.bf16.gmra.mxu2 %v20428_v17  ;;  %12659 = vmatmul.msk.bf16.gmra.mxu1 %vm6119_vm3, %v22352_v28 }
0x13b6   :  { %9582 = vmatmul.bf16.gmra.mxu3 %v22330_v58 }
0x13b8   :  { %v9414_v5 = vpop.f32.mrf.mxu2 }
0x13b9   :  { %v20435_v0 = vadd.f32 %v9414_v5, %v19976_v36  ;;  %v9543_v42 = vpop.f32.mrf.mxu3  ;;  %v22353_v36 = vld [vmem:[#allocation95_spill] sm:$0xff] }
0x13ba   :  { %v20438_v6 = vadd.f32 %v9543_v42, %v20223_v10  ;;  %v9689_v37 = vpop.f32.mrf.mxu1  ;;  %v20453_v13 = vsel %vm6119_vm3, %v22353_v36, %v6650_v51  ;;  %v22354_v10 = vld [vmem:[#allocation148_spill] sm:$0xff]  ;;  %v13397_v42 = vld [vmem:[%s21050_s3 + $0x68] sm:$0xff] }
0x13bb   :  { %v20441_v55 = vadd.f32 %v9689_v37, %v20312_v15  ;;  %v13389_v15 = vld [vmem:[%s21050_s3 + $0x28] sm:$0xff]  ;;  %10530 = vmatpush.bf16.msrb.mxu3 %v13397_v42  ;;  %v9818_v42 = vmax.f32 %v20394_v44, 0.0  ;;  %v9819_v44 = vmax.f32 %v20416_v33, 0.0 }
0x13bc   :  { %10517 = vmatpush.bf16.msrb.mxu2 %v13389_v15  ;;  %v22358_v15 = vld [vmem:[#allocation188_spill] sm:$0xff] }
0x13c0   :  { %v20443_v18 = vpop.f32.mrf.mxu2  ;;  %10518 = vmatpush.bf16.msrb.mxu2 %v13388_v2 }
0x13c1   :  { %v9545_v56 = vpop.f32.mrf.mxu3 }
0x13c2   :  { %v20446_v38 = vadd.f32 %v9545_v56, %v20232_v3  ;;  %v9692_v58 = vpop.f32.mrf.mxu1  ;;  %v22357_v56 = vld [vmem:[#allocation153_spill] sm:$0xff] }
0x13c3   :  { %v20449_v57 = vadd.f32 %v9692_v58, %v20328_v29  ;;  %v13385_v58 = vld [vmem:[%s21050_s3 + $0x8] sm:$0xff] }
0x13c4   :  { %10519 = vmatpush.bf16.msrb.mxu2 %v13387_v14 }
0x13c5   :  { %9458 = vmatmul.bf16.gmra.mxu2 %v20453_v13  ;;  %12660 = vmatmul.msk.bf16.gmra.mxu1 %vm6119_vm3, %v22354_v10 }
0x13c6   :  { %9587 = vmatmul.bf16.gmra.mxu3 %v22355_v23 }
0x13c8   :  { %v9419_v3 = vpop.f32.mrf.mxu2 }
0x13c9   :  { %v20463_v29 = vadd.f32 %v9419_v3, %v22356_v53  ;;  %v9548_v34 = vpop.f32.mrf.mxu3 }
0x13ca   :  { %v20469_v52 = vadd.f32 %v9548_v34, %v20245_v54  ;;  %v9694_v39 = vpop.f32.mrf.mxu1  ;;  %v13386_v54 = vld [vmem:[%s21050_s3 + $0x10] sm:$0xff] }
0x13cb   :  { %v20472_v25 = vadd.f32 %v9694_v39, %v20336_v8  ;;  %10520 = vmatpush.bf16.msrb.mxu2 %v13386_v54 }
0x13cf   :  { %10521 = vmatpush.bf16.msrb.mxu2 %v13385_v58 }
0x13d0   :  { %v20477_v28 = vpop.f32.mrf.mxu2 }
0x13d1   :  { %v9550_v5 = vpop.f32.mrf.mxu3 }
0x13d2   :  { %v20486_v8 = vadd.f32 %v9550_v5, %v20254_v62  ;;  %v9697_v37 = vpop.f32.mrf.mxu1 }
0x13d3   :  { %v20489_v51 = vadd.f32 %v9697_v37, %v20353_v46  ;;  %v13384_v46 = vld [vmem:[%s21050_s3] sm:$0xff]  ;;  %v22359_v37 = vld [vmem:[#allocation32_spill] sm:$0xff] }
0x13d4   :  { %10522 = vmatpush.bf16.msrb.mxu2 %v13384_v46 }
0x13d5   :  { %12661 = vmatmul.msk.bf16.gmra.mxu1 %vm6119_vm3, %v22357_v56  ;;  %v22360_v56 = vld [vmem:[#allocation83_spill] sm:$0xff] }
0x13d6   :  { %9592 = vmatmul.bf16.gmra.mxu3 %v20291_v9 }
0x13d8   :  { %v9424_v10 = vpop.f32.mrf.mxu2 }
0x13d9   :  { %v20498_v62 = vadd.f32 %v9424_v10, %v22358_v15  ;;  %v9553_v23 = vpop.f32.mrf.mxu3 }
0x13da   :  { %v20504_v3 = vadd.f32 %v9553_v23, %v20274_v4  ;;  %v9699_v53 = vpop.f32.mrf.mxu1 }
0x13db   :  { %v20507_v34 = vadd.f32 %v9699_v53, %v20369_v49 }
0x13e0   :  { %v20509_v2 = vpop.f32.mrf.mxu2 }
0x13e1   :  { %v9555_v9 = vpop.f32.mrf.mxu3 }
0x13e2   :  { %v20512_v39 = vadd.f32 %v9555_v9, %v20283_v19  ;;  %v9702_v14 = vpop.f32.mrf.mxu1 }
0x13e3   :  { %v9703_v5 = vadd.f32 %v9702_v14, %v20384_v24 }
0x13e5   :  { %v9826_v54 = vmax.f32 %v9703_v5, 0.0  ;;  %12662 = vmatmul.msk.bf16.gmra.mxu1 %vm6119_vm3, %v22359_v37  ;;  %v9820_v37 = vmax.f32 %v20424_v16, 0.0 }
0x13e6   :  { %9597 = vmatmul.bf16.gmra.mxu3 %v20317_v41  ;;  %v22361_v41 = vld [vmem:[#allocation189_spill] sm:$0xff] }
0x13e7   :  { %v9874_v4 = vmax.f32 %v9818_v42, %v9826_v54 }
0x13e8   :  { %v9429_v49 = vpop.f32.mrf.mxu2 }
0x13e9   :  { %v20520_v58 = vadd.f32 %v9429_v49, %v22360_v56  ;;  %v9558_v10 = vpop.f32.mrf.mxu3  ;;  %v22362_v49 = vld [vmem:[#allocation62_spill] sm:$0xff]  ;;  %v22363_v56 = vld [vmem:[#allocation12_spill] sm:$0xff] }
0x13ea   :  { %v20523_v19 = vadd.f32 %v9558_v10, %v20299_v60  ;;  %v9704_v15 = vpop.f32.mrf.mxu1 }
0x13eb   :  { %v9705_v24 = vadd.f32 %v9704_v15, %v20391_v61 }
0x13ed   :  { %v9827_v23 = vmax.f32 %v9705_v24, 0.0 }
0x13ef   :  { %v9875_v46 = vmax.f32 %v9819_v44, %v9827_v23 }
0x13f0   :  { %v9431_v53 = vpop.f32.mrf.mxu2 }
0x13f1   :  { %v20527_v9 = vmax.f32 %v9874_v4, %v9875_v46  ;;  %v20530_v14 = vadd.f32 %v9431_v53, %v22361_v41  ;;  %v9560_v5 = vpop.f32.mrf.mxu3 }
0x13f2   :  { %v20533_v42 = vadd.f32 %v9560_v5, %v20309_v31  ;;  %v9707_v54 = vpop.f32.mrf.mxu1 }
0x13f3   :  { %v9708_v60 = vadd.f32 %v9707_v54, %v20413_v21  ;;  %v9914_v21 = vpack.c.bf16 %v20306_v43, %v20306_v43 }
0x13f5   :  { %v9828_v61 = vmax.f32 %v9708_v60, 0.0  ;;  %12663 = vmatmul.msk.bf16.gmra.mxu1 %vm6119_vm3, %v22362_v49 }
0x13f6   :  { %9602 = vmatmul.bf16.gmra.mxu3 %v20341_v47  ;;  %v9821_v47 = vmax.f32 %v20441_v55, 0.0  ;;  %v22364_v55 = vld [vmem:[#allocation158_spill] sm:$0xff] }
0x13f7   :  { %v9876_v33 = vmax.f32 %v9820_v37, %v9828_v61  ;;  %v9822_v61 = vmax.f32 %v20449_v57, 0.0 }
0x13f8   :  { %v9434_v4 = vpop.f32.mrf.mxu2 }
0x13f9   :  { %v20541_v10 = vadd.f32 %v9434_v4, %v22363_v56  ;;  %v9563_v15 = vpop.f32.mrf.mxu3  ;;  %v6732_v4 = vsel %vm6119_vm3, %v22364_v55, %v20406_v50  ;;  %v22365_v56 = vld [vmem:[#allocation15_spill] sm:$0xff] }
0x13fa   :  { %v20544_v31 = vadd.f32 %v9563_v15, %v20325_v20  ;;  %v9709_v24 = vpop.f32.mrf.mxu1 }
0x13fb   :  { %v9710_v16 = vadd.f32 %v9709_v24, %v20421_v22  ;;  %v9934_v44 = vpop.permute.xlu0 %9933 }
0x13fc   :  { %v9972_v23 = vsel %vm6119_vm3, %v9914_v21, %v9934_v44 }
0x13fd   :  { %v9829_v46 = vmax.f32 %v9710_v16, 0.0  ;;  %10523 = vmatmul.bf16.vlgmr.msrb.gmra.mxu2 %v9972_v23  ;;  %v9823_v16 = vmax.f32 %v20472_v25, 0.0  ;;  %v13396_v23 = vld [vmem:[%s21050_s3 + $0x60] sm:$0xff] }
0x13fe   :  { %10531 = vmatpush.bf16.msrb.mxu3 %v13396_v23 }
0x13ff   :  { %v9877_v53 = vmax.f32 %v9821_v47, %v9829_v46 }
0x1400   :  { %v9436_v41 = vpop.f32.mrf.mxu2 }
0x1401   :  { %v20552_v5 = vadd.f32 %v9436_v41, %v20075_v7  ;;  %v9565_v20 = vpop.f32.mrf.mxu3  ;;  %v9903_v54 = vmax.f32 %v9876_v33, %v9877_v53  ;;  %v22366_v53 = vld [vmem:[#allocation48_spill] sm:$0xff] }
0x1402   :  { %v20555_v60 = vadd.f32 %v9565_v20, %v20333_v26  ;;  %v9712_v43 = vpop.f32.mrf.mxu1 }
0x1403   :  { %v9713_v22 = vadd.f32 %v9712_v43, %v20438_v6  ;;  %v9919_v37 = vpack.c.bf16 %v9903_v54, %v9903_v54  ;;  %v9824_v54 = vmax.f32 %v20489_v51, 0.0  ;;  %v9825_v51 = vmax.f32 %v20507_v34, 0.0 }
0x1405   :  { %v9830_v49 = vmax.f32 %v9713_v22, 0.0  ;;  %12664 = vmatmul.msk.bf16.gmra.mxu1 %vm6119_vm3, %v22365_v56  ;;  %v9941_v7 = vunpack.c.l.b16 %v9919_v37  ;;  %v22367_v22 = vld [vmem:[#allocation16_spill] sm:$0xff] }
0x1406   :  { %9607 = vmatmul.bf16.gmra.mxu3 %v6732_v4 }
0x1407   :  { %v9878_v33 = vmax.f32 %v9822_v61, %v9830_v49  ;;  %v9942_v15 = vpack.c.b16 %v9941_v7, %v9941_v7  ;;  %v22368_v49 = vld [vmem:[#allocation91_spill] sm:$0xff] }
0x1408   :  { %v9439_v26 = vpop.f32.mrf.mxu2 }
0x1409   :  { %v20565_v24 = vadd.f32 %v9439_v26, %v20084_v30  ;;  %v9568_v6 = vpop.f32.mrf.mxu3  ;;  %9943 = vrot.lane.b32.xlu2 %v9942_v15, %s13490_s1  ;;  %v22369_v26 = vld [vmem:[#allocation185_spill] sm:$0xff] }
0x140a   :  { %v20569_v57 = vadd.f32 %v9568_v6, %v20349_v59  ;;  %v9714_v21 = vpop.f32.mrf.mxu1  ;;  %v9407_v6 = vadd.f32 %v20388_v27, %v22369_v26  ;;  %v13395_v27 = vld [vmem:[%s21050_s3 + $0x58] sm:$0xff] }
0x140b   :  { %v9715_v50 = vadd.f32 %v9714_v21, %v20446_v38  ;;  %v22370_v21 = vld [vmem:[#allocation69_spill] sm:$0xff]  ;;  %10532 = vmatpush.bf16.msrb.mxu3 %v13395_v27 }
0x140d   :  { %v9831_v44 = vmax.f32 %v9715_v50, 0.0 }
0x140f   :  { %v9879_v47 = vmax.f32 %v9823_v16, %v9831_v44 }
0x1410   :  { %v9441_v30 = vpop.f32.mrf.mxu2 }
0x1411   :  { %v20576_v46 = vmax.f32 %v9878_v33, %v9879_v47  ;;  %v20579_v41 = vadd.f32 %v9441_v30, %v22366_v53  ;;  %v9570_v59 = vpop.f32.mrf.mxu3  ;;  %v13407_v30 = vld [vmem:[%s21050_s3 + $0xb8] sm:$0xff] }
0x1412   :  { %v20582_v20 = vadd.f32 %v9570_v59, %v20366_v11  ;;  %v9717_v38 = vpop.f32.mrf.mxu1  ;;  %10541 = vmatpush.bf16.msra.mxu2 %v13407_v30  ;;  %v22371_v59 = vld [vmem:[#allocation49_spill] sm:$0xff]  ;;  %v6660_v30 = vpop.permute.xlu2 %6659 }
0x1413   :  { %v9718_v25 = vadd.f32 %v9717_v38, %v20469_v52 }
0x1415   :  { %v9832_v43 = vmax.f32 %v9718_v25, 0.0  ;;  %12665 = vmatmul.msk.bf16.gmra.mxu1 %vm6119_vm3, %v22367_v22 }
0x1416   :  { %9612 = vmatmul.bf16.gmra.mxu3 %v20400_v12 }
0x1417   :  { %v9880_v37 = vmax.f32 %v9824_v54, %v9832_v43  ;;  %v13406_v54 = vld [vmem:[%s21050_s3 + $0xb0] sm:$0xff] }
0x1418   :  { %v9444_v61 = vpop.f32.mrf.mxu2  ;;  %10542 = vmatpush.bf16.msra.mxu2 %v13406_v54 }
0x1419   :  { %v20590_v4 = vadd.f32 %v9444_v61, %v22368_v49  ;;  %v9573_v56 = vpop.f32.mrf.mxu3  ;;  %v13405_v61 = vld [vmem:[%s21050_s3 + $0xa8] sm:$0xff] }
0x141a   :  { %v20593_v11 = vadd.f32 %v9573_v56, %v20381_v63  ;;  %v9719_v7 = vpop.f32.mrf.mxu1  ;;  %v22372_v56 = vld [vmem:[#allocation117_spill] sm:$0xff] }
0x141b   :  { %v9720_v52 = vadd.f32 %v9719_v7, %v20486_v8 }
0x141c   :  { %10543 = vmatpush.bf16.msra.mxu2 %v13405_v61 }
0x141d   :  { %v9833_v33 = vmax.f32 %v9720_v52, 0.0  ;;  %v13404_v52 = vld [vmem:[%s21050_s3 + $0xa0] sm:$0xff] }
0x141f   :  { %v9881_v15 = vmax.f32 %v9825_v51, %v9833_v33 }
0x1420   :  { %v9446_v12 = vpop.f32.mrf.mxu2  ;;  %10544 = vmatpush.bf16.msra.mxu2 %v13404_v52 }
0x1421   :  { %v20600_v50 = vadd.f32 %v9446_v12, %v22370_v21  ;;  %v9575_v16 = vpop.f32.mrf.mxu3  ;;  %v9905_v44 = vmax.f32 %v9880_v37, %v9881_v15  ;;  %v13393_v37 = vld [vmem:[%s21050_s3 + $0x48] sm:$0xff]  ;;  %v13403_v15 = vld [vmem:[%s21050_s3 + $0x98] sm:$0xff] }
0x1422   :  { %v20602_v23 = vadd.f32 %v9575_v16, %v9407_v6  ;;  %v9722_v63 = vpop.f32.mrf.mxu1  ;;  %v22373_v6 = vld [vmem:[#allocation78_spill] sm:$0xff] }
0x1423   :  { %v20605_v47 = vadd.f32 %v9722_v63, %v20504_v3  ;;  %v9921_v8 = vpack.c.bf16 %v9905_v44, %v9905_v44 }
0x1424   :  { %10545 = vmatpush.bf16.msra.mxu2 %v13403_v15  ;;  %v9916_v15 = vpack.c.bf16 %v20363_v1, %v20363_v1  ;;  %v13415_v1 = vld [vmem:[%s21050_s3 + $0xf8] sm:$0xff] }
0x1425   :  { %12666 = vmatmul.msk.bf16.gmra.mxu1 %vm6119_vm3, %v22338_v40  ;;  %v9946_v34 = vunpack.c.l.b16 %v9921_v8  ;;  %v13394_v40 = vld [vmem:[%s21050_s3 + $0x50] sm:$0xff]  ;;  %v22374_v8 = vld [vmem:[#allocation105_spill] sm:$0xff] }
0x1426   :  { %9617 = vmatmul.bf16.gmra.mxu3 %v20428_v17 }
0x1427   :  { %v9947_v53 = vpack.c.b16 %v9946_v34, %v9946_v34  ;;  %10533 = vmatpush.bf16.msrb.mxu3 %v13394_v40  ;;  %v22376_v40 = vld [vmem:[#allocation50_spill] sm:$0xff] }
0x1428   :  { %v9449_v3 = vpop.f32.mrf.mxu2 }
0x1429   :  { %v20617_v38 = vadd.f32 %v9449_v3, %v22371_v59  ;;  %v9578_v25 = vpop.f32.mrf.mxu3  ;;  %9948 = vrot.lane.b32.xlu0 %v9947_v53, %s13490_s1  ;;  %v22375_v3 = vld [vmem:[#allocation19_spill] sm:$0xff] }
0x142a   :  { %v20627_v17 = vadd.f32 %v9578_v25, %v20409_v32  ;;  %v9724_v43 = vpop.f32.mrf.mxu1  ;;  %v6736_v59 = vsel %vm6119_vm3, %v22375_v3, %v6660_v30  ;;  %v9834_v30 = vmax.f32 %v20605_v47, 0.0 }
0x142b   :  { %v20630_v22 = vadd.f32 %v9724_v43, %v20512_v39  ;;  %10534 = vmatpush.bf16.msrb.mxu3 %v13393_v37  ;;  %v13392_v39 = vld [vmem:[%s21050_s3 + $0x40] sm:$0xff] }
0x142f   :  { %10535 = vmatpush.bf16.msrb.mxu3 %v13392_v39 }
0x1430   :  { %v9451_v49 = vpop.f32.mrf.mxu2 }
0x1431   :  { %v20639_v32 = vadd.f32 %v9451_v49, %v22372_v56  ;;  %v20641_v7 = vpop.f32.mrf.mxu3  ;;  %v22377_v56 = vld [vmem:[#allocation127_spill] sm:$0xff] }
0x1432   :  { %v9727_v51 = vpop.f32.mrf.mxu1 }
0x1433   :  { %v20650_v33 = vadd.f32 %v9727_v51, %v20523_v19  ;;  %v13402_v19 = vld [vmem:[%s21050_s3 + $0x90] sm:$0xff]  ;;  %10554 = vmatpush.bf16.msra.mxu3 %v13415_v1 }
0x1434   :  { %10546 = vmatpush.bf16.msra.mxu2 %v13402_v19 }
0x1435   :  { %12667 = vmatmul.msk.bf16.gmra.mxu1 %vm6119_vm3, %v22340_v35 }
0x1436   :  { %9622 = vmatmul.bf16.gmra.mxu3 %v20453_v13  ;;  %v13401_v13 = vld [vmem:[%s21050_s3 + $0x88] sm:$0xff] }
0x1438   :  { %v9454_v26 = vpop.f32.mrf.mxu2  ;;  %10547 = vmatpush.bf16.msra.mxu2 %v13401_v13  ;;  %v13414_v13 = vld [vmem:[%s21050_s3 + $0xf0] sm:$0xff] }
0x1439   :  { %v20659_v12 = vadd.f32 %v9454_v26, %v22373_v6  ;;  %v9583_v21 = vpop.f32.mrf.mxu3  ;;  %v22378_v6 = vld [vmem:[#allocation163_spill] sm:$0xff]  ;;  %10555 = vmatpush.bf16.msra.mxu3 %v13414_v13 }
0x143a   :  { %v20665_v16 = vadd.f32 %v9583_v21, %v20435_v0  ;;  %v9729_v35 = vpop.f32.mrf.mxu1  ;;  %v13400_v0 = vld [vmem:[%s21050_s3 + $0x80] sm:$0xff] }
0x143b   :  { %v20668_v44 = vadd.f32 %v9729_v35, %v20533_v42 }
0x143c   :  { %10548 = vmatpush.bf16.msra.mxu2 %v13400_v0 }
0x1440   :  { %v9456_v63 = vpop.f32.mrf.mxu2 }
0x1441   :  { %v20674_v34 = vadd.f32 %v9456_v63, %v22374_v8  ;;  %v20676_v27 = vpop.f32.mrf.mxu3 }
0x1442   :  { %v9732_v53 = vpop.f32.mrf.mxu1 }
0x1443   :  { %v20682_v42 = vadd.f32 %v9732_v53, %v20544_v31 }
0x1445   :  { %12668 = vmatmul.msk.bf16.gmra.mxu1 %vm6119_vm3, %v22364_v55  ;;  %v9939_v55 = vpop.permute.xlu1 %9938 }
0x1446   :  { %9627 = vmatmul.bf16.gmra.mxu3 %v6736_v59  ;;  %v13413_v59 = vld [vmem:[%s21050_s3 + $0xe8] sm:$0xff] }
0x1447   :  { %10556 = vmatpush.bf16.msra.mxu3 %v13413_v59 }
0x1448   :  { %v9459_v25 = vpop.f32.mrf.mxu2 }
0x1449   :  { %v20689_v54 = vadd.f32 %v9459_v25, %v22376_v40  ;;  %v9588_v43 = vpop.f32.mrf.mxu3 }
0x144a   :  { %v20692_v37 = vadd.f32 %v9588_v43, %v20463_v29  ;;  %v9734_v61 = vpop.f32.mrf.mxu1  ;;  %v9976_v29 = vsel %vm6119_vm3, %v9916_v15, %v9939_v55 }
0x144b   :  { %v20695_v31 = vadd.f32 %v9734_v61, %v20555_v60 }
0x1450   :  { %v9461_v49 = vpop.f32.mrf.mxu2 }
0x1451   :  { %v20698_v39 = vadd.f32 %v9461_v49, %v22377_v56  ;;  %v20700_v52 = vpop.f32.mrf.mxu3  ;;  %v13411_v49 = vld [vmem:[%s21050_s3 + $0xd8] sm:$0xff] }
0x1452   :  { %v9737_v51 = vpop.f32.mrf.mxu1 }
0x1453   :  { %v20705_v26 = vadd.f32 %v9737_v51, %v20569_v57 }
0x1455   :  { %12669 = vmatmul.msk.bf16.gmra.mxu1 %vm6119_vm3, %v22378_v6 }
0x1456   :  { %10536 = vmatmul.bf16.vlgmr.msrb.gmra.mxu3 %v9976_v29  ;;  %v9836_v29 = vmax.f32 %v20650_v33, 0.0 }
0x1459   :  { %v9593_v60 = vpop.f32.mrf.mxu3 }
0x145a   :  { %v20711_v21 = vadd.f32 %v9593_v60, %v20498_v62  ;;  %v9739_v19 = vpop.f32.mrf.mxu1  ;;  %v9918_v62 = vpack.c.bf16 %v20527_v9, %v20527_v9  ;;  %v13409_v60 = vld [vmem:[%s21050_s3 + $0xc8] sm:$0xff] }
0x145b   :  { %v20714_v35 = vadd.f32 %v9739_v19, %v20582_v20  ;;  %v22379_v19 = vld [vmem:[#allocation57_spill] sm:$0xff] }
0x145c   :  { %v9412_v1 = vadd.f32 %v20418_v45, %v22379_v19 }
0x1461   :  { %v20719_v57 = vpop.f32.mrf.mxu3 }
0x1462   :  { %v9742_v63 = vpop.f32.mrf.mxu1 }
0x1463   :  { %v9743_v8 = vadd.f32 %v9742_v63, %v20593_v11  ;;  %v9944_v0 = vpop.permute.xlu2 %9943  ;;  %v13412_v11 = vld [vmem:[%s21050_s3 + $0xe0] sm:$0xff] }
0x1464   :  { %v9980_v20 = vsel %vm6119_vm3, %v9918_v62, %v9944_v0  ;;  %10557 = vmatpush.bf16.msra.mxu3 %v13412_v11 }
0x1465   :  { %v9842_v53 = vmax.f32 %v9743_v8, 0.0  ;;  %12670 = vmatmul.msk.bf16.gmra.mxu1 %vm6119_vm3, %v22351_v48  ;;  %10549 = vmatmul.bf16.vlgmr.msra.gmra.mxu2 %v9980_v20  ;;  %v9835_v48 = vmax.f32 %v20630_v22, 0.0  ;;  %v9837_v8 = vmax.f32 %v20668_v44, 0.0 }
0x1467   :  { %v9882_v25 = vmax.f32 %v9834_v30, %v9842_v53 }
0x1468   :  { %10558 = vmatpush.bf16.msra.mxu3 %v13411_v49 }
0x1469   :  { %v9598_v9 = vpop.f32.mrf.mxu3 }
0x146a   :  { %v20738_v40 = vadd.f32 %v9598_v9, %v20520_v58  ;;  %v9744_v47 = vpop.f32.mrf.mxu1  ;;  %v13410_v58 = vld [vmem:[%s21050_s3 + $0xd0] sm:$0xff] }
0x146b   :  { %v9745_v43 = vadd.f32 %v9744_v47, %v20602_v23  ;;  %v22380_v47 = vld [vmem:[#allocation187_spill] sm:$0xff] }
0x146c   :  { %10559 = vmatpush.bf16.msra.mxu3 %v13410_v58  ;;  %v9839_v58 = vmax.f32 %v20695_v31, 0.0  ;;  %v22384_v31 = vld [vmem:[#allocation3_spill] sm:$0xff] }
0x146d   :  { %v9843_v61 = vmax.f32 %v9745_v43, 0.0  ;;  %v9417_v43 = vadd.f32 %v20443_v18, %v22380_v47 }
0x146f   :  { %v9883_v56 = vmax.f32 %v9835_v48, %v9843_v61 }
0x1470   :  { %10560 = vmatpush.bf16.msra.mxu3 %v13409_v60  ;;  %v9840_v60 = vmax.f32 %v20705_v26, 0.0 }
0x1471   :  { %v20745_v55 = vmax.f32 %v9882_v25, %v9883_v56  ;;  %v9600_v51 = vpop.f32.mrf.mxu3 }
0x1472   :  { %v20751_v15 = vadd.f32 %v9600_v51, %v20530_v14  ;;  %v9747_v23 = vpop.f32.mrf.mxu1  ;;  %v9581_v14 = vadd.f32 %v20641_v7, %v9412_v1  ;;  %v22382_v1 = vld [vmem:[#allocation36_spill] sm:$0xff] }
0x1473   :  { %v9748_v22 = vadd.f32 %v9747_v23, %v20627_v17  ;;  %v13408_v17 = vld [vmem:[%s21050_s3 + $0xc0] sm:$0xff] }
0x1474   :  { %10561 = vmatpush.bf16.msra.mxu3 %v13408_v17 }
0x1475   :  { %v9844_v6 = vmax.f32 %v9748_v22, 0.0  ;;  %12671 = vmatmul.msk.bf16.gmra.mxu1 %vm6119_vm3, %v22353_v36 }
0x1477   :  { %v9884_v13 = vmax.f32 %v9836_v29, %v9844_v6 }
0x1479   :  { %v9603_v63 = vpop.f32.mrf.mxu3 }
0x147a   :  { %v20767_v33 = vadd.f32 %v9603_v63, %v20541_v10  ;;  %v9749_v36 = vpop.f32.mrf.mxu1  ;;  %v9838_v10 = vmax.f32 %v20682_v42, 0.0 }
0x147b   :  { %v9750_v62 = vadd.f32 %v9749_v36, %v9581_v14  ;;  %v9422_v14 = vadd.f32 %v20477_v28, %v22384_v31 }
0x147d   :  { %v9845_v0 = vmax.f32 %v9750_v62, 0.0  ;;  %v9591_v17 = vadd.f32 %v20700_v52, %v9422_v14  ;;  %v13474_v14 = vld [vmem:[%s21047_s6 + $0x2] ss:$0 sm:$0xff] }
0x147f   :  { %v9885_v20 = vmax.f32 %v9837_v8, %v9845_v0 }
0x1480   :  { %v20770_v45 = vpop.f32.mrf.mxu2 }
0x1481   :  { %v9907_v30 = vmax.f32 %v9884_v13, %v9885_v20  ;;  %v9605_v53 = vpop.f32.mrf.mxu3  ;;  %v9841_v20 = vmax.f32 %v20714_v35, 0.0 }
0x1482   :  { %v20773_v7 = vadd.f32 %v9605_v53, %v20552_v5  ;;  %v9752_v59 = vpop.f32.mrf.mxu1  ;;  %v9586_v5 = vadd.f32 %v20676_v27, %v9417_v43 }
0x1483   :  { %v9753_v25 = vadd.f32 %v9752_v59, %v20665_v16  ;;  %v9923_v9 = vpack.c.bf16 %v9907_v30, %v9907_v30 }
0x1485   :  { %v9846_v11 = vmax.f32 %v9753_v25, 0.0  ;;  %12672 = vmatmul.msk.bf16.gmra.mxu1 %vm6119_vm3, %v22375_v3  ;;  %v9951_v44 = vunpack.c.l.b16 %v9923_v9 }
0x1487   :  { %v9886_v48 = vmax.f32 %v9838_v10, %v9846_v11  ;;  %v9952_v61 = vpack.c.b16 %v9951_v44, %v9951_v44  ;;  %v22385_v10 = vld [vmem:[#allocation6_spill] sm:$0xff] }
0x1488   :  { %v10526_v49 = vpop.f32.mrf.mxu2  ;;  %v9427_v11 = vadd.f32 %v20509_v2, %v22385_v10 }
0x1489   :  { %v9608_v56 = vpop.f32.mrf.mxu3  ;;  %9953 = vrot.lane.b32.xlu1 %v9952_v61, %s13490_s1 }
0x148a   :  { %v20784_v16 = vadd.f32 %v9608_v56, %v20565_v24  ;;  %v9754_v42 = vpop.f32.mrf.mxu1  ;;  %v22381_v24 = vld [vmem:[#allocation79_spill] sm:$0xff]  ;;  %v9596_v35 = vadd.f32 %v20719_v57, %v9427_v11 }
0x148b   :  { %v9755_v51 = vadd.f32 %v9754_v42, %v9586_v5  ;;  %v22383_v13 = vpack.c.b16 %v22381_v24, %v22382_v1 }
0x148d   :  { %v9847_v3 = vmax.f32 %v9755_v51, 0.0 }
0x148f   :  { %v9887_v23 = vmax.f32 %v9839_v58, %v9847_v3  ;;  %v13431_v3 = vld [vmem:[%s21050_s3 + $0x178] sm:$0xff] }
0x1490   :  { %10580 = vmatpush.bf16.msrb.mxu3 %v13431_v3 }
0x1491   :  { %v20787_v22 = vmax.f32 %v9886_v48, %v9887_v23  ;;  %v9610_v18 = vpop.f32.mrf.mxu3 }
0x1492   :  { %v20790_v29 = vadd.f32 %v9610_v18, %v20579_v41  ;;  %v9757_v6 = vpop.f32.mrf.mxu1 }
0x1493   :  { %v9758_v27 = vadd.f32 %v9757_v6, %v20692_v37  ;;  %v9920_v37 = vpack.c.bf16 %v20576_v46, %v20576_v46 }
0x1495   :  { %v9848_v19 = vmax.f32 %v9758_v27, 0.0  ;;  %12673 = vmatmul.msk.bf16.gmra.mxu1 %vm6119_vm3, %v22383_v13 }
0x1497   :  { %v9888_v63 = vmax.f32 %v9840_v60, %v9848_v19  ;;  %v13419_v60 = vld [vmem:[%s21050_s3 + $0x118] sm:$0xff]  ;;  %v13429_v19 = vld [vmem:[%s21050_s3 + $0x168] sm:$0xff] }
0x1499   :  { %v9613_v36 = vpop.f32.mrf.mxu3 }
0x149a   :  { %v20802_v41 = vadd.f32 %v9613_v36, %v20590_v4  ;;  %v9759_v62 = vpop.f32.mrf.mxu1  ;;  %v13416_v36 = vld [vmem:[%s21050_s3 + $0x100] sm:$0xff] }
0x149b   :  { %v9760_v26 = vadd.f32 %v9759_v62, %v9591_v17  ;;  %v9949_v8 = vpop.permute.xlu0 %9948  ;;  %v13427_v17 = vld [vmem:[%s21050_s3 + $0x158] sm:$0xff]  ;;  %v13426_v62 = vld [vmem:[%s21050_s3 + $0x150] sm:$0xff] }
0x149c   :  { %v9984_v0 = vsel %vm6119_vm3, %v9920_v37, %v9949_v8 }
0x149d   :  { %v9849_v30 = vmax.f32 %v9760_v26, 0.0  ;;  %10562 = vmatmul.bf16.vlgmr.msra.gmra.mxu3 %v9984_v0 }
0x149f   :  { %v9889_v28 = vmax.f32 %v9841_v20, %v9849_v30  ;;  %v13424_v20 = vld [vmem:[%s21050_s3 + $0x140] sm:$0xff] }
0x14a1   :  { %v9909_v53 = vmax.f32 %v9888_v63, %v9889_v28  ;;  %v9615_v59 = vpop.f32.mrf.mxu3  ;;  %v13417_v63 = vld [vmem:[%s21050_s3 + $0x108] sm:$0xff] }
0x14a2   :  { %v20809_v52 = vadd.f32 %v9615_v59, %v20600_v50  ;;  %v9762_v4 = vpop.f32.mrf.mxu1 }
0x14a3   :  { %v20812_v25 = vadd.f32 %v9762_v4, %v20711_v21  ;;  %v9925_v9 = vpack.c.bf16 %v9909_v53, %v9909_v53 }
0x14a5   :  { %v9956_v46 = vunpack.c.l.b16 %v9925_v9  ;;  %v9850_v53 = vmax.f32 %v20812_v25, 0.0 }
0x14a7   :  { %v9957_v44 = vpack.c.b16 %v9956_v46, %v9956_v46 }
0x14a9   :  { %v9618_v47 = vpop.f32.mrf.mxu3  ;;  %9958 = vrot.lane.b32.xlu2 %v9957_v44, %s13490_s1 }
0x14aa   :  { %v20819_v43 = vadd.f32 %v9618_v47, %v20617_v38  ;;  %v9764_v50 = vpop.f32.mrf.mxu1  ;;  %v13423_v38 = vld [vmem:[%s21050_s3 + $0x138] sm:$0xff] }
0x14ab   :  { %v20821_v48 = vadd.f32 %v9764_v50, %v9596_v35  ;;  %10567 = vmatpush.bf16.msrb.mxu2 %v13423_v38 }
0x14ad   :  { %v9851_v11 = vmax.f32 %v20821_v48, 0.0 }
0x14b1   :  { %v9620_v61 = vpop.f32.mrf.mxu3 }
0x14b2   :  { %v20824_v21 = vadd.f32 %v9620_v61, %v20639_v32  ;;  %v9767_v49 = vpop.f32.mrf.mxu1  ;;  %v13422_v32 = vld [vmem:[%s21050_s3 + $0x130] sm:$0xff] }
0x14b3   :  { %v20827_v5 = vadd.f32 %v9767_v49, %v20738_v40  ;;  %10568 = vmatpush.bf16.msrb.mxu2 %v13422_v32 }
0x14b5   :  { %v9852_v25 = vmax.f32 %v20827_v5, 0.0 }
0x14b9   :  { %v9623_v2 = vpop.f32.mrf.mxu3 }
0x14ba   :  { %v20830_v57 = vadd.f32 %v9623_v2, %v20659_v12  ;;  %v9769_v56 = vpop.f32.mrf.mxu1 }
0x14bb   :  { %v20833_v42 = vadd.f32 %v9769_v56, %v20751_v15  ;;  %v13421_v15 = vld [vmem:[%s21050_s3 + $0x128] sm:$0xff]  ;;  %v9922_v56 = vpack.c.bf16 %v20745_v55, %v20745_v55 }
0x14bc   :  { %10569 = vmatpush.bf16.msrb.mxu2 %v13421_v15 }
0x14bd   :  { %v9853_v32 = vmax.f32 %v20833_v42, 0.0 }
0x14c1   :  { %v9625_v51 = vpop.f32.mrf.mxu3 }
0x14c2   :  { %v20842_v40 = vadd.f32 %v9625_v51, %v20674_v34  ;;  %v9772_v58 = vpop.f32.mrf.mxu1  ;;  %v13420_v34 = vld [vmem:[%s21050_s3 + $0x120] sm:$0xff] }
0x14c3   :  { %v20845_v12 = vadd.f32 %v9772_v58, %v20767_v33  ;;  %v13430_v33 = vld [vmem:[%s21050_s3 + $0x170] sm:$0xff]  ;;  %10570 = vmatpush.bf16.msrb.mxu2 %v13420_v34 }
0x14c4   :  { %10581 = vmatpush.bf16.msrb.mxu3 %v13430_v33 }
0x14c7   :  { %10571 = vmatpush.bf16.msrb.mxu2 %v13419_v60 }
0x14c8   :  { %10582 = vmatpush.bf16.msrb.mxu3 %v13429_v19 }
0x14c9   :  { %v9628_v23 = vpop.f32.mrf.mxu3 }
0x14ca   :  { %v20860_v18 = vadd.f32 %v9628_v23, %v20689_v54  ;;  %v9774_v6 = vpop.f32.mrf.mxu1  ;;  %v13418_v54 = vld [vmem:[%s21050_s3 + $0x110] sm:$0xff] }
0x14cb   :  { %v20863_v27 = vadd.f32 %v9774_v6, %v20773_v7  ;;  %v13428_v7 = vld [vmem:[%s21050_s3 + $0x160] sm:$0xff]  ;;  %10572 = vmatpush.bf16.msrb.mxu2 %v13418_v54  ;;  %v13438_v54 = vld [vmem:[%s21050_s3 + $0x1b0] sm:$0xff] }
0x14cc   :  { %10583 = vmatpush.bf16.msrb.mxu3 %v13428_v7 }
0x14cf   :  { %10573 = vmatpush.bf16.msrb.mxu2 %v13417_v63 }
0x14d0   :  { %10584 = vmatpush.bf16.msrb.mxu3 %v13427_v17 }
0x14d1   :  { %v9630_v24 = vpop.f32.mrf.mxu3 }
0x14d2   :  { %v20878_v1 = vadd.f32 %v9630_v24, %v20698_v39  ;;  %v9777_v13 = vpop.f32.mrf.mxu1  ;;  %v10525_v39 = vadd.f32 %v13474_v14, %v20770_v45  ;;  %v13425_v45 = vld [vmem:[%s21050_s3 + $0x148] sm:$0xff] }
0x14d3   :  { %v20881_v31 = vadd.f32 %v9777_v13, %v20784_v16  ;;  %10574 = vmatpush.bf16.msrb.mxu2 %v13416_v36  ;;  %v13437_v14 = vld [vmem:[%s21050_s3 + $0x1a8] sm:$0xff] }
0x14d4   :  { %10585 = vmatpush.bf16.msrb.mxu3 %v13426_v62  ;;  %v13435_v62 = vld [vmem:[%s21050_s3 + $0x198] sm:$0xff] }
0x14d8   :  { %10586 = vmatpush.bf16.msrb.mxu3 %v13425_v45 }
0x14d9   :  { %v10537_v16 = vpop.f32.mrf.mxu3 }
0x14da   :  { %v10538_v37 = vadd.f32 %v10537_v16, %v10525_v39  ;;  %v9779_v26 = vpop.f32.mrf.mxu1  ;;  %v9856_v16 = vmax.f32 %v20881_v31, 0.0  ;;  %v13433_v31 = vld [vmem:[%s21050_s3 + $0x188] sm:$0xff] }
0x14db   :  { %v20900_v8 = vadd.f32 %v9779_v26, %v20790_v29 }
0x14dc   :  { %10587 = vmatpush.bf16.msrb.mxu3 %v13424_v20 }
0x14dd   :  { %v9857_v45 = vmax.f32 %v20900_v8, 0.0 }
0x14e1   :  { %v10539_v0 = vpop.f32.mrf.mxu3 }
0x14e2   :  { %v9782_v30 = vpop.f32.mrf.mxu1 }
0x14e3   :  { %v9783_v28 = vadd.f32 %v9782_v30, %v20802_v41 }
0x14e5   :  { %v9858_v29 = vmax.f32 %v9783_v28, 0.0 }
0x14e7   :  { %v9890_v59 = vmax.f32 %v9850_v53, %v9858_v29 }
0x14e8   :  { %v10550_v4 = vpop.f32.mrf.mxu2 }
0x14e9   :  { %v20910_v9 = vadd.f32 %v10550_v4, %v10538_v37 }
0x14ea   :  { %v9784_v46 = vpop.f32.mrf.mxu1 }
0x14eb   :  { %v9785_v10 = vadd.f32 %v9784_v46, %v20809_v52  ;;  %v13447_v46 = vld [vmem:[%s21050_s3 + $0x1f8] sm:$0xff] }
0x14ec   :  { %10606 = vmatpush.bf16.msra.mxu3 %v13447_v46 }
0x14ed   :  { %v9859_v44 = vmax.f32 %v9785_v10, 0.0  ;;  %v13445_v10 = vld [vmem:[%s21050_s3 + $0x1e8] sm:$0xff] }
0x14ef   :  { %v9891_v35 = vmax.f32 %v9851_v11, %v9859_v44  ;;  %v13444_v11 = vld [vmem:[%s21050_s3 + $0x1e0] sm:$0xff]  ;;  %v13443_v44 = vld [vmem:[%s21050_s3 + $0x1d8] sm:$0xff] }
0x14f0   :  { %v10552_v47 = vpop.f32.mrf.mxu2 }
0x14f1   :  { %v20914_v50 = vmax.f32 %v9890_v59, %v9891_v35  ;;  %v13442_v35 = vld [vmem:[%s21050_s3 + $0x1d0] sm:$0xff]  ;;  %v13441_v47 = vld [vmem:[%s21050_s3 + $0x1c8] sm:$0xff] }
0x14f2   :  { %v9787_v61 = vpop.f32.mrf.mxu1 }
0x14f3   :  { %v9788_v41 = vadd.f32 %v9787_v61, %v20819_v43  ;;  %v9924_v43 = vpack.c.bf16 %v20787_v22, %v20787_v22  ;;  %v13439_v22 = vld [vmem:[%s21050_s3 + $0x1b8] sm:$0xff]  ;;  %v13440_v61 = vld [vmem:[%s21050_s3 + $0x1c0] sm:$0xff] }
0x14f4   :  { %10593 = vmatpush.bf16.msra.mxu2 %v13439_v22  ;;  %v13460_v22 = vld [vmem:[%s21052_s5 + $0x20] sm:$0xff] }
0x14f5   :  { %v9860_v49 = vmax.f32 %v9788_v41, 0.0  ;;  %v9926_v41 = vpack.c.bf16 %v20914_v50, %v20914_v50  ;;  %v13455_v50 = vld [vmem:[%s21051_s4 + $0x38] sm:$0xff] }
0x14f7   :  { %v9892_v2 = vmax.f32 %v9852_v25, %v9860_v49 }
0x14f8   :  { %10594 = vmatpush.bf16.msra.mxu2 %v13438_v54 }
0x14fa   :  { %v9789_v38 = vpop.f32.mrf.mxu1 }
0x14fb   :  { %v9790_v52 = vadd.f32 %v9789_v38, %v20824_v21  ;;  %v9954_v51 = vpop.permute.xlu1 %9953  ;;  %v9854_v21 = vmax.f32 %v20845_v12, 0.0  ;;  %v9855_v12 = vmax.f32 %v20863_v27, 0.0 }
0x14fc   :  { %v9988_v48 = vsel %vm6119_vm3, %v9922_v56, %v9954_v51  ;;  %10595 = vmatpush.bf16.msra.mxu2 %v13437_v14 }
0x14fd   :  { %v9861_v58 = vmax.f32 %v9790_v52, 0.0  ;;  %10575 = vmatmul.bf16.vlgmr.msrb.gmra.mxu2 %v9988_v48 }
0x14ff   :  { %v9893_v15 = vmax.f32 %v9853_v32, %v9861_v58 }
0x1501   :  { %v9911_v3 = vmax.f32 %v9892_v2, %v9893_v15 }
0x1502   :  { %v9792_v5 = vpop.f32.mrf.mxu1 }
0x1503   :  { %v9793_v23 = vadd.f32 %v9792_v5, %v20830_v57  ;;  %v9959_v34 = vpop.permute.xlu2 %9958  ;;  %v9927_v55 = vpack.c.bf16 %v9911_v3, %v9911_v3  ;;  %v13454_v3 = vld [vmem:[%s21051_s4 + $0x30] sm:$0xff]  ;;  %v13452_v5 = vld [vmem:[%s21051_s4 + $0x20] sm:$0xff] }
0x1504   :  { %v9992_v33 = vsel %vm6119_vm3, %v9924_v43, %v9959_v34  ;;  %v13453_v43 = vld [vmem:[%s21051_s4 + $0x28] sm:$0xff]  ;;  %v13450_v34 = vld [vmem:[%s21051_s4 + $0x10] sm:$0xff] }
0x1505   :  { %v9862_v6 = vmax.f32 %v9793_v23, 0.0  ;;  %10588 = vmatmul.bf16.vlgmr.msrb.gmra.mxu3 %v9992_v33  ;;  %v9961_v60 = vunpack.c.l.b16 %v9927_v55  ;;  %v13451_v23 = vld [vmem:[%s21051_s4 + $0x18] sm:$0xff]  ;;  %v13449_v55 = vld [vmem:[%s21051_s4 + $0x8] sm:$0xff] }
0x1507   :  { %v9894_v42 = vmax.f32 %v9854_v21, %v9862_v6  ;;  %v9962_v19 = vpack.c.b16 %v9961_v60, %v9961_v60  ;;  %v13448_v21 = vld [vmem:[%s21051_s4] sm:$0xff]  ;;  %v13463_v60 = vld [vmem:[%s21052_s5 + $0x38] sm:$0xff] }
0x1509   :  { %9963 = vrot.lane.b32.xlu0 %v9962_v19, %s13490_s1  ;;  %v13461_v19 = vld [vmem:[%s21052_s5 + $0x28] sm:$0xff] }
0x150a   :  { %v9794_v24 = vpop.f32.mrf.mxu1 }
0x150b   :  { %v9795_v57 = vadd.f32 %v9794_v24, %v20842_v40  ;;  %v13436_v40 = vld [vmem:[%s21050_s3 + $0x1a0] sm:$0xff]  ;;  %v13459_v24 = vld [vmem:[%s21052_s5 + $0x18] sm:$0xff] }
0x150c   :  { %10596 = vmatpush.bf16.msra.mxu2 %v13436_v40  ;;  %v13475_v40 = vld [vmem:[%s21047_s6 + $0x3] ss:$0 sm:$0xff] }
0x150d   :  { %v9863_v7 = vmax.f32 %v9795_v57, 0.0  ;;  %v13458_v57 = vld [vmem:[%s21052_s5 + $0x10] sm:$0xff] }
0x150f   :  { %v9895_v13 = vmax.f32 %v9855_v12, %v9863_v7 }
0x1510   :  { %10597 = vmatpush.bf16.msra.mxu2 %v13435_v62 }
0x1511   :  { %v9912_v63 = vmax.f32 %v9894_v42, %v9895_v13  ;;  %v13462_v42 = vld [vmem:[%s21052_s5 + $0x30] sm:$0xff] }
0x1512   :  { %v9797_v17 = vpop.f32.mrf.mxu1 }
0x1513   :  { %v9798_v39 = vadd.f32 %v9797_v17, %v20860_v18  ;;  %v13434_v18 = vld [vmem:[%s21050_s3 + $0x190] sm:$0xff]  ;;  %v9928_v32 = vpack.c.bf16 %v9912_v63, %v9912_v63  ;;  %v13457_v17 = vld [vmem:[%s21052_s5 + $0x8] sm:$0xff] }
0x1514   :  { %10598 = vmatpush.bf16.msra.mxu2 %v13434_v18 }
0x1515   :  { %v9864_v36 = vmax.f32 %v9798_v39, 0.0  ;;  %v13456_v39 = vld [vmem:[%s21052_s5] sm:$0xff] }
0x1517   :  { %v9896_v27 = vmax.f32 %v9856_v16, %v9864_v36 }
0x1518   :  { %10599 = vmatpush.bf16.msra.mxu2 %v13433_v31 }
0x151a   :  { %v9799_v37 = vpop.f32.mrf.mxu1 }
0x151b   :  { %v9800_v26 = vadd.f32 %v9799_v37, %v20878_v1  ;;  %v13432_v1 = vld [vmem:[%s21050_s3 + $0x180] sm:$0xff] }
0x151c   :  { %10600 = vmatpush.bf16.msra.mxu2 %v13432_v1 }
0x151d   :  { %v9865_v0 = vmax.f32 %v9800_v26, 0.0  ;;  %v13476_v26 = vld [vmem:[%s21047_s6 + $0x4] ss:$0 sm:$0xff] }
0x151f   :  { %v9897_v20 = vmax.f32 %v9857_v45, %v9865_v0 }
0x1520   :  { %v10563_v30 = vpop.f32.mrf.mxu3  ;;  %10686 = vmatpush.bf16.msrb.mxu2 %v13455_v50 }
0x1521   :  { %v9913_v28 = vmax.f32 %v9896_v27, %v9897_v20  ;;  %v10564_v53 = vadd.f32 %v10563_v30, %v20910_v9  ;;  %v13446_v9 = vld [vmem:[%s21050_s3 + $0x1f0] sm:$0xff] }
0x1522   :  { %10607 = vmatpush.bf16.msra.mxu3 %v13446_v9 }
0x1523   :  { %v9929_v29 = vpack.c.bf16 %v9913_v28, %v9913_v28 }
0x1524   :  { %10687 = vmatpush.bf16.msrb.mxu2 %v13454_v3 }
0x1525   :  { %v9966_v59 = vunpack.c.l.b16 %v9929_v29 }
0x1526   :  { %10608 = vmatpush.bf16.msra.mxu3 %v13445_v10 }
0x1527   :  { %v9967_v4 = vpack.c.b16 %v9966_v59, %v9966_v59 }
0x1528   :  { %v10565_v8 = vpop.f32.mrf.mxu3  ;;  %10688 = vmatpush.bf16.msrb.mxu2 %v13453_v43 }
0x1529   :  { %9968 = vrot.lane.b32.xlu1 %v9967_v4, %s13490_s1 }
0x152a   :  { %10609 = vmatpush.bf16.msra.mxu3 %v13444_v11 }
0x152c   :  { %10689 = vmatpush.bf16.msrb.mxu2 %v13452_v5 }
0x152e   :  { %10610 = vmatpush.bf16.msra.mxu3 %v13443_v44 }
0x1530   :  { %10690 = vmatpush.bf16.msrb.mxu2 %v13451_v23 }
0x1532   :  { %10611 = vmatpush.bf16.msra.mxu3 %v13442_v35 }
0x1534   :  { %10691 = vmatpush.bf16.msrb.mxu2 %v13450_v34 }
0x1536   :  { %10612 = vmatpush.bf16.msra.mxu3 %v13441_v47 }
0x1538   :  { %10692 = vmatpush.bf16.msrb.mxu2 %v13449_v55 }
0x153a   :  { %10613 = vmatpush.bf16.msra.mxu3 %v13440_v61 }
0x153c   :  { %10693 = vmatpush.bf16.msrb.mxu2 %v13448_v21 }
0x153e   :  { %10766 = vmatpush.bf16.msrb.mxu3 %v13463_v60 }
0x1542   :  { %10767 = vmatpush.bf16.msrb.mxu3 %v13462_v42 }
0x1546   :  { %10768 = vmatpush.bf16.msrb.mxu3 %v13461_v19 }
0x154a   :  { %10769 = vmatpush.bf16.msrb.mxu3 %v13460_v22 }
0x154e   :  { %10770 = vmatpush.bf16.msrb.mxu3 %v13459_v24 }
0x1552   :  { %10771 = vmatpush.bf16.msrb.mxu3 %v13458_v57 }
0x1556   :  { %10772 = vmatpush.bf16.msrb.mxu3 %v13457_v17 }
0x155a   :  { %10773 = vmatpush.bf16.msrb.mxu3 %v13456_v39 }
0x157b   :  { %v9964_v25 = vpop.permute.xlu0 %9963 }
0x157c   :  { %v9996_v49 = vsel %vm6119_vm3, %v9926_v41, %v9964_v25 }
0x157d   :  { %10601 = vmatmul.bf16.vlgmr.msra.gmra.mxu2 %v9996_v49 }
0x1580   :  { %v10576_v2 = vpop.f32.mrf.mxu2 }
0x1581   :  { %v10577_v56 = vadd.f32 %v10576_v2, %v10564_v53 }
0x1588   :  { %v10578_v38 = vpop.f32.mrf.mxu2  ;;  %v10589_v52 = vpop.f32.mrf.mxu3 }
0x1589   :  { %v10590_v51 = vadd.f32 %v10589_v52, %v10577_v56 }
0x1590   :  { %v10591_v48 = vpop.f32.mrf.mxu3 }
0x159b   :  { %v9969_v58 = vpop.permute.xlu1 %9968 }
0x159c   :  { %v10000_v15 = vsel %vm6119_vm3, %v9928_v32, %v9969_v58 }
0x159d   :  { %10614 = vmatmul.bf16.vlgmr.msra.gmra.mxu3 %v10000_v15 }
0x1600   :  { %v10602_v33 = vpop.f32.mrf.mxu2 }
0x1601   :  { %v10603_v54 = vadd.f32 %v10602_v33, %v10590_v51 }
0x1608   :  { %v10604_v6 = vpop.f32.mrf.mxu2 }
0x1620   :  { %v10615_v12 = vpop.f32.mrf.mxu3 }
0x1621   :  { %v10616_v7 = vadd.f32 %v10615_v12, %v10603_v54 }
0x1623   :  { %v10619_v13 = vmax.f32 %v10616_v7, 0.0 }
0x1625   :  { %v10620_v14 = vpack.c.bf16 %v10619_v13, %v10619_v13 }
0x1627   :  { %10694 = vmatmul.bf16.vlgmr.msrb.gmra.mxu2 %v10620_v14 }
0x1628   :  { %v10617_v63 = vpop.f32.mrf.mxu3 }
0x16aa   :  { %v10695_v16 = vpop.f32.mrf.mxu2 }
0x16ab   :  { %v10696_v36 = vadd.f32 %v13475_v40, %v10695_v16 }
0x16ad   :  { %v10699_v27 = vmax.f32 %v10696_v36, 0.0 }
0x16af   :  { %v10700_v62 = vpack.c.bf16 %v10699_v27, %v10699_v27 }
0x16b1   :  { %10774 = vmatmul.bf16.vlgmr.msrb.gmra.mxu3 %v10700_v62 }
0x16b2   :  { %v10697_v37 = vpop.f32.mrf.mxu2 }
0x1734   :  { %v10775_v18 = vpop.f32.mrf.mxu3 }
0x1735   :  { %v10776_v45 = vadd.f32 %v13476_v26, %v10775_v18 }
0x1737   :  { %10779 = vmax.xlane.f32.xlu2 %v10776_v45 }
0x173c   :  { %v10777_v0 = vpop.f32.mrf.mxu3 }
0x17aa   :  { %v10780_v20 = vpop.xlane.xlu2 %10779 }
0x17ab   :  { %v10781_v31 = vsub.f32 %v10776_v45, %v10780_v20 }
0x17ad   :  { %v10782_v30 = vmul.f32 1.442695, %v10781_v31 }
0x17af   :  { %13477 = vpow2.f32 %v10782_v30 }
0x17b5   :  { %v13478_v28 = vpop.eup %13477 }
0x17b6   :  { %10784 = vadd.xlane.f32.xlu0 %v13478_v28 }
0x1829   :  { %v10785_v53 = vpop.xlane.xlu0 %10784 }
0x182a   :  { %13479 = vlog2.f32 %v10785_v53 }
0x1830   :  { %v13480_v29 = vpop.eup %13479 }
0x1831   :  { %v10787_v1 = vmul.f32 0.6931472, %v13480_v29 }
0x1833   :  { %v10788_v59 = vsub.f32 %v10781_v31, %v10787_v1 }
0x1835   :  { %10789 = vst [vmem:[%s21053_s7] sm:$0xff] %v10788_v59 }

</bundles_post_ra>
